<compile_context>
chip_gen: v7x
topology: tpu7x:2x2x1
jax: 0.10.0
libtpu: 0.0.40
codegen_flags: <defaults>
</compile_context>

<pallas_src>
import jax
import jax.numpy as jnp
from jax.experimental import pallas as pl
from jax.experimental.pallas import tpu as pltpu

IN_DIM = 1200
HID_DIM = 600
LAT_DIM = 20


def _device_kind() -> str:
    try:
        return jax.devices()[0].device_kind.lower()
    except Exception:
        return ""


IS_V7X = "v7" in _device_kind()
# v5e/v6e have 128 MiB VMEM -> big tiles; v7x has 64 MiB per TensorCore.
MAX_BATCH_TILE = 256 if IS_V7X else 512
VMEM_LIMIT_BYTES = (40 << 20) if IS_V7X else (64 << 20)
SIGMOID_IN_BF16 = IS_V7X   # EUP-bound on v7x; HBM/MXU-bound on v5e/v6e


def vae_kernel(x_ref, eps_ref,
               w1_ref, b1_ref, wml_ref, bml_ref,
               w3_ref, b3_ref, w4_ref, b4_ref,
               recon_ref, ml_ref):
    # ---------------- encode: h1 = relu(x @ W1 + b1) ----------------
    x = x_ref[...].astype(jnp.bfloat16)                          # (TB, 1200)
    h1 = jnp.dot(x, w1_ref[...],
                 preferred_element_type=jnp.float32) + b1_ref[...]
    h1 = jnp.maximum(h1, 0.0)                                    # f32 (TB, 600)

    # fused fc21/fc22: single (600, 40) matmul -> [mu | logvar]
    ml = jnp.dot(h1.astype(jnp.bfloat16), wml_ref[...],
                 preferred_element_type=jnp.float32) + bml_ref[...]
    mu = ml[:, :LAT_DIM]                                         # (TB, 20)
    logvar = ml[:, LAT_DIM:]                                     # (TB, 20)

    # ---------- reparameterize: z = mu + eps * exp(0.5*logvar) ----------
    std = jnp.exp(0.5 * logvar)
    z = mu + eps_ref[...] * std                                  # f32 (TB, 20)

    # ---------------- decode ----------------
    h3 = jnp.dot(z.astype(jnp.bfloat16), w3_ref[...],
                 preferred_element_type=jnp.float32) + b3_ref[...]
    h3 = jnp.maximum(h3, 0.0)                                    # f32 (TB, 600)
    logits = jnp.dot(h3.astype(jnp.bfloat16), w4_ref[...],
                     preferred_element_type=jnp.float32) + b4_ref[...]

    if SIGMOID_IN_BF16:
        recon = jax.nn.sigmoid(logits.astype(jnp.bfloat16))
    else:
        recon = jax.nn.sigmoid(logits)
    recon_ref[...] = recon.astype(recon_ref.dtype)               # bf16 (TB, 1200)
    ml_ref[...] = ml                                             # f32  (TB, 40)


def init_params(key):
    """Deterministic params; PyTorch-Linear-style uniform(-1/sqrt(fan_in), +)."""
    def linear(k, fan_in, fan_out):
        kw, kb = jax.random.split(k)
        bound = 1.0 / jnp.sqrt(fan_in)
        # stored as (in, out) so the kernel computes x @ W + b
        w = jax.random.uniform(kw, (fan_in, fan_out), jnp.float32, -bound, bound)
        b = jax.random.uniform(kb, (1, fan_out), jnp.float32, -bound, bound)
        return w, b

    k1, k21, k22, k3, k4 = jax.random.split(key, 5)
    w1, b1 = linear(k1, IN_DIM, HID_DIM)
    w21, b21 = linear(k21, HID_DIM, LAT_DIM)
    w22, b22 = linear(k22, HID_DIM, LAT_DIM)
    w3, b3 = linear(k3, LAT_DIM, HID_DIM)
    w4, b4 = linear(k4, HID_DIM, IN_DIM)
    return (w1, b1, w21, b21, w22, b22, w3, b3, w4, b4)


def prepare_params(params):
    """One-time weight prep: bf16 cast + fc21/fc22 fusion.

    Hoisted out of the forward so the ~6 MB f32 -> ~3 MB bf16 conversion
    traffic is paid once per parameter set, not once per call."""
    w1, b1, w21, b21, w22, b22, w3, b3, w4, b4 = params
    prep = {
        "w1": w1.astype(jnp.bfloat16),
        "b1": b1.astype(jnp.float32),
        "wml": jnp.concatenate([w21, w22], axis=1).astype(jnp.bfloat16),  # (600, 40)
        "bml": jnp.concatenate([b21, b22], axis=1).astype(jnp.float32),   # (1, 40)
        "w3": w3.astype(jnp.bfloat16),
        "b3": b3.astype(jnp.float32),
        "w4": w4.astype(jnp.bfloat16),
        "b4": b4.astype(jnp.float32),
    }
    return jax.tree_util.tree_map(jax.device_put, prep)


def _round_up(n, m):
    return ((n + m - 1) // m) * m


def make_vae_forward(single_buffer_weights: bool = True):
    """Build a jitted forward.  single_buffer_weights=True requests
    pl.Buffered(1) for the VMEM-resident weight blocks (constant index_map ->
    second pipeline buffer is dead VMEM)."""
    if single_buffer_weights:
        pipeline_kwargs = {"pipeline_mode": pl.Buffered(1)}
    else:
        pipeline_kwargs = {}

    @jax.jit
    def vae_forward(x, eps, prep):
        """x: any shape with prod(shape) % 1200 == 0 (PyTorch x.view(-1, 1200))."""
        x2d = jnp.reshape(x, (-1, IN_DIM)).astype(jnp.float32)
        eps2d = eps.astype(jnp.float32)
        B = x2d.shape[0]

        # ---- batch tile selection ----
        B_pad = _round_up(B, 8)
        if B_pad <= MAX_BATCH_TILE:
            TB = B_pad
            # v7x: split into >= 2 tiles (when it divides evenly, so no extra
            # padding) so the "parallel" axis can shard across both TensorCores.
            if IS_V7X and B_pad >= 16 and B_pad % 16 == 0:
                TB = B_pad // 2
        else:
            TB = MAX_BATCH_TILE
            B_pad = _round_up(B, TB)

        # Padding only when B is not already tile-aligned (the common demo /
        # training batch sizes hit the no-pad path).
        if B_pad != B:
            pad = B_pad - B
            x2d = jnp.pad(x2d, ((0, pad), (0, 0)))
            eps2d = jnp.pad(eps2d, ((0, pad), (0, 0)))

        grid = (B_pad // TB,)

        def resident(shape):
            # Weight/bias blocks: constant index_map -> VMEM-resident across
            # the batch grid; single-buffered (no re-DMA, no dead 2nd buffer).
            return pl.BlockSpec(shape, lambda i: (0, 0), **pipeline_kwargs)

        in_specs = [
            pl.BlockSpec((TB, IN_DIM), lambda i: (i, 0)),        # x
            pl.BlockSpec((TB, LAT_DIM), lambda i: (i, 0)),       # eps
            resident((IN_DIM, HID_DIM)),                         # w1  (bf16)
            resident((1, HID_DIM)),                              # b1
            resident((HID_DIM, 2 * LAT_DIM)),                    # w21|w22 (bf16)
            resident((1, 2 * LAT_DIM)),                          # b21|b22
            resident((LAT_DIM, HID_DIM)),                        # w3  (bf16)
            resident((1, HID_DIM)),                              # b3
            resident((HID_DIM, IN_DIM)),                         # w4  (bf16)
            resident((1, IN_DIM)),                               # b4
        ]
        out_specs = (
            pl.BlockSpec((TB, IN_DIM), lambda i: (i, 0)),        # reconstruction (bf16)
            pl.BlockSpec((TB, 2 * LAT_DIM), lambda i: (i, 0)),   # [mu | logvar]  (f32)
        )
        out_shape = (
            jax.ShapeDtypeStruct((B_pad, IN_DIM), jnp.bfloat16),
            jax.ShapeDtypeStruct((B_pad, 2 * LAT_DIM), jnp.float32),
        )

        flops = 2 * B_pad * (IN_DIM * HID_DIM + HID_DIM * 2 * LAT_DIM
                             + LAT_DIM * HID_DIM + HID_DIM * IN_DIM)
        transcendentals = B_pad * (LAT_DIM + 2 * IN_DIM)         # exp(std) + sigmoid(exp+recip)
        bytes_accessed = (
            2 * (prep["w1"].size + prep["wml"].size
                 + prep["w3"].size + prep["w4"].size)            # bf16 weights (one-time)
            + 4 * (prep["b1"].size + prep["bml"].size
                   + prep["b3"].size + prep["b4"].size)          # f32 biases
            + 4 * B_pad * IN_DIM                                 # x in  (f32)
            + 2 * B_pad * IN_DIM                                 # recon out (bf16)
            + 4 * B_pad * LAT_DIM                                # eps in (f32)
            + 4 * B_pad * 2 * LAT_DIM                            # mu|logvar out (f32)
        )

        recon, ml = pl.pallas_call(
            vae_kernel,
            grid=grid,
            in_specs=in_specs,
            out_specs=out_specs,
            out_shape=out_shape,
            compiler_params=pltpu.CompilerParams(
                dimension_semantics=("parallel",),
                vmem_limit_bytes=VMEM_LIMIT_BYTES,
            ),
            cost_estimate=pl.CostEstimate(
                flops=flops,
                transcendentals=transcendentals,
                bytes_accessed=bytes_accessed,
            ),
        )(x2d, eps2d,
          prep["w1"], prep["b1"], prep["wml"], prep["bml"],
          prep["w3"], prep["b3"], prep["w4"], prep["b4"])

        recon = recon[:B]                 # bf16; consumer upcasts if needed
        mu = ml[:B, :LAT_DIM]
        logvar = ml[:B, LAT_DIM:]
        return recon, mu, logvar

    return vae_forward


def vae_reference(x, eps, params):
    """Pure-JAX f32 reference (mirrors the PyTorch forward)."""
    w1, b1, w21, b21, w22, b22, w3, b3, w4, b4 = params
    x2d = jnp.reshape(x, (-1, IN_DIM)).astype(jnp.float32)
    h1 = jax.nn.relu(x2d @ w1 + b1)
    mu = h1 @ w21 + b21
    logvar = h1 @ w22 + b22
    z = mu + eps * jnp.exp(0.5 * logvar)
    h3 = jax.nn.relu(z @ w3 + b3)
    recon = jax.nn.sigmoid(h3 @ w4 + b4)
    return recon, mu, logvar


if __name__ == "__main__":
    key = jax.random.PRNGKey(0)
    k_param, k_x, k_eps = jax.random.split(key, 3)

    params = init_params(k_param)
    prep = prepare_params(params)          # one-time bf16 cast + fc21/fc22 fusion

    B = 8
    # x arrives as "images" that the forward flattens to (-1, 1200); use
    # (B, 3, 20, 20) so 3*20*20 = 1200 per sample.
    x = jax.random.uniform(k_x, (B, 3, 20, 20), jnp.float32)
    # eps plays the role of torch.randn_like(std); generated outside the
    # kernel so the reparameterization is deterministic & reproducible.
    eps = jax.random.normal(k_eps, (B, LAT_DIM), jnp.float32)

    outputs = None
    for single_buf in (True, False):
        try:
            vae_forward = make_vae_forward(single_buffer_weights=single_buf)
            outputs = vae_forward(x, eps, prep)
            jax.block_until_ready(outputs)
            break
        except Exception:
            if not single_buf:
                raise
            # pl.Buffered(1) not accepted on this jax version -> default buffering.
            outputs = None
    recon, mu, logvar = outputs

    assert recon.shape == (B, IN_DIM)
    assert mu.shape == (B, LAT_DIM)
    assert logvar.shape == (B, LAT_DIM)

    recon32 = recon.astype(jnp.float32)
    assert bool(jnp.all(jnp.isfinite(recon32)))
    assert bool(jnp.all((recon32 >= 0.0) & (recon32 <= 1.0)))
    assert bool(jnp.all(jnp.isfinite(mu))) and bool(jnp.all(jnp.isfinite(logvar)))

    # Tolerance check vs. f32 reference (bf16 weights/activations + bf16 recon).
    r_ref, mu_ref, lv_ref = vae_reference(x, eps, params)
    assert float(jnp.max(jnp.abs(recon32 - r_ref))) < 3e-2
    assert float(jnp.max(jnp.abs(mu - mu_ref))) < 5e-2
    assert float(jnp.max(jnp.abs(logvar - lv_ref))) < 5e-2

    print("KERNEL_OK")
</pallas_src>

<mosaic_0001>
module attributes {stable_mosaic.version = 11 : i64} {
  func.func @vae_kernel(%arg0: i32, %arg1: memref<8x1200xf32, #tpu.memory_space<vmem>>, %arg2: memref<8x20xf32, #tpu.memory_space<vmem>>, %arg3: memref<1200x600xbf16, #tpu.memory_space<vmem>>, %arg4: memref<1x600xf32, #tpu.memory_space<vmem>>, %arg5: memref<600x40xbf16, #tpu.memory_space<vmem>>, %arg6: memref<1x40xf32, #tpu.memory_space<vmem>>, %arg7: memref<20x600xbf16, #tpu.memory_space<vmem>>, %arg8: memref<1x600xf32, #tpu.memory_space<vmem>>, %arg9: memref<600x1200xbf16, #tpu.memory_space<vmem>>, %arg10: memref<1x1200xf32, #tpu.memory_space<vmem>>, %arg11: memref<8x1200xbf16, #tpu.memory_space<vmem>>, %arg12: memref<8x40xf32, #tpu.memory_space<vmem>>) attributes {dimension_semantics = [#tpu.dimension_semantics<parallel>], iteration_bounds = array<i64: 1>, scalar_prefetch = 0 : i64, scratch_operands = 0 : i64, tpu.core_type = #tpu.core_type<tc>, window_params = [{transform_indices = @transform_0, window_bounds = array<i64: 8, 1200>}, {transform_indices = @transform_1, window_bounds = array<i64: 8, 20>}, {pipeline_mode = #tpu.pipeline_mode<synchronous>, transform_indices = @transform_2, window_bounds = array<i64: 1200, 600>}, {pipeline_mode = #tpu.pipeline_mode<synchronous>, transform_indices = @transform_3, window_bounds = array<i64: 1, 600>}, {pipeline_mode = #tpu.pipeline_mode<synchronous>, transform_indices = @transform_4, window_bounds = array<i64: 600, 40>}, {pipeline_mode = #tpu.pipeline_mode<synchronous>, transform_indices = @transform_5, window_bounds = array<i64: 1, 40>}, {pipeline_mode = #tpu.pipeline_mode<synchronous>, transform_indices = @transform_6, window_bounds = array<i64: 20, 600>}, {pipeline_mode = #tpu.pipeline_mode<synchronous>, transform_indices = @transform_7, window_bounds = array<i64: 1, 600>}, {pipeline_mode = #tpu.pipeline_mode<synchronous>, transform_indices = @transform_8, window_bounds = array<i64: 600, 1200>}, {pipeline_mode = #tpu.pipeline_mode<synchronous>, transform_indices = @transform_9, window_bounds = array<i64: 1, 1200>}, {transform_indices = @transform_10, window_bounds = array<i64: 8, 1200>}, {transform_indices = @transform_11, window_bounds = array<i64: 8, 40>}]} {
    %c0 = arith.constant 0 : index
    %c0_0 = arith.constant 0 : index
    %0 = vector.load %arg1[%c0, %c0_0] : memref<8x1200xf32, #tpu.memory_space<vmem>>, vector<8x1200xf32>
    %1 = arith.truncf %0 : vector<8x1200xf32> to vector<8x1200xbf16>
    %c0_1 = arith.constant 0 : index
    %c0_2 = arith.constant 0 : index
    %2 = vector.load %arg3[%c0_1, %c0_2] : memref<1200x600xbf16, #tpu.memory_space<vmem>>, vector<1200x600xbf16>
    %cst = arith.constant dense<0.000000e+00> : vector<8x600xf32>
    %3 = tpu.matmul %1, %2, %cst {dimension_numbers = #tpu.dot_dimension_numbers<[1], [0], [0], [1], [0, 0, 1, 1], [], []>} : vector<8x1200xbf16>, vector<1200x600xbf16>, vector<8x600xf32> -> vector<8x600xf32>
    %c0_3 = arith.constant 0 : index
    %c0_4 = arith.constant 0 : index
    %4 = vector.load %arg4[%c0_3, %c0_4] : memref<1x600xf32, #tpu.memory_space<vmem>>, vector<1x600xf32>
    %5 = vector.broadcast %4 : vector<1x600xf32> to vector<8x600xf32>
    %6 = arith.addf %3, %5 : vector<8x600xf32>
    %cst_5 = arith.constant 0.000000e+00 : f32
    %7 = vector.broadcast %cst_5 : f32 to vector<8x600xf32>
    %8 = arith.maximumf %6, %7 : vector<8x600xf32>
    %9 = arith.truncf %8 : vector<8x600xf32> to vector<8x600xbf16>
    %c0_6 = arith.constant 0 : index
    %c0_7 = arith.constant 0 : index
    %10 = vector.load %arg5[%c0_6, %c0_7] : memref<600x40xbf16, #tpu.memory_space<vmem>>, vector<600x40xbf16>
    %cst_8 = arith.constant dense<0.000000e+00> : vector<8x40xf32>
    %11 = tpu.matmul %9, %10, %cst_8 {dimension_numbers = #tpu.dot_dimension_numbers<[1], [0], [0], [1], [0, 0, 1, 1], [], []>} : vector<8x600xbf16>, vector<600x40xbf16>, vector<8x40xf32> -> vector<8x40xf32>
    %c0_9 = arith.constant 0 : index
    %c0_10 = arith.constant 0 : index
    %12 = vector.load %arg6[%c0_9, %c0_10] : memref<1x40xf32, #tpu.memory_space<vmem>>, vector<1x40xf32>
    %13 = vector.broadcast %12 : vector<1x40xf32> to vector<8x40xf32>
    %14 = arith.addf %11, %13 : vector<8x40xf32>
    %15 = vector.extract_strided_slice %14 {offsets = [0, 0], sizes = [8, 20], strides = [1, 1]} : vector<8x40xf32> to vector<8x20xf32>
    %16 = vector.extract_strided_slice %14 {offsets = [0, 20], sizes = [8, 20], strides = [1, 1]} : vector<8x40xf32> to vector<8x20xf32>
    %cst_11 = arith.constant 5.000000e-01 : f32
    %17 = vector.broadcast %cst_11 : f32 to vector<8x20xf32>
    %18 = arith.mulf %17, %16 : vector<8x20xf32>
    %19 = math.exp %18 : vector<8x20xf32>
    %c0_12 = arith.constant 0 : index
    %c0_13 = arith.constant 0 : index
    %20 = vector.load %arg2[%c0_12, %c0_13] : memref<8x20xf32, #tpu.memory_space<vmem>>, vector<8x20xf32>
    %21 = arith.mulf %20, %19 : vector<8x20xf32>
    %22 = arith.addf %15, %21 : vector<8x20xf32>
    %23 = arith.truncf %22 : vector<8x20xf32> to vector<8x20xbf16>
    %c0_14 = arith.constant 0 : index
    %c0_15 = arith.constant 0 : index
    %24 = vector.load %arg7[%c0_14, %c0_15] : memref<20x600xbf16, #tpu.memory_space<vmem>>, vector<20x600xbf16>
    %cst_16 = arith.constant dense<0.000000e+00> : vector<8x600xf32>
    %25 = tpu.matmul %23, %24, %cst_16 {dimension_numbers = #tpu.dot_dimension_numbers<[1], [0], [0], [1], [0, 0, 1, 1], [], []>} : vector<8x20xbf16>, vector<20x600xbf16>, vector<8x600xf32> -> vector<8x600xf32>
    %c0_17 = arith.constant 0 : index
    %c0_18 = arith.constant 0 : index
    %26 = vector.load %arg8[%c0_17, %c0_18] : memref<1x600xf32, #tpu.memory_space<vmem>>, vector<1x600xf32>
    %27 = vector.broadcast %26 : vector<1x600xf32> to vector<8x600xf32>
    %28 = arith.addf %25, %27 : vector<8x600xf32>
    %cst_19 = arith.constant 0.000000e+00 : f32
    %29 = vector.broadcast %cst_19 : f32 to vector<8x600xf32>
    %30 = arith.maximumf %28, %29 : vector<8x600xf32>
    %31 = arith.truncf %30 : vector<8x600xf32> to vector<8x600xbf16>
    %c0_20 = arith.constant 0 : index
    %c0_21 = arith.constant 0 : index
    %32 = vector.load %arg9[%c0_20, %c0_21] : memref<600x1200xbf16, #tpu.memory_space<vmem>>, vector<600x1200xbf16>
    %cst_22 = arith.constant dense<0.000000e+00> : vector<8x1200xf32>
    %33 = tpu.matmul %31, %32, %cst_22 {dimension_numbers = #tpu.dot_dimension_numbers<[1], [0], [0], [1], [0, 0, 1, 1], [], []>} : vector<8x600xbf16>, vector<600x1200xbf16>, vector<8x1200xf32> -> vector<8x1200xf32>
    %c0_23 = arith.constant 0 : index
    %c0_24 = arith.constant 0 : index
    %34 = vector.load %arg10[%c0_23, %c0_24] : memref<1x1200xf32, #tpu.memory_space<vmem>>, vector<1x1200xf32>
    %35 = vector.broadcast %34 : vector<1x1200xf32> to vector<8x1200xf32>
    %36 = arith.addf %33, %35 : vector<8x1200xf32>
    %37 = arith.negf %36 : vector<8x1200xf32>
    %38 = math.exp %37 : vector<8x1200xf32>
    %cst_25 = arith.constant 1.000000e+00 : f32
    %39 = vector.broadcast %cst_25 : f32 to vector<8x1200xf32>
    %40 = arith.addf %39, %38 : vector<8x1200xf32>
    %41 = arith.divf %39, %40 : vector<8x1200xf32>
    %42 = arith.truncf %41 : vector<8x1200xf32> to vector<8x1200xbf16>
    %c0_26 = arith.constant 0 : index
    %c0_27 = arith.constant 0 : index
    %43 = vector.load %arg11[%c0_26, %c0_27] : memref<8x1200xbf16, #tpu.memory_space<vmem>>, vector<8x1200xbf16>
    tpu.vector_store %arg11[%c0_26, %c0_27], %42 {strides = array<i32>} : memref<8x1200xbf16, #tpu.memory_space<vmem>>, vector<8x1200xbf16>,
    %c0_28 = arith.constant 0 : index
    %c0_29 = arith.constant 0 : index
    %44 = vector.load %arg12[%c0_28, %c0_29] : memref<8x40xf32, #tpu.memory_space<vmem>>, vector<8x40xf32>
    tpu.vector_store %arg12[%c0_28, %c0_29], %14 {strides = array<i32>} : memref<8x40xf32, #tpu.memory_space<vmem>>, vector<8x40xf32>,
    return
  }
  func.func @transform_0(%arg0: i32) -> (i32, i32) {
    %c0_i32 = arith.constant 0 : i32
    %c0_i32_0 = arith.constant 0 : i32
    return %arg0, %c0_i32 : i32, i32
  }
  func.func @transform_1(%arg0: i32) -> (i32, i32) {
    %c0_i32 = arith.constant 0 : i32
    %c0_i32_0 = arith.constant 0 : i32
    return %arg0, %c0_i32 : i32, i32
  }
  func.func @transform_2(%arg0: i32) -> (i32, i32) {
    %c0_i32 = arith.constant 0 : i32
    %c0_i32_0 = arith.constant 0 : i32
    %c0_i32_1 = arith.constant 0 : i32
    return %c0_i32, %c0_i32_0 : i32, i32
  }
  func.func @transform_3(%arg0: i32) -> (i32, i32) {
    %c0_i32 = arith.constant 0 : i32
    %c0_i32_0 = arith.constant 0 : i32
    %c0_i32_1 = arith.constant 0 : i32
    return %c0_i32, %c0_i32_0 : i32, i32
  }
  func.func @transform_4(%arg0: i32) -> (i32, i32) {
    %c0_i32 = arith.constant 0 : i32
    %c0_i32_0 = arith.constant 0 : i32
    %c0_i32_1 = arith.constant 0 : i32
    return %c0_i32, %c0_i32_0 : i32, i32
  }
  func.func @transform_5(%arg0: i32) -> (i32, i32) {
    %c0_i32 = arith.constant 0 : i32
    %c0_i32_0 = arith.constant 0 : i32
    %c0_i32_1 = arith.constant 0 : i32
    return %c0_i32, %c0_i32_0 : i32, i32
  }
  func.func @transform_6(%arg0: i32) -> (i32, i32) {
    %c0_i32 = arith.constant 0 : i32
    %c0_i32_0 = arith.constant 0 : i32
    %c0_i32_1 = arith.constant 0 : i32
    return %c0_i32, %c0_i32_0 : i32, i32
  }
  func.func @transform_7(%arg0: i32) -> (i32, i32) {
    %c0_i32 = arith.constant 0 : i32
    %c0_i32_0 = arith.constant 0 : i32
    %c0_i32_1 = arith.constant 0 : i32
    return %c0_i32, %c0_i32_0 : i32, i32
  }
  func.func @transform_8(%arg0: i32) -> (i32, i32) {
    %c0_i32 = arith.constant 0 : i32
    %c0_i32_0 = arith.constant 0 : i32
    %c0_i32_1 = arith.constant 0 : i32
    return %c0_i32, %c0_i32_0 : i32, i32
  }
  func.func @transform_9(%arg0: i32) -> (i32, i32) {
    %c0_i32 = arith.constant 0 : i32
    %c0_i32_0 = arith.constant 0 : i32
    %c0_i32_1 = arith.constant 0 : i32
    return %c0_i32, %c0_i32_0 : i32, i32
  }
  func.func @transform_10(%arg0: i32) -> (i32, i32) {
    %c0_i32 = arith.constant 0 : i32
    %c0_i32_0 = arith.constant 0 : i32
    return %arg0, %c0_i32 : i32, i32
  }
  func.func @transform_11(%arg0: i32) -> (i32, i32) {
    %c0_i32 = arith.constant 0 : i32
    %c0_i32_0 = arith.constant 0 : i32
    return %arg0, %c0_i32 : i32, i32
  }
}

module attributes {stable_mosaic.version = 11 : i64} {
  func.func @vae_kernel(%arg0: i32, %arg1: memref<8x1200xf32, #tpu.memory_space<vmem>>, %arg2: memref<8x20xf32, #tpu.memory_space<vmem>>, %arg3: memref<1200x600xbf16, #tpu.memory_space<vmem>>, %arg4: memref<1x600xf32, #tpu.memory_space<vmem>>, %arg5: memref<600x40xbf16, #tpu.memory_space<vmem>>, %arg6: memref<1x40xf32, #tpu.memory_space<vmem>>, %arg7: memref<20x600xbf16, #tpu.memory_space<vmem>>, %arg8: memref<1x600xf32, #tpu.memory_space<vmem>>, %arg9: memref<600x1200xbf16, #tpu.memory_space<vmem>>, %arg10: memref<1x1200xf32, #tpu.memory_space<vmem>>, %arg11: memref<8x1200xbf16, #tpu.memory_space<vmem>>, %arg12: memref<8x40xf32, #tpu.memory_space<vmem>>) attributes {dimension_semantics = [#tpu.dimension_semantics<parallel>], iteration_bounds = array<i64: 1>, scalar_prefetch = 0 : i64, scratch_operands = 0 : i64, tpu.core_type = #tpu.core_type<tc>, window_params = [{transform_indices = @transform_0, window_bounds = array<i64: 8, 1200>}, {transform_indices = @transform_1, window_bounds = array<i64: 8, 20>}, {pipeline_mode = #tpu.pipeline_mode<synchronous>, transform_indices = @transform_2, window_bounds = array<i64: 1200, 600>}, {pipeline_mode = #tpu.pipeline_mode<synchronous>, transform_indices = @transform_3, window_bounds = array<i64: 1, 600>}, {pipeline_mode = #tpu.pipeline_mode<synchronous>, transform_indices = @transform_4, window_bounds = array<i64: 600, 40>}, {pipeline_mode = #tpu.pipeline_mode<synchronous>, transform_indices = @transform_5, window_bounds = array<i64: 1, 40>}, {pipeline_mode = #tpu.pipeline_mode<synchronous>, transform_indices = @transform_6, window_bounds = array<i64: 20, 600>}, {pipeline_mode = #tpu.pipeline_mode<synchronous>, transform_indices = @transform_7, window_bounds = array<i64: 1, 600>}, {pipeline_mode = #tpu.pipeline_mode<synchronous>, transform_indices = @transform_8, window_bounds = array<i64: 600, 1200>}, {pipeline_mode = #tpu.pipeline_mode<synchronous>, transform_indices = @transform_9, window_bounds = array<i64: 1, 1200>}, {transform_indices = @transform_10, window_bounds = array<i64: 8, 1200>}, {transform_indices = @transform_11, window_bounds = array<i64: 8, 40>}]} {
    %c0 = arith.constant 0 : index
    %c0_0 = arith.constant 0 : index
    %0 = vector.load %arg1[%c0, %c0_0] : memref<8x1200xf32, #tpu.memory_space<vmem>>, vector<8x1200xf32>
    %1 = arith.truncf %0 : vector<8x1200xf32> to vector<8x1200xbf16>
    %c0_1 = arith.constant 0 : index
    %c0_2 = arith.constant 0 : index
    %2 = vector.load %arg3[%c0_1, %c0_2] : memref<1200x600xbf16, #tpu.memory_space<vmem>>, vector<1200x600xbf16>
    %cst = arith.constant dense<0.000000e+00> : vector<8x600xf32>
    %3 = tpu.matmul %1, %2, %cst {dimension_numbers = #tpu.dot_dimension_numbers<[1], [0], [0], [1], [0, 0, 1, 1], [], []>} : vector<8x1200xbf16>, vector<1200x600xbf16>, vector<8x600xf32> -> vector<8x600xf32>
    %c0_3 = arith.constant 0 : index
    %c0_4 = arith.constant 0 : index
    %4 = vector.load %arg4[%c0_3, %c0_4] : memref<1x600xf32, #tpu.memory_space<vmem>>, vector<1x600xf32>
    %5 = vector.broadcast %4 : vector<1x600xf32> to vector<8x600xf32>
    %6 = arith.addf %3, %5 : vector<8x600xf32>
    %cst_5 = arith.constant 0.000000e+00 : f32
    %7 = vector.broadcast %cst_5 : f32 to vector<8x600xf32>
    %8 = arith.maximumf %6, %7 : vector<8x600xf32>
    %9 = arith.truncf %8 : vector<8x600xf32> to vector<8x600xbf16>
    %c0_6 = arith.constant 0 : index
    %c0_7 = arith.constant 0 : index
    %10 = vector.load %arg5[%c0_6, %c0_7] : memref<600x40xbf16, #tpu.memory_space<vmem>>, vector<600x40xbf16>
    %cst_8 = arith.constant dense<0.000000e+00> : vector<8x40xf32>
    %11 = tpu.matmul %9, %10, %cst_8 {dimension_numbers = #tpu.dot_dimension_numbers<[1], [0], [0], [1], [0, 0, 1, 1], [], []>} : vector<8x600xbf16>, vector<600x40xbf16>, vector<8x40xf32> -> vector<8x40xf32>
    %c0_9 = arith.constant 0 : index
    %c0_10 = arith.constant 0 : index
    %12 = vector.load %arg6[%c0_9, %c0_10] : memref<1x40xf32, #tpu.memory_space<vmem>>, vector<1x40xf32>
    %13 = vector.broadcast %12 : vector<1x40xf32> to vector<8x40xf32>
    %14 = arith.addf %11, %13 : vector<8x40xf32>
    %15 = vector.extract_strided_slice %14 {offsets = [0, 0], sizes = [8, 20], strides = [1, 1]} : vector<8x40xf32> to vector<8x20xf32>
    %16 = vector.extract_strided_slice %14 {offsets = [0, 20], sizes = [8, 20], strides = [1, 1]} : vector<8x40xf32> to vector<8x20xf32>
    %cst_11 = arith.constant 5.000000e-01 : f32
    %17 = vector.broadcast %cst_11 : f32 to vector<8x20xf32>
    %18 = arith.mulf %17, %16 : vector<8x20xf32>
    %19 = math.exp %18 : vector<8x20xf32>
    %c0_12 = arith.constant 0 : index
    %c0_13 = arith.constant 0 : index
    %20 = vector.load %arg2[%c0_12, %c0_13] : memref<8x20xf32, #tpu.memory_space<vmem>>, vector<8x20xf32>
    %21 = arith.mulf %20, %19 : vector<8x20xf32>
    %22 = arith.addf %15, %21 : vector<8x20xf32>
    %23 = arith.truncf %22 : vector<8x20xf32> to vector<8x20xbf16>
    %c0_14 = arith.constant 0 : index
    %c0_15 = arith.constant 0 : index
    %24 = vector.load %arg7[%c0_14, %c0_15] : memref<20x600xbf16, #tpu.memory_space<vmem>>, vector<20x600xbf16>
    %cst_16 = arith.constant dense<0.000000e+00> : vector<8x600xf32>
    %25 = tpu.matmul %23, %24, %cst_16 {dimension_numbers = #tpu.dot_dimension_numbers<[1], [0], [0], [1], [0, 0, 1, 1], [], []>} : vector<8x20xbf16>, vector<20x600xbf16>, vector<8x600xf32> -> vector<8x600xf32>
    %c0_17 = arith.constant 0 : index
    %c0_18 = arith.constant 0 : index
    %26 = vector.load %arg8[%c0_17, %c0_18] : memref<1x600xf32, #tpu.memory_space<vmem>>, vector<1x600xf32>
    %27 = vector.broadcast %26 : vector<1x600xf32> to vector<8x600xf32>
    %28 = arith.addf %25, %27 : vector<8x600xf32>
    %cst_19 = arith.constant 0.000000e+00 : f32
    %29 = vector.broadcast %cst_19 : f32 to vector<8x600xf32>
    %30 = arith.maximumf %28, %29 : vector<8x600xf32>
    %31 = arith.truncf %30 : vector<8x600xf32> to vector<8x600xbf16>
    %c0_20 = arith.constant 0 : index
    %c0_21 = arith.constant 0 : index
    %32 = vector.load %arg9[%c0_20, %c0_21] : memref<600x1200xbf16, #tpu.memory_space<vmem>>, vector<600x1200xbf16>
    %cst_22 = arith.constant dense<0.000000e+00> : vector<8x1200xf32>
    %33 = tpu.matmul %31, %32, %cst_22 {dimension_numbers = #tpu.dot_dimension_numbers<[1], [0], [0], [1], [0, 0, 1, 1], [], []>} : vector<8x600xbf16>, vector<600x1200xbf16>, vector<8x1200xf32> -> vector<8x1200xf32>
    %c0_23 = arith.constant 0 : index
    %c0_24 = arith.constant 0 : index
    %34 = vector.load %arg10[%c0_23, %c0_24] : memref<1x1200xf32, #tpu.memory_space<vmem>>, vector<1x1200xf32>
    %35 = vector.broadcast %34 : vector<1x1200xf32> to vector<8x1200xf32>
    %36 = arith.addf %33, %35 : vector<8x1200xf32>
    %37 = arith.negf %36 : vector<8x1200xf32>
    %38 = math.exp %37 : vector<8x1200xf32>
    %cst_25 = arith.constant 1.000000e+00 : f32
    %39 = vector.broadcast %cst_25 : f32 to vector<8x1200xf32>
    %40 = arith.addf %39, %38 : vector<8x1200xf32>
    %41 = arith.divf %39, %40 : vector<8x1200xf32>
    %42 = arith.truncf %41 : vector<8x1200xf32> to vector<8x1200xbf16>
    %c0_26 = arith.constant 0 : index
    %c0_27 = arith.constant 0 : index
    %43 = vector.load %arg11[%c0_26, %c0_27] : memref<8x1200xbf16, #tpu.memory_space<vmem>>, vector<8x1200xbf16>
    tpu.vector_store %arg11[%c0_26, %c0_27], %42 {strides = array<i32>} : memref<8x1200xbf16, #tpu.memory_space<vmem>>, vector<8x1200xbf16>,
    %c0_28 = arith.constant 0 : index
    %c0_29 = arith.constant 0 : index
    %44 = vector.load %arg12[%c0_28, %c0_29] : memref<8x40xf32, #tpu.memory_space<vmem>>, vector<8x40xf32>
    tpu.vector_store %arg12[%c0_28, %c0_29], %14 {strides = array<i32>} : memref<8x40xf32, #tpu.memory_space<vmem>>, vector<8x40xf32>,
    return
  }
  func.func @transform_0(%arg0: i32) -> (i32, i32) {
    %c0_i32 = arith.constant 0 : i32
    %c0_i32_0 = arith.constant 0 : i32
    return %arg0, %c0_i32 : i32, i32
  }
  func.func @transform_1(%arg0: i32) -> (i32, i32) {
    %c0_i32 = arith.constant 0 : i32
    %c0_i32_0 = arith.constant 0 : i32
    return %arg0, %c0_i32 : i32, i32
  }
  func.func @transform_2(%arg0: i32) -> (i32, i32) {
    %c0_i32 = arith.constant 0 : i32
    %c0_i32_0 = arith.constant 0 : i32
    %c0_i32_1 = arith.constant 0 : i32
    return %c0_i32, %c0_i32_0 : i32, i32
  }
  func.func @transform_3(%arg0: i32) -> (i32, i32) {
    %c0_i32 = arith.constant 0 : i32
    %c0_i32_0 = arith.constant 0 : i32
    %c0_i32_1 = arith.constant 0 : i32
    return %c0_i32, %c0_i32_0 : i32, i32
  }
  func.func @transform_4(%arg0: i32) -> (i32, i32) {
    %c0_i32 = arith.constant 0 : i32
    %c0_i32_0 = arith.constant 0 : i32
    %c0_i32_1 = arith.constant 0 : i32
    return %c0_i32, %c0_i32_0 : i32, i32
  }
  func.func @transform_5(%arg0: i32) -> (i32, i32) {
    %c0_i32 = arith.constant 0 : i32
    %c0_i32_0 = arith.constant 0 : i32
    %c0_i32_1 = arith.constant 0 : i32
    return %c0_i32, %c0_i32_0 : i32, i32
  }
  func.func @transform_6(%arg0: i32) -> (i32, i32) {
    %c0_i32 = arith.constant 0 : i32
    %c0_i32_0 = arith.constant 0 : i32
    %c0_i32_1 = arith.constant 0 : i32
    return %c0_i32, %c0_i32_0 : i32, i32
  }
  func.func @transform_7(%arg0: i32) -> (i32, i32) {
    %c0_i32 = arith.constant 0 : i32
    %c0_i32_0 = arith.constant 0 : i32
    %c0_i32_1 = arith.constant 0 : i32
    return %c0_i32, %c0_i32_0 : i32, i32
  }
  func.func @transform_8(%arg0: i32) -> (i32, i32) {
    %c0_i32 = arith.constant 0 : i32
    %c0_i32_0 = arith.constant 0 : i32
    %c0_i32_1 = arith.constant 0 : i32
    return %c0_i32, %c0_i32_0 : i32, i32
  }
  func.func @transform_9(%arg0: i32) -> (i32, i32) {
    %c0_i32 = arith.constant 0 : i32
    %c0_i32_0 = arith.constant 0 : i32
    %c0_i32_1 = arith.constant 0 : i32
    return %c0_i32, %c0_i32_0 : i32, i32
  }
  func.func @transform_10(%arg0: i32) -> (i32, i32) {
    %c0_i32 = arith.constant 0 : i32
    %c0_i32_0 = arith.constant 0 : i32
    return %arg0, %c0_i32 : i32, i32
  }
  func.func @transform_11(%arg0: i32) -> (i32, i32) {
    %c0_i32 = arith.constant 0 : i32
    %c0_i32_0 = arith.constant 0 : i32
    return %arg0, %c0_i32 : i32, i32
  }
}

</mosaic_0001>

<bundles_post_ra>
// kernel: vae_forward.1
= control target key start
LH: loop header
LB: loop body
LE: loop exit
PB: predicated region body
PF: predicated region fallthrough
CT: control target
= control target key end

     0   :  { %17 = vsyncpa [#allocation3], 0  ;;  %s10041_s0 = inlined_call_operand.hbm [shape: f32[8,1200], index: 0, kind: input, shape index: {}]   ;;  %s10042_s1 = inlined_call_operand.hbm [shape: f32[8,20], index: 1, kind: input, shape index: {}]   ;;  %s10043_s2 = inlined_call_operand.hbm [shape: bf16[1200,600], index: 2, kind: input, shape index: {}]   ;;  %s10044_s3 = inlined_call_operand.hbm [shape: f32[1,600], index: 3, kind: input, shape index: {}]   ;;  %s10045_s4 = inlined_call_operand.hbm [shape: bf16[600,40], index: 4, kind: input, shape index: {}]   ;;  %s10046_s5 = inlined_call_operand.hbm [shape: f32[1,40], index: 5, kind: input, shape index: {}]   ;;  %s10047_s6 = inlined_call_operand.hbm [shape: bf16[20,600], index: 6, kind: input, shape index: {}]   ;;  %s10048_s7 = inlined_call_operand.hbm [shape: f32[1,600], index: 7, kind: input, shape index: {}]   ;;  %s10049_s8 = inlined_call_operand.hbm [shape: bf16[600,1200], index: 8, kind: input, shape index: {}]   ;;  %s10050_s9 = inlined_call_operand.hbm [shape: f32[1,1200], index: 9, kind: input, shape index: {}]   ;;  %s10051_s10 = inlined_call_operand.hbm [shape: bf16[8,1200], index: 10, kind: output, shape index: {0}]   ;;  %s10052_s11 = inlined_call_operand.hbm [shape: f32[8,40], index: 11, kind: output, shape index: {1}]  }
   0x1   :  { %18 = vsyncpa [#allocation6], 0 }
   0x2   :  { %19 = vsyncpa [#allocation9], 0 }
   0x3   :  { %20 = vsyncpa [#allocation12], 0 }
   0x4   :  { %21 = vsyncpa [#allocation15], 0 }
   0x5   :  { %22 = vsyncpa [#allocation18], 0 }
   0x6   :  { %23 = vsyncpa [#allocation4], 0 }
   0x7   :  { %24 = vsyncpa [#allocation21], 0  ;;  %s9580_s17 = smov [#allocation5]   ;;  %s9581_s19 = smov [#allocation8]  }
   0x8   :  { %s41_s18 = sshll.u32 %s9580_s17, 4  ;;  %s63_s20 = sshll.u32 %s9581_s19, 4  ;;  %s42_s18 = int_to_ptr.vmem [resolvable:$true] %s41_s18  ;;  %s64_s20 = int_to_ptr.vmem [resolvable:$true] %s63_s20 }
   0x9   :  { %s9300_s23 = scalar_lea.hbm %s10042_s1, 128 }
   0xa   :  { %p9301_p0 = scmp.ne.s32.totalorder %s10042_s1, %s9300_s23  ;;  %p9304_p1 = scmp.lt.u32.totalorder %s9300_s23, %s10042_s1 }
   0xc   :  { %p9306_p2 = pnand %p9304_p1, %p9301_p0 }
   0xe   :  { %9309 = shalt.err (!%p9306_p2)
}
   0xf   :  { %s9310_s28 = scalar_lea.vmem %s42_s18, 128  ;;  %p9315_p4 = scmp.lt.s32.totalorder %s42_s18, %s42_s18 }
  0x10   :  { %p9311_p3 = scmp.ne.s32.totalorder %s42_s18, %s9310_s28  ;;  %p9316_p5 = scmp.lt.s32.totalorder %s9310_s28, %s9310_s28 }
  0x12   :  { %p9317_p6 = por %p9316_p5, %p9315_p4 }
  0x14   :  { %p9318_p7 = pnand %p9317_p6, %p9311_p3 }
  0x16   :  { %9321 = shalt.err (!%p9318_p7)
}
  0x17   :  { %44 = dma.hbm_to_vmem [thread:$0]  %s10042_s1, 128, %s42_s18, [#allocation6]  }
  0x18   :  { %s9322_s14 = scalar_lea.hbm %s10044_s3, 80 }
  0x19   :  { %p9323_p8 = scmp.ne.s32.totalorder %s10044_s3, %s9322_s14  ;;  %p9326_p9 = scmp.lt.u32.totalorder %s9322_s14, %s10044_s3 }
  0x1b   :  { %p9328_p10 = pnand %p9326_p9, %p9323_p8 }
  0x1d   :  { %9331 = shalt.err (!%p9328_p10)
}
  0x1e   :  { %s9332_s21 = scalar_lea.vmem %s64_s20, 80  ;;  %s9336_s22 = scalar_lea.vmem %s64_s20, 96 }
  0x1f   :  { %p9333_p11 = scmp.ne.s32.totalorder %s64_s20, %s9332_s21  ;;  %p9337_p12 = scmp.lt.s32.totalorder %s64_s20, %s64_s20 }
  0x20   :  { %p9338_p13 = scmp.lt.s32.totalorder %s9336_s22, %s9332_s21 }
  0x22   :  { %p9339_p0 = por %p9338_p13, %p9337_p12 }
  0x24   :  { %p9340_p1 = pnand %p9339_p0, %p9333_p11 }
  0x26   :  { %9343 = shalt.err (!%p9340_p1)
}
  0x27   :  { %66 = dma.hbm_to_vmem [thread:$0]  %s10044_s3, 80, %s64_s20, [#allocation9]  }
  0x28   :  { %s9582_s23 = smov [#allocation11]   ;;  %s9583_s25 = smov [#allocation14]  }
  0x29   :  { %s85_s24 = sshll.u32 %s9582_s23, 4  ;;  %s107_s26 = sshll.u32 %s9583_s25, 4  ;;  %s86_s24 = int_to_ptr.vmem [resolvable:$true] %s85_s24  ;;  %s108_s26 = int_to_ptr.vmem [resolvable:$true] %s107_s26 }
  0x2a   :  { %s9344_s29 = scalar_lea.hbm %s10046_s5, 16 }
  0x2b   :  { %p9345_p2 = scmp.ne.s32.totalorder %s10046_s5, %s9344_s29  ;;  %p9348_p3 = scmp.lt.u32.totalorder %s9344_s29, %s10046_s5 }
  0x2d   :  { %p9350_p4 = pnand %p9348_p3, %p9345_p2 }
  0x2f   :  { %9353 = shalt.err (!%p9350_p4)
}
  0x30   :  { %s9354_s3 = scalar_lea.vmem %s86_s24, 16  ;;  %s9358_s20 = scalar_lea.vmem %s86_s24, 32 }
  0x31   :  { %p9355_p5 = scmp.ne.s32.totalorder %s86_s24, %s9354_s3  ;;  %p9359_p6 = scmp.lt.s32.totalorder %s86_s24, %s86_s24 }
  0x32   :  { %p9360_p7 = scmp.lt.s32.totalorder %s9358_s20, %s9354_s3 }
  0x34   :  { %p9361_p8 = por %p9360_p7, %p9359_p6 }
  0x36   :  { %p9362_p9 = pnand %p9361_p8, %p9355_p5 }
  0x38   :  { %9365 = shalt.err (!%p9362_p9)
}
  0x39   :  { %88 = dma.hbm_to_vmem [thread:$0]  %s10046_s5, 16, %s86_s24, [#allocation12]  }
  0x3a   :  { %s9366_s21 = scalar_lea.hbm %s10048_s7, 80 }
  0x3b   :  { %p9367_p10 = scmp.ne.s32.totalorder %s10048_s7, %s9366_s21  ;;  %p9370_p11 = scmp.lt.u32.totalorder %s9366_s21, %s10048_s7 }
  0x3d   :  { %p9372_p12 = pnand %p9370_p11, %p9367_p10 }
  0x3f   :  { %9375 = shalt.err (!%p9372_p12)
}
  0x40   :  { %s9376_s25 = scalar_lea.vmem %s108_s26, 80  ;;  %s9380_s27 = scalar_lea.vmem %s108_s26, 96 }
  0x41   :  { %p9377_p13 = scmp.ne.s32.totalorder %s108_s26, %s9376_s25  ;;  %p9381_p0 = scmp.lt.s32.totalorder %s108_s26, %s108_s26 }
  0x42   :  { %p9382_p1 = scmp.lt.s32.totalorder %s9380_s27, %s9376_s25 }
  0x44   :  { %p9383_p2 = por %p9382_p1, %p9381_p0 }
  0x46   :  { %p9384_p3 = pnand %p9383_p2, %p9377_p13 }
  0x48   :  { %9387 = shalt.err (!%p9384_p3)
}
  0x49   :  { %110 = dma.hbm_to_vmem [thread:$0]  %s10048_s7, 80, %s108_s26, [#allocation15]  }
  0x4a   :  { %s9584_s28 = smov [#allocation2]   ;;  %s9585_s30 = smov [#allocation7]  }
  0x4b   :  { %s31_s29 = sshll.u32 %s9584_s28, 4  ;;  %s50_s12 = sshll.u32 %s9585_s30, 4  ;;  %s32_s29 = int_to_ptr.vmem [resolvable:$true] %s31_s29  ;;  %s9710_s12 = int_to_ptr.vmem [resolvable:$true] %s50_s12 }
  0x4c   :  { %s9388_s3 = scalar_lea.hbm %s10041_s0, 1280 }
  0x4d   :  { %p9389_p4 = scmp.ne.s32.totalorder %s10041_s0, %s9388_s3  ;;  %p9392_p5 = scmp.lt.u32.totalorder %s9388_s3, %s10041_s0 }
  0x4f   :  { %p9394_p6 = pnand %p9392_p5, %p9389_p4 }
  0x51   :  { %9397 = shalt.err (!%p9394_p6)
}
  0x52   :  { %s9398_s7 = scalar_lea.vmem %s32_s29, 1280  ;;  %p9403_p8 = scmp.lt.s32.totalorder %s32_s29, %s32_s29 }
  0x53   :  { %p9399_p7 = scmp.ne.s32.totalorder %s32_s29, %s9398_s7  ;;  %p9404_p9 = scmp.lt.s32.totalorder %s9398_s7, %s9398_s7 }
  0x55   :  { %p9405_p10 = por %p9404_p9, %p9403_p8 }
  0x57   :  { %p9406_p11 = pnand %p9405_p10, %p9399_p7 }
  0x59   :  { %9409 = shalt.err (!%p9406_p11)
}
  0x5a   :  { %34 = dma.hbm_to_vmem [thread:$0]  %s10041_s0, 1280, %s32_s29, [#allocation3]  }
  0x5b   :  { %s9410_s1 = scalar_lea.hbm %s10043_s2, 48000 }
  0x5c   :  { %p9411_p12 = scmp.ne.s32.totalorder %s10043_s2, %s9410_s1  ;;  %p9414_p13 = scmp.lt.u32.totalorder %s9410_s1, %s10043_s2 }
  0x5e   :  { %p9416_p0 = pnand %p9414_p13, %p9411_p12 }
  0x60   :  { %9419 = shalt.err (!%p9416_p0)
}
  0x61   :  { %s9420_s5 = scalar_lea.vmem %s9710_s12, 48000  ;;  %p9425_p2 = scmp.lt.s32.totalorder %s9710_s12, %s9710_s12 }
  0x62   :  { %p9421_p1 = scmp.ne.s32.totalorder %s9710_s12, %s9420_s5  ;;  %p9426_p3 = scmp.lt.s32.totalorder %s9420_s5, %s9420_s5 }
  0x64   :  { %p9427_p4 = por %p9426_p3, %p9425_p2 }
  0x66   :  { %p9428_p5 = pnand %p9427_p4, %p9421_p1 }
  0x68   :  { %9431 = shalt.err (!%p9428_p5)
}
  0x69   :  { %s9586_s0 = smov 320   ;;  %s9587_s24 = smov 20  }
  0x6a   :  { %56 = dma.hbm_to_vmem [thread:$0]  %s10043_s2, 48000, %s9710_s12, [#allocation6], %s9586_s0, %s9586_s0, %s9587_s24  }
  0x6b   :  { %s9588_s30 = smov [#allocation10]   ;;  %s9432_s20 = scalar_lea.hbm %s10045_s4, 4800 }
  0x6c   :  { %s72_s13 = sshll.u32 %s9588_s30, 4  ;;  %p9433_p6 = scmp.ne.s32.totalorder %s10045_s4, %s9432_s20  ;;  %s73_s13 = int_to_ptr.vmem [resolvable:$true] %s72_s13 }
  0x6d   :  { %p9436_p7 = scmp.lt.u32.totalorder %s9432_s20, %s10045_s4 }
  0x6f   :  { %p9438_p8 = pnand %p9436_p7, %p9433_p6 }
  0x71   :  { %9441 = shalt.err (!%p9438_p8)
}
  0x72   :  { %s9442_s26 = scalar_lea.vmem %s73_s13, 4800  ;;  %p9447_p10 = scmp.lt.s32.totalorder %s73_s13, %s73_s13 }
  0x73   :  { %p9443_p9 = scmp.ne.s32.totalorder %s73_s13, %s9442_s26  ;;  %p9448_p11 = scmp.lt.s32.totalorder %s9442_s26, %s9442_s26 }
  0x75   :  { %p9449_p12 = por %p9448_p11, %p9447_p10 }
  0x77   :  { %p9450_p13 = pnand %p9449_p12, %p9443_p9 }
  0x79   :  { %9453 = shalt.err (!%p9450_p13)
}
  0x7a   :  { %s9589_s2 = smov 64   ;;  %s9590_s12 = smov 4  }
  0x7b   :  { %78 = dma.hbm_to_vmem [thread:$0]  %s10045_s4, 4800, %s73_s13, [#allocation9], %s9589_s2, %s9589_s2, %s9590_s12  }
  0x7c   :  { %s9591_s22 = smov [#allocation13]   ;;  %s9592_s18 = smov [#allocation16]  }
  0x7d   :  { %s94_s1 = sshll.u32 %s9591_s22, 4  ;;  %s116_s23 = sshll.u32 %s9592_s18, 4  ;;  %s95_s1 = int_to_ptr.vmem [resolvable:$true] %s94_s1  ;;  %s117_s23 = int_to_ptr.vmem [resolvable:$true] %s116_s23 }
  0x7e   :  { %s9454_s5 = scalar_lea.hbm %s10047_s6, 960 }
  0x7f   :  { %p9455_p0 = scmp.ne.s32.totalorder %s10047_s6, %s9454_s5  ;;  %p9458_p1 = scmp.lt.u32.totalorder %s9454_s5, %s10047_s6 }
  0x81   :  { %p9460_p2 = pnand %p9458_p1, %p9455_p0 }
  0x83   :  { %9463 = shalt.err (!%p9460_p2)
}
  0x84   :  { %s9464_s4 = scalar_lea.vmem %s95_s1, 960  ;;  %p9469_p4 = scmp.lt.s32.totalorder %s95_s1, %s95_s1 }
  0x85   :  { %p9465_p3 = scmp.ne.s32.totalorder %s95_s1, %s9464_s4  ;;  %p9470_p5 = scmp.lt.s32.totalorder %s9464_s4, %s9464_s4 }
  0x87   :  { %p9471_p6 = por %p9470_p5, %p9469_p4 }
  0x89   :  { %p9472_p7 = pnand %p9471_p6, %p9465_p3 }
  0x8b   :  { %9475 = shalt.err (!%p9472_p7)
}
  0x8c   :  { %100 = dma.hbm_to_vmem [thread:$0]  %s10047_s6, 960, %s95_s1, [#allocation12], %s9586_s0, %s9586_s0, %s9587_s24  }
  0x8d   :  { %s9476_s16 = scalar_lea.hbm %s10049_s8, 48000 }
  0x8e   :  { %p9477_p8 = scmp.ne.s32.totalorder %s10049_s8, %s9476_s16  ;;  %p9480_p9 = scmp.lt.u32.totalorder %s9476_s16, %s10049_s8 }
  0x90   :  { %p9482_p10 = pnand %p9480_p9, %p9477_p8 }
  0x92   :  { %9485 = shalt.err (!%p9482_p10)
}
  0x93   :  { %s9486_s12 = scalar_lea.vmem %s117_s23, 48000  ;;  %p9491_p12 = scmp.lt.s32.totalorder %s117_s23, %s117_s23 }
  0x94   :  { %p9487_p11 = scmp.ne.s32.totalorder %s117_s23, %s9486_s12  ;;  %p9492_p13 = scmp.lt.s32.totalorder %s9486_s12, %s9486_s12 }
  0x96   :  { %p9493_p0 = por %p9492_p13, %p9491_p12 }
  0x98   :  { %p9494_p1 = pnand %p9493_p0, %p9487_p11 }
  0x9a   :  { %9497 = shalt.err (!%p9494_p1)
}
  0x9b   :  { %s9593_s6 = smov 640   ;;  %s9594_s0 = smov 40  }
  0x9c   :  { %122 = dma.hbm_to_vmem [thread:$0]  %s10049_s8, 48000, %s117_s23, [#allocation15], %s9593_s6, %s9593_s6, %s9594_s0  }
  0x9d   :  { %s9595_s21 = smov [#allocation17]   ;;  %s9498_s25 = scalar_lea.hbm %s10050_s9, 160 }
  0x9e   :  { %s129_s22 = sshll.u32 %s9595_s21, 4  ;;  %p9499_p2 = scmp.ne.s32.totalorder %s10050_s9, %s9498_s25  ;;  %s130_s22 = int_to_ptr.vmem [resolvable:$true] %s129_s22 }
  0x9f   :  { %p9502_p3 = scmp.lt.u32.totalorder %s9498_s25, %s10050_s9 }
  0xa1   :  { %p9504_p4 = pnand %p9502_p3, %p9499_p2 }
  0xa3   :  { %9507 = shalt.err (!%p9504_p4)
}
  0xa4   :  { %s9508_s30 = scalar_lea.vmem %s130_s22, 160  ;;  %p9513_p6 = scmp.lt.s32.totalorder %s130_s22, %s130_s22 }
  0xa5   :  { %p9509_p5 = scmp.ne.s32.totalorder %s130_s22, %s9508_s30  ;;  %p9514_p7 = scmp.lt.s32.totalorder %s9508_s30, %s9508_s30 }
  0xa7   :  { %p9515_p8 = por %p9514_p7, %p9513_p6 }
  0xa9   :  { %p9516_p9 = pnand %p9515_p8, %p9509_p5 }
  0xab   :  { %9519 = shalt.err (!%p9516_p9)
}
  0xac   :  { %132 = dma.hbm_to_vmem [thread:$0]  %s10050_s9, 160, %s130_s22, [#allocation18]  }
  0xad   :  { %9564 = dma.done.wait [#allocation3], 1280  }
  0xae   :  { %9565 = vsyncadd [#allocation3], 4294966016 }
  0xaf   :  { %9566 = dma.done.wait [#allocation6], 48128  }
  0xb0   :  { %9567 = vsyncadd [#allocation6], 4294919168 }
  0xb1   :  { %9568 = dma.done.wait [#allocation9], 4880  }
  0xb2   :  { %9569 = vsyncadd [#allocation9], 4294962416 }
  0xb3   :  { %9570 = dma.done.wait [#allocation12], 976  }
  0xb4   :  { %9571 = vsyncadd [#allocation12], 4294966320 }
  0xb5   :  { %9572 = dma.done.wait [#allocation15], 48080  }
  0xb6   :  { %9573 = vsyncadd [#allocation15], 4294919216 }
  0xb7   :  { %9574 = dma.done.wait [#allocation18], 160  }
  0xb8   :  { %9575 = vsyncadd [#allocation18], 4294967136  ;;  %v8118_v0 = vld [vmem:[#allocation7 + $0x4] ss:$20 sps:$4 sm:$0xff]   ;;  %v8122_v2 = vld [vmem:[#allocation7] ss:$20 sps:$4 sm:$0xff]  }
  0xb9   :  { %v8120_v1 = vld [vmem:[#allocation7 + $0x284] ss:$20 sps:$4 sm:$0xff]   ;;  %2615 = vmatprep.subr.bf16.mxu1 %v8118_v0  ;;  %v8123_v3 = vld [vmem:[#allocation7 + $0x280] ss:$20 sps:$4 sm:$0xff]   ;;  %v8128_v6 = vld [vmem:[#allocation7 + $0x28] ss:$20 sps:$4 sm:$0xff]  }
  0xba   :  { %2656 = vmatprep.subr.bf16.mxu0 %v8120_v1  ;;  %v8124_v4 = vld [vmem:[#allocation7 + $0x2c] ss:$20 sps:$4 sm:$0xff]   ;;  %2616 = vmatpush1.bf16.msra.mxu1 %v8122_v2  ;;  %v8129_v7 = vld [vmem:[#allocation7 + $0x2a8] ss:$20 sps:$4 sm:$0xff]   ;;  %v8134_v10 = vld [vmem:[#allocation7 + $0x50] ss:$20 sps:$4 sm:$0xff]  }
  0xbb   :  { %2657 = vmatpush1.bf16.msra.mxu0 %v8123_v3  ;;  %v8126_v5 = vld [vmem:[#allocation7 + $0x2ac] ss:$20 sps:$4 sm:$0xff]   ;;  %2617 = vmatprep.subr.bf16.mxu1 %v8124_v4  ;;  %v8130_v8 = vld [vmem:[#allocation7 + $0x54] ss:$20 sps:$4 sm:$0xff]   ;;  %v8135_v11 = vld [vmem:[#allocation7 + $0x2d0] ss:$20 sps:$4 sm:$0xff]  }
  0xbc   :  { %2658 = vmatprep.subr.bf16.mxu0 %v8126_v5  ;;  %v8132_v9 = vld [vmem:[#allocation7 + $0x2d4] ss:$20 sps:$4 sm:$0xff]   ;;  %v8136_v12 = vld [vmem:[#allocation7 + $0x7c] ss:$20 sps:$4 sm:$0xff]   ;;  %v8140_v14 = vld [vmem:[#allocation7 + $0x78] ss:$20 sps:$4 sm:$0xff]  }
  0xbd   :  { %v8138_v13 = vld [vmem:[#allocation7 + $0x2fc] ss:$20 sps:$4 sm:$0xff]   ;;  %v8141_v15 = vld [vmem:[#allocation7 + $0x2f8] ss:$20 sps:$4 sm:$0xff]   ;;  %v8146_v18 = vld [vmem:[#allocation7 + $0xa0] ss:$20 sps:$4 sm:$0xff]  }
  0xbe   :  { %2618 = vmatpush1.bf16.msra.mxu1 %v8128_v6  ;;  %v8142_v16 = vld [vmem:[#allocation7 + $0xa4] ss:$20 sps:$4 sm:$0xff]   ;;  %v8147_v19 = vld [vmem:[#allocation7 + $0x320] ss:$20 sps:$4 sm:$0xff]   ;;  %v8152_v22 = vld [vmem:[#allocation7 + $0xc8] ss:$20 sps:$4 sm:$0xff]  }
  0xbf   :  { %2659 = vmatpush1.bf16.msra.mxu0 %v8129_v7  ;;  %2619 = vmatprep.subr.bf16.mxu1 %v8130_v8  ;;  %v8144_v17 = vld [vmem:[#allocation7 + $0x324] ss:$20 sps:$4 sm:$0xff]   ;;  %v8148_v20 = vld [vmem:[#allocation7 + $0xcc] ss:$20 sps:$4 sm:$0xff]   ;;  %v8153_v23 = vld [vmem:[#allocation7 + $0x348] ss:$20 sps:$4 sm:$0xff]  }
  0xc0   :  { %2660 = vmatprep.subr.bf16.mxu0 %v8132_v9  ;;  %v8150_v21 = vld [vmem:[#allocation7 + $0x34c] ss:$20 sps:$4 sm:$0xff]   ;;  %v8154_v24 = vld [vmem:[#allocation7 + $0xf4] ss:$20 sps:$4 sm:$0xff]   ;;  %v8158_v26 = vld [vmem:[#allocation7 + $0xf0] ss:$20 sps:$4 sm:$0xff]  }
  0xc1   :  { %v8156_v25 = vld [vmem:[#allocation7 + $0x374] ss:$20 sps:$4 sm:$0xff]   ;;  %v8159_v27 = vld [vmem:[#allocation7 + $0x370] ss:$20 sps:$4 sm:$0xff]   ;;  %v8164_v30 = vld [vmem:[#allocation7 + $0x118] ss:$20 sps:$4 sm:$0xff]  }
  0xc2   :  { %2620 = vmatpush1.bf16.msra.mxu1 %v8134_v10  ;;  %v8160_v28 = vld [vmem:[#allocation7 + $0x11c] ss:$20 sps:$4 sm:$0xff]   ;;  %v8165_v31 = vld [vmem:[#allocation7 + $0x398] ss:$20 sps:$4 sm:$0xff]   ;;  %v8170_v34 = vld [vmem:[#allocation7 + $0x140] ss:$20 sps:$4 sm:$0xff]  }
  0xc3   :  { %2661 = vmatpush1.bf16.msra.mxu0 %v8135_v11  ;;  %2621 = vmatprep.subr.bf16.mxu1 %v8136_v12  ;;  %v8162_v29 = vld [vmem:[#allocation7 + $0x39c] ss:$20 sps:$4 sm:$0xff]   ;;  %v8166_v32 = vld [vmem:[#allocation7 + $0x144] ss:$20 sps:$4 sm:$0xff]   ;;  %v8171_v35 = vld [vmem:[#allocation7 + $0x3c0] ss:$20 sps:$4 sm:$0xff]  }
  0xc4   :  { %2662 = vmatprep.subr.bf16.mxu0 %v8138_v13  ;;  %v8168_v33 = vld [vmem:[#allocation7 + $0x3c4] ss:$20 sps:$4 sm:$0xff]   ;;  %v8172_v36 = vld [vmem:[#allocation7 + $0x16c] ss:$20 sps:$4 sm:$0xff]   ;;  %v8176_v38 = vld [vmem:[#allocation7 + $0x168] ss:$20 sps:$4 sm:$0xff]  }
  0xc5   :  { %v8174_v37 = vld [vmem:[#allocation7 + $0x3ec] ss:$20 sps:$4 sm:$0xff]   ;;  %v8177_v39 = vld [vmem:[#allocation7 + $0x3e8] ss:$20 sps:$4 sm:$0xff]   ;;  %v8182_v42 = vld [vmem:[#allocation7 + $0x190] ss:$20 sps:$4 sm:$0xff]  }
  0xc6   :  { %2622 = vmatpush1.bf16.msra.mxu1 %v8140_v14  ;;  %v8178_v40 = vld [vmem:[#allocation7 + $0x194] ss:$20 sps:$4 sm:$0xff]   ;;  %v8183_v43 = vld [vmem:[#allocation7 + $0x410] ss:$20 sps:$4 sm:$0xff]   ;;  %v8188_v47 = vld [vmem:[#allocation7 + $0x1b8] ss:$20 sps:$4 sm:$0xff]  }
  0xc7   :  { %2663 = vmatpush1.bf16.msra.mxu0 %v8141_v15  ;;  %2623 = vmatprep.subr.bf16.mxu1 %v8142_v16  ;;  %v8180_v41 = vld [vmem:[#allocation7 + $0x414] ss:$20 sps:$4 sm:$0xff]   ;;  %v8184_v44 = vld [vmem:[#allocation7 + $0x1bc] ss:$20 sps:$4 sm:$0xff]   ;;  %v167_v49 = vld [vmem:[#allocation2 + $0x18] sm:$0xff]  ;;  %vm2611_vm0 = vcmask 392192  }
  0xc8   :  { %2664 = vmatprep.subr.bf16.mxu0 %v8144_v17  ;;  %v8186_v45 = vld [vmem:[#allocation7 + $0x43c] ss:$20 sps:$4 sm:$0xff]   ;;  %v8189_v50 = vld [vmem:[#allocation7 + $0x438] ss:$20 sps:$4 sm:$0xff]   ;;  %v9797_v52 = vpack.c.bf16 %v167_v49, %v167_v49  ;;  %v8194_v54 = vld [vmem:[#allocation7 + $0x1e0] ss:$20 sps:$4 sm:$0xff]  }
  0xc9   :  { %v165_v46 = vld [vmem:[#allocation2 + $0x8] sm:$0xff]  ;;  %v8190_v51 = vld [vmem:[#allocation7 + $0x1e4] ss:$20 sps:$4 sm:$0xff]   ;;  %v8196_v56 = vld [vmem:[#allocation7 + $0x20c] ss:$20 sps:$4 sm:$0xff]   ;;  %vm3546_vm1 = vcmask 1043456  }
  0xca   :  { %2624 = vmatpush1.bf16.msra.mxu1 %v8146_v18  ;;  %v9795_v48 = vpack.c.bf16 %v165_v46, %v165_v46  ;;  %v8192_v53 = vld [vmem:[#allocation7 + $0x464] ss:$20 sps:$4 sm:$0xff]   ;;  %2688 = vmatprep.mubr.bf16.mxu0 %v9797_v52  ;;  %v8195_v55 = vld [vmem:[#allocation7 + $0x460] ss:$20 sps:$4 sm:$0xff]   ;;  %v8200_v58 = vld [vmem:[#allocation7 + $0x208] ss:$20 sps:$4 sm:$0xff]  }
  0xcb   :  { %2665 = vmatpush1.bf16.msra.mxu0 %v8147_v19  ;;  %2625 = vmatprep.subr.bf16.mxu1 %v8148_v20  ;;  %v8198_v57 = vld [vmem:[#allocation7 + $0x48c] ss:$20 sps:$4 sm:$0xff]   ;;  %v8201_v59 = vld [vmem:[#allocation7 + $0x488] ss:$20 sps:$4 sm:$0xff]   ;;  %v8206_v62 = vld [vmem:[#allocation7 + $0x230] ss:$20 sps:$4 sm:$0xff]  }
  0xcc   :  { %2666 = vmatprep.subr.bf16.mxu0 %v8150_v21  ;;  %2647 = vmatprep.mubr.bf16.mxu1 %v9795_v48  ;;  %v8202_v60 = vld [vmem:[#allocation7 + $0x234] ss:$20 sps:$4 sm:$0xff]   ;;  %v8207_v63 = vld [vmem:[#allocation7 + $0x4b0] ss:$20 sps:$4 sm:$0xff]   ;;  %v8212_v2 = vld [vmem:[#allocation7 + $0x258] ss:$20 sps:$4 sm:$0xff]  }
  0xcd   :  { %v8204_v61 = vld [vmem:[#allocation7 + $0x4b4] ss:$20 sps:$4 sm:$0xff]   ;;  %v8208_v0 = vld [vmem:[#allocation7 + $0x25c] ss:$20 sps:$4 sm:$0xff]   ;;  %v8213_v3 = vld [vmem:[#allocation7 + $0x4d8] ss:$20 sps:$4 sm:$0xff]  }
  0xce   :  { %2626 = vmatpush1.bf16.msra.mxu1 %v8152_v22  ;;  %v8210_v1 = vld [vmem:[#allocation7 + $0x4dc] ss:$20 sps:$4 sm:$0xff]   ;;  %v164_v4 = vld [vmem:[#allocation2] sm:$0xff]  ;;  %v8216_v5 = vld [vmem:[#allocation7 + $0x504] ss:$20 sps:$4 sm:$0xff]   ;;  %vm9598_vm2 = vmmov 0  }
  0xcf   :  { %2667 = vmatpush1.bf16.msra.mxu0 %v8153_v23  ;;  %2627 = vmatprep.subr.bf16.mxu1 %v8154_v24  ;;  %v166_v6 = vld [vmem:[#allocation2 + $0x10] sm:$0xff]  ;;  %v8219_v7 = vld [vmem:[#allocation7 + $0xc] ss:$20 sps:$4 sm:$0xff]   ;;  %v9801_v8 = vpack.c.bf16 %v164_v4, %v164_v4  ;;  %v8225_v13 = vld [vmem:[#allocation7 + $0x34] ss:$20 sps:$4 sm:$0xff]   ;;  %vm3542_vm3 = vcmask 719872  }
  0xd0   :  { %2668 = vmatprep.subr.bf16.mxu0 %v8156_v25  ;;  %v8214_v9 = vld [vmem:[#allocation7 + $0x500] ss:$20 sps:$4 sm:$0xff]   ;;  %v8217_v10 = vld [vmem:[#allocation7 + $0x8] ss:$20 sps:$4 sm:$0xff]   ;;  %v9803_v11 = vpack.c.bf16 %v166_v6, %v166_v6  ;;  %v8223_v15 = vld [vmem:[#allocation7 + $0x30] ss:$20 sps:$4 sm:$0xff]  }
  0xd1   :  { %v8222_v12 = vld [vmem:[#allocation7 + $0x52c] ss:$20 sps:$4 sm:$0xff]   ;;  %v8220_v14 = vld [vmem:[#allocation7 + $0x528] ss:$20 sps:$4 sm:$0xff]   ;;  %v8226_v18 = vld [vmem:[#allocation7 + $0x550] ss:$20 sps:$4 sm:$0xff]  }
  0xd2   :  { %2628 = vmatpush1.bf16.msra.mxu1 %v8158_v26  ;;  %v8228_v16 = vld [vmem:[#allocation7 + $0x554] ss:$20 sps:$4 sm:$0xff]   ;;  %v8231_v17 = vld [vmem:[#allocation7 + $0x5c] ss:$20 sps:$4 sm:$0xff]   ;;  %v8229_v19 = vld [vmem:[#allocation7 + $0x58] ss:$20 sps:$4 sm:$0xff]  }
  0xd3   :  { %2669 = vmatpush1.bf16.msra.mxu0 %v8159_v27  ;;  %2629 = vmatprep.subr.bf16.mxu1 %v8160_v28  ;;  %v8234_v20 = vld [vmem:[#allocation7 + $0x57c] ss:$20 sps:$4 sm:$0xff]   ;;  %v8237_v21 = vld [vmem:[#allocation7 + $0x84] ss:$20 sps:$4 sm:$0xff]   ;;  %v8235_v23 = vld [vmem:[#allocation7 + $0x80] ss:$20 sps:$4 sm:$0xff]  }
  0xd4   :  { %2670 = vmatprep.subr.bf16.mxu0 %v8162_v29  ;;  %v8232_v22 = vld [vmem:[#allocation7 + $0x578] ss:$20 sps:$4 sm:$0xff]   ;;  %v8238_v26 = vld [vmem:[#allocation7 + $0x5a0] ss:$20 sps:$4 sm:$0xff]   ;;  %v8241_v27 = vld [vmem:[#allocation7 + $0xa8] ss:$20 sps:$4 sm:$0xff]  }
  0xd5   :  { %v8240_v24 = vld [vmem:[#allocation7 + $0x5a4] ss:$20 sps:$4 sm:$0xff]   ;;  %v8243_v25 = vld [vmem:[#allocation7 + $0xac] ss:$20 sps:$4 sm:$0xff]   ;;  %v8249_v29 = vld [vmem:[#allocation7 + $0xd4] ss:$20 sps:$4 sm:$0xff]  }
  0xd6   :  { %2630 = vmatpush1.bf16.msra.mxu1 %v8164_v30  ;;  %v8246_v28 = vld [vmem:[#allocation7 + $0x5cc] ss:$20 sps:$4 sm:$0xff]   ;;  %v8244_v30 = vld [vmem:[#allocation7 + $0x5c8] ss:$20 sps:$4 sm:$0xff]   ;;  %v8298_v6 = vld [vmem:[#allocation7 + $0x730] ss:$20 sps:$4 sm:$0xff]  }
  0xd7   :  { %2671 = vmatpush1.bf16.msra.mxu0 %v8165_v31  ;;  %2631 = vmatprep.subr.bf16.mxu1 %v8166_v32  ;;  %v8247_v31 = vld [vmem:[#allocation7 + $0xd0] ss:$20 sps:$4 sm:$0xff]   ;;  %v8252_v32 = vld [vmem:[#allocation7 + $0x5f4] ss:$20 sps:$4 sm:$0xff]   ;;  %v8270_v46 = vld [vmem:[#allocation7 + $0x66c] ss:$20 sps:$4 sm:$0xff]  }
  0xd8   :  { %2672 = vmatprep.subr.bf16.mxu0 %v8168_v33  ;;  %v8255_v33 = vld [vmem:[#allocation7 + $0xfc] ss:$20 sps:$4 sm:$0xff]   ;;  %v8300_v4 = vld [vmem:[#allocation7 + $0x734] ss:$20 sps:$4 sm:$0xff]   ;;  %vm6967_vm4 = vcmask 326656   ;;  %vm3760_vm5 = vcmask 1041408  }
  0xd9   :  { %v8268_v49 = vld [vmem:[#allocation7 + $0x668] ss:$20 sps:$4 sm:$0xff]   ;;  %s9599_s9 = smov 108   ;;  %vm3756_vm6 = vcmask 162816   ;;  %s9600_s14 = smov [#allocation20]  }
  0xda   :  { %2632 = vmatpush1.bf16.msra.mxu1 %v8170_v34  ;;  %v169_v34 = vld [vmem:[#allocation2 + $0x28] sm:$0xff]  ;;  %s6985_s4 = sshll.u32 %s9600_s14, 4  ;;  %s6986_s4 = int_to_ptr.vmem [resolvable:$true] %s6985_s4 }
  0xdb   :  { %2673 = vmatpush1.bf16.msra.mxu0 %v8171_v35  ;;  %2633 = vmatprep.subr.bf16.mxu1 %v8172_v36  ;;  %v8250_v35 = vld [vmem:[#allocation7 + $0x5f0] ss:$20 sps:$4 sm:$0xff]   ;;  %v9808_v36 = vpack.c.bf16 %v169_v34, %v169_v34  ;;  %s9520_s13 = scalar_lea.vmem %s6986_s4, 128  ;;  %p9525_p11 = scmp.lt.s32.totalorder %s6986_s4, %s6986_s4 }
  0xdc   :  { %2674 = vmatprep.subr.bf16.mxu0 %v8174_v37  ;;  %v8253_v37 = vld [vmem:[#allocation7 + $0xf8] ss:$20 sps:$4 sm:$0xff]   ;;  %p9521_p10 = scmp.ne.s32.totalorder %s6986_s4, %s9520_s13  ;;  %p9526_p12 = scmp.lt.s32.totalorder %s9520_s13, %s9520_s13 }
  0xdd   :  { %v8336_v34 = vld [vmem:[#allocation7 + $0x824] ss:$20 sps:$4 sm:$0xff]  }
  0xde   :  { %2634 = vmatpush1.bf16.msra.mxu1 %v8176_v38  ;;  %v8258_v38 = vld [vmem:[#allocation7 + $0x61c] ss:$20 sps:$4 sm:$0xff]   ;;  %p9527_p13 = por %p9526_p12, %p9525_p11 }
  0xdf   :  { %2675 = vmatpush1.bf16.msra.mxu0 %v8177_v39  ;;  %2635 = vmatprep.subr.bf16.mxu1 %v8178_v40  ;;  %v8261_v39 = vld [vmem:[#allocation7 + $0x124] ss:$20 sps:$4 sm:$0xff]  }
  0xe0   :  { %2676 = vmatprep.subr.bf16.mxu0 %v8180_v41  ;;  %v8256_v40 = vld [vmem:[#allocation7 + $0x618] ss:$20 sps:$4 sm:$0xff]   ;;  %v8259_v41 = vld [vmem:[#allocation7 + $0x120] ss:$20 sps:$4 sm:$0xff]   ;;  %p9528_p0 = pnand %p9527_p13, %p9521_p10 }
  0xe2   :  { %2636 = vmatpush1.bf16.msra.mxu1 %v8182_v42  ;;  %v8264_v42 = vld [vmem:[#allocation7 + $0x644] ss:$20 sps:$4 sm:$0xff]  }
  0xe3   :  { %2677 = vmatpush1.bf16.msra.mxu0 %v8183_v43  ;;  %2637 = vmatprep.subr.bf16.mxu1 %v8184_v44  ;;  %v8267_v43 = vld [vmem:[#allocation7 + $0x14c] ss:$20 sps:$4 sm:$0xff]  }
  0xe4   :  { %2678 = vmatprep.subr.bf16.mxu0 %v8186_v45  ;;  %v8262_v44 = vld [vmem:[#allocation7 + $0x640] ss:$20 sps:$4 sm:$0xff]   ;;  %v8265_v45 = vld [vmem:[#allocation7 + $0x148] ss:$20 sps:$4 sm:$0xff]  }
  0xe6   :  { %2638 = vmatpush1.bf16.msra.mxu1 %v8188_v47  ;;  %v8273_v47 = vld [vmem:[#allocation7 + $0x174] ss:$20 sps:$4 sm:$0xff]  }
  0xe7   :  { %2679 = vmatpush1.bf16.msra.mxu0 %v8189_v50  ;;  %2639 = vmatprep.subr.bf16.mxu1 %v8190_v51  ;;  %v8271_v50 = vld [vmem:[#allocation7 + $0x170] ss:$20 sps:$4 sm:$0xff]   ;;  %v8276_v51 = vld [vmem:[#allocation7 + $0x694] ss:$20 sps:$4 sm:$0xff]  }
  0xe8   :  { %2680 = vmatprep.subr.bf16.mxu0 %v8192_v53  ;;  %v8279_v53 = vld [vmem:[#allocation7 + $0x19c] ss:$20 sps:$4 sm:$0xff]  }
  0xea   :  { %2640 = vmatpush1.bf16.msra.mxu1 %v8194_v54  ;;  %v8274_v54 = vld [vmem:[#allocation7 + $0x690] ss:$20 sps:$4 sm:$0xff]  }
  0xeb   :  { %2681 = vmatpush1.bf16.msra.mxu0 %v8195_v55  ;;  %2641 = vmatprep.subr.bf16.mxu1 %v8196_v56  ;;  %v8277_v55 = vld [vmem:[#allocation7 + $0x198] ss:$20 sps:$4 sm:$0xff]   ;;  %v8282_v56 = vld [vmem:[#allocation7 + $0x6bc] ss:$20 sps:$4 sm:$0xff]  }
  0xec   :  { %2682 = vmatprep.subr.bf16.mxu0 %v8198_v57  ;;  %v8285_v57 = vld [vmem:[#allocation7 + $0x1c4] ss:$20 sps:$4 sm:$0xff]  }
  0xee   :  { %2642 = vmatpush1.bf16.msra.mxu1 %v8200_v58  ;;  %v8280_v58 = vld [vmem:[#allocation7 + $0x6b8] ss:$20 sps:$4 sm:$0xff]  }
  0xef   :  { %2683 = vmatpush1.bf16.msra.mxu0 %v8201_v59  ;;  %2643 = vmatprep.subr.bf16.mxu1 %v8202_v60  ;;  %v8283_v59 = vld [vmem:[#allocation7 + $0x1c0] ss:$20 sps:$4 sm:$0xff]   ;;  %v8288_v60 = vld [vmem:[#allocation7 + $0x6e4] ss:$20 sps:$4 sm:$0xff]  }
  0xf0   :  { %2684 = vmatprep.subr.bf16.mxu0 %v8204_v61  ;;  %v8291_v61 = vld [vmem:[#allocation7 + $0x1ec] ss:$20 sps:$4 sm:$0xff]  }
  0xf2   :  { %2644 = vmatpush1.bf16.msra.mxu1 %v8206_v62  ;;  %v8286_v62 = vld [vmem:[#allocation7 + $0x6e0] ss:$20 sps:$4 sm:$0xff]  }
  0xf3   :  { %2685 = vmatpush1.bf16.msra.mxu0 %v8207_v63  ;;  %2645 = vmatprep.subr.bf16.mxu1 %v8208_v0  ;;  %v8289_v63 = vld [vmem:[#allocation7 + $0x1e8] ss:$20 sps:$4 sm:$0xff]   ;;  %v8294_v0 = vld [vmem:[#allocation7 + $0x70c] ss:$20 sps:$4 sm:$0xff]  }
  0xf4   :  { %2686 = vmatprep.subr.bf16.mxu0 %v8210_v1  ;;  %v8297_v1 = vld [vmem:[#allocation7 + $0x214] ss:$20 sps:$4 sm:$0xff]  }
  0xf6   :  { %2646 = vmatpush1.bf16.msra.mxu1 %v8212_v2  ;;  %v8292_v2 = vld [vmem:[#allocation7 + $0x708] ss:$20 sps:$4 sm:$0xff]  }
  0xf7   :  { %2687 = vmatpush1.bf16.msra.mxu0 %v8213_v3  ;;  %2820 = vmatprep.subr.bf16.mxu1 %v8219_v7  ;;  %v8295_v3 = vld [vmem:[#allocation7 + $0x210] ss:$20 sps:$4 sm:$0xff]   ;;  %v8301_v7 = vld [vmem:[#allocation7 + $0x238] ss:$20 sps:$4 sm:$0xff]  }
  0xf8   :  { %2697 = vmatprep.subr.bf16.mxu0 %v8216_v5  ;;  %v8303_v5 = vld [vmem:[#allocation7 + $0x23c] ss:$20 sps:$4 sm:$0xff]  }
  0xf9   :  { %2648 = vmatmul.mubr.bf16.vlgmr.msra.gmra.mrb[0].mxu1 %v9801_v8 }
  0xfa   :  { %2689 = vmatmul.mubr.bf16.vlgmr.msra.gmra.mrb[0].mxu0 %v9803_v11  ;;  %2821 = vmatpush1.bf16.msra.mxu1 %v8217_v10  ;;  %v8309_v10 = vld [vmem:[#allocation7 + $0x264] ss:$20 sps:$4 sm:$0xff]  }
  0xfb   :  { %2698 = vmatpush1.bf16.msra.mxu0 %v8214_v9  ;;  %2822 = vmatprep.subr.bf16.mxu1 %v8225_v13  ;;  %v8306_v9 = vld [vmem:[#allocation7 + $0x75c] ss:$20 sps:$4 sm:$0xff]   ;;  %v8307_v13 = vld [vmem:[#allocation7 + $0x260] ss:$20 sps:$4 sm:$0xff]  }
  0xfc   :  { %2699 = vmatprep.subr.bf16.mxu0 %v8222_v12  ;;  %2852 = vmatprep.mubr.bf16.mxu1 %v9795_v48  ;;  %v8304_v12 = vld [vmem:[#allocation7 + $0x758] ss:$20 sps:$4 sm:$0xff]  }
  0xfd   :  { %2729 = vmatprep.mubr.bf16.mxu0 %v9808_v36 }
  0xfe   :  { %2823 = vmatpush1.bf16.msra.mxu1 %v8223_v15  ;;  %v8312_v15 = vld [vmem:[#allocation7 + $0x784] ss:$20 sps:$4 sm:$0xff]  }
  0xff   :  { %2700 = vmatpush1.bf16.msra.mxu0 %v8220_v14  ;;  %2824 = vmatprep.subr.bf16.mxu1 %v8231_v17  ;;  %v168_v14 = vld [vmem:[#allocation2 + $0x20] sm:$0xff] }
 0x100   :  { %2701 = vmatprep.subr.bf16.mxu0 %v8228_v16  ;;  %v8315_v16 = vld [vmem:[#allocation7 + $0x28c] ss:$20 sps:$4 sm:$0xff]   ;;  %v9811_v17 = vpack.c.bf16 %v168_v14, %v168_v14  ;;  %v8391_v14 = vld [vmem:[#allocation7 + $0x490] ss:$20 sps:$4 sm:$0xff]  }
 0x102   :  { %2825 = vmatpush1.bf16.msra.mxu1 %v8229_v19  ;;  %v8313_v19 = vld [vmem:[#allocation7 + $0x288] ss:$20 sps:$4 sm:$0xff]  }
 0x103   :  { %2702 = vmatpush1.bf16.msra.mxu0 %v8226_v18  ;;  %2826 = vmatprep.subr.bf16.mxu1 %v8237_v21  ;;  %v8310_v18 = vld [vmem:[#allocation7 + $0x780] ss:$20 sps:$4 sm:$0xff]  }
 0x104   :  { %2703 = vmatprep.subr.bf16.mxu0 %v8234_v20  ;;  %v8318_v20 = vld [vmem:[#allocation7 + $0x7ac] ss:$20 sps:$4 sm:$0xff]   ;;  %v8321_v21 = vld [vmem:[#allocation7 + $0x2b4] ss:$20 sps:$4 sm:$0xff]  }
 0x106   :  { %2827 = vmatpush1.bf16.msra.mxu1 %v8235_v23  ;;  %v8316_v23 = vld [vmem:[#allocation7 + $0x7a8] ss:$20 sps:$4 sm:$0xff]  }
 0x107   :  { %2704 = vmatpush1.bf16.msra.mxu0 %v8232_v22  ;;  %2828 = vmatprep.subr.bf16.mxu1 %v8243_v25  ;;  %v171_v22 = vld [vmem:[#allocation2 + $0x38] sm:$0xff] }
 0x108   :  { %2705 = vmatprep.subr.bf16.mxu0 %v8240_v24  ;;  %v9815_v24 = vpack.c.bf16 %v171_v22, %v171_v22  ;;  %v8319_v25 = vld [vmem:[#allocation7 + $0x2b0] ss:$20 sps:$4 sm:$0xff]   ;;  %v8400_v22 = vld [vmem:[#allocation7 + $0x9d8] ss:$20 sps:$4 sm:$0xff]  }
 0x10a   :  { %2829 = vmatpush1.bf16.msra.mxu1 %v8241_v27  ;;  %v8327_v27 = vld [vmem:[#allocation7 + $0x2dc] ss:$20 sps:$4 sm:$0xff]  }
 0x10b   :  { %2706 = vmatpush1.bf16.msra.mxu0 %v8238_v26  ;;  %2830 = vmatprep.subr.bf16.mxu1 %v8249_v29  ;;  %v8324_v26 = vld [vmem:[#allocation7 + $0x7d4] ss:$20 sps:$4 sm:$0xff]   ;;  %v8325_v29 = vld [vmem:[#allocation7 + $0x2d8] ss:$20 sps:$4 sm:$0xff]  }
 0x10c   :  { %2707 = vmatprep.subr.bf16.mxu0 %v8246_v28  ;;  %v8322_v28 = vld [vmem:[#allocation7 + $0x7d0] ss:$20 sps:$4 sm:$0xff]  }
 0x10e   :  { %2831 = vmatpush1.bf16.msra.mxu1 %v8247_v31  ;;  %v8333_v31 = vld [vmem:[#allocation7 + $0x304] ss:$20 sps:$4 sm:$0xff]  }
 0x10f   :  { %2708 = vmatpush1.bf16.msra.mxu0 %v8244_v30  ;;  %2832 = vmatprep.subr.bf16.mxu1 %v8255_v33  ;;  %v8330_v30 = vld [vmem:[#allocation7 + $0x7fc] ss:$20 sps:$4 sm:$0xff]   ;;  %v8331_v33 = vld [vmem:[#allocation7 + $0x300] ss:$20 sps:$4 sm:$0xff]  }
 0x110   :  { %2709 = vmatprep.subr.bf16.mxu0 %v8252_v32  ;;  %v8328_v32 = vld [vmem:[#allocation7 + $0x7f8] ss:$20 sps:$4 sm:$0xff]  }
 0x112   :  { %2833 = vmatpush1.bf16.msra.mxu1 %v8253_v37  ;;  %v8334_v37 = vld [vmem:[#allocation7 + $0x820] ss:$20 sps:$4 sm:$0xff]  }
 0x113   :  { %2710 = vmatpush1.bf16.msra.mxu0 %v8250_v35  ;;  %2834 = vmatprep.subr.bf16.mxu1 %v8261_v39  ;;  %v8339_v35 = vld [vmem:[#allocation7 + $0x32c] ss:$20 sps:$4 sm:$0xff]  }
 0x114   :  { %2711 = vmatprep.subr.bf16.mxu0 %v8258_v38  ;;  %v8337_v38 = vld [vmem:[#allocation7 + $0x328] ss:$20 sps:$4 sm:$0xff]   ;;  %v8342_v39 = vld [vmem:[#allocation7 + $0x84c] ss:$20 sps:$4 sm:$0xff]  }
 0x116   :  { %2835 = vmatpush1.bf16.msra.mxu1 %v8259_v41  ;;  %v8340_v41 = vld [vmem:[#allocation7 + $0x848] ss:$20 sps:$4 sm:$0xff]  }
 0x117   :  { %2712 = vmatpush1.bf16.msra.mxu0 %v8256_v40  ;;  %2836 = vmatprep.subr.bf16.mxu1 %v8267_v43  ;;  %v8345_v40 = vld [vmem:[#allocation7 + $0x354] ss:$20 sps:$4 sm:$0xff]  }
 0x118   :  { %2713 = vmatprep.subr.bf16.mxu0 %v8264_v42  ;;  %v8343_v42 = vld [vmem:[#allocation7 + $0x350] ss:$20 sps:$4 sm:$0xff]   ;;  %v8348_v43 = vld [vmem:[#allocation7 + $0x874] ss:$20 sps:$4 sm:$0xff]  }
 0x11a   :  { %2837 = vmatpush1.bf16.msra.mxu1 %v8265_v45  ;;  %v8346_v45 = vld [vmem:[#allocation7 + $0x870] ss:$20 sps:$4 sm:$0xff]  }
 0x11b   :  { %2714 = vmatpush1.bf16.msra.mxu0 %v8262_v44  ;;  %2838 = vmatprep.subr.bf16.mxu1 %v8273_v47  ;;  %v8351_v44 = vld [vmem:[#allocation7 + $0x37c] ss:$20 sps:$4 sm:$0xff]  }
 0x11c   :  { %2715 = vmatprep.subr.bf16.mxu0 %v8270_v46  ;;  %v8349_v46 = vld [vmem:[#allocation7 + $0x378] ss:$20 sps:$4 sm:$0xff]   ;;  %v8354_v47 = vld [vmem:[#allocation7 + $0x89c] ss:$20 sps:$4 sm:$0xff]  }
 0x11e   :  { %2839 = vmatpush1.bf16.msra.mxu1 %v8271_v50  ;;  %v8352_v50 = vld [vmem:[#allocation7 + $0x898] ss:$20 sps:$4 sm:$0xff]  }
 0x11f   :  { %2716 = vmatpush1.bf16.msra.mxu0 %v8268_v49  ;;  %2840 = vmatprep.subr.bf16.mxu1 %v8279_v53  ;;  %v8357_v49 = vld [vmem:[#allocation7 + $0x3a4] ss:$20 sps:$4 sm:$0xff]  }
 0x120   :  { %2717 = vmatprep.subr.bf16.mxu0 %v8276_v51  ;;  %v8355_v51 = vld [vmem:[#allocation7 + $0x3a0] ss:$20 sps:$4 sm:$0xff]   ;;  %v8360_v53 = vld [vmem:[#allocation7 + $0x8c4] ss:$20 sps:$4 sm:$0xff]  }
 0x122   :  { %2841 = vmatpush1.bf16.msra.mxu1 %v8277_v55  ;;  %v8358_v55 = vld [vmem:[#allocation7 + $0x8c0] ss:$20 sps:$4 sm:$0xff]  }
 0x123   :  { %2718 = vmatpush1.bf16.msra.mxu0 %v8274_v54  ;;  %2842 = vmatprep.subr.bf16.mxu1 %v8285_v57  ;;  %v8363_v54 = vld [vmem:[#allocation7 + $0x3cc] ss:$20 sps:$4 sm:$0xff]  }
 0x124   :  { %2719 = vmatprep.subr.bf16.mxu0 %v8282_v56  ;;  %v8361_v56 = vld [vmem:[#allocation7 + $0x3c8] ss:$20 sps:$4 sm:$0xff]   ;;  %v8366_v57 = vld [vmem:[#allocation7 + $0x8ec] ss:$20 sps:$4 sm:$0xff]  }
 0x126   :  { %2843 = vmatpush1.bf16.msra.mxu1 %v8283_v59  ;;  %v8364_v59 = vld [vmem:[#allocation7 + $0x8e8] ss:$20 sps:$4 sm:$0xff]  }
 0x127   :  { %2720 = vmatpush1.bf16.msra.mxu0 %v8280_v58  ;;  %2844 = vmatprep.subr.bf16.mxu1 %v8291_v61  ;;  %v8369_v58 = vld [vmem:[#allocation7 + $0x3f4] ss:$20 sps:$4 sm:$0xff]  }
 0x128   :  { %2721 = vmatprep.subr.bf16.mxu0 %v8288_v60  ;;  %v8367_v60 = vld [vmem:[#allocation7 + $0x3f0] ss:$20 sps:$4 sm:$0xff]   ;;  %v8372_v61 = vld [vmem:[#allocation7 + $0x914] ss:$20 sps:$4 sm:$0xff]  }
 0x12a   :  { %2845 = vmatpush1.bf16.msra.mxu1 %v8289_v63  ;;  %v8370_v63 = vld [vmem:[#allocation7 + $0x910] ss:$20 sps:$4 sm:$0xff]  }
 0x12b   :  { %2722 = vmatpush1.bf16.msra.mxu0 %v8286_v62  ;;  %2846 = vmatprep.subr.bf16.mxu1 %v8297_v1  ;;  %v8375_v62 = vld [vmem:[#allocation7 + $0x41c] ss:$20 sps:$4 sm:$0xff]  }
 0x12c   :  { %2723 = vmatprep.subr.bf16.mxu0 %v8294_v0  ;;  %v8373_v0 = vld [vmem:[#allocation7 + $0x418] ss:$20 sps:$4 sm:$0xff]   ;;  %v8378_v1 = vld [vmem:[#allocation7 + $0x93c] ss:$20 sps:$4 sm:$0xff]  }
 0x12e   :  { %2847 = vmatpush1.bf16.msra.mxu1 %v8295_v3  ;;  %v8376_v3 = vld [vmem:[#allocation7 + $0x938] ss:$20 sps:$4 sm:$0xff]  }
 0x12f   :  { %2724 = vmatpush1.bf16.msra.mxu0 %v8292_v2  ;;  %2848 = vmatprep.subr.bf16.mxu1 %v8303_v5  ;;  %v8381_v2 = vld [vmem:[#allocation7 + $0x444] ss:$20 sps:$4 sm:$0xff]  }
 0x130   :  { %2725 = vmatprep.subr.bf16.mxu0 %v8300_v4  ;;  %v8379_v4 = vld [vmem:[#allocation7 + $0x440] ss:$20 sps:$4 sm:$0xff]   ;;  %v8384_v5 = vld [vmem:[#allocation7 + $0x964] ss:$20 sps:$4 sm:$0xff]  }
 0x132   :  { %2849 = vmatpush1.bf16.msra.mxu1 %v8301_v7  ;;  %v8382_v7 = vld [vmem:[#allocation7 + $0x960] ss:$20 sps:$4 sm:$0xff]  }
 0x133   :  { %2726 = vmatpush1.bf16.msra.mxu0 %v8298_v6  ;;  %2850 = vmatprep.subr.bf16.mxu1 %v8309_v10  ;;  %v8387_v6 = vld [vmem:[#allocation7 + $0x46c] ss:$20 sps:$4 sm:$0xff]  }
 0x134   :  { %2727 = vmatprep.subr.bf16.mxu0 %v8306_v9  ;;  %v8385_v9 = vld [vmem:[#allocation7 + $0x468] ss:$20 sps:$4 sm:$0xff]   ;;  %v8390_v10 = vld [vmem:[#allocation7 + $0x98c] ss:$20 sps:$4 sm:$0xff]  }
 0x136   :  { %2851 = vmatpush1.bf16.msra.mxu1 %v8307_v13  ;;  %v8388_v13 = vld [vmem:[#allocation7 + $0x988] ss:$20 sps:$4 sm:$0xff]  }
 0x137   :  { %2728 = vmatpush1.bf16.msra.mxu0 %v8304_v12  ;;  %2861 = vmatprep.subr.bf16.mxu1 %v8315_v16  ;;  %v8393_v12 = vld [vmem:[#allocation7 + $0x494] ss:$20 sps:$4 sm:$0xff]   ;;  %v8399_v16 = vld [vmem:[#allocation7 + $0x4bc] ss:$20 sps:$4 sm:$0xff]  }
 0x138   :  { %2738 = vmatprep.subr.bf16.mxu0 %v8312_v15  ;;  %v8396_v15 = vld [vmem:[#allocation7 + $0x9b4] ss:$20 sps:$4 sm:$0xff]  }
 0x139   :  { %2853 = vmatmul.mubr.bf16.vlgmr.msra.gmra.mrb[4].mxu1 %v9801_v8 }
 0x13a   :  { %2730 = vmatmul.mubr.bf16.vlgmr.msra.gmra.mrb[0].mxu0 %v9811_v17  ;;  %2862 = vmatpush1.bf16.msra.mxu1 %v8313_v19  ;;  %v8397_v19 = vld [vmem:[#allocation7 + $0x4b8] ss:$20 sps:$4 sm:$0xff]  }
 0x13b   :  { %2739 = vmatpush1.bf16.msra.mxu0 %v8310_v18  ;;  %2863 = vmatprep.subr.bf16.mxu1 %v8321_v21  ;;  %v8394_v18 = vld [vmem:[#allocation7 + $0x9b0] ss:$20 sps:$4 sm:$0xff]  }
 0x13c   :  { %2740 = vmatprep.subr.bf16.mxu0 %v8318_v20  ;;  %2770 = vmatprep.mubr.bf16.mxu0 %v9815_v24  ;;  %v8402_v20 = vld [vmem:[#allocation7 + $0x9dc] ss:$20 sps:$4 sm:$0xff]   ;;  %v8405_v21 = vld [vmem:[#allocation7 + $0x4e4] ss:$20 sps:$4 sm:$0xff]  }
 0x13d   :  { %2893 = vmatprep.mubr.bf16.mxu1 %v9797_v52 }
 0x13e   :  { %2864 = vmatpush1.bf16.msra.mxu1 %v8319_v25  ;;  %v8408_v25 = vld [vmem:[#allocation7 + $0xa04] ss:$20 sps:$4 sm:$0xff]  }
 0x13f   :  { %2741 = vmatpush1.bf16.msra.mxu0 %v8316_v23  ;;  %2865 = vmatprep.subr.bf16.mxu1 %v8327_v27  ;;  %v8403_v23 = vld [vmem:[#allocation7 + $0x4e0] ss:$20 sps:$4 sm:$0xff]   ;;  %v170_v27 = vld [vmem:[#allocation2 + $0x30] sm:$0xff] }
 0x140   :  { %2742 = vmatprep.subr.bf16.mxu0 %v8324_v26  ;;  %v8411_v26 = vld [vmem:[#allocation7 + $0x50c] ss:$20 sps:$4 sm:$0xff]  }
 0x142   :  { %2866 = vmatpush1.bf16.msra.mxu1 %v8325_v29  ;;  %v8406_v29 = vld [vmem:[#allocation7 + $0xa00] ss:$20 sps:$4 sm:$0xff]  }
 0x143   :  { %2743 = vmatpush1.bf16.msra.mxu0 %v8322_v28  ;;  %2867 = vmatprep.subr.bf16.mxu1 %v8333_v31  ;;  %v173_v28 = vld [vmem:[#allocation2 + $0x48] sm:$0xff]  ;;  %v9819_v31 = vpack.c.bf16 %v170_v27, %v170_v27 }
 0x144   :  { %2744 = vmatprep.subr.bf16.mxu0 %v8330_v30  ;;  %v8409_v30 = vld [vmem:[#allocation7 + $0x508] ss:$20 sps:$4 sm:$0xff]   ;;  %v8548_v27 = vld [vmem:[#allocation7 + $0x1a0] ss:$20 sps:$4 sm:$0xff]  }
 0x146   :  { %2868 = vmatpush1.bf16.msra.mxu1 %v8331_v33  ;;  %v8417_v33 = vld [vmem:[#allocation7 + $0x534] ss:$20 sps:$4 sm:$0xff]  }
 0x147   :  { %2745 = vmatpush1.bf16.msra.mxu0 %v8328_v32  ;;  %2869 = vmatprep.subr.bf16.mxu1 %v8339_v35  ;;  %v8414_v32 = vld [vmem:[#allocation7 + $0xa2c] ss:$20 sps:$4 sm:$0xff]   ;;  %v8412_v35 = vld [vmem:[#allocation7 + $0xa28] ss:$20 sps:$4 sm:$0xff]  }
 0x148   :  { %2746 = vmatprep.subr.bf16.mxu0 %v8336_v34  ;;  %v9821_v34 = vpack.c.bf16 %v173_v28, %v173_v28  ;;  %v8478_v28 = vld [vmem:[#allocation7 + $0x710] ss:$20 sps:$4 sm:$0xff]  }
 0x14a   :  { %2870 = vmatpush1.bf16.msra.mxu1 %v8337_v38  ;;  %v8420_v38 = vld [vmem:[#allocation7 + $0xa54] ss:$20 sps:$4 sm:$0xff]  }
 0x14b   :  { %2747 = vmatpush1.bf16.msra.mxu0 %v8334_v37  ;;  %2871 = vmatprep.subr.bf16.mxu1 %v8345_v40  ;;  %v8415_v37 = vld [vmem:[#allocation7 + $0x530] ss:$20 sps:$4 sm:$0xff]  }
 0x14c   :  { %2748 = vmatprep.subr.bf16.mxu0 %v8342_v39  ;;  %v8423_v39 = vld [vmem:[#allocation7 + $0x55c] ss:$20 sps:$4 sm:$0xff]  }
 0x14d   :  { %v8418_v40 = vld [vmem:[#allocation7 + $0xa50] ss:$20 sps:$4 sm:$0xff]  }
 0x14e   :  { %2872 = vmatpush1.bf16.msra.mxu1 %v8343_v42  ;;  %v8426_v42 = vld [vmem:[#allocation7 + $0xa7c] ss:$20 sps:$4 sm:$0xff]  }
 0x14f   :  { %2749 = vmatpush1.bf16.msra.mxu0 %v8340_v41  ;;  %2873 = vmatprep.subr.bf16.mxu1 %v8351_v44  ;;  %v8421_v41 = vld [vmem:[#allocation7 + $0x558] ss:$20 sps:$4 sm:$0xff]  }
 0x150   :  { %2750 = vmatprep.subr.bf16.mxu0 %v8348_v43  ;;  %v8429_v43 = vld [vmem:[#allocation7 + $0x584] ss:$20 sps:$4 sm:$0xff]  }
 0x151   :  { %v8424_v44 = vld [vmem:[#allocation7 + $0xa78] ss:$20 sps:$4 sm:$0xff]  }
 0x152   :  { %2874 = vmatpush1.bf16.msra.mxu1 %v8349_v46  ;;  %v8432_v46 = vld [vmem:[#allocation7 + $0xaa4] ss:$20 sps:$4 sm:$0xff]  }
 0x153   :  { %2751 = vmatpush1.bf16.msra.mxu0 %v8346_v45  ;;  %2875 = vmatprep.subr.bf16.mxu1 %v8357_v49  ;;  %v8427_v45 = vld [vmem:[#allocation7 + $0x580] ss:$20 sps:$4 sm:$0xff]  }
 0x154   :  { %2752 = vmatprep.subr.bf16.mxu0 %v8354_v47  ;;  %v8435_v47 = vld [vmem:[#allocation7 + $0x5ac] ss:$20 sps:$4 sm:$0xff]  }
 0x155   :  { %v8430_v49 = vld [vmem:[#allocation7 + $0xaa0] ss:$20 sps:$4 sm:$0xff]  }
 0x156   :  { %2876 = vmatpush1.bf16.msra.mxu1 %v8355_v51  ;;  %v8438_v51 = vld [vmem:[#allocation7 + $0xacc] ss:$20 sps:$4 sm:$0xff]  }
 0x157   :  { %2753 = vmatpush1.bf16.msra.mxu0 %v8352_v50  ;;  %2877 = vmatprep.subr.bf16.mxu1 %v8363_v54  ;;  %v8433_v50 = vld [vmem:[#allocation7 + $0x5a8] ss:$20 sps:$4 sm:$0xff]  }
 0x158   :  { %2754 = vmatprep.subr.bf16.mxu0 %v8360_v53  ;;  %v8441_v53 = vld [vmem:[#allocation7 + $0x5d4] ss:$20 sps:$4 sm:$0xff]  }
 0x159   :  { %v8436_v54 = vld [vmem:[#allocation7 + $0xac8] ss:$20 sps:$4 sm:$0xff]  }
 0x15a   :  { %2878 = vmatpush1.bf16.msra.mxu1 %v8361_v56  ;;  %v8444_v56 = vld [vmem:[#allocation7 + $0xaf4] ss:$20 sps:$4 sm:$0xff]  }
 0x15b   :  { %2755 = vmatpush1.bf16.msra.mxu0 %v8358_v55  ;;  %2879 = vmatprep.subr.bf16.mxu1 %v8369_v58  ;;  %v8439_v55 = vld [vmem:[#allocation7 + $0x5d0] ss:$20 sps:$4 sm:$0xff]  }
 0x15c   :  { %2756 = vmatprep.subr.bf16.mxu0 %v8366_v57  ;;  %v8447_v57 = vld [vmem:[#allocation7 + $0x5fc] ss:$20 sps:$4 sm:$0xff]  }
 0x15d   :  { %v8442_v58 = vld [vmem:[#allocation7 + $0xaf0] ss:$20 sps:$4 sm:$0xff]  }
 0x15e   :  { %2880 = vmatpush1.bf16.msra.mxu1 %v8367_v60  ;;  %v8450_v60 = vld [vmem:[#allocation7 + $0xb1c] ss:$20 sps:$4 sm:$0xff]  }
 0x15f   :  { %2757 = vmatpush1.bf16.msra.mxu0 %v8364_v59  ;;  %2881 = vmatprep.subr.bf16.mxu1 %v8375_v62  ;;  %v8445_v59 = vld [vmem:[#allocation7 + $0x5f8] ss:$20 sps:$4 sm:$0xff]  }
 0x160   :  { %2758 = vmatprep.subr.bf16.mxu0 %v8372_v61  ;;  %v8453_v61 = vld [vmem:[#allocation7 + $0x624] ss:$20 sps:$4 sm:$0xff]  }
 0x161   :  { %v8448_v62 = vld [vmem:[#allocation7 + $0xb18] ss:$20 sps:$4 sm:$0xff]  }
 0x162   :  { %2882 = vmatpush1.bf16.msra.mxu1 %v8373_v0  ;;  %v8456_v0 = vld [vmem:[#allocation7 + $0xb44] ss:$20 sps:$4 sm:$0xff]  }
 0x163   :  { %2759 = vmatpush1.bf16.msra.mxu0 %v8370_v63  ;;  %2883 = vmatprep.subr.bf16.mxu1 %v8381_v2  ;;  %v8451_v63 = vld [vmem:[#allocation7 + $0x620] ss:$20 sps:$4 sm:$0xff]  }
 0x164   :  { %2760 = vmatprep.subr.bf16.mxu0 %v8378_v1  ;;  %v8459_v1 = vld [vmem:[#allocation7 + $0x64c] ss:$20 sps:$4 sm:$0xff]  }
 0x165   :  { %v8454_v2 = vld [vmem:[#allocation7 + $0xb40] ss:$20 sps:$4 sm:$0xff]  }
 0x166   :  { %2884 = vmatpush1.bf16.msra.mxu1 %v8379_v4  ;;  %v8462_v4 = vld [vmem:[#allocation7 + $0xb6c] ss:$20 sps:$4 sm:$0xff]  }
 0x167   :  { %2761 = vmatpush1.bf16.msra.mxu0 %v8376_v3  ;;  %2885 = vmatprep.subr.bf16.mxu1 %v8387_v6  ;;  %v8457_v3 = vld [vmem:[#allocation7 + $0x648] ss:$20 sps:$4 sm:$0xff]  }
 0x168   :  { %2762 = vmatprep.subr.bf16.mxu0 %v8384_v5  ;;  %v8465_v5 = vld [vmem:[#allocation7 + $0x674] ss:$20 sps:$4 sm:$0xff]  }
 0x169   :  { %v8460_v6 = vld [vmem:[#allocation7 + $0xb68] ss:$20 sps:$4 sm:$0xff]  }
 0x16a   :  { %2886 = vmatpush1.bf16.msra.mxu1 %v8385_v9  ;;  %v8468_v9 = vld [vmem:[#allocation7 + $0xb94] ss:$20 sps:$4 sm:$0xff]  }
 0x16b   :  { %2763 = vmatpush1.bf16.msra.mxu0 %v8382_v7  ;;  %2887 = vmatprep.subr.bf16.mxu1 %v8393_v12  ;;  %v8463_v7 = vld [vmem:[#allocation7 + $0x670] ss:$20 sps:$4 sm:$0xff]  }
 0x16c   :  { %2764 = vmatprep.subr.bf16.mxu0 %v8390_v10  ;;  %v8471_v10 = vld [vmem:[#allocation7 + $0x69c] ss:$20 sps:$4 sm:$0xff]  }
 0x16d   :  { %v8466_v12 = vld [vmem:[#allocation7 + $0xb90] ss:$20 sps:$4 sm:$0xff]  }
 0x16e   :  { %2888 = vmatpush1.bf16.msra.mxu1 %v8391_v14  ;;  %v172_v14 = vld [vmem:[#allocation2 + $0x40] sm:$0xff] }
 0x16f   :  { %2765 = vmatpush1.bf16.msra.mxu0 %v8388_v13  ;;  %2889 = vmatprep.subr.bf16.mxu1 %v8399_v16  ;;  %v8469_v13 = vld [vmem:[#allocation7 + $0x698] ss:$20 sps:$4 sm:$0xff]   ;;  %v8538_v16 = vld [vmem:[#allocation7 + $0x150] ss:$20 sps:$4 sm:$0xff]  }
 0x170   :  { %2766 = vmatprep.subr.bf16.mxu0 %v8396_v15  ;;  %v8474_v15 = vld [vmem:[#allocation7 + $0x6c4] ss:$20 sps:$4 sm:$0xff]  }
 0x172   :  { %2890 = vmatpush1.bf16.msra.mxu1 %v8397_v19  ;;  %v9828_v19 = vpack.c.bf16 %v172_v14, %v172_v14  ;;  %v8597_v14 = vld [vmem:[#allocation7 + $0x5b0] ss:$20 sps:$4 sm:$0xff]  }
 0x173   :  { %2767 = vmatpush1.bf16.msra.mxu0 %v8394_v18  ;;  %2891 = vmatprep.subr.bf16.mxu1 %v8405_v21  ;;  %v8472_v18 = vld [vmem:[#allocation7 + $0x6c0] ss:$20 sps:$4 sm:$0xff]   ;;  %v8539_v21 = vld [vmem:[#allocation7 + $0x10] ss:$20 sps:$4 sm:$0xff]  }
 0x174   :  { %2768 = vmatprep.subr.bf16.mxu0 %v8402_v20  ;;  %v8477_v20 = vld [vmem:[#allocation7 + $0x6ec] ss:$20 sps:$4 sm:$0xff]  }
 0x176   :  { %2892 = vmatpush1.bf16.msra.mxu1 %v8403_v23  ;;  %v8475_v23 = vld [vmem:[#allocation7 + $0x6e8] ss:$20 sps:$4 sm:$0xff]  }
 0x177   :  { %2769 = vmatpush1.bf16.msra.mxu0 %v8400_v22  ;;  %2902 = vmatprep.subr.bf16.mxu1 %v8411_v26  ;;  %v8543_v22 = vld [vmem:[#allocation7 + $0x178] ss:$20 sps:$4 sm:$0xff]  }
 0x178   :  { %2779 = vmatprep.subr.bf16.mxu0 %v8408_v25  ;;  %v8480_v25 = vld [vmem:[#allocation7 + $0x714] ss:$20 sps:$4 sm:$0xff]   ;;  %v8544_v26 = vld [vmem:[#allocation7 + $0x38] ss:$20 sps:$4 sm:$0xff]  }
 0x179   :  { %2894 = vmatmul.mubr.bf16.vlgmr.msra.gmra.mrb[4].mxu1 %v9803_v11 }
 0x17a   :  { %2771 = vmatmul.mubr.bf16.vlgmr.msra.gmra.mrb[0].mxu0 %v9819_v31  ;;  %2903 = vmatpush1.bf16.msra.mxu1 %v8409_v30  ;;  %v8549_v30 = vld [vmem:[#allocation7 + $0x60] ss:$20 sps:$4 sm:$0xff]  }
 0x17b   :  { %2780 = vmatpush1.bf16.msra.mxu0 %v8406_v29  ;;  %2904 = vmatprep.subr.bf16.mxu1 %v8417_v33  ;;  %v8483_v29 = vld [vmem:[#allocation7 + $0x73c] ss:$20 sps:$4 sm:$0xff]   ;;  %v8481_v33 = vld [vmem:[#allocation7 + $0x738] ss:$20 sps:$4 sm:$0xff]  }
 0x17c   :  { %2781 = vmatprep.subr.bf16.mxu0 %v8414_v32  ;;  %7378 = vmatprep.mubr.msk.bf16.mxu0 %vm2611_vm0, %v9821_v34  ;;  %v8553_v32 = vld [vmem:[#allocation7 + $0x1c8] ss:$20 sps:$4 sm:$0xff]  }
 0x17d   :  { %2934 = vmatprep.mubr.bf16.mxu1 %v9808_v36 }
 0x17e   :  { %2905 = vmatpush1.bf16.msra.mxu1 %v8415_v37  ;;  %v8554_v37 = vld [vmem:[#allocation7 + $0x88] ss:$20 sps:$4 sm:$0xff]  }
 0x17f   :  { %2782 = vmatpush1.bf16.msra.mxu0 %v8412_v35  ;;  %2906 = vmatprep.subr.bf16.mxu1 %v8423_v39  ;;  %v8486_v35 = vld [vmem:[#allocation7 + $0x764] ss:$20 sps:$4 sm:$0xff]   ;;  %v8484_v39 = vld [vmem:[#allocation7 + $0x760] ss:$20 sps:$4 sm:$0xff]  }
 0x180   :  { %2783 = vmatprep.subr.bf16.mxu0 %v8420_v38  ;;  %v8558_v38 = vld [vmem:[#allocation7 + $0x1f0] ss:$20 sps:$4 sm:$0xff]  }
 0x182   :  { %2907 = vmatpush1.bf16.msra.mxu1 %v8421_v41  ;;  %v8563_v41 = vld [vmem:[#allocation7 + $0x218] ss:$20 sps:$4 sm:$0xff]  }
 0x183   :  { %2784 = vmatpush1.bf16.msra.mxu0 %v8418_v40  ;;  %2908 = vmatprep.subr.bf16.mxu1 %v8429_v43  ;;  %v8489_v40 = vld [vmem:[#allocation7 + $0x78c] ss:$20 sps:$4 sm:$0xff]   ;;  %v8492_v43 = vld [vmem:[#allocation7 + $0x7b4] ss:$20 sps:$4 sm:$0xff]  }
 0x184   :  { %2785 = vmatprep.subr.bf16.mxu0 %v8426_v42  ;;  %v8487_v42 = vld [vmem:[#allocation7 + $0x788] ss:$20 sps:$4 sm:$0xff]  }
 0x186   :  { %2909 = vmatpush1.bf16.msra.mxu1 %v8427_v45  ;;  %v8568_v45 = vld [vmem:[#allocation7 + $0x240] ss:$20 sps:$4 sm:$0xff]  }
 0x187   :  { %2786 = vmatpush1.bf16.msra.mxu0 %v8424_v44  ;;  %2910 = vmatprep.subr.bf16.mxu1 %v8435_v47  ;;  %v8564_v44 = vld [vmem:[#allocation7 + $0xd8] ss:$20 sps:$4 sm:$0xff]   ;;  %v8495_v47 = vld [vmem:[#allocation7 + $0x7dc] ss:$20 sps:$4 sm:$0xff]  }
 0x188   :  { %2787 = vmatprep.subr.bf16.mxu0 %v8432_v46  ;;  %v8490_v46 = vld [vmem:[#allocation7 + $0x7b0] ss:$20 sps:$4 sm:$0xff]  }
 0x18a   :  { %2911 = vmatpush1.bf16.msra.mxu1 %v8433_v50  ;;  %v8573_v50 = vld [vmem:[#allocation7 + $0x268] ss:$20 sps:$4 sm:$0xff]  }
 0x18b   :  { %2788 = vmatpush1.bf16.msra.mxu0 %v8430_v49  ;;  %2912 = vmatprep.subr.bf16.mxu1 %v8441_v53  ;;  %v8569_v49 = vld [vmem:[#allocation7 + $0x100] ss:$20 sps:$4 sm:$0xff]   ;;  %v8498_v53 = vld [vmem:[#allocation7 + $0x804] ss:$20 sps:$4 sm:$0xff]  }
 0x18c   :  { %2789 = vmatprep.subr.bf16.mxu0 %v8438_v51  ;;  %v8493_v51 = vld [vmem:[#allocation7 + $0x7d8] ss:$20 sps:$4 sm:$0xff]  }
 0x18e   :  { %2913 = vmatpush1.bf16.msra.mxu1 %v8439_v55  ;;  %v8578_v55 = vld [vmem:[#allocation7 + $0x650] ss:$20 sps:$4 sm:$0xff]  }
 0x18f   :  { %2790 = vmatpush1.bf16.msra.mxu0 %v8436_v54  ;;  %2914 = vmatprep.subr.bf16.mxu1 %v8447_v57  ;;  %v8574_v54 = vld [vmem:[#allocation7 + $0x128] ss:$20 sps:$4 sm:$0xff]   ;;  %v8501_v57 = vld [vmem:[#allocation7 + $0x82c] ss:$20 sps:$4 sm:$0xff]  }
 0x190   :  { %2791 = vmatprep.subr.bf16.mxu0 %v8444_v56  ;;  %v8496_v56 = vld [vmem:[#allocation7 + $0x800] ss:$20 sps:$4 sm:$0xff]  }
 0x192   :  { %2915 = vmatpush1.bf16.msra.mxu1 %v8445_v59  ;;  %v8499_v59 = vld [vmem:[#allocation7 + $0x828] ss:$20 sps:$4 sm:$0xff]  }
 0x193   :  { %2792 = vmatpush1.bf16.msra.mxu0 %v8442_v58  ;;  %2916 = vmatprep.subr.bf16.mxu1 %v8453_v61  ;;  %v8579_v58 = vld [vmem:[#allocation7 + $0x510] ss:$20 sps:$4 sm:$0xff]   ;;  %v8504_v61 = vld [vmem:[#allocation7 + $0x854] ss:$20 sps:$4 sm:$0xff]  }
 0x194   :  { %2793 = vmatprep.subr.bf16.mxu0 %v8450_v60  ;;  %v8583_v60 = vld [vmem:[#allocation7 + $0x678] ss:$20 sps:$4 sm:$0xff]  }
 0x196   :  { %2917 = vmatpush1.bf16.msra.mxu1 %v8451_v63  ;;  %v8588_v63 = vld [vmem:[#allocation7 + $0x6a0] ss:$20 sps:$4 sm:$0xff]  }
 0x197   :  { %2794 = vmatpush1.bf16.msra.mxu0 %v8448_v62  ;;  %2918 = vmatprep.subr.bf16.mxu1 %v8459_v1  ;;  %v8584_v62 = vld [vmem:[#allocation7 + $0x538] ss:$20 sps:$4 sm:$0xff]   ;;  %v8507_v1 = vld [vmem:[#allocation7 + $0x87c] ss:$20 sps:$4 sm:$0xff]  }
 0x198   :  { %2795 = vmatprep.subr.bf16.mxu0 %v8456_v0  ;;  %v8502_v0 = vld [vmem:[#allocation7 + $0x850] ss:$20 sps:$4 sm:$0xff]  }
 0x19a   :  { %2919 = vmatpush1.bf16.msra.mxu1 %v8457_v3  ;;  %v8592_v3 = vld [vmem:[#allocation7 + $0x6c8] ss:$20 sps:$4 sm:$0xff]  }
 0x19b   :  { %2796 = vmatpush1.bf16.msra.mxu0 %v8454_v2  ;;  %2920 = vmatprep.subr.bf16.mxu1 %v8465_v5  ;;  %v8589_v2 = vld [vmem:[#allocation7 + $0x560] ss:$20 sps:$4 sm:$0xff]   ;;  %v8505_v5 = vld [vmem:[#allocation7 + $0x878] ss:$20 sps:$4 sm:$0xff]  }
 0x19c   :  { %2797 = vmatprep.subr.bf16.mxu0 %v8462_v4 }
 0x19e   :  { %2921 = vmatpush1.bf16.msra.mxu1 %v8463_v7  ;;  %v8510_v7 = vld [vmem:[#allocation7 + $0x8a4] ss:$20 sps:$4 sm:$0xff]  }
 0x19f   :  { %2798 = vmatpush1.bf16.msra.mxu0 %v8460_v6  ;;  %2922 = vmatprep.subr.bf16.mxu1 %v8471_v10 }
 0x1a0   :  { %2799 = vmatprep.subr.bf16.mxu0 %v8468_v9  ;;  %v8593_v9 = vld [vmem:[#allocation7 + $0x588] ss:$20 sps:$4 sm:$0xff]  }
 0x1a2   :  { %2923 = vmatpush1.bf16.msra.mxu1 %v8469_v13  ;;  %v8513_v13 = vld [vmem:[#allocation7 + $0x8cc] ss:$20 sps:$4 sm:$0xff]  }
 0x1a3   :  { %2800 = vmatpush1.bf16.msra.mxu0 %v8466_v12  ;;  %2924 = vmatprep.subr.bf16.mxu1 %v8474_v15  ;;  %v8508_v12 = vld [vmem:[#allocation7 + $0x8a0] ss:$20 sps:$4 sm:$0xff]   ;;  %v8600_v15 = vld [vmem:[#allocation7 + $0x718] ss:$20 sps:$4 sm:$0xff]  }
 0x1a4   :  { %7846 = vmatprep.subr.bf16.mxu0 %v8538_v16  ;;  %v8511_v16 = vld [vmem:[#allocation7 + $0x8c8] ss:$20 sps:$4 sm:$0xff]  }
 0x1a6   :  { %2812 = vmatmul.mubr.bf16.vlgmr.msra.gmra.mrb[0].mxu0 %v9828_v19  ;;  %2925 = vmatpush1.bf16.msra.mxu1 %v8472_v18  ;;  %v8516_v18 = vld [vmem:[#allocation7 + $0x8f4] ss:$20 sps:$4 sm:$0xff]  }
 0x1a7   :  { %7847 = vmatpush3.bf16.msra.mxu0 %v8539_v21  ;;  %2926 = vmatprep.subr.bf16.mxu1 %v8477_v20  ;;  %v8601_v20 = vld [vmem:[#allocation7 + $0x5d8] ss:$20 sps:$4 sm:$0xff]   ;;  %v8604_v21 = vld [vmem:[#allocation7 + $0x740] ss:$20 sps:$4 sm:$0xff]  }
 0x1a8   :  { %7848 = vmatprep.subr.bf16.mxu0 %v8543_v22  ;;  %3057 = vmatprep.mubr.bf16.mxu0 %v9795_v48  ;;  %v8559_v48 = vld [vmem:[#allocation7 + $0xb0] ss:$20 sps:$4 sm:$0xff]  }
 0x1a9   :  { %v8514_v22 = vld [vmem:[#allocation7 + $0x8f0] ss:$20 sps:$4 sm:$0xff]  }
 0x1aa   :  { %2927 = vmatpush1.bf16.msra.mxu1 %v8475_v23  ;;  %v8519_v23 = vld [vmem:[#allocation7 + $0x91c] ss:$20 sps:$4 sm:$0xff]  }
 0x1ab   :  { %7849 = vmatpush3.bf16.msra.mxu0 %v8544_v26  ;;  %2928 = vmatprep.subr.bf16.mxu1 %v8480_v25  ;;  %v8605_v25 = vld [vmem:[#allocation7 + $0x600] ss:$20 sps:$4 sm:$0xff]   ;;  %v8608_v26 = vld [vmem:[#allocation7 + $0x768] ss:$20 sps:$4 sm:$0xff]  }
 0x1ac   :  { %7850 = vmatprep.subr.bf16.mxu0 %v8548_v27  ;;  %v8517_v27 = vld [vmem:[#allocation7 + $0x918] ss:$20 sps:$4 sm:$0xff]  }
 0x1ae   :  { %2929 = vmatpush1.bf16.msra.mxu1 %v8478_v28  ;;  %v8522_v28 = vld [vmem:[#allocation7 + $0x944] ss:$20 sps:$4 sm:$0xff]  }
 0x1af   :  { %7851 = vmatpush3.bf16.msra.mxu0 %v8549_v30  ;;  %2930 = vmatprep.subr.bf16.mxu1 %v8483_v29  ;;  %v8609_v29 = vld [vmem:[#allocation7 + $0x628] ss:$20 sps:$4 sm:$0xff]   ;;  %v8520_v30 = vld [vmem:[#allocation7 + $0x940] ss:$20 sps:$4 sm:$0xff]  }
 0x1b0   :  { %7852 = vmatprep.subr.bf16.mxu0 %v8553_v32  ;;  %v8525_v32 = vld [vmem:[#allocation7 + $0x96c] ss:$20 sps:$4 sm:$0xff]  }
 0x1b2   :  { %2931 = vmatpush1.bf16.msra.mxu1 %v8481_v33  ;;  %v8612_v33 = vld [vmem:[#allocation7 + $0xa10] ss:$20 sps:$4 sm:$0xff]  }
 0x1b3   :  { %7853 = vmatpush3.bf16.msra.mxu0 %v8554_v37  ;;  %2932 = vmatprep.subr.bf16.mxu1 %v8486_v35  ;;  %v8523_v35 = vld [vmem:[#allocation7 + $0x968] ss:$20 sps:$4 sm:$0xff]   ;;  %v9596_v37 = vmov 0  }
 0x1b4   :  { %7854 = vmatprep.subr.bf16.mxu0 %v8558_v38  ;;  %v8528_v38 = vld [vmem:[#allocation7 + $0x994] ss:$20 sps:$4 sm:$0xff]  }
 0x1b6   :  { %2933 = vmatpush1.bf16.msra.mxu1 %v8484_v39  ;;  %v8615_v39 = vld [vmem:[#allocation7 + $0xa38] ss:$20 sps:$4 sm:$0xff]  }
 0x1b7   :  { %7855 = vmatpush3.bf16.msra.mxu0 %v8559_v48  ;;  %2943 = vmatprep.subr.bf16.mxu1 %v8489_v40  ;;  %v8526_v40 = vld [vmem:[#allocation7 + $0x990] ss:$20 sps:$4 sm:$0xff]  }
 0x1b8   :  { %7856 = vmatprep.subr.bf16.mxu0 %v8563_v41  ;;  %v8531_v48 = vld [vmem:[#allocation7 + $0x9bc] ss:$20 sps:$4 sm:$0xff]   ;;  %v8618_v41 = vld [vmem:[#allocation7 + $0xa60] ss:$20 sps:$4 sm:$0xff]  }
 0x1b9   :  { %2935 = vmatmul.mubr.bf16.vlgmr.msra.gmra.mrb[4].mxu1 %v9811_v17 }
 0x1ba   :  { %2944 = vmatpush1.bf16.msra.mxu1 %v8487_v42  ;;  %2975 = vmatprep.mubr.bf16.mxu1 %v9815_v24  ;;  %v8529_v42 = vld [vmem:[#allocation7 + $0x9b8] ss:$20 sps:$4 sm:$0xff]  }
 0x1bb   :  { %2945 = vmatprep.subr.bf16.mxu1 %v8492_v43  ;;  %7857 = vmatpush3.bf16.msra.mxu0 %v8564_v44  ;;  %v8534_v43 = vld [vmem:[#allocation7 + $0x9e4] ss:$20 sps:$4 sm:$0xff]   ;;  %v8532_v44 = vld [vmem:[#allocation7 + $0x9e0] ss:$20 sps:$4 sm:$0xff]  }
 0x1bc   :  { %7858 = vmatprep.subr.bf16.mxu0 %v8568_v45  ;;  %v8537_v45 = vld [vmem:[#allocation7 + $0xa0c] ss:$20 sps:$4 sm:$0xff]  }
 0x1be   :  { %2946 = vmatpush1.bf16.msra.mxu1 %v8490_v46  ;;  %v8624_v46 = vld [vmem:[#allocation7 + $0xab0] ss:$20 sps:$4 sm:$0xff]  }
 0x1bf   :  { %2947 = vmatprep.subr.bf16.mxu1 %v8495_v47  ;;  %7859 = vmatpush3.bf16.msra.mxu0 %v8569_v49  ;;  %v8535_v47 = vld [vmem:[#allocation7 + $0xa08] ss:$20 sps:$4 sm:$0xff]  }
 0x1c0   :  { %7860 = vmatprep.subr.bf16.mxu0 %v8573_v50  ;;  %v8542_v49 = vld [vmem:[#allocation7 + $0xa34] ss:$20 sps:$4 sm:$0xff]   ;;  %v8627_v50 = vld [vmem:[#allocation7 + $0xad8] ss:$20 sps:$4 sm:$0xff]  }
 0x1c2   :  { %2948 = vmatpush1.bf16.msra.mxu1 %v8493_v51  ;;  %v8540_v51 = vld [vmem:[#allocation7 + $0xa30] ss:$20 sps:$4 sm:$0xff]  }
 0x1c3   :  { %2949 = vmatprep.subr.bf16.mxu1 %v8498_v53  ;;  %7861 = vmatpush3.bf16.msra.mxu0 %v8574_v54  ;;  %v8547_v53 = vld [vmem:[#allocation7 + $0xa5c] ss:$20 sps:$4 sm:$0xff]   ;;  %v8630_v54 = vld [vmem:[#allocation7 + $0xb00] ss:$20 sps:$4 sm:$0xff]  }
 0x1c4   :  { %7890 = vmatprep.subr.bf16.mxu0 %v8578_v55  ;;  %v8545_v55 = vld [vmem:[#allocation7 + $0xa58] ss:$20 sps:$4 sm:$0xff]  }
 0x1c6   :  { %2950 = vmatpush1.bf16.msra.mxu1 %v8496_v56  ;;  %3058 = vmatmul.mubr.bf16.vlgmr.msra.gmra.mrb[4].mxu0 %v9801_v8  ;;  %v8552_v56 = vld [vmem:[#allocation7 + $0xa84] ss:$20 sps:$4 sm:$0xff]  }
 0x1c7   :  { %2951 = vmatprep.subr.bf16.mxu1 %v8501_v57  ;;  %7891 = vmatpush3.bf16.msra.mxu0 %v8579_v58  ;;  %v8633_v57 = vld [vmem:[#allocation7 + $0xb28] ss:$20 sps:$4 sm:$0xff]   ;;  %v8550_v58 = vld [vmem:[#allocation7 + $0xa80] ss:$20 sps:$4 sm:$0xff]  }
 0x1c8   :  { %7892 = vmatprep.subr.bf16.mxu0 %v8583_v60  ;;  %3137 = vmatprep.mubr.bf16.mxu0 %v9808_v36  ;;  %v8596_v36 = vld [vmem:[#allocation7 + $0x6f0] ss:$20 sps:$4 sm:$0xff]  }
 0x1c9   :  { %v8636_v60 = vld [vmem:[#allocation7 + $0xb50] ss:$20 sps:$4 sm:$0xff]  }
 0x1ca   :  { %2952 = vmatpush1.bf16.msra.mxu1 %v8499_v59  ;;  %v8557_v59 = vld [vmem:[#allocation7 + $0xaac] ss:$20 sps:$4 sm:$0xff]  }
 0x1cb   :  { %2953 = vmatprep.subr.bf16.mxu1 %v8504_v61  ;;  %7893 = vmatpush3.bf16.msra.mxu0 %v8584_v62  ;;  %v8562_v61 = vld [vmem:[#allocation7 + $0xad4] ss:$20 sps:$4 sm:$0xff]   ;;  %v8639_v62 = vld [vmem:[#allocation7 + $0xb78] ss:$20 sps:$4 sm:$0xff]  }
 0x1cc   :  { %v9836_v4 = vpop.f32.mrb[0].mxu1  ;;  %7894 = vmatprep.subr.bf16.mxu0 %v8588_v63  ;;  %v8560_v63 = vld [vmem:[#allocation7 + $0xad0] ss:$20 sps:$4 sm:$0xff]  }
 0x1cd   :  { %v9838_v6 = vpop.f32.mrb[1].mxu1 }
 0x1ce   :  { %v2653_v8 = vpop.f32.mrb[2].mxu1  ;;  %2954 = vmatpush1.bf16.msra.mxu1 %v8502_v0  ;;  %v8567_v0 = vld [vmem:[#allocation7 + $0xafc] ss:$20 sps:$4 sm:$0xff]  }
 0x1cf   :  { %v2654_v10 = vpop.f32.mrb[3].mxu1  ;;  %2955 = vmatprep.subr.bf16.mxu1 %v8507_v1  ;;  %7895 = vmatpush3.bf16.msra.mxu0 %v8589_v2  ;;  %v8642_v1 = vld [vmem:[#allocation7 + $0xba0] ss:$20 sps:$4 sm:$0xff]   ;;  %v8565_v2 = vld [vmem:[#allocation7 + $0xaf8] ss:$20 sps:$4 sm:$0xff]  }
 0x1d0   :  { %7896 = vmatprep.subr.bf16.mxu0 %v8592_v3  ;;  %v8572_v3 = vld [vmem:[#allocation7 + $0xb24] ss:$20 sps:$4 sm:$0xff]   ;;  %v8577_v8 = vld [vmem:[#allocation7 + $0xb4c] ss:$20 sps:$4 sm:$0xff]  }
 0x1d1   :  { %v8580_v10 = vld [vmem:[#allocation7 + $0xb70] ss:$20 sps:$4 sm:$0xff]  }
 0x1d2   :  { %2956 = vmatpush1.bf16.msra.mxu1 %v8505_v5  ;;  %v8570_v5 = vld [vmem:[#allocation7 + $0xb20] ss:$20 sps:$4 sm:$0xff]  }
 0x1d3   :  { %2957 = vmatprep.subr.bf16.mxu1 %v8510_v7  ;;  %7897 = vmatpush3.bf16.msra.mxu0 %v8593_v9  ;;  %v8575_v7 = vld [vmem:[#allocation7 + $0xb48] ss:$20 sps:$4 sm:$0xff]  }
 0x1d4   :  { %7898 = vmatprep.subr.bf16.mxu0 %v8596_v36  ;;  %v8582_v9 = vld [vmem:[#allocation7 + $0xb74] ss:$20 sps:$4 sm:$0xff]   ;;  %v8587_v36 = vld [vmem:[#allocation7 + $0xb9c] ss:$20 sps:$4 sm:$0xff]  }
 0x1d6   :  { %2958 = vmatpush1.bf16.msra.mxu1 %v8508_v12  ;;  %v8585_v12 = vld [vmem:[#allocation7 + $0xb98] ss:$20 sps:$4 sm:$0xff]  }
 0x1d7   :  { %2959 = vmatprep.subr.bf16.mxu1 %v8513_v13  ;;  %7899 = vmatpush3.bf16.msra.mxu0 %v8597_v14  ;;  %v8590_v13 = vld [vmem:[#allocation7 + $0x3d0] ss:$20 sps:$4 sm:$0xff]  }
 0x1d8   :  { %7900 = vmatprep.subr.bf16.mxu0 %v8600_v15  ;;  %v8591_v14 = vld [vmem:[#allocation7 + $0x290] ss:$20 sps:$4 sm:$0xff]   ;;  %v8594_v15 = vld [vmem:[#allocation7 + $0x3f8] ss:$20 sps:$4 sm:$0xff]  }
 0x1da   :  { %2960 = vmatpush1.bf16.msra.mxu1 %v8511_v16  ;;  %v8595_v16 = vld [vmem:[#allocation7 + $0x2b8] ss:$20 sps:$4 sm:$0xff]  }
 0x1db   :  { %2961 = vmatprep.subr.bf16.mxu1 %v8516_v18  ;;  %7901 = vmatpush3.bf16.msra.mxu0 %v8601_v20  ;;  %v8598_v18 = vld [vmem:[#allocation7 + $0x420] ss:$20 sps:$4 sm:$0xff]  }
 0x1dc   :  { %7902 = vmatprep.subr.bf16.mxu0 %v8604_v21  ;;  %v8599_v20 = vld [vmem:[#allocation7 + $0x2e0] ss:$20 sps:$4 sm:$0xff]   ;;  %v8602_v21 = vld [vmem:[#allocation7 + $0x448] ss:$20 sps:$4 sm:$0xff]  }
 0x1de   :  { %2962 = vmatpush1.bf16.msra.mxu1 %v8514_v22  ;;  %v8603_v22 = vld [vmem:[#allocation7 + $0x308] ss:$20 sps:$4 sm:$0xff]  }
 0x1df   :  { %2963 = vmatprep.subr.bf16.mxu1 %v8519_v23  ;;  %7903 = vmatpush3.bf16.msra.mxu0 %v8605_v25  ;;  %v8606_v23 = vld [vmem:[#allocation7 + $0x470] ss:$20 sps:$4 sm:$0xff]  }
 0x1e0   :  { %7904 = vmatprep.subr.bf16.mxu0 %v8608_v26  ;;  %v8607_v25 = vld [vmem:[#allocation7 + $0x330] ss:$20 sps:$4 sm:$0xff]   ;;  %v8610_v26 = vld [vmem:[#allocation7 + $0x498] ss:$20 sps:$4 sm:$0xff]  }
 0x1e2   :  { %2964 = vmatpush1.bf16.msra.mxu1 %v8517_v27  ;;  %v8611_v27 = vld [vmem:[#allocation7 + $0x358] ss:$20 sps:$4 sm:$0xff]  }
 0x1e3   :  { %2965 = vmatprep.subr.bf16.mxu1 %v8522_v28  ;;  %7905 = vmatpush3.bf16.msra.mxu0 %v8609_v29  ;;  %v8613_v28 = vld [vmem:[#allocation7 + $0x4c0] ss:$20 sps:$4 sm:$0xff]   ;;  %v8616_v29 = vld [vmem:[#allocation7 + $0x4e8] ss:$20 sps:$4 sm:$0xff]  }
 0x1e4   :  { %3185 = vmatprep.subr.bf16.mxu0 %v9596_v37 }
 0x1e6   :  { %2966 = vmatpush1.bf16.msra.mxu1 %v8520_v30  ;;  %3138 = vmatmul.mubr.bf16.vlgmr.msra.gmra.mrb[8].mxu0 %v9811_v17  ;;  %v8621_v17 = vld [vmem:[#allocation7 + $0xa88] ss:$20 sps:$4 sm:$0xff]   ;;  %v8619_v30 = vld [vmem:[#allocation7 + $0x8d0] ss:$20 sps:$4 sm:$0xff]  }
 0x1e7   :  { %2967 = vmatprep.subr.bf16.mxu1 %v8525_v32  ;;  %3186 = vmatpush1.bf16.msra.mxu0 %v8612_v33  ;;  %v8620_v32 = vld [vmem:[#allocation7 + $0x790] ss:$20 sps:$4 sm:$0xff]   ;;  %v8622_v33 = vld [vmem:[#allocation7 + $0x8f8] ss:$20 sps:$4 sm:$0xff]  }
 0x1e8   :  { %3187 = vmatprep.subr.bf16.mxu0 %v9596_v37  ;;  %7380 = vmatprep.mubr.msk.bf16.mxu0 %vm2611_vm0, %v9821_v34 }
 0x1ea   :  { %2968 = vmatpush1.bf16.msra.mxu1 %v8523_v35  ;;  %v8623_v35 = vld [vmem:[#allocation7 + $0x7b8] ss:$20 sps:$4 sm:$0xff]  }
 0x1eb   :  { %2969 = vmatprep.subr.bf16.mxu1 %v8528_v38  ;;  %3188 = vmatpush1.bf16.msra.mxu0 %v8615_v39  ;;  %v8625_v38 = vld [vmem:[#allocation7 + $0x920] ss:$20 sps:$4 sm:$0xff]  }
 0x1ec   :  { %3189 = vmatprep.subr.bf16.mxu0 %v9596_v37  ;;  %v8626_v39 = vld [vmem:[#allocation7 + $0x7e0] ss:$20 sps:$4 sm:$0xff]  }
 0x1ee   :  { %2970 = vmatpush1.bf16.msra.mxu1 %v8526_v40  ;;  %v8628_v40 = vld [vmem:[#allocation7 + $0x948] ss:$20 sps:$4 sm:$0xff]  }
 0x1ef   :  { %2971 = vmatprep.subr.bf16.mxu1 %v8531_v48  ;;  %3190 = vmatpush1.bf16.msra.mxu0 %v8618_v41  ;;  %v8629_v48 = vld [vmem:[#allocation7 + $0x808] ss:$20 sps:$4 sm:$0xff]   ;;  %v8631_v41 = vld [vmem:[#allocation7 + $0x970] ss:$20 sps:$4 sm:$0xff]  }
 0x1f0   :  { %3191 = vmatprep.subr.bf16.mxu0 %v9596_v37 }
 0x1f2   :  { %2972 = vmatpush1.bf16.msra.mxu1 %v8529_v42  ;;  %v8632_v42 = vld [vmem:[#allocation7 + $0x830] ss:$20 sps:$4 sm:$0xff]  }
 0x1f3   :  { %2973 = vmatprep.subr.bf16.mxu1 %v8534_v43  ;;  %3192 = vmatpush1.bf16.msra.mxu0 %v8621_v17  ;;  %v8634_v43 = vld [vmem:[#allocation7 + $0x998] ss:$20 sps:$4 sm:$0xff]  }
 0x1f4   :  { %3193 = vmatprep.subr.bf16.mxu0 %v9596_v37  ;;  %v8635_v17 = vld [vmem:[#allocation7 + $0x858] ss:$20 sps:$4 sm:$0xff]  }
 0x1f6   :  { %2974 = vmatpush1.bf16.msra.mxu1 %v8532_v44  ;;  %v8637_v44 = vld [vmem:[#allocation7 + $0x9c0] ss:$20 sps:$4 sm:$0xff]  }
 0x1f7   :  { %2984 = vmatprep.subr.bf16.mxu1 %v8537_v45  ;;  %3194 = vmatpush1.bf16.msra.mxu0 %v8624_v46  ;;  %v8640_v45 = vld [vmem:[#allocation7 + $0x9e8] ss:$20 sps:$4 sm:$0xff]  }
 0x1f8   :  { %3195 = vmatprep.subr.bf16.mxu0 %v9596_v37  ;;  %v8643_v46 = vld [vmem:[#allocation10 + $0x40] sm:$0xff]  }
 0x1f9   :  { %2976 = vmatmul.mubr.bf16.vlgmr.msra.gmra.mrb[4].mxu1 %v9819_v31 }
 0x1fa   :  { %2985 = vmatpush1.bf16.msra.mxu1 %v8535_v47  ;;  %7379 = vmatprep.mubr.msk.bf16.mxu1 %vm2611_vm0, %v9821_v34  ;;  %v8555_v34 = vld [vmem:[#allocation7 + $0xaa8] ss:$20 sps:$4 sm:$0xff]  }
 0x1fb   :  { %2986 = vmatprep.subr.bf16.mxu1 %v8542_v49  ;;  %3196 = vmatpush1.bf16.msra.mxu0 %v8627_v50  ;;  %v8644_v47 = vld [vmem:[#allocation10] sm:$0xff]   ;;  %v8645_v49 = vld [vmem:[#allocation10 + $0x48] sm:$0xff]  }
 0x1fc   :  { %3197 = vmatprep.subr.bf16.mxu0 %v9596_v37  ;;  %v8646_v50 = vld [vmem:[#allocation10 + $0x8] sm:$0xff]  }
 0x1fe   :  { %2987 = vmatpush1.bf16.msra.mxu1 %v8540_v51  ;;  %v8647_v51 = vld [vmem:[#allocation10 + $0x50] sm:$0xff]  }
 0x1ff   :  { %2988 = vmatprep.subr.bf16.mxu1 %v8547_v53  ;;  %3198 = vmatpush1.bf16.msra.mxu0 %v8630_v54  ;;  %v636_v53 = vlaneseq  ;;  %v8648_v54 = vld [vmem:[#allocation10 + $0x10] sm:$0xff]  }
 0x200   :  { %3199 = vmatprep.subr.bf16.mxu0 %v9596_v37 }
 0x202   :  { %2989 = vmatpush1.bf16.msra.mxu1 %v8545_v55  ;;  %v8649_v55 = vld [vmem:[#allocation10 + $0x58] sm:$0xff]  }
 0x203   :  { %2990 = vmatprep.subr.bf16.mxu1 %v8552_v56  ;;  %3200 = vmatpush1.bf16.msra.mxu0 %v8633_v57  ;;  %v9863_v56 = vshrl.u32 %v636_v53, 7  ;;  %v8650_v57 = vld [vmem:[#allocation10 + $0x18] sm:$0xff]  }
 0x204   :  { %3201 = vmatprep.subr.bf16.mxu0 %v9596_v37 }
 0x206   :  { %2991 = vmatpush1.bf16.msra.mxu1 %v8550_v58  ;;  %v9866_v58 = vsub.s32 0, %v9863_v56 }
 0x207   :  { %2992 = vmatprep.subr.bf16.mxu1 %v8557_v59  ;;  %3202 = vmatpush1.bf16.msra.mxu0 %v8636_v60  ;;  %v8651_v59 = vld [vmem:[#allocation10 + $0x60] sm:$0xff]   ;;  %v9868_v60 = vld [vmem:[#allocation8] sm:$0x1f] }
 0x208   :  { %3203 = vmatprep.subr.bf16.mxu0 %v9596_v37 }
 0x20a   :  { %2993 = vmatpush1.bf16.msra.mxu1 %v8555_v34  ;;  %v8652_v34 = vld [vmem:[#allocation10 + $0x20] sm:$0xff]  }
 0x20b   :  { %2994 = vmatprep.subr.bf16.mxu1 %v8562_v61  ;;  %3204 = vmatpush1.bf16.msra.mxu0 %v8639_v62  ;;  %v639_v61 = vrot.slane %v9868_v60, %v9866_v58  ;;  %v8653_v62 = vld [vmem:[#allocation10 + $0x68] sm:$0xff]  }
 0x20c   :  { %3205 = vmatprep.subr.bf16.mxu0 %v9596_v37 }
 0x20e   :  { %2995 = vmatpush1.bf16.msra.mxu1 %v8560_v63 }
 0x20f   :  { %2996 = vmatprep.subr.bf16.mxu1 %v8567_v0  ;;  %3206 = vmatpush1.bf16.msra.mxu0 %v8642_v1  ;;  %v8654_v0 = vld [vmem:[#allocation10 + $0x28] sm:$0xff]   ;;  %v2650_v1 = vadd.f32 %v9836_v4, %v639_v61  ;;  %v8659_v4 = vld [vmem:[#allocation10 + $0xc0] sm:$0xff]   ;;  %v9892_v61 = vsub.s32 3, %v9863_v56 }
 0x212   :  { %2997 = vmatpush1.bf16.msra.mxu1 %v8565_v2  ;;  %3218 = vmatmul.mubr.bf16.vlgmr.msra.gmra.mrb[12].mxu0 %v9828_v19  ;;  %v8655_v2 = vld [vmem:[#allocation10 + $0x70] sm:$0xff]  }
 0x213   :  { %2998 = vmatprep.subr.bf16.mxu1 %v8572_v3 }
 0x216   :  { %2999 = vmatpush1.bf16.msra.mxu1 %v8570_v5 }
 0x217   :  { %3000 = vmatprep.subr.bf16.mxu1 %v8577_v8 }
 0x21a   :  { %3001 = vmatpush1.bf16.msra.mxu1 %v8575_v7 }
 0x21b   :  { %3002 = vmatprep.subr.bf16.mxu1 %v8582_v9 }
 0x21e   :  { %3003 = vmatpush1.bf16.msra.mxu1 %v8580_v10 }
 0x21f   :  { %3004 = vmatprep.subr.bf16.mxu1 %v8587_v36  ;;  %v8656_v36 = vld [vmem:[#allocation10 + $0x30] sm:$0xff]  }
 0x222   :  { %3005 = vmatpush1.bf16.msra.mxu1 %v8585_v12 }
 0x223   :  { %7868 = vmatprep.subr.bf16.mxu1 %v8590_v13  ;;  %v8657_v13 = vld [vmem:[#allocation10 + $0x78] sm:$0xff]  }
 0x225   :  { %3017 = vmatmul.mubr.bf16.vlgmr.msra.gmra.mrb[4].mxu1 %v9828_v19  ;;  %v8614_v19 = vld [vmem:[#allocation7 + $0x380] ss:$20 sps:$4 sm:$0xff]  }
 0x226   :  { %7869 = vmatpush3.bf16.msra.mxu1 %v8591_v14  ;;  %3097 = vmatprep.mubr.bf16.mxu1 %v9797_v52  ;;  %v8617_v52 = vld [vmem:[#allocation7 + $0x3a8] ss:$20 sps:$4 sm:$0xff]  }
 0x227   :  { %7870 = vmatprep.subr.bf16.mxu1 %v8594_v15 }
 0x22a   :  { %7871 = vmatpush3.bf16.msra.mxu1 %v8595_v16  ;;  %v8658_v16 = vld [vmem:[#allocation10 + $0x38] sm:$0xff]  }
 0x22b   :  { %7872 = vmatprep.subr.bf16.mxu1 %v8598_v18 }
 0x22e   :  { %7873 = vmatpush3.bf16.msra.mxu1 %v8599_v20 }
 0x22f   :  { %7874 = vmatprep.subr.bf16.mxu1 %v8602_v21  ;;  %v8661_v21 = vld [vmem:[#allocation10 + $0xc8] sm:$0xff]  }
 0x232   :  { %7875 = vmatpush3.bf16.msra.mxu1 %v8603_v22  ;;  %v8662_v22 = vld [vmem:[#allocation10 + $0x88] sm:$0xff]  }
 0x233   :  { %7876 = vmatprep.subr.bf16.mxu1 %v8606_v23  ;;  %v8663_v23 = vld [vmem:[#allocation10 + $0xd0] sm:$0xff]  }
 0x236   :  { %7877 = vmatpush3.bf16.msra.mxu1 %v8607_v25  ;;  %v8664_v25 = vld [vmem:[#allocation10 + $0x90] sm:$0xff]  }
 0x237   :  { %7878 = vmatprep.subr.bf16.mxu1 %v8610_v26  ;;  %v8665_v26 = vld [vmem:[#allocation10 + $0xd8] sm:$0xff]  }
 0x23a   :  { %7879 = vmatpush3.bf16.msra.mxu1 %v8611_v27  ;;  %v8666_v27 = vld [vmem:[#allocation10 + $0x98] sm:$0xff]  }
 0x23b   :  { %7880 = vmatprep.subr.bf16.mxu1 %v8613_v28  ;;  %v8667_v28 = vld [vmem:[#allocation10 + $0xe0] sm:$0xff]  }
 0x23e   :  { %7881 = vmatpush3.bf16.msra.mxu1 %v8614_v19  ;;  %v8668_v19 = vld [vmem:[#allocation10 + $0xa0] sm:$0xff]  }
 0x23f   :  { %7882 = vmatprep.subr.bf16.mxu1 %v8616_v29  ;;  %v8669_v29 = vld [vmem:[#allocation10 + $0xe8] sm:$0xff]  }
 0x242   :  { %7883 = vmatpush3.bf16.msra.mxu1 %v8617_v52  ;;  %v8670_v52 = vld [vmem:[#allocation10 + $0xa8] sm:$0xff]  }
 0x243   :  { %7912 = vmatprep.subr.bf16.mxu1 %v8619_v30  ;;  %v8671_v30 = vld [vmem:[#allocation10 + $0xf0] sm:$0xff]  }
 0x245   :  { %3098 = vmatmul.mubr.bf16.vlgmr.msra.gmra.mrb[8].mxu1 %v9803_v11  ;;  %v8638_v11 = vld [vmem:[#allocation7 + $0x880] ss:$20 sps:$4 sm:$0xff]  }
 0x246   :  { %7913 = vmatpush3.bf16.msra.mxu1 %v8620_v32  ;;  %3177 = vmatprep.mubr.bf16.mxu1 %v9815_v24  ;;  %v8641_v24 = vld [vmem:[#allocation7 + $0x8a8] ss:$20 sps:$4 sm:$0xff]  }
 0x247   :  { %7914 = vmatprep.subr.bf16.mxu1 %v8622_v33 }
 0x24a   :  { %7915 = vmatpush3.bf16.msra.mxu1 %v8623_v35  ;;  %v8672_v35 = vld [vmem:[#allocation10 + $0xb0] sm:$0xff]  }
 0x24b   :  { %7916 = vmatprep.subr.bf16.mxu1 %v8625_v38 }
 0x24e   :  { %7917 = vmatpush3.bf16.msra.mxu1 %v8626_v39 }
 0x24f   :  { %7918 = vmatprep.subr.bf16.mxu1 %v8628_v40  ;;  %v8673_v40 = vld [vmem:[#allocation10 + $0xf8] sm:$0xff]  }
 0x252   :  { %7919 = vmatpush3.bf16.msra.mxu1 %v8629_v48 }
 0x253   :  { %7920 = vmatprep.subr.bf16.mxu1 %v8631_v41  ;;  %v8675_v41 = vld [vmem:[#allocation10 + $0x100] sm:$0xff]  }
 0x256   :  { %7921 = vmatpush3.bf16.msra.mxu1 %v8632_v42  ;;  %v9597_v42 = vmov 0.0  }
 0x257   :  { %7922 = vmatprep.subr.bf16.mxu1 %v8634_v43  ;;  %7988 = vmatprep.subr.bf16.mxu0 %v9597_v42  ;;  %v8674_v43 = vld [vmem:[#allocation10 + $0xb8] sm:$0xff]  }
 0x258   :  { %7989 = vmatpush3.bf16.msra.mxu0 %v8675_v41  ;;  %8000 = vmatprep.mubr.msk.bf16.mxu0 %vm9598_vm2, %v9597_v42 }
 0x259   :  { %7990 = vmatprep.subr.bf16.mxu0 %v9597_v42 }
 0x25a   :  { %7923 = vmatpush3.bf16.msra.mxu1 %v8635_v17  ;;  %v8676_v17 = vld [vmem:[#allocation10 + $0x108] sm:$0xff]  }
 0x25b   :  { %7924 = vmatprep.subr.bf16.mxu1 %v8637_v44  ;;  %v8677_v44 = vld [vmem:[#allocation10 + $0x110] sm:$0xff]  }
 0x25c   :  { %7991 = vmatpush3.bf16.msra.mxu0 %v8676_v17 }
 0x25d   :  { %7992 = vmatprep.subr.bf16.mxu0 %v9597_v42 }
 0x25e   :  { %7925 = vmatpush3.bf16.msra.mxu1 %v8638_v11  ;;  %v8678_v11 = vld [vmem:[#allocation10 + $0x118] sm:$0xff]  }
 0x25f   :  { %7926 = vmatprep.subr.bf16.mxu1 %v8640_v45 }
 0x260   :  { %7993 = vmatpush3.bf16.msra.mxu0 %v8677_v44 }
 0x261   :  { %7994 = vmatprep.subr.bf16.mxu0 %v9597_v42 }
 0x262   :  { %7927 = vmatpush3.bf16.msra.mxu1 %v8641_v24 }
 0x263   :  { %7934 = vmatprep.subr.bf16.mxu1 %v8643_v46 }
 0x264   :  { %7995 = vmatpush3.bf16.msra.mxu0 %v8678_v11 }
 0x265   :  { %3178 = vmatmul.mubr.bf16.vlgmr.msra.gmra.mrb[12].mxu1 %v9819_v31  ;;  %v9871_v31 = vsub.s32 1, %v9863_v56  ;;  %7996 = vmatprep.subr.bf16.mxu0 %v9597_v42 }
 0x266   :  { %7935 = vmatpush3.bf16.msra.mxu1 %v8644_v47 }
 0x267   :  { %7936 = vmatprep.subr.bf16.mxu1 %v8645_v49  ;;  %v643_v63 = vrot.slane %v9868_v60, %v9871_v31  ;;  %v8679_v49 = vld [vmem:[#allocation10 + $0x120] sm:$0xff]  }
 0x268   :  { %7997 = vmatpush3.bf16.msra.mxu0 %v8679_v49 }
 0x269   :  { %v2652_v3 = vadd.f32 %v9838_v6, %v643_v63  ;;  %v8660_v6 = vld [vmem:[#allocation10 + $0x80] sm:$0xff]   ;;  %7998 = vmatprep.subr.bf16.mxu0 %v9597_v42  ;;  %v651_v63 = vrot.slane %v9868_v60, %v9892_v61 }
 0x26a   :  { %7937 = vmatpush3.bf16.msra.mxu1 %v8646_v50 }
 0x26b   :  { %7938 = vmatprep.subr.bf16.mxu1 %v8647_v51  ;;  %v8680_v51 = vld [vmem:[#allocation10 + $0x128] ss:$0 sps:$4 sm:$0xff]  }
 0x26c   :  { %v3548_v53 = vsel %vm3546_vm1, %v8680_v51, 0 }
 0x26d   :  { %7999 = vmatpush3.bf16.msra.mxu0 %v3548_v53  ;;  %v3687_v53 = vld [vmem:[#allocation13 + $0x28] sm:$0x33] }
 0x26e   :  { %7939 = vmatpush3.bf16.msra.mxu1 %v8648_v54 }
 0x26f   :  { %7940 = vmatprep.subr.bf16.mxu1 %v8649_v55 }
 0x272   :  { %7941 = vmatpush3.bf16.msra.mxu1 %v8650_v57 }
 0x273   :  { %7942 = vmatprep.subr.bf16.mxu1 %v8651_v59 }
 0x276   :  { %7943 = vmatpush3.bf16.msra.mxu1 %v8652_v34  ;;  %v9889_v34 = vsub.s32 2, %v9863_v56 }
 0x277   :  { %7944 = vmatprep.subr.bf16.mxu1 %v8653_v62 }
 0x278   :  { %v647_v62 = vrot.slane %v9868_v60, %v9889_v34 }
 0x279   :  { %v2813_v5 = vpop.f32.mrb[0].mxu0 }
 0x27a   :  { %v8013_v8 = vadd.f32 %v2813_v5, %v2650_v1  ;;  %v2815_v7 = vpop.f32.mrb[1].mxu0  ;;  %7945 = vmatpush3.bf16.msra.mxu1 %v8654_v0 }
 0x27b   :  { %v8015_v9 = vadd.f32 %v2815_v7, %v2652_v3  ;;  %v2817_v10 = vpop.f32.mrb[2].mxu0  ;;  %7946 = vmatprep.subr.bf16.mxu1 %v8655_v2 }
 0x27c   :  { %v2818_v12 = vpop.f32.mrb[3].mxu0  ;;  %v3225_v18 = vmax.f32 %v8013_v8, 0.0 }
 0x27d   :  { %v3226_v14 = vmax.f32 %v8015_v9, 0.0  ;;  %v9900_v12 = vsub.s32 4, %v9863_v56 }
 0x27e   :  { %7947 = vmatpush3.bf16.msra.mxu1 %v8656_v36  ;;  %v3230_v20 = vpack.c.bf16 %v3225_v18, %v3225_v18 }
 0x27f   :  { %v3231_v15 = vpack.c.bf16 %v3226_v14, %v3226_v14  ;;  %7948 = vmatprep.subr.bf16.mxu1 %v8657_v13  ;;  %v655_v13 = vrot.slane %v9868_v60, %v9900_v12 }
 0x281   :  { %3582 = vmatprep.mubr.bf16.mxu1 %v3231_v15 }
 0x282   :  { %7949 = vmatpush3.bf16.msra.mxu1 %v8658_v16 }
 0x283   :  { %7956 = vmatprep.subr.bf16.mxu1 %v8659_v4 }
 0x285   :  { %3583 = vmatmul.mubr.bf16.vlgmr.msra.gmra.mrb[16].mxu1 %v3230_v20 }
 0x286   :  { %7957 = vmatpush3.bf16.msra.mxu1 %v8660_v6 }
 0x287   :  { %7958 = vmatprep.subr.bf16.mxu1 %v8661_v21 }
 0x28a   :  { %7959 = vmatpush3.bf16.msra.mxu1 %v8662_v22 }
 0x28b   :  { %7960 = vmatprep.subr.bf16.mxu1 %v8663_v23 }
 0x28e   :  { %7961 = vmatpush3.bf16.msra.mxu1 %v8664_v25 }
 0x28f   :  { %7962 = vmatprep.subr.bf16.mxu1 %v8665_v26 }
 0x292   :  { %7963 = vmatpush3.bf16.msra.mxu1 %v8666_v27 }
 0x293   :  { %7964 = vmatprep.subr.bf16.mxu1 %v8667_v28 }
 0x296   :  { %7965 = vmatpush3.bf16.msra.mxu1 %v8668_v19 }
 0x297   :  { %7966 = vmatprep.subr.bf16.mxu1 %v8669_v29 }
 0x299   :  { %v7862_v32 = vpop.f32.mrb[4].mxu0 }
 0x29a   :  { %v7863_v33 = vpop.f32.mrb[5].mxu0  ;;  %7967 = vmatpush3.bf16.msra.mxu1 %v8670_v52 }
 0x29b   :  { %v7864_v38 = vadd.f32 %v7863_v33, %v7862_v32  ;;  %v7865_v39 = vpop.f32.mrb[6].mxu0  ;;  %7968 = vmatprep.subr.bf16.mxu1 %v8671_v30 }
 0x29c   :  { %v7866_v48 = vpop.f32.mrb[7].mxu0  ;;  %v8683_v39 = vld [vmem:[#allocation13 + $0x4] ss:$20 sps:$4 sm:$0xff]  }
 0x29d   :  { %v3060_v16 = vadd.f32 %v7864_v38, %v655_v13  ;;  %v8681_v38 = vld [vmem:[#allocation13] ss:$20 sps:$4 sm:$0xff]  }
 0x29e   :  { %7969 = vmatpush3.bf16.msra.mxu1 %v8672_v35  ;;  %v8725_v13 = vld [vmem:[#allocation16 + $0x194] ss:$40 sps:$4 sm:$0xff]  }
 0x29f   :  { %7970 = vmatprep.subr.bf16.mxu1 %v8673_v40  ;;  %v7381_v40 = vld [vmem:[#allocation11] ss:$0 sm:$0xff] }
 0x2a2   :  { %7971 = vmatpush3.bf16.msra.mxu1 %v8674_v43 }
 0x2a3   :  { %3776 = vmatprep.subr.bf16.mxu1 %v8683_v39 }
 0x2b9   :  { %v7906_v45 = vpop.f32.mrb[8].mxu0 }
 0x2ba   :  { %v7907_v24 = vpop.f32.mrb[9].mxu0 }
 0x2bb   :  { %v7908_v46 = vadd.f32 %v7907_v24, %v7906_v45  ;;  %v7909_v47 = vpop.f32.mrb[10].mxu0 }
 0x2bc   :  { %v7910_v50 = vpop.f32.mrb[11].mxu0 }
 0x2e5   :  { %v3219_v54 = vpop.f32.mrb[12].mxu0 }
 0x2e6   :  { %v3221_v55 = vpop.f32.mrb[13].mxu0 }
 0x2e7   :  { %v3222_v57 = vpop.f32.mrb[14].mxu0  ;;  %v7427_v55 = vcombine.high %v3687_v53, %v3687_v53 }
 0x2e8   :  { %v3223_v59 = vpop.f32.mrb[15].mxu0  ;;  %v7426_v57 = vcombine.low %v3687_v53, %v3687_v53  ;;  %v8720_v53 = vld [vmem:[#allocation16 + $0x148] ss:$40 sps:$4 sm:$0xff]  }
 0x2ea   :  { %v3762_v59 = vsel %vm3760_vm5, %v7426_v57, 0  ;;  %v8734_v57 = vld [vmem:[#allocation16 + $0x1ec] ss:$40 sps:$4 sm:$0xff]  }
 0x2f8   :  { %v3018_v0 = vpop.f32.mrb[4].mxu1 }
 0x2f9   :  { %v8016_v1 = vadd.f32 %v3018_v0, %v647_v62  ;;  %v3020_v2 = vpop.f32.mrb[5].mxu1  ;;  %v8688_v62 = vld [vmem:[#allocation13 + $0xc] ss:$20 sps:$4 sm:$0xff]  }
 0x2fa   :  { %v8017_v3 = vadd.f32 %v3020_v2, %v651_v63  ;;  %v3022_v5 = vpop.f32.mrb[6].mxu1  ;;  %v8693_v0 = vld [vmem:[#allocation16] ss:$40 sps:$4 sm:$0xff]   ;;  %v8701_v2 = vld [vmem:[#allocation16 + $0x54] ss:$40 sps:$4 sm:$0xff]  }
 0x2fb   :  { %v3227_v8 = vmax.f32 %v8016_v1, 0.0  ;;  %v3023_v7 = vpop.f32.mrb[7].mxu1  ;;  %v8695_v1 = vld [vmem:[#allocation16 + $0x4] ss:$40 sps:$4 sm:$0xff]  }
 0x2fc   :  { %v3228_v9 = vmax.f32 %v8017_v3, 0.0  ;;  %6245 = vmatprep.subr.bf16.mxu0 %v8695_v1  ;;  %v8699_v3 = vld [vmem:[#allocation16 + $0x50] ss:$40 sps:$4 sm:$0xff]   ;;  %v8707_v5 = vld [vmem:[#allocation16 + $0xa4] ss:$40 sps:$4 sm:$0xff]  }
 0x2fd   :  { %v3232_v36 = vpack.c.bf16 %v3227_v8, %v3227_v8  ;;  %v8705_v8 = vld [vmem:[#allocation16 + $0xa0] ss:$40 sps:$4 sm:$0xff]   ;;  %v8713_v7 = vld [vmem:[#allocation16 + $0xf4] ss:$40 sps:$4 sm:$0xff]  }
 0x2fe   :  { %v3233_v10 = vpack.c.bf16 %v3228_v9, %v3228_v9  ;;  %v8711_v9 = vld [vmem:[#allocation16 + $0xf0] ss:$40 sps:$4 sm:$0xff]  }
 0x2ff   :  { %v8744_v1 = vld [vmem:[#allocation16 + $0x288] ss:$40 sps:$4 sm:$0xff]  }
 0x300   :  { %3622 = vmatprep.mubr.bf16.mxu1 %v3233_v10  ;;  %v8719_v10 = vld [vmem:[#allocation16 + $0x144] ss:$40 sps:$4 sm:$0xff]  }
 0x301   :  { %3623 = vmatmul.mubr.bf16.vlgmr.msra.gmra.mrb[20].mxu1 %v3232_v36  ;;  %v8717_v36 = vld [vmem:[#allocation16 + $0x140] ss:$40 sps:$4 sm:$0xff]  }
 0x302   :  { %3808 = vmatprep.mubr.bf16.mxu1 %v9596_v37  ;;  %3777 = vmatpush1.bf16.msra.mxu1 %v8681_v38  ;;  %v8686_v38 = vld [vmem:[#allocation13 + $0x8] ss:$20 sps:$4 sm:$0xff]  }
 0x303   :  { %7431 = vmatprep.subr.msk.bf16.mxu1 %vm3760_vm5, %v7427_v55  ;;  %v8726_v55 = vld [vmem:[#allocation16 + $0x198] ss:$40 sps:$4 sm:$0xff]  }
 0x306   :  { %3779 = vmatpush1.bf16.msra.mxu1 %v3762_v59  ;;  %v8732_v59 = vld [vmem:[#allocation16 + $0x1e8] ss:$40 sps:$4 sm:$0xff]  }
 0x307   :  { %3817 = vmatprep.subr.bf16.mxu1 %v8688_v62  ;;  %v8740_v62 = vld [vmem:[#allocation16 + $0x23c] ss:$40 sps:$4 sm:$0xff]  }
 0x318   :  { %v7884_v14 = vpop.f32.mrb[8].mxu1 }
 0x319   :  { %v7885_v15 = vpop.f32.mrb[9].mxu1 }
 0x31a   :  { %v7886_v18 = vadd.f32 %v7885_v15, %v7884_v14  ;;  %v7887_v4 = vpop.f32.mrb[10].mxu1  ;;  %v8723_v14 = vld [vmem:[#allocation16 + $0x190] ss:$40 sps:$4 sm:$0xff]   ;;  %v8731_v15 = vld [vmem:[#allocation16 + $0x1e4] ss:$40 sps:$4 sm:$0xff]  }
 0x31b   :  { %v7888_v6 = vpop.f32.mrb[11].mxu1  ;;  %v8735_v4 = vld [vmem:[#allocation16 + $0x230] ss:$40 sps:$4 sm:$0xff]  }
 0x31c   :  { %v3100_v20 = vadd.f32 %v7886_v18, %v3060_v16  ;;  %v8729_v16 = vld [vmem:[#allocation16 + $0x1e0] ss:$40 sps:$4 sm:$0xff]   ;;  %v8737_v18 = vld [vmem:[#allocation16 + $0x234] ss:$40 sps:$4 sm:$0xff]   ;;  %v8743_v6 = vld [vmem:[#allocation16 + $0x284] ss:$40 sps:$4 sm:$0xff]  }
 0x31e   :  { %v3140_v21 = vadd.f32 %v7908_v46, %v3100_v20  ;;  %v8741_v20 = vld [vmem:[#allocation16 + $0x280] ss:$40 sps:$4 sm:$0xff]  }
 0x338   :  { %v7928_v22 = vpop.f32.mrb[12].mxu1 }
 0x339   :  { %v7929_v23 = vpop.f32.mrb[13].mxu1 }
 0x33a   :  { %v7930_v25 = vadd.f32 %v7929_v23, %v7928_v22  ;;  %v7931_v26 = vpop.f32.mrb[14].mxu1  ;;  %v8747_v22 = vld [vmem:[#allocation16 + $0x2d0] ss:$40 sps:$4 sm:$0xff]   ;;  %v8755_v23 = vld [vmem:[#allocation16 + $0x324] ss:$40 sps:$4 sm:$0xff]  }
 0x33b   :  { %v7932_v27 = vpop.f32.mrb[15].mxu1  ;;  %v8761_v26 = vld [vmem:[#allocation16 + $0x374] ss:$40 sps:$4 sm:$0xff]  }
 0x33c   :  { %v3180_v28 = vadd.f32 %v7930_v25, %v3140_v21  ;;  %v8749_v21 = vld [vmem:[#allocation16 + $0x2d4] ss:$40 sps:$4 sm:$0xff]   ;;  %v8753_v25 = vld [vmem:[#allocation16 + $0x320] ss:$40 sps:$4 sm:$0xff]   ;;  %v8759_v27 = vld [vmem:[#allocation16 + $0x370] ss:$40 sps:$4 sm:$0xff]  }
 0x33e   :  { %v3220_v19 = vadd.f32 %v3219_v54, %v3180_v28  ;;  %v8767_v28 = vld [vmem:[#allocation16 + $0x3c4] ss:$40 sps:$4 sm:$0xff]  }
 0x340   :  { %v3229_v29 = vmax.f32 %v3220_v19, 0.0  ;;  %v8765_v19 = vld [vmem:[#allocation16 + $0x3c0] ss:$40 sps:$4 sm:$0xff]  }
 0x342   :  { %v3234_v52 = vpack.c.bf16 %v3229_v29, %v3229_v29  ;;  %v8773_v29 = vld [vmem:[#allocation16 + $0x414] ss:$40 sps:$4 sm:$0xff]  }
 0x344   :  { %8001 = vmatmul.mubr.msk.bf16.vlgmr.msra.gmra.mrb[16].mxu0 %vm3542_vm3, %v3234_v52  ;;  %v8771_v52 = vld [vmem:[#allocation16 + $0x410] ss:$40 sps:$4 sm:$0xff]  }
 0x345   :  { %6246 = vmatpush1.bf16.msra.mxu0 %v8693_v0  ;;  %v8746_v0 = vld [vmem:[#allocation16 + $0x28c] ss:$40 sps:$4 sm:$0xff]  }
 0x346   :  { %6247 = vmatprep.subr.bf16.mxu0 %v8701_v2  ;;  %v8752_v2 = vld [vmem:[#allocation16 + $0x2dc] ss:$40 sps:$4 sm:$0xff]  }
 0x349   :  { %6248 = vmatpush1.bf16.msra.mxu0 %v8699_v3  ;;  %v8750_v3 = vld [vmem:[#allocation16 + $0x2d8] ss:$40 sps:$4 sm:$0xff]  }
 0x34a   :  { %6249 = vmatprep.subr.bf16.mxu0 %v8707_v5  ;;  %v8758_v5 = vld [vmem:[#allocation16 + $0x32c] ss:$40 sps:$4 sm:$0xff]  }
 0x34d   :  { %6250 = vmatpush1.bf16.msra.mxu0 %v8705_v8  ;;  %v8756_v8 = vld [vmem:[#allocation16 + $0x328] ss:$40 sps:$4 sm:$0xff]  }
 0x34e   :  { %6251 = vmatprep.subr.bf16.mxu0 %v8713_v7  ;;  %v8764_v7 = vld [vmem:[#allocation16 + $0x37c] ss:$40 sps:$4 sm:$0xff]  }
 0x351   :  { %6252 = vmatpush1.bf16.msra.mxu0 %v8711_v9  ;;  %v8762_v9 = vld [vmem:[#allocation16 + $0x378] ss:$40 sps:$4 sm:$0xff]  }
 0x352   :  { %6253 = vmatprep.subr.bf16.mxu0 %v8719_v10  ;;  %v8770_v10 = vld [vmem:[#allocation16 + $0x3cc] ss:$40 sps:$4 sm:$0xff]  }
 0x355   :  { %6254 = vmatpush1.bf16.msra.mxu0 %v8717_v36  ;;  %v8768_v36 = vld [vmem:[#allocation16 + $0x3c8] ss:$40 sps:$4 sm:$0xff]  }
 0x356   :  { %6255 = vmatprep.subr.bf16.mxu0 %v8725_v13  ;;  %v8776_v13 = vld [vmem:[#allocation16 + $0x41c] ss:$40 sps:$4 sm:$0xff]  }
 0x358   :  { %v7950_v60 = vpop.f32.mrb[16].mxu1 }
 0x359   :  { %v7951_v30 = vpop.f32.mrb[17].mxu1  ;;  %6256 = vmatpush1.bf16.msra.mxu0 %v8723_v14  ;;  %v8774_v14 = vld [vmem:[#allocation16 + $0x418] ss:$40 sps:$4 sm:$0xff]  }
 0x35a   :  { %v7952_v32 = vadd.f32 %v7951_v30, %v7950_v60  ;;  %v7953_v33 = vpop.f32.mrb[18].mxu1  ;;  %6257 = vmatprep.subr.bf16.mxu0 %v8731_v15  ;;  %v3673_v60 = vld [vmem:[#allocation5] sm:$0xff] }
 0x35b   :  { %v7954_v35 = vpop.f32.mrb[19].mxu1  ;;  %v3688_v33 = vld [vmem:[#allocation13 + $0x30] sm:$0x33] }
 0x35c   :  { %v3585_v43 = vadd.f32 %v7952_v32, %v7381_v40  ;;  %v7429_v40 = vcombine.high %v3688_v33, %v3688_v33  ;;  %v8779_v15 = vld [vmem:[#allocation16 + $0x464] ss:$40 sps:$4 sm:$0xff]  }
 0x35d   :  { %6258 = vmatpush1.bf16.msra.mxu0 %v8729_v16  ;;  %v8782_v16 = vld [vmem:[#allocation16 + $0x46c] ss:$40 sps:$4 sm:$0xff]  }
 0x35e   :  { %6259 = vmatprep.subr.bf16.mxu0 %v8737_v18  ;;  %v8777_v18 = vld [vmem:[#allocation16 + $0x460] ss:$40 sps:$4 sm:$0xff]  }
 0x361   :  { %6260 = vmatpush1.bf16.msra.mxu0 %v8735_v4  ;;  %v8780_v4 = vld [vmem:[#allocation16 + $0x468] ss:$40 sps:$4 sm:$0xff]  }
 0x362   :  { %6261 = vmatprep.subr.bf16.mxu0 %v8743_v6  ;;  %v8785_v6 = vld [vmem:[#allocation16 + $0x4b4] ss:$40 sps:$4 sm:$0xff]  }
 0x365   :  { %6262 = vmatpush1.bf16.msra.mxu0 %v8741_v20  ;;  %v8788_v20 = vld [vmem:[#allocation16 + $0x4bc] ss:$40 sps:$4 sm:$0xff]  }
 0x366   :  { %6263 = vmatprep.subr.bf16.mxu0 %v8749_v21  ;;  %v8783_v21 = vld [vmem:[#allocation16 + $0x4b0] ss:$40 sps:$4 sm:$0xff]  }
 0x369   :  { %6264 = vmatpush1.bf16.msra.mxu0 %v8747_v22  ;;  %v8786_v22 = vld [vmem:[#allocation16 + $0x4b8] ss:$40 sps:$4 sm:$0xff]  }
 0x36a   :  { %6265 = vmatprep.subr.bf16.mxu0 %v8755_v23  ;;  %v8791_v23 = vld [vmem:[#allocation16 + $0x504] ss:$40 sps:$4 sm:$0xff]  }
 0x36d   :  { %6266 = vmatpush1.bf16.msra.mxu0 %v8753_v25  ;;  %v8794_v25 = vld [vmem:[#allocation16 + $0x50c] ss:$40 sps:$4 sm:$0xff]  }
 0x36e   :  { %6267 = vmatprep.subr.bf16.mxu0 %v8761_v26  ;;  %v9923_v26 = vld [vmem:[#allocation14] sm:$0x1f] }
 0x371   :  { %6268 = vmatpush1.bf16.msra.mxu0 %v8759_v27  ;;  %v3695_v27 = vrot.slane %v9923_v26, %v9866_v58 }
 0x372   :  { %6269 = vmatprep.subr.bf16.mxu0 %v8767_v28  ;;  %v3699_v28 = vrot.slane %v9923_v26, %v9871_v31 }
 0x375   :  { %6270 = vmatpush1.bf16.msra.mxu0 %v8765_v19 }
 0x376   :  { %6271 = vmatprep.subr.bf16.mxu0 %v8773_v29 }
 0x379   :  { %6272 = vmatpush1.bf16.msra.mxu0 %v8771_v52 }
 0x37a   :  { %6273 = vmatprep.subr.bf16.mxu0 %v8779_v15  ;;  %v8827_v15 = vld [vmem:[#allocation16 + $0x6e4] ss:$40 sps:$4 sm:$0xff]  }
 0x37d   :  { %6274 = vmatpush1.bf16.msra.mxu0 %v8777_v18  ;;  %v8825_v18 = vld [vmem:[#allocation16 + $0x6e0] ss:$40 sps:$4 sm:$0xff]  }
 0x37e   :  { %6275 = vmatprep.subr.bf16.mxu0 %v8785_v6  ;;  %v8833_v6 = vld [vmem:[#allocation16 + $0x734] ss:$40 sps:$4 sm:$0xff]  }
 0x381   :  { %6276 = vmatpush1.bf16.msra.mxu0 %v8783_v21  ;;  %v8831_v21 = vld [vmem:[#allocation16 + $0x730] ss:$40 sps:$4 sm:$0xff]  }
 0x382   :  { %6286 = vmatprep.subr.bf16.mxu0 %v8791_v23  ;;  %v8839_v23 = vld [vmem:[#allocation16 + $0x784] ss:$40 sps:$4 sm:$0xff]  }
 0x3d4   :  { %v7972_v48 = vpop.f32.mrb[20].mxu1 }
 0x3d5   :  { %v7973_v41 = vpop.f32.mrb[21].mxu1 }
 0x3d6   :  { %v7974_v17 = vadd.f32 %v7973_v41, %v7972_v48  ;;  %v7975_v44 = vpop.f32.mrb[22].mxu1  ;;  %v7428_v48 = vcombine.low %v3688_v33, %v3688_v33 }
 0x3d7   :  { %v7976_v11 = vpop.f32.mrb[23].mxu1 }
 0x3d8   :  { %v3625_v45 = vadd.f32 %v7974_v17, %v3585_v43  ;;  %v3768_v41 = vsel %vm3760_vm5, %v7428_v48, 0  ;;  %v8691_v43 = vld [vmem:[#allocation13 + $0x10] ss:$20 sps:$4 sm:$0xff]   ;;  %v8692_v17 = vld [vmem:[#allocation13 + $0x38] ss:$0 sps:$4 sm:$0x33]   ;;  %v3707_v48 = vrot.slane %v9923_v26, %v9892_v61 }
 0x3d9   :  { %v3774_v44 = vsel %vm3760_vm5, %v8692_v17, 0  ;;  %v8698_v11 = vld [vmem:[#allocation16 + $0xc] ss:$40 sps:$4 sm:$0xff]   ;;  %v8800_v17 = vld [vmem:[#allocation16 + $0x55c] ss:$40 sps:$4 sm:$0xff]  }
 0x417   :  { %v3664_v24 = vpop.f32.mrb[16].mxu0 }
 0x418   :  { %v9905_v46 = vadd.f32 %v3664_v24, %v3625_v45  ;;  %v8002_v47 = vpop.f32.mrb[17].mxu0  ;;  %v8696_v45 = vld [vmem:[#allocation16 + $0x8] ss:$40 sps:$4 sm:$0xff]   ;;  %v8704_v24 = vld [vmem:[#allocation16 + $0x5c] ss:$40 sps:$4 sm:$0xff]  }
 0x419   :  { %v3667_v49 = vpop.f32.mrb[18].mxu0  ;;  %v8710_v47 = vld [vmem:[#allocation16 + $0xac] ss:$40 sps:$4 sm:$0xff]  }
 0x41a   :  { %v3670_v50 = vmul.f32 0.5, %v9905_v46  ;;  %v8003_v51 = vpop.f32.mrb[19].mxu0  ;;  %6968 = vst.msk [vmem:[#allocation20] sm:$0xff] %vm6967_vm4, %v9905_v46  ;;  %v8708_v49 = vld [vmem:[#allocation16 + $0xa8] ss:$40 sps:$4 sm:$0xff]  }
 0x41b   :  { %v8714_v51 = vld [vmem:[#allocation16 + $0xf8] ss:$40 sps:$4 sm:$0xff]  }
 0x41c   :  { %v3671_v54 = vmul.f32 1.442695, %v3670_v50  ;;  %v8716_v50 = vld [vmem:[#allocation16 + $0xfc] ss:$40 sps:$4 sm:$0xff]  }
 0x41e   :  { %9258 = vpow2.f32 %v3671_v54  ;;  %v8728_v54 = vld [vmem:[#allocation16 + $0x19c] ss:$40 sps:$4 sm:$0xff]  }
 0x428   :  { %v9259_v63 = vpop.eup %9258 }
 0x429   :  { %3675 = vrot.lane.b32.xlu0 %v9259_v63, %s9599_s9  ;;  %v8738_v63 = vld [vmem:[#allocation16 + $0x238] ss:$40 sps:$4 sm:$0xff]  }
 0x49b   :  { %v3676_v30 = vpop.permute.xlu0 %3675 }
 0x49c   :  { %v3678_v32 = vmul.f32 %v3676_v30, %v3673_v60 }
 0x49e   :  { %v3679_v35 = vadd.f32 %v3678_v32, %v9905_v46  ;;  %v8702_v46 = vld [vmem:[#allocation16 + $0x58] ss:$40 sps:$4 sm:$0xff]  }
 0x4a0   :  { %v3680_v39 = vpack.c.bf16 %v3679_v35, %v3679_v35 }
 0x4a2   :  { %7432 = vmatmul.mubr.msk.bf16.vlgmr.msra.gmra.mrb[24].mxu1 %vm3756_vm6, %v3680_v39 }
 0x4a3   :  { %3818 = vmatpush1.bf16.msra.mxu1 %v8686_v38  ;;  %3849 = vmatprep.mubr.bf16.mxu1 %v9596_v37 }
 0x4a4   :  { %7433 = vmatprep.subr.msk.bf16.mxu1 %vm3760_vm5, %v7429_v40  ;;  %v8792_v40 = vld [vmem:[#allocation16 + $0x508] ss:$40 sps:$4 sm:$0xff]  }
 0x4a7   :  { %3820 = vmatpush1.bf16.msra.mxu1 %v3768_v41 }
 0x4a8   :  { %8004 = vmatprep.subr.bf16.mxu1 %v9597_v42 }
 0x4aa   :  { %7434 = vmatmul.mubr.msk.bf16.vlgmr.msra.gmra.mrb[28].mxu1 %vm3756_vm6, %v3680_v39 }
 0x4ab   :  { %8005 = vmatpush3.bf16.msra.mxu1 %v8691_v43  ;;  %8008 = vmatprep.mubr.msk.bf16.mxu1 %vm9598_vm2, %v9597_v42  ;;  %v8797_v43 = vld [vmem:[#allocation16 + $0x554] ss:$40 sps:$4 sm:$0xff]  }
 0x4ac   :  { %8006 = vmatprep.subr.bf16.mxu1 %v9597_v42  ;;  %v8722_v42 = vld [vmem:[#allocation16 + $0x14c] ss:$40 sps:$4 sm:$0xff]  }
 0x4af   :  { %8007 = vmatpush3.bf16.msra.mxu1 %v3774_v44 }
 0x4b0   :  { %6368 = vmatprep.subr.bf16.mxu1 %v8698_v11 }
 0x4b2   :  { %8009 = vmatmul.mubr.msk.bf16.vlgmr.msra.gmra.mrb[32].mxu1 %vm3756_vm6, %v3680_v39  ;;  %v8789_v39 = vld [vmem:[#allocation16 + $0x500] ss:$40 sps:$4 sm:$0xff]  }
 0x4b3   :  { %6369 = vmatpush1.bf16.msra.mxu1 %v8696_v45 }
 0x4b4   :  { %6370 = vmatprep.subr.bf16.mxu1 %v8704_v24 }
 0x4b7   :  { %6371 = vmatpush1.bf16.msra.mxu1 %v8702_v46  ;;  %v8795_v46 = vld [vmem:[#allocation16 + $0x550] ss:$40 sps:$4 sm:$0xff]  }
 0x4b8   :  { %6372 = vmatprep.subr.bf16.mxu1 %v8710_v47  ;;  %v8798_v47 = vld [vmem:[#allocation16 + $0x558] ss:$40 sps:$4 sm:$0xff]  }
 0x4bb   :  { %6373 = vmatpush1.bf16.msra.mxu1 %v8708_v49 }
 0x4bc   :  { %6374 = vmatprep.subr.bf16.mxu1 %v8716_v50  ;;  %v8803_v50 = vld [vmem:[#allocation16 + $0x5a4] ss:$40 sps:$4 sm:$0xff]  }
 0x4bf   :  { %6375 = vmatpush1.bf16.msra.mxu1 %v8714_v51  ;;  %v8806_v51 = vld [vmem:[#allocation16 + $0x5ac] ss:$40 sps:$4 sm:$0xff]  }
 0x4c0   :  { %6376 = vmatprep.subr.bf16.mxu1 %v8722_v42 }
 0x4c3   :  { %6377 = vmatpush1.bf16.msra.mxu1 %v8720_v53 }
 0x4c4   :  { %6378 = vmatprep.subr.bf16.mxu1 %v8728_v54  ;;  %v8801_v54 = vld [vmem:[#allocation16 + $0x5a0] ss:$40 sps:$4 sm:$0xff]  }
 0x4c7   :  { %6379 = vmatpush1.bf16.msra.mxu1 %v8726_v55  ;;  %v8804_v55 = vld [vmem:[#allocation16 + $0x5a8] ss:$40 sps:$4 sm:$0xff]  }
 0x4c8   :  { %6380 = vmatprep.subr.bf16.mxu1 %v8734_v57  ;;  %v8809_v57 = vld [vmem:[#allocation16 + $0x5f4] ss:$40 sps:$4 sm:$0xff]  }
 0x4cb   :  { %6381 = vmatpush1.bf16.msra.mxu1 %v8732_v59  ;;  %v8812_v59 = vld [vmem:[#allocation16 + $0x5fc] ss:$40 sps:$4 sm:$0xff]  }
 0x4cc   :  { %6382 = vmatprep.subr.bf16.mxu1 %v8740_v62 }
 0x4cf   :  { %6383 = vmatpush1.bf16.msra.mxu1 %v8738_v63 }
 0x4d0   :  { %6384 = vmatprep.subr.bf16.mxu1 %v8746_v0 }
 0x4d3   :  { %6385 = vmatpush1.bf16.msra.mxu1 %v8744_v1  ;;  %v8807_v1 = vld [vmem:[#allocation16 + $0x5f0] ss:$40 sps:$4 sm:$0xff]  }
 0x4d4   :  { %6386 = vmatprep.subr.bf16.mxu1 %v8752_v2  ;;  %v8810_v2 = vld [vmem:[#allocation16 + $0x5f8] ss:$40 sps:$4 sm:$0xff]  }
 0x4d7   :  { %6387 = vmatpush1.bf16.msra.mxu1 %v8750_v3 }
 0x4d8   :  { %6388 = vmatprep.subr.bf16.mxu1 %v8758_v5  ;;  %v8815_v5 = vld [vmem:[#allocation16 + $0x644] ss:$40 sps:$4 sm:$0xff]  }
 0x4db   :  { %6389 = vmatpush1.bf16.msra.mxu1 %v8756_v8  ;;  %v8818_v8 = vld [vmem:[#allocation16 + $0x64c] ss:$40 sps:$4 sm:$0xff]  }
 0x4dc   :  { %6390 = vmatprep.subr.bf16.mxu1 %v8764_v7  ;;  %v8813_v7 = vld [vmem:[#allocation16 + $0x640] ss:$40 sps:$4 sm:$0xff]  }
 0x4df   :  { %6391 = vmatpush1.bf16.msra.mxu1 %v8762_v9  ;;  %v8816_v9 = vld [vmem:[#allocation16 + $0x648] ss:$40 sps:$4 sm:$0xff]  }
 0x4e0   :  { %6392 = vmatprep.subr.bf16.mxu1 %v8770_v10  ;;  %v8821_v10 = vld [vmem:[#allocation16 + $0x694] ss:$40 sps:$4 sm:$0xff]  }
 0x4e3   :  { %6393 = vmatpush1.bf16.msra.mxu1 %v8768_v36  ;;  %v8824_v36 = vld [vmem:[#allocation16 + $0x69c] ss:$40 sps:$4 sm:$0xff]  }
 0x4e4   :  { %6394 = vmatprep.subr.bf16.mxu1 %v8776_v13  ;;  %v8819_v13 = vld [vmem:[#allocation16 + $0x690] ss:$40 sps:$4 sm:$0xff]  }
 0x4e7   :  { %6395 = vmatpush1.bf16.msra.mxu1 %v8774_v14  ;;  %v8822_v14 = vld [vmem:[#allocation16 + $0x698] ss:$40 sps:$4 sm:$0xff]  }
 0x4e8   :  { %6396 = vmatprep.subr.bf16.mxu1 %v8782_v16  ;;  %v8830_v16 = vld [vmem:[#allocation16 + $0x6ec] ss:$40 sps:$4 sm:$0xff]  }
 0x4eb   :  { %6397 = vmatpush1.bf16.msra.mxu1 %v8780_v4  ;;  %v8828_v4 = vld [vmem:[#allocation16 + $0x6e8] ss:$40 sps:$4 sm:$0xff]  }
 0x4ec   :  { %6398 = vmatprep.subr.bf16.mxu1 %v8788_v20  ;;  %v8836_v20 = vld [vmem:[#allocation16 + $0x73c] ss:$40 sps:$4 sm:$0xff]  }
 0x4ef   :  { %6399 = vmatpush1.bf16.msra.mxu1 %v8786_v22  ;;  %v8834_v22 = vld [vmem:[#allocation16 + $0x738] ss:$40 sps:$4 sm:$0xff]  }
 0x4f0   :  { %6409 = vmatprep.subr.bf16.mxu1 %v8794_v25  ;;  %v8842_v25 = vld [vmem:[#allocation16 + $0x78c] ss:$40 sps:$4 sm:$0xff]  }
 0x575   :  { %v3810_v19 = vpop.f32.mrb[24].mxu1 }
 0x576   :  { %v3811_v29 = vadd.f32 %v3810_v19, %v3695_v27  ;;  %v3812_v52 = vpop.f32.mrb[25].mxu1  ;;  %v8837_v27 = vld [vmem:[#allocation16 + $0x780] ss:$40 sps:$4 sm:$0xff]   ;;  %v8845_v19 = vld [vmem:[#allocation16 + $0x7d4] ss:$40 sps:$4 sm:$0xff]  }
 0x577   :  { %v3813_v60 = vadd.f32 %v3812_v52, %v3699_v28  ;;  %v3814_v30 = vpop.f32.mrb[26].mxu1  ;;  %v8840_v28 = vld [vmem:[#allocation16 + $0x788] ss:$40 sps:$4 sm:$0xff]  }
 0x578   :  { %v3898_v32 = vmax.f32 %v3811_v29, 0.0  ;;  %v3815_v33 = vpop.f32.mrb[27].mxu1  ;;  %v8848_v29 = vld [vmem:[#allocation16 + $0x7dc] ss:$40 sps:$4 sm:$0xff]   ;;  %v8843_v52 = vld [vmem:[#allocation16 + $0x7d0] ss:$40 sps:$4 sm:$0xff]  }
 0x579   :  { %v3899_v35 = vmax.f32 %v3813_v60, 0.0  ;;  %v8846_v60 = vld [vmem:[#allocation16 + $0x7d8] ss:$40 sps:$4 sm:$0xff]   ;;  %v8851_v30 = vld [vmem:[#allocation16 + $0x824] ss:$40 sps:$4 sm:$0xff]  }
 0x57a   :  { %v9933_v41 = vpack.c.bf16 %v3898_v32, %v3898_v32  ;;  %v8854_v32 = vld [vmem:[#allocation16 + $0x82c] ss:$40 sps:$4 sm:$0xff]   ;;  %v8849_v33 = vld [vmem:[#allocation16 + $0x820] ss:$40 sps:$4 sm:$0xff]  }
 0x57b   :  { %v9929_v38 = vpack.c.bf16 %v3899_v35, %v3899_v35  ;;  %v8852_v35 = vld [vmem:[#allocation16 + $0x828] ss:$40 sps:$4 sm:$0xff]  }
 0x57d   :  { %v9935_v44 = vpop.f32.mrb[28].mxu1  ;;  %6277 = vmatprep.mubr.bf16.mxu0 %v9929_v38  ;;  %6400 = vmatprep.mubr.bf16.mxu1 %v9929_v38 }
 0x57e   :  { %v3853_v11 = vpop.f32.mrb[29].mxu1  ;;  %6278 = vmatmul.mubr.bf16.vlgmr.msra.gmra.mrb[20].mxu0 %v9933_v41  ;;  %6401 = vmatmul.mubr.bf16.vlgmr.msra.gmra.mrb[36].mxu1 %v9933_v41 }
 0x57f   :  { %v3854_v45 = vadd.f32 %v3853_v11, %v3707_v48  ;;  %6287 = vmatpush1.bf16.msra.mxu0 %v8789_v39  ;;  %6410 = vmatpush1.bf16.msra.mxu1 %v8792_v40  ;;  %v3855_v24 = vpop.f32.mrb[30].mxu1  ;;  %v8857_v39 = vld [vmem:[#allocation16 + $0x874] ss:$40 sps:$4 sm:$0xff]   ;;  %v8855_v48 = vld [vmem:[#allocation16 + $0x870] ss:$40 sps:$4 sm:$0xff]  }
 0x580   :  { %v3856_v49 = vpop.f32.mrb[31].mxu1  ;;  %6288 = vmatprep.subr.bf16.mxu0 %v8797_v43  ;;  %6411 = vmatprep.subr.bf16.mxu1 %v8800_v17  ;;  %v8860_v40 = vld [vmem:[#allocation16 + $0x87c] ss:$40 sps:$4 sm:$0xff]   ;;  %v8858_v43 = vld [vmem:[#allocation16 + $0x878] ss:$40 sps:$4 sm:$0xff]  }
 0x581   :  { %v3901_v42 = vmax.f32 %v3854_v45, 0.0  ;;  %v8863_v17 = vld [vmem:[#allocation16 + $0x8c4] ss:$40 sps:$4 sm:$0xff]   ;;  %v8861_v45 = vld [vmem:[#allocation16 + $0x8c0] ss:$40 sps:$4 sm:$0xff]  }
 0x582   :  { %v8866_v11 = vld [vmem:[#allocation16 + $0x8cc] ss:$40 sps:$4 sm:$0xff]   ;;  %v8864_v24 = vld [vmem:[#allocation16 + $0x8c8] ss:$40 sps:$4 sm:$0xff]  }
 0x583   :  { %v9941_v53 = vpack.c.bf16 %v3901_v42, %v3901_v42  ;;  %6289 = vmatpush1.bf16.msra.mxu0 %v8795_v46  ;;  %6412 = vmatpush1.bf16.msra.mxu1 %v8798_v47  ;;  %v8869_v46 = vld [vmem:[#allocation16 + $0x914] ss:$40 sps:$4 sm:$0xff]   ;;  %v8867_v49 = vld [vmem:[#allocation16 + $0x910] ss:$40 sps:$4 sm:$0xff]   ;;  %v8875_v42 = vld [vmem:[#allocation16 + $0x964] ss:$40 sps:$4 sm:$0xff]  }
 0x584   :  { %6290 = vmatprep.subr.bf16.mxu0 %v8803_v50  ;;  %6413 = vmatprep.subr.bf16.mxu1 %v8806_v51  ;;  %v8872_v47 = vld [vmem:[#allocation16 + $0x91c] ss:$40 sps:$4 sm:$0xff]   ;;  %v8870_v50 = vld [vmem:[#allocation16 + $0x918] ss:$40 sps:$4 sm:$0xff]   ;;  %v3703_v51 = vrot.slane %v9923_v26, %v9889_v34 }
 0x585   :  { %v9943_v62 = vpop.f32.mrb[32].mxu1  ;;  %6318 = vmatprep.mubr.bf16.mxu0 %v9941_v53  ;;  %6441 = vmatprep.mubr.bf16.mxu1 %v9941_v53 }
 0x586   :  { %v8010_v63 = vpop.f32.mrb[33].mxu1 }
 0x587   :  { %6291 = vmatpush1.bf16.msra.mxu0 %v8801_v54  ;;  %6414 = vmatpush1.bf16.msra.mxu1 %v8804_v55  ;;  %v3895_v0 = vpop.f32.mrb[34].mxu1  ;;  %v8878_v54 = vld [vmem:[#allocation16 + $0x96c] ss:$40 sps:$4 sm:$0xff]   ;;  %v8873_v55 = vld [vmem:[#allocation16 + $0x960] ss:$40 sps:$4 sm:$0xff]  }
 0x588   :  { %v8011_v3 = vpop.f32.mrb[35].mxu1  ;;  %6292 = vmatprep.subr.bf16.mxu0 %v8809_v57  ;;  %6415 = vmatprep.subr.bf16.mxu1 %v8812_v59  ;;  %v8876_v57 = vld [vmem:[#allocation16 + $0x968] ss:$40 sps:$4 sm:$0xff]   ;;  %v3852_v59 = vadd.f32 %v9935_v44, %v3703_v51  ;;  %v8881_v63 = vld [vmem:[#allocation16 + $0x9b4] ss:$40 sps:$4 sm:$0xff]  }
 0x589   :  { %v8884_v0 = vld [vmem:[#allocation16 + $0x9bc] ss:$40 sps:$4 sm:$0xff]   ;;  %v8931_v51 = vld [vmem:[#allocation16 + $0xb0] ss:$40 sps:$4 sm:$0xff]  }
 0x58a   :  { %v3900_v3 = vmax.f32 %v3852_v59, 0.0  ;;  %v8893_v44 = vld [vmem:[#allocation16 + $0xa54] ss:$40 sps:$4 sm:$0xff]   ;;  %v8940_v59 = vld [vmem:[#allocation16 + $0x108] ss:$40 sps:$4 sm:$0xff]  }
 0x58b   :  { %6293 = vmatpush1.bf16.msra.mxu0 %v8807_v1  ;;  %6416 = vmatpush1.bf16.msra.mxu1 %v8810_v2  ;;  %v8879_v1 = vld [vmem:[#allocation16 + $0x9b0] ss:$40 sps:$4 sm:$0xff]  }
 0x58c   :  { %6294 = vmatprep.subr.bf16.mxu0 %v8815_v5  ;;  %6417 = vmatprep.subr.bf16.mxu1 %v8818_v8  ;;  %v8882_v2 = vld [vmem:[#allocation16 + $0x9b8] ss:$40 sps:$4 sm:$0xff]   ;;  %v8887_v5 = vld [vmem:[#allocation16 + $0xa04] ss:$40 sps:$4 sm:$0xff]  }
 0x58d   :  { %v8890_v8 = vld [vmem:[#allocation16 + $0xa0c] ss:$40 sps:$4 sm:$0xff]  }
 0x58f   :  { %6295 = vmatpush1.bf16.msra.mxu0 %v8813_v7  ;;  %6418 = vmatpush1.bf16.msra.mxu1 %v8816_v9  ;;  %v8885_v7 = vld [vmem:[#allocation16 + $0xa00] ss:$40 sps:$4 sm:$0xff]  }
 0x590   :  { %6296 = vmatprep.subr.bf16.mxu0 %v8821_v10  ;;  %6419 = vmatprep.subr.bf16.mxu1 %v8824_v36  ;;  %v8888_v9 = vld [vmem:[#allocation16 + $0xa08] ss:$40 sps:$4 sm:$0xff]   ;;  %v9950_v10 = vpack.c.bf16 %v3900_v3, %v3900_v3  ;;  %v8896_v36 = vld [vmem:[#allocation16 + $0xa5c] ss:$40 sps:$4 sm:$0xff]  }
 0x591   :  { %v8951_v3 = vld [vmem:[#allocation16 + $0x1a4] ss:$40 sps:$4 sm:$0xff]  }
 0x593   :  { %6297 = vmatpush1.bf16.msra.mxu0 %v8819_v13  ;;  %6420 = vmatpush1.bf16.msra.mxu1 %v8822_v14  ;;  %v8891_v13 = vld [vmem:[#allocation16 + $0xa50] ss:$40 sps:$4 sm:$0xff]  }
 0x594   :  { %6298 = vmatprep.subr.bf16.mxu0 %v8827_v15  ;;  %6421 = vmatprep.subr.bf16.mxu1 %v8830_v16  ;;  %v8894_v14 = vld [vmem:[#allocation16 + $0xa58] ss:$40 sps:$4 sm:$0xff]   ;;  %v8899_v15 = vld [vmem:[#allocation16 + $0xaa4] ss:$40 sps:$4 sm:$0xff]  }
 0x595   :  { %v8902_v16 = vld [vmem:[#allocation16 + $0xaac] ss:$40 sps:$4 sm:$0xff]  }
 0x597   :  { %6299 = vmatpush1.bf16.msra.mxu0 %v8825_v18  ;;  %6422 = vmatpush1.bf16.msra.mxu1 %v8828_v4  ;;  %v8897_v18 = vld [vmem:[#allocation16 + $0xaa0] ss:$40 sps:$4 sm:$0xff]  }
 0x598   :  { %6300 = vmatprep.subr.bf16.mxu0 %v8833_v6  ;;  %6423 = vmatprep.subr.bf16.mxu1 %v8836_v20  ;;  %v8900_v4 = vld [vmem:[#allocation16 + $0xaa8] ss:$40 sps:$4 sm:$0xff]   ;;  %v8905_v6 = vld [vmem:[#allocation16 + $0xaf4] ss:$40 sps:$4 sm:$0xff]  }
 0x599   :  { %v8908_v20 = vld [vmem:[#allocation16 + $0xafc] ss:$40 sps:$4 sm:$0xff]  }
 0x59b   :  { %6301 = vmatpush1.bf16.msra.mxu0 %v8831_v21  ;;  %6424 = vmatpush1.bf16.msra.mxu1 %v8834_v22  ;;  %v8903_v21 = vld [vmem:[#allocation16 + $0xaf0] ss:$40 sps:$4 sm:$0xff]  }
 0x59c   :  { %6302 = vmatprep.subr.bf16.mxu0 %v8839_v23  ;;  %6425 = vmatprep.subr.bf16.mxu1 %v8842_v25  ;;  %v8906_v22 = vld [vmem:[#allocation16 + $0xaf8] ss:$40 sps:$4 sm:$0xff]   ;;  %v3711_v23 = vrot.slane %v9923_v26, %v9900_v12  ;;  %v8911_v25 = vld [vmem:[#allocation16 + $0xb44] ss:$40 sps:$4 sm:$0xff]  }
 0x59f   :  { %6303 = vmatpush1.bf16.msra.mxu0 %v8837_v27  ;;  %6426 = vmatpush1.bf16.msra.mxu1 %v8840_v28  ;;  %v8914_v27 = vld [vmem:[#allocation16 + $0xb4c] ss:$40 sps:$4 sm:$0xff]  }
 0x5a0   :  { %6304 = vmatprep.subr.bf16.mxu0 %v8845_v19  ;;  %6427 = vmatprep.subr.bf16.mxu1 %v8848_v29  ;;  %v4278_v28 = vld [vmem:[#allocation16 + $0xb90] sm:$0xff]  ;;  %v4279_v19 = vld [vmem:[#allocation16 + $0xb98] sm:$0xff]  ;;  %v8909_v29 = vld [vmem:[#allocation16 + $0xb40] ss:$40 sps:$4 sm:$0xff]  }
 0x5a3   :  { %6305 = vmatpush1.bf16.msra.mxu0 %v8843_v52  ;;  %6428 = vmatpush1.bf16.msra.mxu1 %v8846_v60  ;;  %v8912_v52 = vld [vmem:[#allocation16 + $0xb48] ss:$40 sps:$4 sm:$0xff]   ;;  %v7807_v60 = vcombine.high %v4278_v28, %v4278_v28 }
 0x5a4   :  { %6306 = vmatprep.subr.bf16.mxu0 %v8851_v30  ;;  %6429 = vmatprep.subr.bf16.mxu1 %v8854_v32  ;;  %v7806_v30 = vcombine.low %v4278_v28, %v4278_v28  ;;  %v3893_v32 = vadd.f32 %v9943_v62, %v3711_v23  ;;  %v8919_v62 = vld [vmem:[#allocation16 + $0x10] ss:$40 sps:$4 sm:$0xff]   ;;  %v8978_v23 = vld [vmem:[#allocation16 + $0x2ec] ss:$40 sps:$4 sm:$0xff]  }
 0x5a5   :  { %v8981_v28 = vld [vmem:[#allocation16 + $0x334] ss:$40 sps:$4 sm:$0xff]  }
 0x5a6   :  { %v6216_v26 = vsel %vm3546_vm1, %v7806_v30, 0  ;;  %v8990_v30 = vld [vmem:[#allocation16 + $0x38c] ss:$40 sps:$4 sm:$0xff]  }
 0x5a7   :  { %6307 = vmatpush1.bf16.msra.mxu0 %v8849_v33  ;;  %6430 = vmatpush1.bf16.msra.mxu1 %v8852_v35  ;;  %v7809_v33 = vcombine.high %v4279_v19, %v4279_v19  ;;  %v7808_v35 = vcombine.low %v4279_v19, %v4279_v19  ;;  %v8984_v19 = vld [vmem:[#allocation16 + $0x33c] ss:$40 sps:$4 sm:$0xff]  }
 0x5a8   :  { %6308 = vmatprep.subr.bf16.mxu0 %v8857_v39  ;;  %6431 = vmatprep.subr.bf16.mxu1 %v8860_v40  ;;  %v3902_v39 = vmax.f32 %v3893_v32, 0.0  ;;  %v8985_v32 = vld [vmem:[#allocation16 + $0x380] ss:$40 sps:$4 sm:$0xff]  }
 0x5a9   :  { %v6222_v40 = vsel %vm3546_vm1, %v7808_v35, 0  ;;  %v8993_v35 = vld [vmem:[#allocation16 + $0x3d4] ss:$40 sps:$4 sm:$0xff]  }
 0x5ab   :  { %6309 = vmatpush1.bf16.msra.mxu0 %v8855_v48  ;;  %6432 = vmatpush1.bf16.msra.mxu1 %v8858_v43  ;;  %v8921_v48 = vld [vmem:[#allocation16 + $0x14] ss:$40 sps:$4 sm:$0xff]  }
 0x5ac   :  { %6310 = vmatprep.subr.bf16.mxu0 %v8863_v17  ;;  %6433 = vmatprep.subr.bf16.mxu1 %v8866_v11  ;;  %v8924_v43 = vld [vmem:[#allocation16 + $0x1c] ss:$40 sps:$4 sm:$0xff]   ;;  %v9963_v17 = vpack.c.bf16 %v3902_v39, %v3902_v39  ;;  %v8922_v11 = vld [vmem:[#allocation16 + $0x18] ss:$40 sps:$4 sm:$0xff]  }
 0x5ad   :  { %v8991_v39 = vld [vmem:[#allocation16 + $0x3d0] ss:$40 sps:$4 sm:$0xff]  }
 0x5af   :  { %6311 = vmatpush1.bf16.msra.mxu0 %v8861_v45  ;;  %6434 = vmatpush1.bf16.msra.mxu1 %v8864_v24  ;;  %v8927_v45 = vld [vmem:[#allocation16 + $0x64] ss:$40 sps:$4 sm:$0xff]  }
 0x5b0   :  { %6312 = vmatprep.subr.bf16.mxu0 %v8869_v46  ;;  %6435 = vmatprep.subr.bf16.mxu1 %v8872_v47  ;;  %v8930_v24 = vld [vmem:[#allocation16 + $0x6c] ss:$40 sps:$4 sm:$0xff]   ;;  %v8925_v46 = vld [vmem:[#allocation16 + $0x60] ss:$40 sps:$4 sm:$0xff]  }
 0x5b1   :  { %v8928_v47 = vld [vmem:[#allocation16 + $0x68] ss:$40 sps:$4 sm:$0xff]  }
 0x5b3   :  { %6313 = vmatpush1.bf16.msra.mxu0 %v8867_v49  ;;  %6436 = vmatpush1.bf16.msra.mxu1 %v8870_v50  ;;  %v8933_v49 = vld [vmem:[#allocation16 + $0xb4] ss:$40 sps:$4 sm:$0xff]  }
 0x5b4   :  { %6314 = vmatprep.subr.bf16.mxu0 %v8875_v42  ;;  %6437 = vmatprep.subr.bf16.mxu1 %v8878_v54  ;;  %v8936_v50 = vld [vmem:[#allocation16 + $0xbc] ss:$40 sps:$4 sm:$0xff]   ;;  %v8934_v42 = vld [vmem:[#allocation16 + $0xb8] ss:$40 sps:$4 sm:$0xff]  }
 0x5b5   :  { %v8939_v54 = vld [vmem:[#allocation16 + $0x104] ss:$40 sps:$4 sm:$0xff]  }
 0x5b7   :  { %6315 = vmatpush1.bf16.msra.mxu0 %v8873_v55  ;;  %6438 = vmatpush1.bf16.msra.mxu1 %v8876_v57  ;;  %v8942_v55 = vld [vmem:[#allocation16 + $0x10c] ss:$40 sps:$4 sm:$0xff]   ;;  %v8937_v57 = vld [vmem:[#allocation16 + $0x100] ss:$40 sps:$4 sm:$0xff]  }
 0x5b8   :  { %6316 = vmatprep.subr.bf16.mxu0 %v8881_v63  ;;  %6439 = vmatprep.subr.bf16.mxu1 %v8884_v0  ;;  %v8945_v63 = vld [vmem:[#allocation16 + $0x154] ss:$40 sps:$4 sm:$0xff]  }
 0x5b9   :  { %v8948_v0 = vld [vmem:[#allocation16 + $0x15c] ss:$40 sps:$4 sm:$0xff]  }
 0x5bb   :  { %6317 = vmatpush1.bf16.msra.mxu0 %v8879_v1  ;;  %6440 = vmatpush1.bf16.msra.mxu1 %v8882_v2  ;;  %v8943_v1 = vld [vmem:[#allocation16 + $0x150] ss:$40 sps:$4 sm:$0xff]  }
 0x5bc   :  { %6327 = vmatprep.subr.bf16.mxu0 %v8887_v5  ;;  %6450 = vmatprep.subr.bf16.mxu1 %v8890_v8  ;;  %v8946_v2 = vld [vmem:[#allocation16 + $0x158] ss:$40 sps:$4 sm:$0xff]   ;;  %v8954_v5 = vld [vmem:[#allocation16 + $0x1ac] ss:$40 sps:$4 sm:$0xff]  }
 0x5bd   :  { %v8949_v8 = vld [vmem:[#allocation16 + $0x1a0] ss:$40 sps:$4 sm:$0xff]  }
 0x5be   :  { %6319 = vmatmul.mubr.bf16.vlgmr.msra.gmra.mrb[20].mxu0 %v9950_v10  ;;  %6442 = vmatmul.mubr.bf16.vlgmr.msra.gmra.mrb[36].mxu1 %v9950_v10 }
 0x5bf   :  { %6328 = vmatpush1.bf16.msra.mxu0 %v8885_v7  ;;  %6451 = vmatpush1.bf16.msra.mxu1 %v8888_v9  ;;  %v8952_v7 = vld [vmem:[#allocation16 + $0x1a8] ss:$40 sps:$4 sm:$0xff]   ;;  %v8957_v9 = vld [vmem:[#allocation16 + $0x1f4] ss:$40 sps:$4 sm:$0xff]  }
 0x5c0   :  { %6329 = vmatprep.subr.bf16.mxu0 %v8893_v44  ;;  %6452 = vmatprep.subr.bf16.mxu1 %v8896_v36  ;;  %v8960_v44 = vld [vmem:[#allocation16 + $0x1fc] ss:$40 sps:$4 sm:$0xff]   ;;  %v8955_v36 = vld [vmem:[#allocation16 + $0x1f0] ss:$40 sps:$4 sm:$0xff]  }
 0x5c1   :  { %6359 = vmatprep.mubr.bf16.mxu0 %v9596_v37  ;;  %6482 = vmatprep.mubr.bf16.mxu1 %v9596_v37 }
 0x5c3   :  { %6330 = vmatpush1.bf16.msra.mxu0 %v8891_v13  ;;  %6453 = vmatpush1.bf16.msra.mxu1 %v8894_v14  ;;  %v8958_v13 = vld [vmem:[#allocation16 + $0x1f8] ss:$40 sps:$4 sm:$0xff]   ;;  %v8963_v14 = vld [vmem:[#allocation16 + $0x244] ss:$40 sps:$4 sm:$0xff]  }
 0x5c4   :  { %6331 = vmatprep.subr.bf16.mxu0 %v8899_v15  ;;  %6454 = vmatprep.subr.bf16.mxu1 %v8902_v16  ;;  %v8966_v15 = vld [vmem:[#allocation16 + $0x24c] ss:$40 sps:$4 sm:$0xff]   ;;  %v8961_v16 = vld [vmem:[#allocation16 + $0x240] ss:$40 sps:$4 sm:$0xff]  }
 0x5c7   :  { %6332 = vmatpush1.bf16.msra.mxu0 %v8897_v18  ;;  %6455 = vmatpush1.bf16.msra.mxu1 %v8900_v4  ;;  %v8964_v18 = vld [vmem:[#allocation16 + $0x248] ss:$40 sps:$4 sm:$0xff]   ;;  %v8969_v4 = vld [vmem:[#allocation16 + $0x294] ss:$40 sps:$4 sm:$0xff]  }
 0x5c8   :  { %6333 = vmatprep.subr.bf16.mxu0 %v8905_v6  ;;  %6456 = vmatprep.subr.bf16.mxu1 %v8908_v20  ;;  %v8972_v6 = vld [vmem:[#allocation16 + $0x29c] ss:$40 sps:$4 sm:$0xff]   ;;  %v8967_v20 = vld [vmem:[#allocation16 + $0x290] ss:$40 sps:$4 sm:$0xff]  }
 0x5cb   :  { %6334 = vmatpush1.bf16.msra.mxu0 %v8903_v21  ;;  %6457 = vmatpush1.bf16.msra.mxu1 %v8906_v22  ;;  %v8970_v21 = vld [vmem:[#allocation16 + $0x298] ss:$40 sps:$4 sm:$0xff]   ;;  %v8975_v22 = vld [vmem:[#allocation16 + $0x2e4] ss:$40 sps:$4 sm:$0xff]  }
 0x5cc   :  { %6335 = vmatprep.subr.bf16.mxu0 %v8911_v25  ;;  %6458 = vmatprep.subr.bf16.mxu1 %v8914_v27  ;;  %v8973_v25 = vld [vmem:[#allocation16 + $0x2e0] ss:$40 sps:$4 sm:$0xff]  }
 0x5cd   :  { %v8976_v27 = vld [vmem:[#allocation16 + $0x2e8] ss:$40 sps:$4 sm:$0xff]  }
 0x5cf   :  { %6336 = vmatpush1.bf16.msra.mxu0 %v8909_v29  ;;  %6459 = vmatpush1.bf16.msra.mxu1 %v8912_v52  ;;  %v8979_v29 = vld [vmem:[#allocation16 + $0x330] ss:$40 sps:$4 sm:$0xff]  }
 0x5d0   :  { %7816 = vmatprep.subr.msk.bf16.mxu0 %vm3546_vm1, %v7807_v60  ;;  %7818 = vmatprep.subr.msk.bf16.mxu1 %vm3546_vm1, %v7809_v33  ;;  %v8982_v52 = vld [vmem:[#allocation16 + $0x338] ss:$40 sps:$4 sm:$0xff]   ;;  %v8987_v60 = vld [vmem:[#allocation16 + $0x384] ss:$40 sps:$4 sm:$0xff]   ;;  %v8988_v33 = vld [vmem:[#allocation16 + $0x388] ss:$40 sps:$4 sm:$0xff]  }
 0x5d3   :  { %6338 = vmatpush1.bf16.msra.mxu0 %v6216_v26  ;;  %6461 = vmatpush1.bf16.msra.mxu1 %v6222_v40  ;;  %v8996_v26 = vld [vmem:[#allocation16 + $0x3dc] ss:$40 sps:$4 sm:$0xff]   ;;  %v8994_v40 = vld [vmem:[#allocation16 + $0x3d8] ss:$40 sps:$4 sm:$0xff]  }
 0x5d4   :  { %6491 = vmatprep.subr.bf16.mxu0 %v8921_v48  ;;  %6614 = vmatprep.subr.bf16.mxu1 %v8924_v43  ;;  %v8999_v48 = vld [vmem:[#allocation16 + $0x424] ss:$40 sps:$4 sm:$0xff]  }
 0x5d5   :  { %v9002_v43 = vld [vmem:[#allocation16 + $0x42c] ss:$40 sps:$4 sm:$0xff]  }
 0x5d6   :  { %7817 = vmatmul.mubr.msk.bf16.vlgmr.msra.gmra.mrb[20].mxu0 %vm3542_vm3, %v9963_v17  ;;  %7819 = vmatmul.mubr.msk.bf16.vlgmr.msra.gmra.mrb[36].mxu1 %vm3542_vm3, %v9963_v17 }
 0x5d7   :  { %6492 = vmatpush1.bf16.msra.mxu0 %v8919_v62  ;;  %6523 = vmatprep.mubr.bf16.mxu0 %v9929_v38  ;;  %v8997_v62 = vld [vmem:[#allocation16 + $0x420] ss:$40 sps:$4 sm:$0xff]  }
 0x5d8   :  { %6615 = vmatpush1.bf16.msra.mxu1 %v8922_v11  ;;  %6646 = vmatprep.mubr.bf16.mxu1 %v9929_v38  ;;  %v9000_v11 = vld [vmem:[#allocation16 + $0x428] ss:$40 sps:$4 sm:$0xff]  }
 0x5d9   :  { %6493 = vmatprep.subr.bf16.mxu0 %v8927_v45  ;;  %6616 = vmatprep.subr.bf16.mxu1 %v8930_v24  ;;  %v9005_v45 = vld [vmem:[#allocation16 + $0x474] ss:$40 sps:$4 sm:$0xff]  }
 0x5da   :  { %v9008_v24 = vld [vmem:[#allocation16 + $0x47c] ss:$40 sps:$4 sm:$0xff]  }
 0x5db   :  { %6494 = vmatpush1.bf16.msra.mxu0 %v8925_v46  ;;  %v9003_v46 = vld [vmem:[#allocation16 + $0x470] ss:$40 sps:$4 sm:$0xff]  }
 0x5dc   :  { %6617 = vmatpush1.bf16.msra.mxu1 %v8928_v47  ;;  %6495 = vmatprep.subr.bf16.mxu0 %v8933_v49  ;;  %v9006_v47 = vld [vmem:[#allocation16 + $0x478] ss:$40 sps:$4 sm:$0xff]   ;;  %v9011_v49 = vld [vmem:[#allocation16 + $0x4c4] ss:$40 sps:$4 sm:$0xff]  }
 0x5dd   :  { %6618 = vmatprep.subr.bf16.mxu1 %v8936_v50  ;;  %v9014_v50 = vld [vmem:[#allocation16 + $0x4cc] ss:$40 sps:$4 sm:$0xff]  }
 0x5df   :  { %6496 = vmatpush1.bf16.msra.mxu0 %v8931_v51  ;;  %v9009_v51 = vld [vmem:[#allocation16 + $0x4c0] ss:$40 sps:$4 sm:$0xff]  }
 0x5e0   :  { %6619 = vmatpush1.bf16.msra.mxu1 %v8934_v42  ;;  %6497 = vmatprep.subr.bf16.mxu0 %v8939_v54  ;;  %v9012_v42 = vld [vmem:[#allocation16 + $0x4c8] ss:$40 sps:$4 sm:$0xff]   ;;  %v9017_v54 = vld [vmem:[#allocation16 + $0x514] ss:$40 sps:$4 sm:$0xff]  }
 0x5e1   :  { %6620 = vmatprep.subr.bf16.mxu1 %v8942_v55  ;;  %v9020_v55 = vld [vmem:[#allocation16 + $0x51c] ss:$40 sps:$4 sm:$0xff]  }
 0x5e3   :  { %6498 = vmatpush1.bf16.msra.mxu0 %v8937_v57  ;;  %v9015_v57 = vld [vmem:[#allocation16 + $0x510] ss:$40 sps:$4 sm:$0xff]  }
 0x5e4   :  { %6621 = vmatpush1.bf16.msra.mxu1 %v8940_v59  ;;  %6499 = vmatprep.subr.bf16.mxu0 %v8945_v63  ;;  %v9018_v59 = vld [vmem:[#allocation16 + $0x518] ss:$40 sps:$4 sm:$0xff]   ;;  %v9023_v63 = vld [vmem:[#allocation16 + $0x564] ss:$40 sps:$4 sm:$0xff]  }
 0x5e5   :  { %6622 = vmatprep.subr.bf16.mxu1 %v8948_v0  ;;  %v9026_v0 = vld [vmem:[#allocation16 + $0x56c] ss:$40 sps:$4 sm:$0xff]  }
 0x5e7   :  { %6500 = vmatpush1.bf16.msra.mxu0 %v8943_v1  ;;  %v9021_v1 = vld [vmem:[#allocation16 + $0x560] ss:$40 sps:$4 sm:$0xff]  }
 0x5e8   :  { %6623 = vmatpush1.bf16.msra.mxu1 %v8946_v2  ;;  %6501 = vmatprep.subr.bf16.mxu0 %v8951_v3  ;;  %v9024_v2 = vld [vmem:[#allocation16 + $0x568] ss:$40 sps:$4 sm:$0xff]   ;;  %v9029_v3 = vld [vmem:[#allocation16 + $0x5b4] ss:$40 sps:$4 sm:$0xff]  }
 0x5e9   :  { %6624 = vmatprep.subr.bf16.mxu1 %v8954_v5  ;;  %v9032_v5 = vld [vmem:[#allocation16 + $0x5bc] ss:$40 sps:$4 sm:$0xff]  }
 0x5eb   :  { %6502 = vmatpush1.bf16.msra.mxu0 %v8949_v8  ;;  %v9027_v8 = vld [vmem:[#allocation16 + $0x5b0] ss:$40 sps:$4 sm:$0xff]  }
 0x5ec   :  { %6625 = vmatpush1.bf16.msra.mxu1 %v8952_v7  ;;  %6503 = vmatprep.subr.bf16.mxu0 %v8957_v9  ;;  %v9030_v7 = vld [vmem:[#allocation16 + $0x5b8] ss:$40 sps:$4 sm:$0xff]   ;;  %v9035_v9 = vld [vmem:[#allocation16 + $0x604] ss:$40 sps:$4 sm:$0xff]  }
 0x5ed   :  { %6626 = vmatprep.subr.bf16.mxu1 %v8960_v44  ;;  %v9038_v44 = vld [vmem:[#allocation16 + $0x60c] ss:$40 sps:$4 sm:$0xff]  }
 0x5ef   :  { %6504 = vmatpush1.bf16.msra.mxu0 %v8955_v36  ;;  %v9033_v36 = vld [vmem:[#allocation16 + $0x600] ss:$40 sps:$4 sm:$0xff]  }
 0x5f0   :  { %6627 = vmatpush1.bf16.msra.mxu1 %v8958_v13  ;;  %6505 = vmatprep.subr.bf16.mxu0 %v8963_v14  ;;  %v9036_v13 = vld [vmem:[#allocation16 + $0x608] ss:$40 sps:$4 sm:$0xff]   ;;  %v9041_v14 = vld [vmem:[#allocation16 + $0x654] ss:$40 sps:$4 sm:$0xff]  }
 0x5f1   :  { %6628 = vmatprep.subr.bf16.mxu1 %v8966_v15  ;;  %v9044_v15 = vld [vmem:[#allocation16 + $0x65c] ss:$40 sps:$4 sm:$0xff]  }
 0x5f3   :  { %6506 = vmatpush1.bf16.msra.mxu0 %v8961_v16  ;;  %v9039_v16 = vld [vmem:[#allocation16 + $0x650] ss:$40 sps:$4 sm:$0xff]  }
 0x5f4   :  { %6629 = vmatpush1.bf16.msra.mxu1 %v8964_v18  ;;  %6507 = vmatprep.subr.bf16.mxu0 %v8969_v4  ;;  %v9042_v18 = vld [vmem:[#allocation16 + $0x658] ss:$40 sps:$4 sm:$0xff]   ;;  %v9047_v4 = vld [vmem:[#allocation16 + $0x6a4] ss:$40 sps:$4 sm:$0xff]  }
 0x5f5   :  { %6630 = vmatprep.subr.bf16.mxu1 %v8972_v6  ;;  %v9050_v6 = vld [vmem:[#allocation16 + $0x6ac] ss:$40 sps:$4 sm:$0xff]  }
 0x5f7   :  { %6508 = vmatpush1.bf16.msra.mxu0 %v8967_v20  ;;  %v9045_v20 = vld [vmem:[#allocation16 + $0x6a0] ss:$40 sps:$4 sm:$0xff]  }
 0x5f8   :  { %6631 = vmatpush1.bf16.msra.mxu1 %v8970_v21  ;;  %6509 = vmatprep.subr.bf16.mxu0 %v8975_v22  ;;  %v9048_v21 = vld [vmem:[#allocation16 + $0x6a8] ss:$40 sps:$4 sm:$0xff]   ;;  %v9053_v22 = vld [vmem:[#allocation16 + $0x6f4] ss:$40 sps:$4 sm:$0xff]  }
 0x5f9   :  { %6632 = vmatprep.subr.bf16.mxu1 %v8978_v23  ;;  %v9056_v23 = vld [vmem:[#allocation16 + $0x6fc] ss:$40 sps:$4 sm:$0xff]  }
 0x5fb   :  { %6510 = vmatpush1.bf16.msra.mxu0 %v8973_v25  ;;  %v9051_v25 = vld [vmem:[#allocation16 + $0x6f0] ss:$40 sps:$4 sm:$0xff]  }
 0x5fc   :  { %6633 = vmatpush1.bf16.msra.mxu1 %v8976_v27  ;;  %6511 = vmatprep.subr.bf16.mxu0 %v8981_v28  ;;  %v9054_v27 = vld [vmem:[#allocation16 + $0x6f8] ss:$40 sps:$4 sm:$0xff]   ;;  %v9059_v28 = vld [vmem:[#allocation16 + $0x744] ss:$40 sps:$4 sm:$0xff]  }
 0x5fd   :  { %6634 = vmatprep.subr.bf16.mxu1 %v8984_v19  ;;  %v9062_v19 = vld [vmem:[#allocation16 + $0x74c] ss:$40 sps:$4 sm:$0xff]  }
 0x5ff   :  { %6512 = vmatpush1.bf16.msra.mxu0 %v8979_v29  ;;  %v9057_v29 = vld [vmem:[#allocation16 + $0x740] ss:$40 sps:$4 sm:$0xff]  }
 0x600   :  { %6635 = vmatpush1.bf16.msra.mxu1 %v8982_v52  ;;  %6513 = vmatprep.subr.bf16.mxu0 %v8987_v60  ;;  %v9060_v52 = vld [vmem:[#allocation16 + $0x748] ss:$40 sps:$4 sm:$0xff]   ;;  %v9065_v60 = vld [vmem:[#allocation16 + $0x794] ss:$40 sps:$4 sm:$0xff]  }
 0x601   :  { %6636 = vmatprep.subr.bf16.mxu1 %v8990_v30  ;;  %v9068_v30 = vld [vmem:[#allocation16 + $0x79c] ss:$40 sps:$4 sm:$0xff]  }
 0x603   :  { %6514 = vmatpush1.bf16.msra.mxu0 %v8985_v32  ;;  %v9063_v32 = vld [vmem:[#allocation16 + $0x790] ss:$40 sps:$4 sm:$0xff]  }
 0x604   :  { %6637 = vmatpush1.bf16.msra.mxu1 %v8988_v33  ;;  %6515 = vmatprep.subr.bf16.mxu0 %v8993_v35  ;;  %v9066_v33 = vld [vmem:[#allocation16 + $0x798] ss:$40 sps:$4 sm:$0xff]   ;;  %v9071_v35 = vld [vmem:[#allocation16 + $0x7e4] ss:$40 sps:$4 sm:$0xff]  }
 0x605   :  { %6638 = vmatprep.subr.bf16.mxu1 %v8996_v26  ;;  %v9074_v26 = vld [vmem:[#allocation16 + $0x7ec] ss:$40 sps:$4 sm:$0xff]  }
 0x607   :  { %6516 = vmatpush1.bf16.msra.mxu0 %v8991_v39  ;;  %v9069_v39 = vld [vmem:[#allocation16 + $0x7e0] ss:$40 sps:$4 sm:$0xff]  }
 0x608   :  { %6639 = vmatpush1.bf16.msra.mxu1 %v8994_v40  ;;  %6517 = vmatprep.subr.bf16.mxu0 %v8999_v48  ;;  %v9072_v40 = vld [vmem:[#allocation16 + $0x7e8] ss:$40 sps:$4 sm:$0xff]   ;;  %v9077_v48 = vld [vmem:[#allocation16 + $0x834] ss:$40 sps:$4 sm:$0xff]  }
 0x609   :  { %6640 = vmatprep.subr.bf16.mxu1 %v9002_v43  ;;  %v9080_v43 = vld [vmem:[#allocation16 + $0x83c] ss:$40 sps:$4 sm:$0xff]  }
 0x60b   :  { %6518 = vmatpush1.bf16.msra.mxu0 %v8997_v62  ;;  %v9075_v62 = vld [vmem:[#allocation16 + $0x830] ss:$40 sps:$4 sm:$0xff]  }
 0x60c   :  { %6641 = vmatpush1.bf16.msra.mxu1 %v9000_v11  ;;  %6519 = vmatprep.subr.bf16.mxu0 %v9005_v45  ;;  %v9078_v11 = vld [vmem:[#allocation16 + $0x838] ss:$40 sps:$4 sm:$0xff]   ;;  %v9083_v45 = vld [vmem:[#allocation16 + $0x884] ss:$40 sps:$4 sm:$0xff]  }
 0x60d   :  { %6642 = vmatprep.subr.bf16.mxu1 %v9008_v24  ;;  %v9086_v24 = vld [vmem:[#allocation16 + $0x88c] ss:$40 sps:$4 sm:$0xff]  }
 0x60f   :  { %6520 = vmatpush1.bf16.msra.mxu0 %v9003_v46  ;;  %v9081_v46 = vld [vmem:[#allocation16 + $0x880] ss:$40 sps:$4 sm:$0xff]  }
 0x610   :  { %6643 = vmatpush1.bf16.msra.mxu1 %v9006_v47  ;;  %6521 = vmatprep.subr.bf16.mxu0 %v9011_v49  ;;  %v9084_v47 = vld [vmem:[#allocation16 + $0x888] ss:$40 sps:$4 sm:$0xff]   ;;  %v9089_v49 = vld [vmem:[#allocation16 + $0x8d4] ss:$40 sps:$4 sm:$0xff]  }
 0x611   :  { %6644 = vmatprep.subr.bf16.mxu1 %v9014_v50  ;;  %v9092_v50 = vld [vmem:[#allocation16 + $0x8dc] ss:$40 sps:$4 sm:$0xff]  }
 0x613   :  { %6522 = vmatpush1.bf16.msra.mxu0 %v9009_v51  ;;  %v9087_v51 = vld [vmem:[#allocation16 + $0x8d0] ss:$40 sps:$4 sm:$0xff]  }
 0x614   :  { %6645 = vmatpush1.bf16.msra.mxu1 %v9012_v42  ;;  %6532 = vmatprep.subr.bf16.mxu0 %v9017_v54  ;;  %v9090_v42 = vld [vmem:[#allocation16 + $0x8d8] ss:$40 sps:$4 sm:$0xff]   ;;  %v9095_v54 = vld [vmem:[#allocation16 + $0x924] ss:$40 sps:$4 sm:$0xff]  }
 0x615   :  { %6655 = vmatprep.subr.bf16.mxu1 %v9020_v55  ;;  %v9098_v55 = vld [vmem:[#allocation16 + $0x92c] ss:$40 sps:$4 sm:$0xff]  }
 0x616   :  { %6524 = vmatmul.mubr.bf16.vlgmr.msra.gmra.mrb[24].mxu0 %v9933_v41 }
 0x617   :  { %6647 = vmatmul.mubr.bf16.vlgmr.msra.gmra.mrb[40].mxu1 %v9933_v41  ;;  %6533 = vmatpush1.bf16.msra.mxu0 %v9015_v57  ;;  %v9093_v57 = vld [vmem:[#allocation16 + $0x920] ss:$40 sps:$4 sm:$0xff]  }
 0x618   :  { %6564 = vmatprep.mubr.bf16.mxu0 %v9941_v53  ;;  %6656 = vmatpush1.bf16.msra.mxu1 %v9018_v59  ;;  %v9096_v59 = vld [vmem:[#allocation16 + $0x928] ss:$40 sps:$4 sm:$0xff]  }
 0x619   :  { %6687 = vmatprep.mubr.bf16.mxu1 %v9941_v53  ;;  %6534 = vmatprep.subr.bf16.mxu0 %v9023_v63  ;;  %v9101_v63 = vld [vmem:[#allocation16 + $0x974] ss:$40 sps:$4 sm:$0xff]  }
 0x61a   :  { %6657 = vmatprep.subr.bf16.mxu1 %v9026_v0  ;;  %v9104_v0 = vld [vmem:[#allocation16 + $0x97c] ss:$40 sps:$4 sm:$0xff]  }
 0x61b   :  { %6535 = vmatpush1.bf16.msra.mxu0 %v9021_v1  ;;  %v9099_v1 = vld [vmem:[#allocation16 + $0x970] ss:$40 sps:$4 sm:$0xff]  }
 0x61c   :  { %6658 = vmatpush1.bf16.msra.mxu1 %v9024_v2  ;;  %6536 = vmatprep.subr.bf16.mxu0 %v9029_v3  ;;  %v9102_v2 = vld [vmem:[#allocation16 + $0x978] ss:$40 sps:$4 sm:$0xff]   ;;  %v9107_v3 = vld [vmem:[#allocation16 + $0x9c4] ss:$40 sps:$4 sm:$0xff]  }
 0x61d   :  { %6659 = vmatprep.subr.bf16.mxu1 %v9032_v5  ;;  %v9110_v5 = vld [vmem:[#allocation16 + $0x9cc] ss:$40 sps:$4 sm:$0xff]  }
 0x61f   :  { %6537 = vmatpush1.bf16.msra.mxu0 %v9027_v8  ;;  %v9105_v8 = vld [vmem:[#allocation16 + $0x9c0] ss:$40 sps:$4 sm:$0xff]  }
 0x620   :  { %6660 = vmatpush1.bf16.msra.mxu1 %v9030_v7  ;;  %6538 = vmatprep.subr.bf16.mxu0 %v9035_v9  ;;  %v9108_v7 = vld [vmem:[#allocation16 + $0x9c8] ss:$40 sps:$4 sm:$0xff]   ;;  %v9113_v9 = vld [vmem:[#allocation16 + $0xa14] ss:$40 sps:$4 sm:$0xff]  }
 0x621   :  { %6661 = vmatprep.subr.bf16.mxu1 %v9038_v44  ;;  %v9116_v44 = vld [vmem:[#allocation16 + $0xa1c] ss:$40 sps:$4 sm:$0xff]  }
 0x623   :  { %6539 = vmatpush1.bf16.msra.mxu0 %v9033_v36  ;;  %v9111_v36 = vld [vmem:[#allocation16 + $0xa10] ss:$40 sps:$4 sm:$0xff]  }
 0x624   :  { %6662 = vmatpush1.bf16.msra.mxu1 %v9036_v13  ;;  %6540 = vmatprep.subr.bf16.mxu0 %v9041_v14  ;;  %v9114_v13 = vld [vmem:[#allocation16 + $0xa18] ss:$40 sps:$4 sm:$0xff]   ;;  %v9119_v14 = vld [vmem:[#allocation16 + $0xa64] ss:$40 sps:$4 sm:$0xff]  }
 0x625   :  { %6663 = vmatprep.subr.bf16.mxu1 %v9044_v15  ;;  %v9122_v15 = vld [vmem:[#allocation16 + $0xa6c] ss:$40 sps:$4 sm:$0xff]  }
 0x627   :  { %6541 = vmatpush1.bf16.msra.mxu0 %v9039_v16  ;;  %v9117_v16 = vld [vmem:[#allocation16 + $0xa60] ss:$40 sps:$4 sm:$0xff]  }
 0x628   :  { %6664 = vmatpush1.bf16.msra.mxu1 %v9042_v18  ;;  %6542 = vmatprep.subr.bf16.mxu0 %v9047_v4  ;;  %v9120_v18 = vld [vmem:[#allocation16 + $0xa68] ss:$40 sps:$4 sm:$0xff]   ;;  %v9125_v4 = vld [vmem:[#allocation16 + $0xab4] ss:$40 sps:$4 sm:$0xff]  }
 0x629   :  { %6665 = vmatprep.subr.bf16.mxu1 %v9050_v6  ;;  %v9128_v6 = vld [vmem:[#allocation16 + $0xabc] ss:$40 sps:$4 sm:$0xff]  }
 0x62b   :  { %6543 = vmatpush1.bf16.msra.mxu0 %v9045_v20  ;;  %v9123_v20 = vld [vmem:[#allocation16 + $0xab0] ss:$40 sps:$4 sm:$0xff]  }
 0x62c   :  { %6666 = vmatpush1.bf16.msra.mxu1 %v9048_v21  ;;  %6544 = vmatprep.subr.bf16.mxu0 %v9053_v22  ;;  %v9126_v21 = vld [vmem:[#allocation16 + $0xab8] ss:$40 sps:$4 sm:$0xff]   ;;  %v9131_v22 = vld [vmem:[#allocation16 + $0xb04] ss:$40 sps:$4 sm:$0xff]  }
 0x62d   :  { %6667 = vmatprep.subr.bf16.mxu1 %v9056_v23  ;;  %v9134_v23 = vld [vmem:[#allocation16 + $0xb0c] ss:$40 sps:$4 sm:$0xff]  }
 0x62f   :  { %6545 = vmatpush1.bf16.msra.mxu0 %v9051_v25  ;;  %v9129_v25 = vld [vmem:[#allocation16 + $0xb00] ss:$40 sps:$4 sm:$0xff]  }
 0x630   :  { %6668 = vmatpush1.bf16.msra.mxu1 %v9054_v27  ;;  %6546 = vmatprep.subr.bf16.mxu0 %v9059_v28  ;;  %v9132_v27 = vld [vmem:[#allocation16 + $0xb08] ss:$40 sps:$4 sm:$0xff]   ;;  %v9137_v28 = vld [vmem:[#allocation16 + $0xb54] ss:$40 sps:$4 sm:$0xff]  }
 0x631   :  { %6669 = vmatprep.subr.bf16.mxu1 %v9062_v19  ;;  %v9140_v19 = vld [vmem:[#allocation16 + $0xb5c] ss:$40 sps:$4 sm:$0xff]  }
 0x633   :  { %6547 = vmatpush1.bf16.msra.mxu0 %v9057_v29  ;;  %v4280_v29 = vld [vmem:[#allocation16 + $0xba0] sm:$0xff] }
 0x634   :  { %6670 = vmatpush1.bf16.msra.mxu1 %v9060_v52  ;;  %6548 = vmatprep.subr.bf16.mxu0 %v9065_v60  ;;  %v4281_v52 = vld [vmem:[#allocation16 + $0xba8] sm:$0xff]  ;;  %v9135_v60 = vld [vmem:[#allocation16 + $0xb50] ss:$40 sps:$4 sm:$0xff]  }
 0x635   :  { %6671 = vmatprep.subr.bf16.mxu1 %v9068_v30  ;;  %v9138_v30 = vld [vmem:[#allocation16 + $0xb58] ss:$40 sps:$4 sm:$0xff]  }
 0x637   :  { %6549 = vmatpush1.bf16.msra.mxu0 %v9063_v32  ;;  %v7811_v32 = vcombine.high %v4280_v29, %v4280_v29 }
 0x638   :  { %6672 = vmatpush1.bf16.msra.mxu1 %v9066_v33  ;;  %6550 = vmatprep.subr.bf16.mxu0 %v9071_v35  ;;  %v7810_v33 = vcombine.low %v4280_v29, %v4280_v29  ;;  %v7813_v35 = vcombine.high %v4281_v52, %v4281_v52 }
 0x639   :  { %6673 = vmatprep.subr.bf16.mxu1 %v9074_v26  ;;  %v7812_v26 = vcombine.low %v4281_v52, %v4281_v52 }
 0x63b   :  { %6551 = vmatpush1.bf16.msra.mxu0 %v9069_v39  ;;  %v6228_v39 = vsel %vm3546_vm1, %v7810_v33, 0  ;;  %v9198_v33 = vld [vmem:[#allocation16 + $0x574] ss:$40 sps:$4 sm:$0xff]  }
 0x63c   :  { %6674 = vmatpush1.bf16.msra.mxu1 %v9072_v40  ;;  %6552 = vmatprep.subr.bf16.mxu0 %v9077_v48  ;;  %v9147_v40 = vld [vmem:[#allocation16 + $0x24] ss:$40 sps:$4 sm:$0xff]   ;;  %v6234_v48 = vsel %vm3546_vm1, %v7812_v26, 0 }
 0x63d   :  { %6675 = vmatprep.subr.bf16.mxu1 %v9080_v43  ;;  %v9145_v43 = vld [vmem:[#allocation16 + $0x20] ss:$40 sps:$4 sm:$0xff]  }
 0x63f   :  { %6553 = vmatpush1.bf16.msra.mxu0 %v9075_v62  ;;  %v9150_v62 = vld [vmem:[#allocation16 + $0x74] ss:$40 sps:$4 sm:$0xff]  }
 0x640   :  { %6676 = vmatpush1.bf16.msra.mxu1 %v9078_v11  ;;  %6554 = vmatprep.subr.bf16.mxu0 %v9083_v45  ;;  %v9148_v11 = vld [vmem:[#allocation16 + $0x70] ss:$40 sps:$4 sm:$0xff]   ;;  %v9153_v45 = vld [vmem:[#allocation16 + $0xc4] ss:$40 sps:$4 sm:$0xff]  }
 0x641   :  { %6677 = vmatprep.subr.bf16.mxu1 %v9086_v24  ;;  %v9151_v24 = vld [vmem:[#allocation16 + $0xc0] ss:$40 sps:$4 sm:$0xff]  }
 0x643   :  { %6555 = vmatpush1.bf16.msra.mxu0 %v9081_v46  ;;  %v9156_v46 = vld [vmem:[#allocation16 + $0x114] ss:$40 sps:$4 sm:$0xff]  }
 0x644   :  { %6678 = vmatpush1.bf16.msra.mxu1 %v9084_v47  ;;  %6556 = vmatprep.subr.bf16.mxu0 %v9089_v49  ;;  %v9154_v47 = vld [vmem:[#allocation16 + $0x110] ss:$40 sps:$4 sm:$0xff]   ;;  %v9159_v49 = vld [vmem:[#allocation16 + $0x164] ss:$40 sps:$4 sm:$0xff]  }
 0x645   :  { %6679 = vmatprep.subr.bf16.mxu1 %v9092_v50  ;;  %v9157_v50 = vld [vmem:[#allocation16 + $0x160] ss:$40 sps:$4 sm:$0xff]  }
 0x647   :  { %6557 = vmatpush1.bf16.msra.mxu0 %v9087_v51  ;;  %v9162_v51 = vld [vmem:[#allocation16 + $0x1b4] ss:$40 sps:$4 sm:$0xff]  }
 0x648   :  { %6680 = vmatpush1.bf16.msra.mxu1 %v9090_v42  ;;  %6558 = vmatprep.subr.bf16.mxu0 %v9095_v54  ;;  %v9160_v42 = vld [vmem:[#allocation16 + $0x1b0] ss:$40 sps:$4 sm:$0xff]   ;;  %v9165_v54 = vld [vmem:[#allocation16 + $0x204] ss:$40 sps:$4 sm:$0xff]  }
 0x649   :  { %6681 = vmatprep.subr.bf16.mxu1 %v9098_v55  ;;  %v9168_v55 = vld [vmem:[#allocation16 + $0x254] ss:$40 sps:$4 sm:$0xff]  }
 0x64b   :  { %6559 = vmatpush1.bf16.msra.mxu0 %v9093_v57  ;;  %v9166_v57 = vld [vmem:[#allocation16 + $0x250] ss:$40 sps:$4 sm:$0xff]  }
 0x64c   :  { %6682 = vmatpush1.bf16.msra.mxu1 %v9096_v59  ;;  %6560 = vmatprep.subr.bf16.mxu0 %v9101_v63  ;;  %v9171_v59 = vld [vmem:[#allocation16 + $0x2a4] ss:$40 sps:$4 sm:$0xff]   ;;  %v9169_v63 = vld [vmem:[#allocation16 + $0x2a0] ss:$40 sps:$4 sm:$0xff]  }
 0x64d   :  { %6683 = vmatprep.subr.bf16.mxu1 %v9104_v0  ;;  %v9174_v0 = vld [vmem:[#allocation16 + $0x2f4] ss:$40 sps:$4 sm:$0xff]  }
 0x64f   :  { %6561 = vmatpush1.bf16.msra.mxu0 %v9099_v1  ;;  %v9172_v1 = vld [vmem:[#allocation16 + $0x2f0] ss:$40 sps:$4 sm:$0xff]  }
 0x650   :  { %6684 = vmatpush1.bf16.msra.mxu1 %v9102_v2  ;;  %6562 = vmatprep.subr.bf16.mxu0 %v9107_v3  ;;  %v9177_v2 = vld [vmem:[#allocation16 + $0x344] ss:$40 sps:$4 sm:$0xff]   ;;  %v9175_v3 = vld [vmem:[#allocation16 + $0x340] ss:$40 sps:$4 sm:$0xff]  }
 0x651   :  { %6685 = vmatprep.subr.bf16.mxu1 %v9110_v5  ;;  %v9180_v5 = vld [vmem:[#allocation16 + $0x394] ss:$40 sps:$4 sm:$0xff]  }
 0x653   :  { %6563 = vmatpush1.bf16.msra.mxu0 %v9105_v8  ;;  %v9178_v8 = vld [vmem:[#allocation16 + $0x390] ss:$40 sps:$4 sm:$0xff]  }
 0x654   :  { %6686 = vmatpush1.bf16.msra.mxu1 %v9108_v7  ;;  %6573 = vmatprep.subr.bf16.mxu0 %v9113_v9  ;;  %v9183_v7 = vld [vmem:[#allocation16 + $0x3e4] ss:$40 sps:$4 sm:$0xff]   ;;  %v9181_v9 = vld [vmem:[#allocation16 + $0x3e0] ss:$40 sps:$4 sm:$0xff]  }
 0x655   :  { %6696 = vmatprep.subr.bf16.mxu1 %v9116_v44  ;;  %v9186_v44 = vld [vmem:[#allocation16 + $0x434] ss:$40 sps:$4 sm:$0xff]  }
 0x656   :  { %6565 = vmatmul.mubr.bf16.vlgmr.msra.gmra.mrb[24].mxu0 %v9950_v10 }
 0x657   :  { %6688 = vmatmul.mubr.bf16.vlgmr.msra.gmra.mrb[40].mxu1 %v9950_v10  ;;  %6574 = vmatpush1.bf16.msra.mxu0 %v9111_v36  ;;  %v9184_v36 = vld [vmem:[#allocation16 + $0x430] ss:$40 sps:$4 sm:$0xff]  }
 0x658   :  { %6697 = vmatpush1.bf16.msra.mxu1 %v9114_v13  ;;  %6575 = vmatprep.subr.bf16.mxu0 %v9119_v14  ;;  %v9189_v13 = vld [vmem:[#allocation16 + $0x484] ss:$40 sps:$4 sm:$0xff]   ;;  %v9187_v14 = vld [vmem:[#allocation16 + $0x480] ss:$40 sps:$4 sm:$0xff]  }
 0x659   :  { %6698 = vmatprep.subr.bf16.mxu1 %v9122_v15  ;;  %6605 = vmatprep.mubr.bf16.mxu0 %v9596_v37  ;;  %v9988_v15 = vld [vmem:[#allocation17] sm:$0xff] }
 0x65a   :  { %6728 = vmatprep.mubr.bf16.mxu1 %v9596_v37 }
 0x65b   :  { %6576 = vmatpush1.bf16.msra.mxu0 %v9117_v16  ;;  %v9192_v16 = vld [vmem:[#allocation16 + $0x4d4] ss:$40 sps:$4 sm:$0xff]  }
 0x65c   :  { %6699 = vmatpush1.bf16.msra.mxu1 %v9120_v18  ;;  %6577 = vmatprep.subr.bf16.mxu0 %v9125_v4  ;;  %v4290_v18 = vrot.slane %v9988_v15, %v9866_v58  ;;  %v4298_v4 = vrot.slane %v9988_v15, %v9889_v34 }
 0x65d   :  { %6700 = vmatprep.subr.bf16.mxu1 %v9128_v6  ;;  %v4294_v6 = vrot.slane %v9988_v15, %v9871_v31 }
 0x65f   :  { %6578 = vmatpush1.bf16.msra.mxu0 %v9123_v20  ;;  %v4302_v20 = vrot.slane %v9988_v15, %v9892_v61 }
 0x660   :  { %6701 = vmatpush1.bf16.msra.mxu1 %v9126_v21  ;;  %6579 = vmatprep.subr.bf16.mxu0 %v9131_v22  ;;  %v9190_v21 = vld [vmem:[#allocation16 + $0x4d0] ss:$40 sps:$4 sm:$0xff]   ;;  %v9195_v22 = vld [vmem:[#allocation16 + $0x524] ss:$40 sps:$4 sm:$0xff]  }
 0x661   :  { %6702 = vmatprep.subr.bf16.mxu1 %v9134_v23 }
 0x663   :  { %6580 = vmatpush1.bf16.msra.mxu0 %v9129_v25 }
 0x664   :  { %6703 = vmatpush1.bf16.msra.mxu1 %v9132_v27  ;;  %6581 = vmatprep.subr.bf16.mxu0 %v9137_v28 }
 0x665   :  { %6704 = vmatprep.subr.bf16.mxu1 %v9140_v19 }
 0x667   :  { %6582 = vmatpush1.bf16.msra.mxu0 %v9135_v60 }
 0x668   :  { %6705 = vmatpush1.bf16.msra.mxu1 %v9138_v30  ;;  %7820 = vmatprep.subr.msk.bf16.mxu0 %vm3546_vm1, %v7811_v32  ;;  %v9193_v32 = vld [vmem:[#allocation16 + $0x520] ss:$40 sps:$4 sm:$0xff]  }
 0x669   :  { %7822 = vmatprep.subr.msk.bf16.mxu1 %vm3546_vm1, %v7813_v35 }
 0x66b   :  { %6584 = vmatpush1.bf16.msra.mxu0 %v6228_v39 }
 0x66c   :  { %6707 = vmatpush1.bf16.msra.mxu1 %v6234_v48  ;;  %6737 = vmatprep.subr.bf16.mxu0 %v9147_v40 }
 0x66e   :  { %7821 = vmatmul.mubr.msk.bf16.vlgmr.msra.gmra.mrb[24].mxu0 %vm3542_vm3, %v9963_v17 }
 0x66f   :  { %7823 = vmatmul.mubr.msk.bf16.vlgmr.msra.gmra.mrb[40].mxu1 %vm3542_vm3, %v9963_v17  ;;  %6738 = vmatpush1.bf16.msra.mxu0 %v9145_v43  ;;  %v9196_v43 = vld [vmem:[#allocation16 + $0x570] ss:$40 sps:$4 sm:$0xff]  }
 0x670   :  { %6769 = vmatprep.mubr.bf16.mxu0 %v9929_v38  ;;  %6739 = vmatprep.subr.bf16.mxu0 %v9150_v62  ;;  %v9163_v38 = vld [vmem:[#allocation16 + $0x200] ss:$40 sps:$4 sm:$0xff]   ;;  %v9201_v62 = vld [vmem:[#allocation16 + $0x5c4] ss:$40 sps:$4 sm:$0xff]  }
 0x673   :  { %6740 = vmatpush1.bf16.msra.mxu0 %v9148_v11  ;;  %v9199_v11 = vld [vmem:[#allocation16 + $0x5c0] ss:$40 sps:$4 sm:$0xff]  }
 0x674   :  { %6741 = vmatprep.subr.bf16.mxu0 %v9153_v45  ;;  %v9204_v45 = vld [vmem:[#allocation16 + $0x614] ss:$40 sps:$4 sm:$0xff]  }
 0x677   :  { %6742 = vmatpush1.bf16.msra.mxu0 %v9151_v24  ;;  %v9202_v24 = vld [vmem:[#allocation16 + $0x610] ss:$40 sps:$4 sm:$0xff]  }
 0x678   :  { %6743 = vmatprep.subr.bf16.mxu0 %v9156_v46 }
 0x67b   :  { %6744 = vmatpush1.bf16.msra.mxu0 %v9154_v47  ;;  %v9207_v47 = vld [vmem:[#allocation16 + $0x664] ss:$40 sps:$4 sm:$0xff]  }
 0x67c   :  { %6745 = vmatprep.subr.bf16.mxu0 %v9159_v49 }
 0x67f   :  { %6746 = vmatpush1.bf16.msra.mxu0 %v9157_v50 }
 0x680   :  { %6747 = vmatprep.subr.bf16.mxu0 %v9162_v51 }
 0x683   :  { %6748 = vmatpush1.bf16.msra.mxu0 %v9160_v42 }
 0x684   :  { %6749 = vmatprep.subr.bf16.mxu0 %v9165_v54  ;;  %v9205_v54 = vld [vmem:[#allocation16 + $0x660] ss:$40 sps:$4 sm:$0xff]  }
 0x687   :  { %6750 = vmatpush1.bf16.msra.mxu0 %v9163_v38 }
 0x688   :  { %6751 = vmatprep.subr.bf16.mxu0 %v9168_v55  ;;  %v9210_v55 = vld [vmem:[#allocation16 + $0x6b4] ss:$40 sps:$4 sm:$0xff]  }
 0x68b   :  { %6752 = vmatpush1.bf16.msra.mxu0 %v9166_v57  ;;  %v9208_v57 = vld [vmem:[#allocation16 + $0x6b0] ss:$40 sps:$4 sm:$0xff]  }
 0x68c   :  { %6753 = vmatprep.subr.bf16.mxu0 %v9171_v59  ;;  %v9213_v59 = vld [vmem:[#allocation16 + $0x704] ss:$40 sps:$4 sm:$0xff]  }
 0x68f   :  { %6754 = vmatpush1.bf16.msra.mxu0 %v9169_v63  ;;  %v9211_v63 = vld [vmem:[#allocation16 + $0x700] ss:$40 sps:$4 sm:$0xff]  }
 0x690   :  { %6755 = vmatprep.subr.bf16.mxu0 %v9174_v0  ;;  %v9216_v0 = vld [vmem:[#allocation16 + $0x754] ss:$40 sps:$4 sm:$0xff]  }
 0x693   :  { %6756 = vmatpush1.bf16.msra.mxu0 %v9172_v1 }
 0x694   :  { %6757 = vmatprep.subr.bf16.mxu0 %v9177_v2 }
 0x697   :  { %6758 = vmatpush1.bf16.msra.mxu0 %v9175_v3 }
 0x698   :  { %6759 = vmatprep.subr.bf16.mxu0 %v9180_v5  ;;  %v9214_v5 = vld [vmem:[#allocation16 + $0x750] ss:$40 sps:$4 sm:$0xff]  }
 0x69b   :  { %6760 = vmatpush1.bf16.msra.mxu0 %v9178_v8 }
 0x69c   :  { %6761 = vmatprep.subr.bf16.mxu0 %v9183_v7  ;;  %v9219_v7 = vld [vmem:[#allocation16 + $0x7a4] ss:$40 sps:$4 sm:$0xff]  }
 0x69f   :  { %6762 = vmatpush1.bf16.msra.mxu0 %v9181_v9 }
 0x6a0   :  { %6763 = vmatprep.subr.bf16.mxu0 %v9186_v44 }
 0x6a3   :  { %6764 = vmatpush1.bf16.msra.mxu0 %v9184_v36  ;;  %v9217_v36 = vld [vmem:[#allocation16 + $0x7a0] ss:$40 sps:$4 sm:$0xff]  }
 0x6a4   :  { %6765 = vmatprep.subr.bf16.mxu0 %v9189_v13  ;;  %v9222_v13 = vld [vmem:[#allocation16 + $0x7f4] ss:$40 sps:$4 sm:$0xff]  }
 0x6a7   :  { %6766 = vmatpush1.bf16.msra.mxu0 %v9187_v14  ;;  %v9220_v14 = vld [vmem:[#allocation16 + $0x7f0] ss:$40 sps:$4 sm:$0xff]  }
 0x6a8   :  { %6767 = vmatprep.subr.bf16.mxu0 %v9192_v16  ;;  %v9225_v16 = vld [vmem:[#allocation16 + $0x844] ss:$40 sps:$4 sm:$0xff]  }
 0x6a9   :  { %v6361_v23 = vpop.f32.mrb[20].mxu0  ;;  %v6484_v25 = vpop.f32.mrb[36].mxu1 }
 0x6aa   :  { %v8018_v27 = vadd.f32 %v6361_v23, %v4290_v18  ;;  %v8020_v28 = vadd.f32 %v6484_v25, %v4298_v4  ;;  %v6363_v19 = vpop.f32.mrb[21].mxu0  ;;  %v6486_v29 = vpop.f32.mrb[37].mxu1  ;;  %v9223_v18 = vld [vmem:[#allocation16 + $0x840] ss:$40 sps:$4 sm:$0xff]   ;;  %v9228_v4 = vld [vmem:[#allocation16 + $0x894] ss:$40 sps:$4 sm:$0xff]  }
 0x6ab   :  { %v8019_v52 = vadd.f32 %v6363_v19, %v4294_v6  ;;  %v8021_v60 = vadd.f32 %v6486_v29, %v4302_v20  ;;  %v6365_v30 = vpop.f32.mrb[22].mxu0  ;;  %v6488_v34 = vpop.f32.mrb[38].mxu1  ;;  %6768 = vmatpush1.bf16.msra.mxu0 %v9190_v21  ;;  %v9226_v6 = vld [vmem:[#allocation16 + $0x890] ss:$40 sps:$4 sm:$0xff]   ;;  %v9231_v20 = vld [vmem:[#allocation16 + $0x8e4] ss:$40 sps:$4 sm:$0xff]  }
 0x6ac   :  { %v7826_v35 = vmul.f32 -1.442695, %v8018_v27  ;;  %v7828_v26 = vmul.f32 -1.442695, %v8020_v28  ;;  %v6366_v39 = vpop.f32.mrb[23].mxu0  ;;  %v6489_v61 = vpop.f32.mrb[39].mxu1  ;;  %6778 = vmatprep.subr.bf16.mxu0 %v9195_v22 }
 0x6ad   :  { %v7827_v40 = vmul.f32 -1.442695, %v8019_v52  ;;  %v7829_v48 = vmul.f32 -1.442695, %v8021_v60  ;;  %v9229_v21 = vld [vmem:[#allocation16 + $0x8e0] ss:$40 sps:$4 sm:$0xff]  }
 0x6ae   :  { %9260 = vpow2.f32 %v7826_v35  ;;  %6770 = vmatmul.mubr.bf16.vlgmr.msra.gmra.mrb[28].mxu0 %v9933_v41  ;;  %v9234_v22 = vld [vmem:[#allocation16 + $0x934] ss:$40 sps:$4 sm:$0xff]   ;;  %v9232_v23 = vld [vmem:[#allocation16 + $0x930] ss:$40 sps:$4 sm:$0xff]   ;;  %v9237_v25 = vld [vmem:[#allocation16 + $0x984] ss:$40 sps:$4 sm:$0xff]  }
 0x6af   :  { %9262 = vpow2.f32 %v7828_v26  ;;  %6779 = vmatpush1.bf16.msra.mxu0 %v9193_v32  ;;  %6810 = vmatprep.mubr.bf16.mxu0 %v9941_v53  ;;  %v9235_v27 = vld [vmem:[#allocation16 + $0x980] ss:$40 sps:$4 sm:$0xff]   ;;  %v9240_v28 = vld [vmem:[#allocation16 + $0x9d4] ss:$40 sps:$4 sm:$0xff]   ;;  %v9238_v19 = vld [vmem:[#allocation16 + $0x9d0] ss:$40 sps:$4 sm:$0xff]  }
 0x6b0   :  { %9264 = vpow2.f32 %v7827_v40  ;;  %6780 = vmatprep.subr.bf16.mxu0 %v9198_v33  ;;  %v9243_v29 = vld [vmem:[#allocation16 + $0xa24] ss:$40 sps:$4 sm:$0xff]   ;;  %v9241_v52 = vld [vmem:[#allocation16 + $0xa20] ss:$40 sps:$4 sm:$0xff]   ;;  %v9246_v60 = vld [vmem:[#allocation16 + $0xa74] ss:$40 sps:$4 sm:$0xff]  }
 0x6b1   :  { %9266 = vpow2.f32 %v7829_v48  ;;  %v9244_v30 = vld [vmem:[#allocation16 + $0xa70] ss:$40 sps:$4 sm:$0xff]   ;;  %v9249_v34 = vld [vmem:[#allocation16 + $0xac4] ss:$40 sps:$4 sm:$0xff]   ;;  %v9247_v32 = vld [vmem:[#allocation16 + $0xac0] ss:$40 sps:$4 sm:$0xff]  }
 0x6b2   :  { %v9252_v33 = vld [vmem:[#allocation16 + $0xb14] ss:$40 sps:$4 sm:$0xff]   ;;  %v9250_v35 = vld [vmem:[#allocation16 + $0xb10] ss:$40 sps:$4 sm:$0xff]   ;;  %v9255_v26 = vld [vmem:[#allocation16 + $0xb64] ss:$40 sps:$4 sm:$0xff]  }
 0x6b3   :  { %6781 = vmatpush1.bf16.msra.mxu0 %v9196_v43  ;;  %v4282_v39 = vld [vmem:[#allocation16 + $0xbb0] sm:$0xff]  ;;  %v9253_v61 = vld [vmem:[#allocation16 + $0xb60] ss:$40 sps:$4 sm:$0xff]   ;;  %v4313_v48 = vsub.s32 6, %v9863_v56  ;;  %v4309_v43 = vsub.s32 5, %v9863_v56 }
 0x6b4   :  { %6782 = vmatprep.subr.bf16.mxu0 %v9201_v62  ;;  %v7815_v40 = vcombine.high %v4282_v39, %v4282_v39  ;;  %v4317_v62 = vsub.s32 7, %v9863_v56 }
 0x6b7   :  { %6783 = vmatpush1.bf16.msra.mxu0 %v9199_v11  ;;  %v4306_v11 = vrot.slane %v9988_v15, %v9900_v12 }
 0x6b8   :  { %v9261_v46 = vpop.eup %9260  ;;  %6784 = vmatprep.subr.bf16.mxu0 %v9204_v45  ;;  %v4314_v45 = vrot.slane %v9988_v15, %v4313_v48 }
 0x6b9   :  { %v9263_v49 = vpop.eup %9262  ;;  %v6890_v41 = vadd.f32 1.0, %v9261_v46  ;;  %v4318_v46 = vrot.slane %v9988_v15, %v4317_v62 }
 0x6ba   :  { %v9265_v50 = vpop.eup %9264  ;;  %v6892_v51 = vadd.f32 1.0, %v9263_v49 }
 0x6bb   :  { %v9267_v42 = vpop.eup %9266  ;;  %9268 = vrcp.f32 %v6890_v41  ;;  %v6891_v53 = vadd.f32 1.0, %v9265_v50  ;;  %6785 = vmatpush1.bf16.msra.mxu0 %v9202_v24  ;;  %v4310_v24 = vrot.slane %v9988_v15, %v4309_v43 }
 0x6bc   :  { %9270 = vrcp.f32 %v6892_v51  ;;  %v6893_v38 = vadd.f32 1.0, %v9267_v42  ;;  %6786 = vmatprep.subr.bf16.mxu0 %v9207_v47 }
 0x6bd   :  { %9272 = vrcp.f32 %v6891_v53 }
 0x6be   :  { %9274 = vrcp.f32 %v6893_v38 }
 0x6bf   :  { %6787 = vmatpush1.bf16.msra.mxu0 %v9205_v54 }
 0x6c0   :  { %6788 = vmatprep.subr.bf16.mxu0 %v9210_v55 }
 0x6c3   :  { %6789 = vmatpush1.bf16.msra.mxu0 %v9208_v57 }
 0x6c4   :  { %6790 = vmatprep.subr.bf16.mxu0 %v9213_v59 }
 0x6c5   :  { %v9269_v1 = vpop.eup %9268 }
 0x6c6   :  { %v9271_v2 = vpop.eup %9270 }
 0x6c7   :  { %v9273_v3 = vpop.eup %9272  ;;  %6791 = vmatpush1.bf16.msra.mxu0 %v9211_v63 }
 0x6c8   :  { %v9275_v8 = vpop.eup %9274  ;;  %6792 = vmatprep.subr.bf16.mxu0 %v9216_v0  ;;  %v7841_v9 = vpack.c.bf16 %v9273_v3, %v9269_v1 }
 0x6c9   :  { %v7842_v44 = vpack.c.bf16 %v9275_v8, %v9271_v2 }
 0x6ca   :  { %6960 = vst [vmem:[#allocation19] sm:$0xff] %v7841_v9 }
 0x6cb   :  { %6793 = vmatpush1.bf16.msra.mxu0 %v9214_v5  ;;  %6961 = vst [vmem:[#allocation19 + $0x8] sm:$0xff] %v7842_v44 }
 0x6cc   :  { %6794 = vmatprep.subr.bf16.mxu0 %v9219_v7 }
 0x6cf   :  { %6795 = vmatpush1.bf16.msra.mxu0 %v9217_v36 }
 0x6d0   :  { %6796 = vmatprep.subr.bf16.mxu0 %v9222_v13 }
 0x6d3   :  { %6797 = vmatpush1.bf16.msra.mxu0 %v9220_v14 }
 0x6d4   :  { %6798 = vmatprep.subr.bf16.mxu0 %v9225_v16 }
 0x6d7   :  { %6799 = vmatpush1.bf16.msra.mxu0 %v9223_v18 }
 0x6d8   :  { %6800 = vmatprep.subr.bf16.mxu0 %v9228_v4 }
 0x6db   :  { %6801 = vmatpush1.bf16.msra.mxu0 %v9226_v6 }
 0x6dc   :  { %6802 = vmatprep.subr.bf16.mxu0 %v9231_v20 }
 0x6df   :  { %6803 = vmatpush1.bf16.msra.mxu0 %v9229_v21 }
 0x6e0   :  { %6804 = vmatprep.subr.bf16.mxu0 %v9234_v22 }
 0x6e3   :  { %6805 = vmatpush1.bf16.msra.mxu0 %v9232_v23 }
 0x6e4   :  { %6806 = vmatprep.subr.bf16.mxu0 %v9237_v25 }
 0x6e7   :  { %6807 = vmatpush1.bf16.msra.mxu0 %v9235_v27 }
 0x6e8   :  { %6808 = vmatprep.subr.bf16.mxu0 %v9240_v28 }
 0x6eb   :  { %6809 = vmatpush1.bf16.msra.mxu0 %v9238_v19 }
 0x6ec   :  { %6819 = vmatprep.subr.bf16.mxu0 %v9243_v29 }
 0x6ee   :  { %6811 = vmatmul.mubr.bf16.vlgmr.msra.gmra.mrb[28].mxu0 %v9950_v10  ;;  %v7814_v10 = vcombine.low %v4282_v39, %v4282_v39 }
 0x6ef   :  { %6820 = vmatpush1.bf16.msra.mxu0 %v9241_v52  ;;  %6851 = vmatprep.mubr.bf16.mxu0 %v9596_v37 }
 0x6f0   :  { %6821 = vmatprep.subr.bf16.mxu0 %v9246_v60  ;;  %v6240_v37 = vsel %vm3546_vm1, %v7814_v10, 0 }
 0x6f3   :  { %6822 = vmatpush1.bf16.msra.mxu0 %v9244_v30 }
 0x6f4   :  { %6823 = vmatprep.subr.bf16.mxu0 %v9249_v34 }
 0x6f7   :  { %6824 = vmatpush1.bf16.msra.mxu0 %v9247_v32 }
 0x6f8   :  { %6825 = vmatprep.subr.bf16.mxu0 %v9252_v33 }
 0x6fb   :  { %6826 = vmatpush1.bf16.msra.mxu0 %v9250_v35 }
 0x6fc   :  { %6827 = vmatprep.subr.bf16.mxu0 %v9255_v26 }
 0x6ff   :  { %6828 = vmatpush1.bf16.msra.mxu0 %v9253_v61 }
 0x700   :  { %7824 = vmatprep.subr.msk.bf16.mxu0 %vm3546_vm1, %v7815_v40 }
 0x703   :  { %6830 = vmatpush1.bf16.msra.mxu0 %v6240_v37 }
 0x706   :  { %7825 = vmatmul.mubr.msk.bf16.vlgmr.msra.gmra.mrb[28].mxu0 %vm3542_vm3, %v9963_v17 }
 0x741   :  { %v6607_v47 = vpop.f32.mrb[24].mxu0 }
 0x742   :  { %v8022_v49 = vadd.f32 %v6607_v47, %v4306_v11  ;;  %v6730_v41 = vpop.f32.mrb[40].mxu1  ;;  %v6609_v50 = vpop.f32.mrb[25].mxu0 }
 0x743   :  { %v8024_v17 = vadd.f32 %v6730_v41, %v4314_v45  ;;  %v8023_v51 = vadd.f32 %v6609_v50, %v4310_v24  ;;  %v6732_v42 = vpop.f32.mrb[41].mxu1  ;;  %v6611_v53 = vpop.f32.mrb[26].mxu0 }
 0x744   :  { %v7830_v54 = vmul.f32 -1.442695, %v8022_v49  ;;  %v8025_v38 = vadd.f32 %v6732_v42, %v4318_v46  ;;  %v6734_v56 = vpop.f32.mrb[42].mxu1  ;;  %v6612_v55 = vpop.f32.mrb[27].mxu0 }
 0x745   :  { %v7832_v57 = vmul.f32 -1.442695, %v8024_v17  ;;  %v7831_v12 = vmul.f32 -1.442695, %v8023_v51  ;;  %v6735_v59 = vpop.f32.mrb[43].mxu1 }
 0x746   :  { %9276 = vpow2.f32 %v7830_v54  ;;  %v7833_v63 = vmul.f32 -1.442695, %v8025_v38 }
 0x747   :  { %9278 = vpow2.f32 %v7832_v57 }
 0x748   :  { %9280 = vpow2.f32 %v7831_v12 }
 0x749   :  { %9282 = vpow2.f32 %v7833_v63 }
 0x750   :  { %v9277_v15 = vpop.eup %9276 }
 0x751   :  { %v9279_v0 = vpop.eup %9278  ;;  %v6894_v1 = vadd.f32 1.0, %v9277_v15 }
 0x752   :  { %v9281_v2 = vpop.eup %9280  ;;  %v6896_v3 = vadd.f32 1.0, %v9279_v0 }
 0x753   :  { %v9283_v5 = vpop.eup %9282  ;;  %9284 = vrcp.f32 %v6894_v1  ;;  %v6895_v8 = vadd.f32 1.0, %v9281_v2 }
 0x754   :  { %9286 = vrcp.f32 %v6896_v3  ;;  %v6897_v7 = vadd.f32 1.0, %v9283_v5 }
 0x755   :  { %9288 = vrcp.f32 %v6895_v8 }
 0x756   :  { %9290 = vrcp.f32 %v6897_v7 }
 0x75d   :  { %v9285_v9 = vpop.eup %9284 }
 0x75e   :  { %v9287_v44 = vpop.eup %9286 }
 0x75f   :  { %v9289_v36 = vpop.eup %9288 }
 0x760   :  { %v9291_v13 = vpop.eup %9290  ;;  %v7843_v14 = vpack.c.bf16 %v9289_v36, %v9285_v9 }
 0x761   :  { %v7844_v16 = vpack.c.bf16 %v9291_v13, %v9287_v44 }
 0x762   :  { %6962 = vst [vmem:[#allocation19 + $0x10] sm:$0xff] %v7843_v14 }
 0x763   :  { %6963 = vst [vmem:[#allocation19 + $0x18] sm:$0xff] %v7844_v16 }
 0x764   :  { %9531 = shalt.err (!%p9528_p0)
}
 0x765   :  { %s9532_s15 = scalar_lea.hbm %s10052_s11, 128 }
 0x766   :  { %p9533_p1 = scmp.ne.s32.totalorder %s10052_s11, %s9532_s15  ;;  %p9536_p2 = scmp.lt.u32.totalorder %s9532_s15, %s10052_s11 }
 0x768   :  { %p9538_p3 = pnand %p9536_p2, %p9533_p1 }
 0x76a   :  { %9541 = shalt.err (!%p9538_p3)
}
 0x76b   :  { %6988 = dma.vmem_to_hbm [thread:$0]  %s6986_s4, 128, %s10052_s11, [#allocation21]   ;;  %v4284_v18 = vld [vmem:[#allocation17 + $0x8] sm:$0x3]  ;;  %vm6964_vm7 = vcmask 392196  }
 0x76c   :  { %v4322_v4 = vrot.slane %v4284_v18, %v9866_v58  ;;  %v4326_v6 = vrot.slane %v4284_v18, %v9871_v31  ;;  %s9601_s11 = smov [#allocation19]   ;;  %vm6965_vm8 = vmor %vm6964_vm7, %vm3546_vm1 }
 0x76d   :  { %s6975_s6 = sshll.u32 %s9601_s11, 4  ;;  %s6976_s6 = int_to_ptr.vmem [resolvable:$true] %s6975_s6 }
 0x76e   :  { %s9542_s0 = scalar_lea.vmem %s6976_s6, 640  ;;  %p9547_p5 = scmp.lt.s32.totalorder %s6976_s6, %s6976_s6 }
 0x76f   :  { %p9543_p4 = scmp.ne.s32.totalorder %s6976_s6, %s9542_s0  ;;  %p9548_p6 = scmp.lt.s32.totalorder %s9542_s0, %s9542_s0 }
 0x771   :  { %p9549_p7 = por %p9548_p6, %p9547_p5 }
 0x773   :  { %p9550_p8 = pnand %p9549_p7, %p9543_p4 }
 0x7d9   :  { %v6853_v20 = vpop.f32.mrb[28].mxu0 }
 0x7da   :  { %v8026_v21 = vadd.f32 %v6853_v20, %v4322_v4  ;;  %v6855_v22 = vpop.f32.mrb[29].mxu0 }
 0x7db   :  { %v8027_v23 = vadd.f32 %v6855_v22, %v4326_v6  ;;  %v6857_v25 = vpop.f32.mrb[30].mxu0 }
 0x7dc   :  { %v7834_v27 = vmul.f32 -1.442695, %v8026_v21  ;;  %v6858_v28 = vpop.f32.mrb[31].mxu0 }
 0x7dd   :  { %v7835_v19 = vmul.f32 -1.442695, %v8027_v23 }
 0x7de   :  { %9292 = vpow2.f32 %v7834_v27 }
 0x7df   :  { %9294 = vpow2.f32 %v7835_v19 }
 0x7e8   :  { %v9293_v29 = vpop.eup %9292 }
 0x7e9   :  { %v9295_v52 = vpop.eup %9294  ;;  %v6898_v60 = vadd.f32 1.0, %v9293_v29 }
 0x7ea   :  { %v6899_v30 = vadd.f32 1.0, %v9295_v52 }
 0x7eb   :  { %9296 = vrcp.f32 %v6898_v60 }
 0x7ec   :  { %9298 = vrcp.f32 %v6899_v30 }
 0x7f5   :  { %v9297_v58 = vpop.eup %9296 }
 0x7f6   :  { %v9299_v31 = vpop.eup %9298 }
 0x7f7   :  { %v7845_v34 = vpack.c.bf16 %v9299_v31, %v9297_v58 }
 0x7f9   :  { %6966 = vst.msk [vmem:[#allocation19 + $0x20] sm:$0xff] %vm6965_vm8, %v7845_v34 }
 0x7fa   :  { %9553 = shalt.err (!%p9550_p8)
}
 0x7fb   :  { %s9554_s21 = scalar_lea.hbm %s10051_s10, 640 }
 0x7fc   :  { %p9555_p9 = scmp.ne.s32.totalorder %s10051_s10, %s9554_s21  ;;  %p9558_p10 = scmp.lt.u32.totalorder %s9554_s21, %s10051_s10 }
 0x7fe   :  { %p9560_p11 = pnand %p9558_p10, %p9555_p9 }
 0x800   :  { %9563 = shalt.err (!%p9560_p11)
}
 0x801   :  { %6978 = dma.vmem_to_hbm [thread:$0]  %s6976_s6, 640, %s10051_s10, [#allocation4]  }
 0x802   :  { %9576 = dma.done.wait [#allocation4], 640  }
 0x803   :  { %9577 = vsyncadd [#allocation4], 4294966656 }
 0x804   :  { %9578 = dma.done.wait [#allocation21], 128  }
 0x805   :  { %9579 = vsyncadd [#allocation21], 4294967168 }
 0x806   :  { %6995 = vsyncpa [#allocation3], 1 }
 0x807   :  { %6996 = vsyncpa [#allocation6], 1 }
 0x808   :  { %6997 = vsyncpa [#allocation9], 1 }
 0x809   :  { %6998 = vsyncpa [#allocation12], 1 }
 0x80a   :  { %6999 = vsyncpa [#allocation15], 1 }
 0x80b   :  { %7000 = vsyncpa [#allocation18], 1 }
 0x80c   :  { %7001 = vsyncpa [#allocation4], 1 }
 0x80d   :  { %7002 = vsyncpa [#allocation21], 1 }

// kernel: vae_forward.1
= control target key start
LH: loop header
LB: loop body
LE: loop exit
PB: predicated region body
PF: predicated region fallthrough
CT: control target
= control target key end

     0   :  { %17 = vsyncpa [#allocation3], 0  ;;  %s10041_s0 = inlined_call_operand.hbm [shape: f32[8,1200], index: 0, kind: input, shape index: {}]   ;;  %s10042_s1 = inlined_call_operand.hbm [shape: f32[8,20], index: 1, kind: input, shape index: {}]   ;;  %s10043_s2 = inlined_call_operand.hbm [shape: bf16[1200,600], index: 2, kind: input, shape index: {}]   ;;  %s10044_s3 = inlined_call_operand.hbm [shape: f32[1,600], index: 3, kind: input, shape index: {}]   ;;  %s10045_s4 = inlined_call_operand.hbm [shape: bf16[600,40], index: 4, kind: input, shape index: {}]   ;;  %s10046_s5 = inlined_call_operand.hbm [shape: f32[1,40], index: 5, kind: input, shape index: {}]   ;;  %s10047_s6 = inlined_call_operand.hbm [shape: bf16[20,600], index: 6, kind: input, shape index: {}]   ;;  %s10048_s7 = inlined_call_operand.hbm [shape: f32[1,600], index: 7, kind: input, shape index: {}]   ;;  %s10049_s8 = inlined_call_operand.hbm [shape: bf16[600,1200], index: 8, kind: input, shape index: {}]   ;;  %s10050_s9 = inlined_call_operand.hbm [shape: f32[1,1200], index: 9, kind: input, shape index: {}]   ;;  %s10051_s10 = inlined_call_operand.hbm [shape: bf16[8,1200], index: 10, kind: output, shape index: {0}]   ;;  %s10052_s11 = inlined_call_operand.hbm [shape: f32[8,40], index: 11, kind: output, shape index: {1}]  }
   0x1   :  { %18 = vsyncpa [#allocation6], 0 }
   0x2   :  { %19 = vsyncpa [#allocation9], 0 }
   0x3   :  { %20 = vsyncpa [#allocation12], 0 }
   0x4   :  { %21 = vsyncpa [#allocation15], 0 }
   0x5   :  { %22 = vsyncpa [#allocation18], 0 }
   0x6   :  { %23 = vsyncpa [#allocation4], 0 }
   0x7   :  { %24 = vsyncpa [#allocation21], 0  ;;  %s9580_s17 = smov [#allocation5]   ;;  %s9581_s19 = smov [#allocation8]  }
   0x8   :  { %s41_s18 = sshll.u32 %s9580_s17, 4  ;;  %s63_s20 = sshll.u32 %s9581_s19, 4  ;;  %s42_s18 = int_to_ptr.vmem [resolvable:$true] %s41_s18  ;;  %s64_s20 = int_to_ptr.vmem [resolvable:$true] %s63_s20 }
   0x9   :  { %s9300_s23 = scalar_lea.hbm %s10042_s1, 128 }
   0xa   :  { %p9301_p0 = scmp.ne.s32.totalorder %s10042_s1, %s9300_s23  ;;  %p9304_p1 = scmp.lt.u32.totalorder %s9300_s23, %s10042_s1 }
   0xc   :  { %p9306_p2 = pnand %p9304_p1, %p9301_p0 }
   0xe   :  { %9309 = shalt.err (!%p9306_p2)
}
   0xf   :  { %s9310_s28 = scalar_lea.vmem %s42_s18, 128  ;;  %p9315_p4 = scmp.lt.s32.totalorder %s42_s18, %s42_s18 }
  0x10   :  { %p9311_p3 = scmp.ne.s32.totalorder %s42_s18, %s9310_s28  ;;  %p9316_p5 = scmp.lt.s32.totalorder %s9310_s28, %s9310_s28 }
  0x12   :  { %p9317_p6 = por %p9316_p5, %p9315_p4 }
  0x14   :  { %p9318_p7 = pnand %p9317_p6, %p9311_p3 }
  0x16   :  { %9321 = shalt.err (!%p9318_p7)
}
  0x17   :  { %44 = dma.hbm_to_vmem [thread:$0]  %s10042_s1, 128, %s42_s18, [#allocation6]  }
  0x18   :  { %s9322_s14 = scalar_lea.hbm %s10044_s3, 80 }
  0x19   :  { %p9323_p8 = scmp.ne.s32.totalorder %s10044_s3, %s9322_s14  ;;  %p9326_p9 = scmp.lt.u32.totalorder %s9322_s14, %s10044_s3 }
  0x1b   :  { %p9328_p10 = pnand %p9326_p9, %p9323_p8 }
  0x1d   :  { %9331 = shalt.err (!%p9328_p10)
}
  0x1e   :  { %s9332_s21 = scalar_lea.vmem %s64_s20, 80  ;;  %s9336_s22 = scalar_lea.vmem %s64_s20, 96 }
  0x1f   :  { %p9333_p11 = scmp.ne.s32.totalorder %s64_s20, %s9332_s21  ;;  %p9337_p12 = scmp.lt.s32.totalorder %s64_s20, %s64_s20 }
  0x20   :  { %p9338_p13 = scmp.lt.s32.totalorder %s9336_s22, %s9332_s21 }
  0x22   :  { %p9339_p0 = por %p9338_p13, %p9337_p12 }
  0x24   :  { %p9340_p1 = pnand %p9339_p0, %p9333_p11 }
  0x26   :  { %9343 = shalt.err (!%p9340_p1)
}
  0x27   :  { %66 = dma.hbm_to_vmem [thread:$0]  %s10044_s3, 80, %s64_s20, [#allocation9]  }
  0x28   :  { %s9582_s23 = smov [#allocation11]   ;;  %s9583_s25 = smov [#allocation14]  }
  0x29   :  { %s85_s24 = sshll.u32 %s9582_s23, 4  ;;  %s107_s26 = sshll.u32 %s9583_s25, 4  ;;  %s86_s24 = int_to_ptr.vmem [resolvable:$true] %s85_s24  ;;  %s108_s26 = int_to_ptr.vmem [resolvable:$true] %s107_s26 }
  0x2a   :  { %s9344_s29 = scalar_lea.hbm %s10046_s5, 16 }
  0x2b   :  { %p9345_p2 = scmp.ne.s32.totalorder %s10046_s5, %s9344_s29  ;;  %p9348_p3 = scmp.lt.u32.totalorder %s9344_s29, %s10046_s5 }
  0x2d   :  { %p9350_p4 = pnand %p9348_p3, %p9345_p2 }
  0x2f   :  { %9353 = shalt.err (!%p9350_p4)
}
  0x30   :  { %s9354_s3 = scalar_lea.vmem %s86_s24, 16  ;;  %s9358_s20 = scalar_lea.vmem %s86_s24, 32 }
  0x31   :  { %p9355_p5 = scmp.ne.s32.totalorder %s86_s24, %s9354_s3  ;;  %p9359_p6 = scmp.lt.s32.totalorder %s86_s24, %s86_s24 }
  0x32   :  { %p9360_p7 = scmp.lt.s32.totalorder %s9358_s20, %s9354_s3 }
  0x34   :  { %p9361_p8 = por %p9360_p7, %p9359_p6 }
  0x36   :  { %p9362_p9 = pnand %p9361_p8, %p9355_p5 }
  0x38   :  { %9365 = shalt.err (!%p9362_p9)
}
  0x39   :  { %88 = dma.hbm_to_vmem [thread:$0]  %s10046_s5, 16, %s86_s24, [#allocation12]  }
  0x3a   :  { %s9366_s21 = scalar_lea.hbm %s10048_s7, 80 }
  0x3b   :  { %p9367_p10 = scmp.ne.s32.totalorder %s10048_s7, %s9366_s21  ;;  %p9370_p11 = scmp.lt.u32.totalorder %s9366_s21, %s10048_s7 }
  0x3d   :  { %p9372_p12 = pnand %p9370_p11, %p9367_p10 }
  0x3f   :  { %9375 = shalt.err (!%p9372_p12)
}
  0x40   :  { %s9376_s25 = scalar_lea.vmem %s108_s26, 80  ;;  %s9380_s27 = scalar_lea.vmem %s108_s26, 96 }
  0x41   :  { %p9377_p13 = scmp.ne.s32.totalorder %s108_s26, %s9376_s25  ;;  %p9381_p0 = scmp.lt.s32.totalorder %s108_s26, %s108_s26 }
  0x42   :  { %p9382_p1 = scmp.lt.s32.totalorder %s9380_s27, %s9376_s25 }
  0x44   :  { %p9383_p2 = por %p9382_p1, %p9381_p0 }
  0x46   :  { %p9384_p3 = pnand %p9383_p2, %p9377_p13 }
  0x48   :  { %9387 = shalt.err (!%p9384_p3)
}
  0x49   :  { %110 = dma.hbm_to_vmem [thread:$0]  %s10048_s7, 80, %s108_s26, [#allocation15]  }
  0x4a   :  { %s9584_s28 = smov [#allocation2]   ;;  %s9585_s30 = smov [#allocation7]  }
  0x4b   :  { %s31_s29 = sshll.u32 %s9584_s28, 4  ;;  %s50_s12 = sshll.u32 %s9585_s30, 4  ;;  %s32_s29 = int_to_ptr.vmem [resolvable:$true] %s31_s29  ;;  %s9710_s12 = int_to_ptr.vmem [resolvable:$true] %s50_s12 }
  0x4c   :  { %s9388_s3 = scalar_lea.hbm %s10041_s0, 1280 }
  0x4d   :  { %p9389_p4 = scmp.ne.s32.totalorder %s10041_s0, %s9388_s3  ;;  %p9392_p5 = scmp.lt.u32.totalorder %s9388_s3, %s10041_s0 }
  0x4f   :  { %p9394_p6 = pnand %p9392_p5, %p9389_p4 }
  0x51   :  { %9397 = shalt.err (!%p9394_p6)
}
  0x52   :  { %s9398_s7 = scalar_lea.vmem %s32_s29, 1280  ;;  %p9403_p8 = scmp.lt.s32.totalorder %s32_s29, %s32_s29 }
  0x53   :  { %p9399_p7 = scmp.ne.s32.totalorder %s32_s29, %s9398_s7  ;;  %p9404_p9 = scmp.lt.s32.totalorder %s9398_s7, %s9398_s7 }
  0x55   :  { %p9405_p10 = por %p9404_p9, %p9403_p8 }
  0x57   :  { %p9406_p11 = pnand %p9405_p10, %p9399_p7 }
  0x59   :  { %9409 = shalt.err (!%p9406_p11)
}
  0x5a   :  { %34 = dma.hbm_to_vmem [thread:$0]  %s10041_s0, 1280, %s32_s29, [#allocation3]  }
  0x5b   :  { %s9410_s1 = scalar_lea.hbm %s10043_s2, 48000 }
  0x5c   :  { %p9411_p12 = scmp.ne.s32.totalorder %s10043_s2, %s9410_s1  ;;  %p9414_p13 = scmp.lt.u32.totalorder %s9410_s1, %s10043_s2 }
  0x5e   :  { %p9416_p0 = pnand %p9414_p13, %p9411_p12 }
  0x60   :  { %9419 = shalt.err (!%p9416_p0)
}
  0x61   :  { %s9420_s5 = scalar_lea.vmem %s9710_s12, 48000  ;;  %p9425_p2 = scmp.lt.s32.totalorder %s9710_s12, %s9710_s12 }
  0x62   :  { %p9421_p1 = scmp.ne.s32.totalorder %s9710_s12, %s9420_s5  ;;  %p9426_p3 = scmp.lt.s32.totalorder %s9420_s5, %s9420_s5 }
  0x64   :  { %p9427_p4 = por %p9426_p3, %p9425_p2 }
  0x66   :  { %p9428_p5 = pnand %p9427_p4, %p9421_p1 }
  0x68   :  { %9431 = shalt.err (!%p9428_p5)
}
  0x69   :  { %s9586_s0 = smov 320   ;;  %s9587_s24 = smov 20  }
  0x6a   :  { %56 = dma.hbm_to_vmem [thread:$0]  %s10043_s2, 48000, %s9710_s12, [#allocation6], %s9586_s0, %s9586_s0, %s9587_s24  }
  0x6b   :  { %s9588_s30 = smov [#allocation10]   ;;  %s9432_s20 = scalar_lea.hbm %s10045_s4, 4800 }
  0x6c   :  { %s72_s13 = sshll.u32 %s9588_s30, 4  ;;  %p9433_p6 = scmp.ne.s32.totalorder %s10045_s4, %s9432_s20  ;;  %s73_s13 = int_to_ptr.vmem [resolvable:$true] %s72_s13 }
  0x6d   :  { %p9436_p7 = scmp.lt.u32.totalorder %s9432_s20, %s10045_s4 }
  0x6f   :  { %p9438_p8 = pnand %p9436_p7, %p9433_p6 }
  0x71   :  { %9441 = shalt.err (!%p9438_p8)
}
  0x72   :  { %s9442_s26 = scalar_lea.vmem %s73_s13, 4800  ;;  %p9447_p10 = scmp.lt.s32.totalorder %s73_s13, %s73_s13 }
  0x73   :  { %p9443_p9 = scmp.ne.s32.totalorder %s73_s13, %s9442_s26  ;;  %p9448_p11 = scmp.lt.s32.totalorder %s9442_s26, %s9442_s26 }
  0x75   :  { %p9449_p12 = por %p9448_p11, %p9447_p10 }
  0x77   :  { %p9450_p13 = pnand %p9449_p12, %p9443_p9 }
  0x79   :  { %9453 = shalt.err (!%p9450_p13)
}
  0x7a   :  { %s9589_s2 = smov 64   ;;  %s9590_s12 = smov 4  }
  0x7b   :  { %78 = dma.hbm_to_vmem [thread:$0]  %s10045_s4, 4800, %s73_s13, [#allocation9], %s9589_s2, %s9589_s2, %s9590_s12  }
  0x7c   :  { %s9591_s22 = smov [#allocation13]   ;;  %s9592_s18 = smov [#allocation16]  }
  0x7d   :  { %s94_s1 = sshll.u32 %s9591_s22, 4  ;;  %s116_s23 = sshll.u32 %s9592_s18, 4  ;;  %s95_s1 = int_to_ptr.vmem [resolvable:$true] %s94_s1  ;;  %s117_s23 = int_to_ptr.vmem [resolvable:$true] %s116_s23 }
  0x7e   :  { %s9454_s5 = scalar_lea.hbm %s10047_s6, 960 }
  0x7f   :  { %p9455_p0 = scmp.ne.s32.totalorder %s10047_s6, %s9454_s5  ;;  %p9458_p1 = scmp.lt.u32.totalorder %s9454_s5, %s10047_s6 }
  0x81   :  { %p9460_p2 = pnand %p9458_p1, %p9455_p0 }
  0x83   :  { %9463 = shalt.err (!%p9460_p2)
}
  0x84   :  { %s9464_s4 = scalar_lea.vmem %s95_s1, 960  ;;  %p9469_p4 = scmp.lt.s32.totalorder %s95_s1, %s95_s1 }
  0x85   :  { %p9465_p3 = scmp.ne.s32.totalorder %s95_s1, %s9464_s4  ;;  %p9470_p5 = scmp.lt.s32.totalorder %s9464_s4, %s9464_s4 }
  0x87   :  { %p9471_p6 = por %p9470_p5, %p9469_p4 }
  0x89   :  { %p9472_p7 = pnand %p9471_p6, %p9465_p3 }
  0x8b   :  { %9475 = shalt.err (!%p9472_p7)
}
  0x8c   :  { %100 = dma.hbm_to_vmem [thread:$0]  %s10047_s6, 960, %s95_s1, [#allocation12], %s9586_s0, %s9586_s0, %s9587_s24  }
  0x8d   :  { %s9476_s16 = scalar_lea.hbm %s10049_s8, 48000 }
  0x8e   :  { %p9477_p8 = scmp.ne.s32.totalorder %s10049_s8, %s9476_s16  ;;  %p9480_p9 = scmp.lt.u32.totalorder %s9476_s16, %s10049_s8 }
  0x90   :  { %p9482_p10 = pnand %p9480_p9, %p9477_p8 }
  0x92   :  { %9485 = shalt.err (!%p9482_p10)
}
  0x93   :  { %s9486_s12 = scalar_lea.vmem %s117_s23, 48000  ;;  %p9491_p12 = scmp.lt.s32.totalorder %s117_s23, %s117_s23 }
  0x94   :  { %p9487_p11 = scmp.ne.s32.totalorder %s117_s23, %s9486_s12  ;;  %p9492_p13 = scmp.lt.s32.totalorder %s9486_s12, %s9486_s12 }
  0x96   :  { %p9493_p0 = por %p9492_p13, %p9491_p12 }
  0x98   :  { %p9494_p1 = pnand %p9493_p0, %p9487_p11 }
  0x9a   :  { %9497 = shalt.err (!%p9494_p1)
}
  0x9b   :  { %s9593_s6 = smov 640   ;;  %s9594_s0 = smov 40  }
  0x9c   :  { %122 = dma.hbm_to_vmem [thread:$0]  %s10049_s8, 48000, %s117_s23, [#allocation15], %s9593_s6, %s9593_s6, %s9594_s0  }
  0x9d   :  { %s9595_s21 = smov [#allocation17]   ;;  %s9498_s25 = scalar_lea.hbm %s10050_s9, 160 }
  0x9e   :  { %s129_s22 = sshll.u32 %s9595_s21, 4  ;;  %p9499_p2 = scmp.ne.s32.totalorder %s10050_s9, %s9498_s25  ;;  %s130_s22 = int_to_ptr.vmem [resolvable:$true] %s129_s22 }
  0x9f   :  { %p9502_p3 = scmp.lt.u32.totalorder %s9498_s25, %s10050_s9 }
  0xa1   :  { %p9504_p4 = pnand %p9502_p3, %p9499_p2 }
  0xa3   :  { %9507 = shalt.err (!%p9504_p4)
}
  0xa4   :  { %s9508_s30 = scalar_lea.vmem %s130_s22, 160  ;;  %p9513_p6 = scmp.lt.s32.totalorder %s130_s22, %s130_s22 }
  0xa5   :  { %p9509_p5 = scmp.ne.s32.totalorder %s130_s22, %s9508_s30  ;;  %p9514_p7 = scmp.lt.s32.totalorder %s9508_s30, %s9508_s30 }
  0xa7   :  { %p9515_p8 = por %p9514_p7, %p9513_p6 }
  0xa9   :  { %p9516_p9 = pnand %p9515_p8, %p9509_p5 }
  0xab   :  { %9519 = shalt.err (!%p9516_p9)
}
  0xac   :  { %132 = dma.hbm_to_vmem [thread:$0]  %s10050_s9, 160, %s130_s22, [#allocation18]  }
  0xad   :  { %9564 = dma.done.wait [#allocation3], 1280  }
  0xae   :  { %9565 = vsyncadd [#allocation3], 4294966016 }
  0xaf   :  { %9566 = dma.done.wait [#allocation6], 48128  }
  0xb0   :  { %9567 = vsyncadd [#allocation6], 4294919168 }
  0xb1   :  { %9568 = dma.done.wait [#allocation9], 4880  }
  0xb2   :  { %9569 = vsyncadd [#allocation9], 4294962416 }
  0xb3   :  { %9570 = dma.done.wait [#allocation12], 976  }
  0xb4   :  { %9571 = vsyncadd [#allocation12], 4294966320 }
  0xb5   :  { %9572 = dma.done.wait [#allocation15], 48080  }
  0xb6   :  { %9573 = vsyncadd [#allocation15], 4294919216 }
  0xb7   :  { %9574 = dma.done.wait [#allocation18], 160  }
  0xb8   :  { %9575 = vsyncadd [#allocation18], 4294967136  ;;  %v8118_v0 = vld [vmem:[#allocation7 + $0x4] ss:$20 sps:$4 sm:$0xff]   ;;  %v8122_v2 = vld [vmem:[#allocation7] ss:$20 sps:$4 sm:$0xff]  }
  0xb9   :  { %v8120_v1 = vld [vmem:[#allocation7 + $0x284] ss:$20 sps:$4 sm:$0xff]   ;;  %2615 = vmatprep.subr.bf16.mxu1 %v8118_v0  ;;  %v8123_v3 = vld [vmem:[#allocation7 + $0x280] ss:$20 sps:$4 sm:$0xff]   ;;  %v8128_v6 = vld [vmem:[#allocation7 + $0x28] ss:$20 sps:$4 sm:$0xff]  }
  0xba   :  { %2656 = vmatprep.subr.bf16.mxu0 %v8120_v1  ;;  %v8124_v4 = vld [vmem:[#allocation7 + $0x2c] ss:$20 sps:$4 sm:$0xff]   ;;  %2616 = vmatpush1.bf16.msra.mxu1 %v8122_v2  ;;  %v8129_v7 = vld [vmem:[#allocation7 + $0x2a8] ss:$20 sps:$4 sm:$0xff]   ;;  %v8134_v10 = vld [vmem:[#allocation7 + $0x50] ss:$20 sps:$4 sm:$0xff]  }
  0xbb   :  { %2657 = vmatpush1.bf16.msra.mxu0 %v8123_v3  ;;  %v8126_v5 = vld [vmem:[#allocation7 + $0x2ac] ss:$20 sps:$4 sm:$0xff]   ;;  %2617 = vmatprep.subr.bf16.mxu1 %v8124_v4  ;;  %v8130_v8 = vld [vmem:[#allocation7 + $0x54] ss:$20 sps:$4 sm:$0xff]   ;;  %v8135_v11 = vld [vmem:[#allocation7 + $0x2d0] ss:$20 sps:$4 sm:$0xff]  }
  0xbc   :  { %2658 = vmatprep.subr.bf16.mxu0 %v8126_v5  ;;  %v8132_v9 = vld [vmem:[#allocation7 + $0x2d4] ss:$20 sps:$4 sm:$0xff]   ;;  %v8136_v12 = vld [vmem:[#allocation7 + $0x7c] ss:$20 sps:$4 sm:$0xff]   ;;  %v8140_v14 = vld [vmem:[#allocation7 + $0x78] ss:$20 sps:$4 sm:$0xff]  }
  0xbd   :  { %v8138_v13 = vld [vmem:[#allocation7 + $0x2fc] ss:$20 sps:$4 sm:$0xff]   ;;  %v8141_v15 = vld [vmem:[#allocation7 + $0x2f8] ss:$20 sps:$4 sm:$0xff]   ;;  %v8146_v18 = vld [vmem:[#allocation7 + $0xa0] ss:$20 sps:$4 sm:$0xff]  }
  0xbe   :  { %2618 = vmatpush1.bf16.msra.mxu1 %v8128_v6  ;;  %v8142_v16 = vld [vmem:[#allocation7 + $0xa4] ss:$20 sps:$4 sm:$0xff]   ;;  %v8147_v19 = vld [vmem:[#allocation7 + $0x320] ss:$20 sps:$4 sm:$0xff]   ;;  %v8152_v22 = vld [vmem:[#allocation7 + $0xc8] ss:$20 sps:$4 sm:$0xff]  }
  0xbf   :  { %2659 = vmatpush1.bf16.msra.mxu0 %v8129_v7  ;;  %2619 = vmatprep.subr.bf16.mxu1 %v8130_v8  ;;  %v8144_v17 = vld [vmem:[#allocation7 + $0x324] ss:$20 sps:$4 sm:$0xff]   ;;  %v8148_v20 = vld [vmem:[#allocation7 + $0xcc] ss:$20 sps:$4 sm:$0xff]   ;;  %v8153_v23 = vld [vmem:[#allocation7 + $0x348] ss:$20 sps:$4 sm:$0xff]  }
  0xc0   :  { %2660 = vmatprep.subr.bf16.mxu0 %v8132_v9  ;;  %v8150_v21 = vld [vmem:[#allocation7 + $0x34c] ss:$20 sps:$4 sm:$0xff]   ;;  %v8154_v24 = vld [vmem:[#allocation7 + $0xf4] ss:$20 sps:$4 sm:$0xff]   ;;  %v8158_v26 = vld [vmem:[#allocation7 + $0xf0] ss:$20 sps:$4 sm:$0xff]  }
  0xc1   :  { %v8156_v25 = vld [vmem:[#allocation7 + $0x374] ss:$20 sps:$4 sm:$0xff]   ;;  %v8159_v27 = vld [vmem:[#allocation7 + $0x370] ss:$20 sps:$4 sm:$0xff]   ;;  %v8164_v30 = vld [vmem:[#allocation7 + $0x118] ss:$20 sps:$4 sm:$0xff]  }
  0xc2   :  { %2620 = vmatpush1.bf16.msra.mxu1 %v8134_v10  ;;  %v8160_v28 = vld [vmem:[#allocation7 + $0x11c] ss:$20 sps:$4 sm:$0xff]   ;;  %v8165_v31 = vld [vmem:[#allocation7 + $0x398] ss:$20 sps:$4 sm:$0xff]   ;;  %v8170_v34 = vld [vmem:[#allocation7 + $0x140] ss:$20 sps:$4 sm:$0xff]  }
  0xc3   :  { %2661 = vmatpush1.bf16.msra.mxu0 %v8135_v11  ;;  %2621 = vmatprep.subr.bf16.mxu1 %v8136_v12  ;;  %v8162_v29 = vld [vmem:[#allocation7 + $0x39c] ss:$20 sps:$4 sm:$0xff]   ;;  %v8166_v32 = vld [vmem:[#allocation7 + $0x144] ss:$20 sps:$4 sm:$0xff]   ;;  %v8171_v35 = vld [vmem:[#allocation7 + $0x3c0] ss:$20 sps:$4 sm:$0xff]  }
  0xc4   :  { %2662 = vmatprep.subr.bf16.mxu0 %v8138_v13  ;;  %v8168_v33 = vld [vmem:[#allocation7 + $0x3c4] ss:$20 sps:$4 sm:$0xff]   ;;  %v8172_v36 = vld [vmem:[#allocation7 + $0x16c] ss:$20 sps:$4 sm:$0xff]   ;;  %v8176_v38 = vld [vmem:[#allocation7 + $0x168] ss:$20 sps:$4 sm:$0xff]  }
  0xc5   :  { %v8174_v37 = vld [vmem:[#allocation7 + $0x3ec] ss:$20 sps:$4 sm:$0xff]   ;;  %v8177_v39 = vld [vmem:[#allocation7 + $0x3e8] ss:$20 sps:$4 sm:$0xff]   ;;  %v8182_v42 = vld [vmem:[#allocation7 + $0x190] ss:$20 sps:$4 sm:$0xff]  }
  0xc6   :  { %2622 = vmatpush1.bf16.msra.mxu1 %v8140_v14  ;;  %v8178_v40 = vld [vmem:[#allocation7 + $0x194] ss:$20 sps:$4 sm:$0xff]   ;;  %v8183_v43 = vld [vmem:[#allocation7 + $0x410] ss:$20 sps:$4 sm:$0xff]   ;;  %v8188_v47 = vld [vmem:[#allocation7 + $0x1b8] ss:$20 sps:$4 sm:$0xff]  }
  0xc7   :  { %2663 = vmatpush1.bf16.msra.mxu0 %v8141_v15  ;;  %2623 = vmatprep.subr.bf16.mxu1 %v8142_v16  ;;  %v8180_v41 = vld [vmem:[#allocation7 + $0x414] ss:$20 sps:$4 sm:$0xff]   ;;  %v8184_v44 = vld [vmem:[#allocation7 + $0x1bc] ss:$20 sps:$4 sm:$0xff]   ;;  %v167_v49 = vld [vmem:[#allocation2 + $0x18] sm:$0xff]  ;;  %vm2611_vm0 = vcmask 392192  }
  0xc8   :  { %2664 = vmatprep.subr.bf16.mxu0 %v8144_v17  ;;  %v8186_v45 = vld [vmem:[#allocation7 + $0x43c] ss:$20 sps:$4 sm:$0xff]   ;;  %v8189_v50 = vld [vmem:[#allocation7 + $0x438] ss:$20 sps:$4 sm:$0xff]   ;;  %v9797_v52 = vpack.c.bf16 %v167_v49, %v167_v49  ;;  %v8194_v54 = vld [vmem:[#allocation7 + $0x1e0] ss:$20 sps:$4 sm:$0xff]  }
  0xc9   :  { %v165_v46 = vld [vmem:[#allocation2 + $0x8] sm:$0xff]  ;;  %v8190_v51 = vld [vmem:[#allocation7 + $0x1e4] ss:$20 sps:$4 sm:$0xff]   ;;  %v8196_v56 = vld [vmem:[#allocation7 + $0x20c] ss:$20 sps:$4 sm:$0xff]   ;;  %vm3546_vm1 = vcmask 1043456  }
  0xca   :  { %2624 = vmatpush1.bf16.msra.mxu1 %v8146_v18  ;;  %v9795_v48 = vpack.c.bf16 %v165_v46, %v165_v46  ;;  %v8192_v53 = vld [vmem:[#allocation7 + $0x464] ss:$20 sps:$4 sm:$0xff]   ;;  %2688 = vmatprep.mubr.bf16.mxu0 %v9797_v52  ;;  %v8195_v55 = vld [vmem:[#allocation7 + $0x460] ss:$20 sps:$4 sm:$0xff]   ;;  %v8200_v58 = vld [vmem:[#allocation7 + $0x208] ss:$20 sps:$4 sm:$0xff]  }
  0xcb   :  { %2665 = vmatpush1.bf16.msra.mxu0 %v8147_v19  ;;  %2625 = vmatprep.subr.bf16.mxu1 %v8148_v20  ;;  %v8198_v57 = vld [vmem:[#allocation7 + $0x48c] ss:$20 sps:$4 sm:$0xff]   ;;  %v8201_v59 = vld [vmem:[#allocation7 + $0x488] ss:$20 sps:$4 sm:$0xff]   ;;  %v8206_v62 = vld [vmem:[#allocation7 + $0x230] ss:$20 sps:$4 sm:$0xff]  }
  0xcc   :  { %2666 = vmatprep.subr.bf16.mxu0 %v8150_v21  ;;  %2647 = vmatprep.mubr.bf16.mxu1 %v9795_v48  ;;  %v8202_v60 = vld [vmem:[#allocation7 + $0x234] ss:$20 sps:$4 sm:$0xff]   ;;  %v8207_v63 = vld [vmem:[#allocation7 + $0x4b0] ss:$20 sps:$4 sm:$0xff]   ;;  %v8212_v2 = vld [vmem:[#allocation7 + $0x258] ss:$20 sps:$4 sm:$0xff]  }
  0xcd   :  { %v8204_v61 = vld [vmem:[#allocation7 + $0x4b4] ss:$20 sps:$4 sm:$0xff]   ;;  %v8208_v0 = vld [vmem:[#allocation7 + $0x25c] ss:$20 sps:$4 sm:$0xff]   ;;  %v8213_v3 = vld [vmem:[#allocation7 + $0x4d8] ss:$20 sps:$4 sm:$0xff]  }
  0xce   :  { %2626 = vmatpush1.bf16.msra.mxu1 %v8152_v22  ;;  %v8210_v1 = vld [vmem:[#allocation7 + $0x4dc] ss:$20 sps:$4 sm:$0xff]   ;;  %v164_v4 = vld [vmem:[#allocation2] sm:$0xff]  ;;  %v8216_v5 = vld [vmem:[#allocation7 + $0x504] ss:$20 sps:$4 sm:$0xff]   ;;  %vm9598_vm2 = vmmov 0  }
  0xcf   :  { %2667 = vmatpush1.bf16.msra.mxu0 %v8153_v23  ;;  %2627 = vmatprep.subr.bf16.mxu1 %v8154_v24  ;;  %v166_v6 = vld [vmem:[#allocation2 + $0x10] sm:$0xff]  ;;  %v8219_v7 = vld [vmem:[#allocation7 + $0xc] ss:$20 sps:$4 sm:$0xff]   ;;  %v9801_v8 = vpack.c.bf16 %v164_v4, %v164_v4  ;;  %v8225_v13 = vld [vmem:[#allocation7 + $0x34] ss:$20 sps:$4 sm:$0xff]   ;;  %vm3542_vm3 = vcmask 719872  }
  0xd0   :  { %2668 = vmatprep.subr.bf16.mxu0 %v8156_v25  ;;  %v8214_v9 = vld [vmem:[#allocation7 + $0x500] ss:$20 sps:$4 sm:$0xff]   ;;  %v8217_v10 = vld [vmem:[#allocation7 + $0x8] ss:$20 sps:$4 sm:$0xff]   ;;  %v9803_v11 = vpack.c.bf16 %v166_v6, %v166_v6  ;;  %v8223_v15 = vld [vmem:[#allocation7 + $0x30] ss:$20 sps:$4 sm:$0xff]  }
  0xd1   :  { %v8222_v12 = vld [vmem:[#allocation7 + $0x52c] ss:$20 sps:$4 sm:$0xff]   ;;  %v8220_v14 = vld [vmem:[#allocation7 + $0x528] ss:$20 sps:$4 sm:$0xff]   ;;  %v8226_v18 = vld [vmem:[#allocation7 + $0x550] ss:$20 sps:$4 sm:$0xff]  }
  0xd2   :  { %2628 = vmatpush1.bf16.msra.mxu1 %v8158_v26  ;;  %v8228_v16 = vld [vmem:[#allocation7 + $0x554] ss:$20 sps:$4 sm:$0xff]   ;;  %v8231_v17 = vld [vmem:[#allocation7 + $0x5c] ss:$20 sps:$4 sm:$0xff]   ;;  %v8229_v19 = vld [vmem:[#allocation7 + $0x58] ss:$20 sps:$4 sm:$0xff]  }
  0xd3   :  { %2669 = vmatpush1.bf16.msra.mxu0 %v8159_v27  ;;  %2629 = vmatprep.subr.bf16.mxu1 %v8160_v28  ;;  %v8234_v20 = vld [vmem:[#allocation7 + $0x57c] ss:$20 sps:$4 sm:$0xff]   ;;  %v8237_v21 = vld [vmem:[#allocation7 + $0x84] ss:$20 sps:$4 sm:$0xff]   ;;  %v8235_v23 = vld [vmem:[#allocation7 + $0x80] ss:$20 sps:$4 sm:$0xff]  }
  0xd4   :  { %2670 = vmatprep.subr.bf16.mxu0 %v8162_v29  ;;  %v8232_v22 = vld [vmem:[#allocation7 + $0x578] ss:$20 sps:$4 sm:$0xff]   ;;  %v8238_v26 = vld [vmem:[#allocation7 + $0x5a0] ss:$20 sps:$4 sm:$0xff]   ;;  %v8241_v27 = vld [vmem:[#allocation7 + $0xa8] ss:$20 sps:$4 sm:$0xff]  }
  0xd5   :  { %v8240_v24 = vld [vmem:[#allocation7 + $0x5a4] ss:$20 sps:$4 sm:$0xff]   ;;  %v8243_v25 = vld [vmem:[#allocation7 + $0xac] ss:$20 sps:$4 sm:$0xff]   ;;  %v8249_v29 = vld [vmem:[#allocation7 + $0xd4] ss:$20 sps:$4 sm:$0xff]  }
  0xd6   :  { %2630 = vmatpush1.bf16.msra.mxu1 %v8164_v30  ;;  %v8246_v28 = vld [vmem:[#allocation7 + $0x5cc] ss:$20 sps:$4 sm:$0xff]   ;;  %v8244_v30 = vld [vmem:[#allocation7 + $0x5c8] ss:$20 sps:$4 sm:$0xff]   ;;  %v8298_v6 = vld [vmem:[#allocation7 + $0x730] ss:$20 sps:$4 sm:$0xff]  }
  0xd7   :  { %2671 = vmatpush1.bf16.msra.mxu0 %v8165_v31  ;;  %2631 = vmatprep.subr.bf16.mxu1 %v8166_v32  ;;  %v8247_v31 = vld [vmem:[#allocation7 + $0xd0] ss:$20 sps:$4 sm:$0xff]   ;;  %v8252_v32 = vld [vmem:[#allocation7 + $0x5f4] ss:$20 sps:$4 sm:$0xff]   ;;  %v8270_v46 = vld [vmem:[#allocation7 + $0x66c] ss:$20 sps:$4 sm:$0xff]  }
  0xd8   :  { %2672 = vmatprep.subr.bf16.mxu0 %v8168_v33  ;;  %v8255_v33 = vld [vmem:[#allocation7 + $0xfc] ss:$20 sps:$4 sm:$0xff]   ;;  %v8300_v4 = vld [vmem:[#allocation7 + $0x734] ss:$20 sps:$4 sm:$0xff]   ;;  %vm6967_vm4 = vcmask 326656   ;;  %vm3760_vm5 = vcmask 1041408  }
  0xd9   :  { %v8268_v49 = vld [vmem:[#allocation7 + $0x668] ss:$20 sps:$4 sm:$0xff]   ;;  %s9599_s9 = smov 108   ;;  %vm3756_vm6 = vcmask 162816   ;;  %s9600_s14 = smov [#allocation20]  }
  0xda   :  { %2632 = vmatpush1.bf16.msra.mxu1 %v8170_v34  ;;  %v169_v34 = vld [vmem:[#allocation2 + $0x28] sm:$0xff]  ;;  %s6985_s4 = sshll.u32 %s9600_s14, 4  ;;  %s6986_s4 = int_to_ptr.vmem [resolvable:$true] %s6985_s4 }
  0xdb   :  { %2673 = vmatpush1.bf16.msra.mxu0 %v8171_v35  ;;  %2633 = vmatprep.subr.bf16.mxu1 %v8172_v36  ;;  %v8250_v35 = vld [vmem:[#allocation7 + $0x5f0] ss:$20 sps:$4 sm:$0xff]   ;;  %v9808_v36 = vpack.c.bf16 %v169_v34, %v169_v34  ;;  %s9520_s13 = scalar_lea.vmem %s6986_s4, 128  ;;  %p9525_p11 = scmp.lt.s32.totalorder %s6986_s4, %s6986_s4 }
  0xdc   :  { %2674 = vmatprep.subr.bf16.mxu0 %v8174_v37  ;;  %v8253_v37 = vld [vmem:[#allocation7 + $0xf8] ss:$20 sps:$4 sm:$0xff]   ;;  %p9521_p10 = scmp.ne.s32.totalorder %s6986_s4, %s9520_s13  ;;  %p9526_p12 = scmp.lt.s32.totalorder %s9520_s13, %s9520_s13 }
  0xdd   :  { %v8336_v34 = vld [vmem:[#allocation7 + $0x824] ss:$20 sps:$4 sm:$0xff]  }
  0xde   :  { %2634 = vmatpush1.bf16.msra.mxu1 %v8176_v38  ;;  %v8258_v38 = vld [vmem:[#allocation7 + $0x61c] ss:$20 sps:$4 sm:$0xff]   ;;  %p9527_p13 = por %p9526_p12, %p9525_p11 }
  0xdf   :  { %2675 = vmatpush1.bf16.msra.mxu0 %v8177_v39  ;;  %2635 = vmatprep.subr.bf16.mxu1 %v8178_v40  ;;  %v8261_v39 = vld [vmem:[#allocation7 + $0x124] ss:$20 sps:$4 sm:$0xff]  }
  0xe0   :  { %2676 = vmatprep.subr.bf16.mxu0 %v8180_v41  ;;  %v8256_v40 = vld [vmem:[#allocation7 + $0x618] ss:$20 sps:$4 sm:$0xff]   ;;  %v8259_v41 = vld [vmem:[#allocation7 + $0x120] ss:$20 sps:$4 sm:$0xff]   ;;  %p9528_p0 = pnand %p9527_p13, %p9521_p10 }
  0xe2   :  { %2636 = vmatpush1.bf16.msra.mxu1 %v8182_v42  ;;  %v8264_v42 = vld [vmem:[#allocation7 + $0x644] ss:$20 sps:$4 sm:$0xff]  }
  0xe3   :  { %2677 = vmatpush1.bf16.msra.mxu0 %v8183_v43  ;;  %2637 = vmatprep.subr.bf16.mxu1 %v8184_v44  ;;  %v8267_v43 = vld [vmem:[#allocation7 + $0x14c] ss:$20 sps:$4 sm:$0xff]  }
  0xe4   :  { %2678 = vmatprep.subr.bf16.mxu0 %v8186_v45  ;;  %v8262_v44 = vld [vmem:[#allocation7 + $0x640] ss:$20 sps:$4 sm:$0xff]   ;;  %v8265_v45 = vld [vmem:[#allocation7 + $0x148] ss:$20 sps:$4 sm:$0xff]  }
  0xe6   :  { %2638 = vmatpush1.bf16.msra.mxu1 %v8188_v47  ;;  %v8273_v47 = vld [vmem:[#allocation7 + $0x174] ss:$20 sps:$4 sm:$0xff]  }
  0xe7   :  { %2679 = vmatpush1.bf16.msra.mxu0 %v8189_v50  ;;  %2639 = vmatprep.subr.bf16.mxu1 %v8190_v51  ;;  %v8271_v50 = vld [vmem:[#allocation7 + $0x170] ss:$20 sps:$4 sm:$0xff]   ;;  %v8276_v51 = vld [vmem:[#allocation7 + $0x694] ss:$20 sps:$4 sm:$0xff]  }
  0xe8   :  { %2680 = vmatprep.subr.bf16.mxu0 %v8192_v53  ;;  %v8279_v53 = vld [vmem:[#allocation7 + $0x19c] ss:$20 sps:$4 sm:$0xff]  }
  0xea   :  { %2640 = vmatpush1.bf16.msra.mxu1 %v8194_v54  ;;  %v8274_v54 = vld [vmem:[#allocation7 + $0x690] ss:$20 sps:$4 sm:$0xff]  }
  0xeb   :  { %2681 = vmatpush1.bf16.msra.mxu0 %v8195_v55  ;;  %2641 = vmatprep.subr.bf16.mxu1 %v8196_v56  ;;  %v8277_v55 = vld [vmem:[#allocation7 + $0x198] ss:$20 sps:$4 sm:$0xff]   ;;  %v8282_v56 = vld [vmem:[#allocation7 + $0x6bc] ss:$20 sps:$4 sm:$0xff]  }
  0xec   :  { %2682 = vmatprep.subr.bf16.mxu0 %v8198_v57  ;;  %v8285_v57 = vld [vmem:[#allocation7 + $0x1c4] ss:$20 sps:$4 sm:$0xff]  }
  0xee   :  { %2642 = vmatpush1.bf16.msra.mxu1 %v8200_v58  ;;  %v8280_v58 = vld [vmem:[#allocation7 + $0x6b8] ss:$20 sps:$4 sm:$0xff]  }
  0xef   :  { %2683 = vmatpush1.bf16.msra.mxu0 %v8201_v59  ;;  %2643 = vmatprep.subr.bf16.mxu1 %v8202_v60  ;;  %v8283_v59 = vld [vmem:[#allocation7 + $0x1c0] ss:$20 sps:$4 sm:$0xff]   ;;  %v8288_v60 = vld [vmem:[#allocation7 + $0x6e4] ss:$20 sps:$4 sm:$0xff]  }
  0xf0   :  { %2684 = vmatprep.subr.bf16.mxu0 %v8204_v61  ;;  %v8291_v61 = vld [vmem:[#allocation7 + $0x1ec] ss:$20 sps:$4 sm:$0xff]  }
  0xf2   :  { %2644 = vmatpush1.bf16.msra.mxu1 %v8206_v62  ;;  %v8286_v62 = vld [vmem:[#allocation7 + $0x6e0] ss:$20 sps:$4 sm:$0xff]  }
  0xf3   :  { %2685 = vmatpush1.bf16.msra.mxu0 %v8207_v63  ;;  %2645 = vmatprep.subr.bf16.mxu1 %v8208_v0  ;;  %v8289_v63 = vld [vmem:[#allocation7 + $0x1e8] ss:$20 sps:$4 sm:$0xff]   ;;  %v8294_v0 = vld [vmem:[#allocation7 + $0x70c] ss:$20 sps:$4 sm:$0xff]  }
  0xf4   :  { %2686 = vmatprep.subr.bf16.mxu0 %v8210_v1  ;;  %v8297_v1 = vld [vmem:[#allocation7 + $0x214] ss:$20 sps:$4 sm:$0xff]  }
  0xf6   :  { %2646 = vmatpush1.bf16.msra.mxu1 %v8212_v2  ;;  %v8292_v2 = vld [vmem:[#allocation7 + $0x708] ss:$20 sps:$4 sm:$0xff]  }
  0xf7   :  { %2687 = vmatpush1.bf16.msra.mxu0 %v8213_v3  ;;  %2820 = vmatprep.subr.bf16.mxu1 %v8219_v7  ;;  %v8295_v3 = vld [vmem:[#allocation7 + $0x210] ss:$20 sps:$4 sm:$0xff]   ;;  %v8301_v7 = vld [vmem:[#allocation7 + $0x238] ss:$20 sps:$4 sm:$0xff]  }
  0xf8   :  { %2697 = vmatprep.subr.bf16.mxu0 %v8216_v5  ;;  %v8303_v5 = vld [vmem:[#allocation7 + $0x23c] ss:$20 sps:$4 sm:$0xff]  }
  0xf9   :  { %2648 = vmatmul.mubr.bf16.vlgmr.msra.gmra.mrb[0].mxu1 %v9801_v8 }
  0xfa   :  { %2689 = vmatmul.mubr.bf16.vlgmr.msra.gmra.mrb[0].mxu0 %v9803_v11  ;;  %2821 = vmatpush1.bf16.msra.mxu1 %v8217_v10  ;;  %v8309_v10 = vld [vmem:[#allocation7 + $0x264] ss:$20 sps:$4 sm:$0xff]  }
  0xfb   :  { %2698 = vmatpush1.bf16.msra.mxu0 %v8214_v9  ;;  %2822 = vmatprep.subr.bf16.mxu1 %v8225_v13  ;;  %v8306_v9 = vld [vmem:[#allocation7 + $0x75c] ss:$20 sps:$4 sm:$0xff]   ;;  %v8307_v13 = vld [vmem:[#allocation7 + $0x260] ss:$20 sps:$4 sm:$0xff]  }
  0xfc   :  { %2699 = vmatprep.subr.bf16.mxu0 %v8222_v12  ;;  %2852 = vmatprep.mubr.bf16.mxu1 %v9795_v48  ;;  %v8304_v12 = vld [vmem:[#allocation7 + $0x758] ss:$20 sps:$4 sm:$0xff]  }
  0xfd   :  { %2729 = vmatprep.mubr.bf16.mxu0 %v9808_v36 }
  0xfe   :  { %2823 = vmatpush1.bf16.msra.mxu1 %v8223_v15  ;;  %v8312_v15 = vld [vmem:[#allocation7 + $0x784] ss:$20 sps:$4 sm:$0xff]  }
  0xff   :  { %2700 = vmatpush1.bf16.msra.mxu0 %v8220_v14  ;;  %2824 = vmatprep.subr.bf16.mxu1 %v8231_v17  ;;  %v168_v14 = vld [vmem:[#allocation2 + $0x20] sm:$0xff] }
 0x100   :  { %2701 = vmatprep.subr.bf16.mxu0 %v8228_v16  ;;  %v8315_v16 = vld [vmem:[#allocation7 + $0x28c] ss:$20 sps:$4 sm:$0xff]   ;;  %v9811_v17 = vpack.c.bf16 %v168_v14, %v168_v14  ;;  %v8391_v14 = vld [vmem:[#allocation7 + $0x490] ss:$20 sps:$4 sm:$0xff]  }
 0x102   :  { %2825 = vmatpush1.bf16.msra.mxu1 %v8229_v19  ;;  %v8313_v19 = vld [vmem:[#allocation7 + $0x288] ss:$20 sps:$4 sm:$0xff]  }
 0x103   :  { %2702 = vmatpush1.bf16.msra.mxu0 %v8226_v18  ;;  %2826 = vmatprep.subr.bf16.mxu1 %v8237_v21  ;;  %v8310_v18 = vld [vmem:[#allocation7 + $0x780] ss:$20 sps:$4 sm:$0xff]  }
 0x104   :  { %2703 = vmatprep.subr.bf16.mxu0 %v8234_v20  ;;  %v8318_v20 = vld [vmem:[#allocation7 + $0x7ac] ss:$20 sps:$4 sm:$0xff]   ;;  %v8321_v21 = vld [vmem:[#allocation7 + $0x2b4] ss:$20 sps:$4 sm:$0xff]  }
 0x106   :  { %2827 = vmatpush1.bf16.msra.mxu1 %v8235_v23  ;;  %v8316_v23 = vld [vmem:[#allocation7 + $0x7a8] ss:$20 sps:$4 sm:$0xff]  }
 0x107   :  { %2704 = vmatpush1.bf16.msra.mxu0 %v8232_v22  ;;  %2828 = vmatprep.subr.bf16.mxu1 %v8243_v25  ;;  %v171_v22 = vld [vmem:[#allocation2 + $0x38] sm:$0xff] }
 0x108   :  { %2705 = vmatprep.subr.bf16.mxu0 %v8240_v24  ;;  %v9815_v24 = vpack.c.bf16 %v171_v22, %v171_v22  ;;  %v8319_v25 = vld [vmem:[#allocation7 + $0x2b0] ss:$20 sps:$4 sm:$0xff]   ;;  %v8400_v22 = vld [vmem:[#allocation7 + $0x9d8] ss:$20 sps:$4 sm:$0xff]  }
 0x10a   :  { %2829 = vmatpush1.bf16.msra.mxu1 %v8241_v27  ;;  %v8327_v27 = vld [vmem:[#allocation7 + $0x2dc] ss:$20 sps:$4 sm:$0xff]  }
 0x10b   :  { %2706 = vmatpush1.bf16.msra.mxu0 %v8238_v26  ;;  %2830 = vmatprep.subr.bf16.mxu1 %v8249_v29  ;;  %v8324_v26 = vld [vmem:[#allocation7 + $0x7d4] ss:$20 sps:$4 sm:$0xff]   ;;  %v8325_v29 = vld [vmem:[#allocation7 + $0x2d8] ss:$20 sps:$4 sm:$0xff]  }
 0x10c   :  { %2707 = vmatprep.subr.bf16.mxu0 %v8246_v28  ;;  %v8322_v28 = vld [vmem:[#allocation7 + $0x7d0] ss:$20 sps:$4 sm:$0xff]  }
 0x10e   :  { %2831 = vmatpush1.bf16.msra.mxu1 %v8247_v31  ;;  %v8333_v31 = vld [vmem:[#allocation7 + $0x304] ss:$20 sps:$4 sm:$0xff]  }
 0x10f   :  { %2708 = vmatpush1.bf16.msra.mxu0 %v8244_v30  ;;  %2832 = vmatprep.subr.bf16.mxu1 %v8255_v33  ;;  %v8330_v30 = vld [vmem:[#allocation7 + $0x7fc] ss:$20 sps:$4 sm:$0xff]   ;;  %v8331_v33 = vld [vmem:[#allocation7 + $0x300] ss:$20 sps:$4 sm:$0xff]  }
 0x110   :  { %2709 = vmatprep.subr.bf16.mxu0 %v8252_v32  ;;  %v8328_v32 = vld [vmem:[#allocation7 + $0x7f8] ss:$20 sps:$4 sm:$0xff]  }
 0x112   :  { %2833 = vmatpush1.bf16.msra.mxu1 %v8253_v37  ;;  %v8334_v37 = vld [vmem:[#allocation7 + $0x820] ss:$20 sps:$4 sm:$0xff]  }
 0x113   :  { %2710 = vmatpush1.bf16.msra.mxu0 %v8250_v35  ;;  %2834 = vmatprep.subr.bf16.mxu1 %v8261_v39  ;;  %v8339_v35 = vld [vmem:[#allocation7 + $0x32c] ss:$20 sps:$4 sm:$0xff]  }
 0x114   :  { %2711 = vmatprep.subr.bf16.mxu0 %v8258_v38  ;;  %v8337_v38 = vld [vmem:[#allocation7 + $0x328] ss:$20 sps:$4 sm:$0xff]   ;;  %v8342_v39 = vld [vmem:[#allocation7 + $0x84c] ss:$20 sps:$4 sm:$0xff]  }
 0x116   :  { %2835 = vmatpush1.bf16.msra.mxu1 %v8259_v41  ;;  %v8340_v41 = vld [vmem:[#allocation7 + $0x848] ss:$20 sps:$4 sm:$0xff]  }
 0x117   :  { %2712 = vmatpush1.bf16.msra.mxu0 %v8256_v40  ;;  %2836 = vmatprep.subr.bf16.mxu1 %v8267_v43  ;;  %v8345_v40 = vld [vmem:[#allocation7 + $0x354] ss:$20 sps:$4 sm:$0xff]  }
 0x118   :  { %2713 = vmatprep.subr.bf16.mxu0 %v8264_v42  ;;  %v8343_v42 = vld [vmem:[#allocation7 + $0x350] ss:$20 sps:$4 sm:$0xff]   ;;  %v8348_v43 = vld [vmem:[#allocation7 + $0x874] ss:$20 sps:$4 sm:$0xff]  }
 0x11a   :  { %2837 = vmatpush1.bf16.msra.mxu1 %v8265_v45  ;;  %v8346_v45 = vld [vmem:[#allocation7 + $0x870] ss:$20 sps:$4 sm:$0xff]  }
 0x11b   :  { %2714 = vmatpush1.bf16.msra.mxu0 %v8262_v44  ;;  %2838 = vmatprep.subr.bf16.mxu1 %v8273_v47  ;;  %v8351_v44 = vld [vmem:[#allocation7 + $0x37c] ss:$20 sps:$4 sm:$0xff]  }
 0x11c   :  { %2715 = vmatprep.subr.bf16.mxu0 %v8270_v46  ;;  %v8349_v46 = vld [vmem:[#allocation7 + $0x378] ss:$20 sps:$4 sm:$0xff]   ;;  %v8354_v47 = vld [vmem:[#allocation7 + $0x89c] ss:$20 sps:$4 sm:$0xff]  }
 0x11e   :  { %2839 = vmatpush1.bf16.msra.mxu1 %v8271_v50  ;;  %v8352_v50 = vld [vmem:[#allocation7 + $0x898] ss:$20 sps:$4 sm:$0xff]  }
 0x11f   :  { %2716 = vmatpush1.bf16.msra.mxu0 %v8268_v49  ;;  %2840 = vmatprep.subr.bf16.mxu1 %v8279_v53  ;;  %v8357_v49 = vld [vmem:[#allocation7 + $0x3a4] ss:$20 sps:$4 sm:$0xff]  }
 0x120   :  { %2717 = vmatprep.subr.bf16.mxu0 %v8276_v51  ;;  %v8355_v51 = vld [vmem:[#allocation7 + $0x3a0] ss:$20 sps:$4 sm:$0xff]   ;;  %v8360_v53 = vld [vmem:[#allocation7 + $0x8c4] ss:$20 sps:$4 sm:$0xff]  }
 0x122   :  { %2841 = vmatpush1.bf16.msra.mxu1 %v8277_v55  ;;  %v8358_v55 = vld [vmem:[#allocation7 + $0x8c0] ss:$20 sps:$4 sm:$0xff]  }
 0x123   :  { %2718 = vmatpush1.bf16.msra.mxu0 %v8274_v54  ;;  %2842 = vmatprep.subr.bf16.mxu1 %v8285_v57  ;;  %v8363_v54 = vld [vmem:[#allocation7 + $0x3cc] ss:$20 sps:$4 sm:$0xff]  }
 0x124   :  { %2719 = vmatprep.subr.bf16.mxu0 %v8282_v56  ;;  %v8361_v56 = vld [vmem:[#allocation7 + $0x3c8] ss:$20 sps:$4 sm:$0xff]   ;;  %v8366_v57 = vld [vmem:[#allocation7 + $0x8ec] ss:$20 sps:$4 sm:$0xff]  }
 0x126   :  { %2843 = vmatpush1.bf16.msra.mxu1 %v8283_v59  ;;  %v8364_v59 = vld [vmem:[#allocation7 + $0x8e8] ss:$20 sps:$4 sm:$0xff]  }
 0x127   :  { %2720 = vmatpush1.bf16.msra.mxu0 %v8280_v58  ;;  %2844 = vmatprep.subr.bf16.mxu1 %v8291_v61  ;;  %v8369_v58 = vld [vmem:[#allocation7 + $0x3f4] ss:$20 sps:$4 sm:$0xff]  }
 0x128   :  { %2721 = vmatprep.subr.bf16.mxu0 %v8288_v60  ;;  %v8367_v60 = vld [vmem:[#allocation7 + $0x3f0] ss:$20 sps:$4 sm:$0xff]   ;;  %v8372_v61 = vld [vmem:[#allocation7 + $0x914] ss:$20 sps:$4 sm:$0xff]  }
 0x12a   :  { %2845 = vmatpush1.bf16.msra.mxu1 %v8289_v63  ;;  %v8370_v63 = vld [vmem:[#allocation7 + $0x910] ss:$20 sps:$4 sm:$0xff]  }
 0x12b   :  { %2722 = vmatpush1.bf16.msra.mxu0 %v8286_v62  ;;  %2846 = vmatprep.subr.bf16.mxu1 %v8297_v1  ;;  %v8375_v62 = vld [vmem:[#allocation7 + $0x41c] ss:$20 sps:$4 sm:$0xff]  }
 0x12c   :  { %2723 = vmatprep.subr.bf16.mxu0 %v8294_v0  ;;  %v8373_v0 = vld [vmem:[#allocation7 + $0x418] ss:$20 sps:$4 sm:$0xff]   ;;  %v8378_v1 = vld [vmem:[#allocation7 + $0x93c] ss:$20 sps:$4 sm:$0xff]  }
 0x12e   :  { %2847 = vmatpush1.bf16.msra.mxu1 %v8295_v3  ;;  %v8376_v3 = vld [vmem:[#allocation7 + $0x938] ss:$20 sps:$4 sm:$0xff]  }
 0x12f   :  { %2724 = vmatpush1.bf16.msra.mxu0 %v8292_v2  ;;  %2848 = vmatprep.subr.bf16.mxu1 %v8303_v5  ;;  %v8381_v2 = vld [vmem:[#allocation7 + $0x444] ss:$20 sps:$4 sm:$0xff]  }
 0x130   :  { %2725 = vmatprep.subr.bf16.mxu0 %v8300_v4  ;;  %v8379_v4 = vld [vmem:[#allocation7 + $0x440] ss:$20 sps:$4 sm:$0xff]   ;;  %v8384_v5 = vld [vmem:[#allocation7 + $0x964] ss:$20 sps:$4 sm:$0xff]  }
 0x132   :  { %2849 = vmatpush1.bf16.msra.mxu1 %v8301_v7  ;;  %v8382_v7 = vld [vmem:[#allocation7 + $0x960] ss:$20 sps:$4 sm:$0xff]  }
 0x133   :  { %2726 = vmatpush1.bf16.msra.mxu0 %v8298_v6  ;;  %2850 = vmatprep.subr.bf16.mxu1 %v8309_v10  ;;  %v8387_v6 = vld [vmem:[#allocation7 + $0x46c] ss:$20 sps:$4 sm:$0xff]  }
 0x134   :  { %2727 = vmatprep.subr.bf16.mxu0 %v8306_v9  ;;  %v8385_v9 = vld [vmem:[#allocation7 + $0x468] ss:$20 sps:$4 sm:$0xff]   ;;  %v8390_v10 = vld [vmem:[#allocation7 + $0x98c] ss:$20 sps:$4 sm:$0xff]  }
 0x136   :  { %2851 = vmatpush1.bf16.msra.mxu1 %v8307_v13  ;;  %v8388_v13 = vld [vmem:[#allocation7 + $0x988] ss:$20 sps:$4 sm:$0xff]  }
 0x137   :  { %2728 = vmatpush1.bf16.msra.mxu0 %v8304_v12  ;;  %2861 = vmatprep.subr.bf16.mxu1 %v8315_v16  ;;  %v8393_v12 = vld [vmem:[#allocation7 + $0x494] ss:$20 sps:$4 sm:$0xff]   ;;  %v8399_v16 = vld [vmem:[#allocation7 + $0x4bc] ss:$20 sps:$4 sm:$0xff]  }
 0x138   :  { %2738 = vmatprep.subr.bf16.mxu0 %v8312_v15  ;;  %v8396_v15 = vld [vmem:[#allocation7 + $0x9b4] ss:$20 sps:$4 sm:$0xff]  }
 0x139   :  { %2853 = vmatmul.mubr.bf16.vlgmr.msra.gmra.mrb[4].mxu1 %v9801_v8 }
 0x13a   :  { %2730 = vmatmul.mubr.bf16.vlgmr.msra.gmra.mrb[0].mxu0 %v9811_v17  ;;  %2862 = vmatpush1.bf16.msra.mxu1 %v8313_v19  ;;  %v8397_v19 = vld [vmem:[#allocation7 + $0x4b8] ss:$20 sps:$4 sm:$0xff]  }
 0x13b   :  { %2739 = vmatpush1.bf16.msra.mxu0 %v8310_v18  ;;  %2863 = vmatprep.subr.bf16.mxu1 %v8321_v21  ;;  %v8394_v18 = vld [vmem:[#allocation7 + $0x9b0] ss:$20 sps:$4 sm:$0xff]  }
 0x13c   :  { %2740 = vmatprep.subr.bf16.mxu0 %v8318_v20  ;;  %2770 = vmatprep.mubr.bf16.mxu0 %v9815_v24  ;;  %v8402_v20 = vld [vmem:[#allocation7 + $0x9dc] ss:$20 sps:$4 sm:$0xff]   ;;  %v8405_v21 = vld [vmem:[#allocation7 + $0x4e4] ss:$20 sps:$4 sm:$0xff]  }
 0x13d   :  { %2893 = vmatprep.mubr.bf16.mxu1 %v9797_v52 }
 0x13e   :  { %2864 = vmatpush1.bf16.msra.mxu1 %v8319_v25  ;;  %v8408_v25 = vld [vmem:[#allocation7 + $0xa04] ss:$20 sps:$4 sm:$0xff]  }
 0x13f   :  { %2741 = vmatpush1.bf16.msra.mxu0 %v8316_v23  ;;  %2865 = vmatprep.subr.bf16.mxu1 %v8327_v27  ;;  %v8403_v23 = vld [vmem:[#allocation7 + $0x4e0] ss:$20 sps:$4 sm:$0xff]   ;;  %v170_v27 = vld [vmem:[#allocation2 + $0x30] sm:$0xff] }
 0x140   :  { %2742 = vmatprep.subr.bf16.mxu0 %v8324_v26  ;;  %v8411_v26 = vld [vmem:[#allocation7 + $0x50c] ss:$20 sps:$4 sm:$0xff]  }
 0x142   :  { %2866 = vmatpush1.bf16.msra.mxu1 %v8325_v29  ;;  %v8406_v29 = vld [vmem:[#allocation7 + $0xa00] ss:$20 sps:$4 sm:$0xff]  }
 0x143   :  { %2743 = vmatpush1.bf16.msra.mxu0 %v8322_v28  ;;  %2867 = vmatprep.subr.bf16.mxu1 %v8333_v31  ;;  %v173_v28 = vld [vmem:[#allocation2 + $0x48] sm:$0xff]  ;;  %v9819_v31 = vpack.c.bf16 %v170_v27, %v170_v27 }
 0x144   :  { %2744 = vmatprep.subr.bf16.mxu0 %v8330_v30  ;;  %v8409_v30 = vld [vmem:[#allocation7 + $0x508] ss:$20 sps:$4 sm:$0xff]   ;;  %v8548_v27 = vld [vmem:[#allocation7 + $0x1a0] ss:$20 sps:$4 sm:$0xff]  }
 0x146   :  { %2868 = vmatpush1.bf16.msra.mxu1 %v8331_v33  ;;  %v8417_v33 = vld [vmem:[#allocation7 + $0x534] ss:$20 sps:$4 sm:$0xff]  }
 0x147   :  { %2745 = vmatpush1.bf16.msra.mxu0 %v8328_v32  ;;  %2869 = vmatprep.subr.bf16.mxu1 %v8339_v35  ;;  %v8414_v32 = vld [vmem:[#allocation7 + $0xa2c] ss:$20 sps:$4 sm:$0xff]   ;;  %v8412_v35 = vld [vmem:[#allocation7 + $0xa28] ss:$20 sps:$4 sm:$0xff]  }
 0x148   :  { %2746 = vmatprep.subr.bf16.mxu0 %v8336_v34  ;;  %v9821_v34 = vpack.c.bf16 %v173_v28, %v173_v28  ;;  %v8478_v28 = vld [vmem:[#allocation7 + $0x710] ss:$20 sps:$4 sm:$0xff]  }
 0x14a   :  { %2870 = vmatpush1.bf16.msra.mxu1 %v8337_v38  ;;  %v8420_v38 = vld [vmem:[#allocation7 + $0xa54] ss:$20 sps:$4 sm:$0xff]  }
 0x14b   :  { %2747 = vmatpush1.bf16.msra.mxu0 %v8334_v37  ;;  %2871 = vmatprep.subr.bf16.mxu1 %v8345_v40  ;;  %v8415_v37 = vld [vmem:[#allocation7 + $0x530] ss:$20 sps:$4 sm:$0xff]  }
 0x14c   :  { %2748 = vmatprep.subr.bf16.mxu0 %v8342_v39  ;;  %v8423_v39 = vld [vmem:[#allocation7 + $0x55c] ss:$20 sps:$4 sm:$0xff]  }
 0x14d   :  { %v8418_v40 = vld [vmem:[#allocation7 + $0xa50] ss:$20 sps:$4 sm:$0xff]  }
 0x14e   :  { %2872 = vmatpush1.bf16.msra.mxu1 %v8343_v42  ;;  %v8426_v42 = vld [vmem:[#allocation7 + $0xa7c] ss:$20 sps:$4 sm:$0xff]  }
 0x14f   :  { %2749 = vmatpush1.bf16.msra.mxu0 %v8340_v41  ;;  %2873 = vmatprep.subr.bf16.mxu1 %v8351_v44  ;;  %v8421_v41 = vld [vmem:[#allocation7 + $0x558] ss:$20 sps:$4 sm:$0xff]  }
 0x150   :  { %2750 = vmatprep.subr.bf16.mxu0 %v8348_v43  ;;  %v8429_v43 = vld [vmem:[#allocation7 + $0x584] ss:$20 sps:$4 sm:$0xff]  }
 0x151   :  { %v8424_v44 = vld [vmem:[#allocation7 + $0xa78] ss:$20 sps:$4 sm:$0xff]  }
 0x152   :  { %2874 = vmatpush1.bf16.msra.mxu1 %v8349_v46  ;;  %v8432_v46 = vld [vmem:[#allocation7 + $0xaa4] ss:$20 sps:$4 sm:$0xff]  }
 0x153   :  { %2751 = vmatpush1.bf16.msra.mxu0 %v8346_v45  ;;  %2875 = vmatprep.subr.bf16.mxu1 %v8357_v49  ;;  %v8427_v45 = vld [vmem:[#allocation7 + $0x580] ss:$20 sps:$4 sm:$0xff]  }
 0x154   :  { %2752 = vmatprep.subr.bf16.mxu0 %v8354_v47  ;;  %v8435_v47 = vld [vmem:[#allocation7 + $0x5ac] ss:$20 sps:$4 sm:$0xff]  }
 0x155   :  { %v8430_v49 = vld [vmem:[#allocation7 + $0xaa0] ss:$20 sps:$4 sm:$0xff]  }
 0x156   :  { %2876 = vmatpush1.bf16.msra.mxu1 %v8355_v51  ;;  %v8438_v51 = vld [vmem:[#allocation7 + $0xacc] ss:$20 sps:$4 sm:$0xff]  }
 0x157   :  { %2753 = vmatpush1.bf16.msra.mxu0 %v8352_v50  ;;  %2877 = vmatprep.subr.bf16.mxu1 %v8363_v54  ;;  %v8433_v50 = vld [vmem:[#allocation7 + $0x5a8] ss:$20 sps:$4 sm:$0xff]  }
 0x158   :  { %2754 = vmatprep.subr.bf16.mxu0 %v8360_v53  ;;  %v8441_v53 = vld [vmem:[#allocation7 + $0x5d4] ss:$20 sps:$4 sm:$0xff]  }
 0x159   :  { %v8436_v54 = vld [vmem:[#allocation7 + $0xac8] ss:$20 sps:$4 sm:$0xff]  }
 0x15a   :  { %2878 = vmatpush1.bf16.msra.mxu1 %v8361_v56  ;;  %v8444_v56 = vld [vmem:[#allocation7 + $0xaf4] ss:$20 sps:$4 sm:$0xff]  }
 0x15b   :  { %2755 = vmatpush1.bf16.msra.mxu0 %v8358_v55  ;;  %2879 = vmatprep.subr.bf16.mxu1 %v8369_v58  ;;  %v8439_v55 = vld [vmem:[#allocation7 + $0x5d0] ss:$20 sps:$4 sm:$0xff]  }
 0x15c   :  { %2756 = vmatprep.subr.bf16.mxu0 %v8366_v57  ;;  %v8447_v57 = vld [vmem:[#allocation7 + $0x5fc] ss:$20 sps:$4 sm:$0xff]  }
 0x15d   :  { %v8442_v58 = vld [vmem:[#allocation7 + $0xaf0] ss:$20 sps:$4 sm:$0xff]  }
 0x15e   :  { %2880 = vmatpush1.bf16.msra.mxu1 %v8367_v60  ;;  %v8450_v60 = vld [vmem:[#allocation7 + $0xb1c] ss:$20 sps:$4 sm:$0xff]  }
 0x15f   :  { %2757 = vmatpush1.bf16.msra.mxu0 %v8364_v59  ;;  %2881 = vmatprep.subr.bf16.mxu1 %v8375_v62  ;;  %v8445_v59 = vld [vmem:[#allocation7 + $0x5f8] ss:$20 sps:$4 sm:$0xff]  }
 0x160   :  { %2758 = vmatprep.subr.bf16.mxu0 %v8372_v61  ;;  %v8453_v61 = vld [vmem:[#allocation7 + $0x624] ss:$20 sps:$4 sm:$0xff]  }
 0x161   :  { %v8448_v62 = vld [vmem:[#allocation7 + $0xb18] ss:$20 sps:$4 sm:$0xff]  }
 0x162   :  { %2882 = vmatpush1.bf16.msra.mxu1 %v8373_v0  ;;  %v8456_v0 = vld [vmem:[#allocation7 + $0xb44] ss:$20 sps:$4 sm:$0xff]  }
 0x163   :  { %2759 = vmatpush1.bf16.msra.mxu0 %v8370_v63  ;;  %2883 = vmatprep.subr.bf16.mxu1 %v8381_v2  ;;  %v8451_v63 = vld [vmem:[#allocation7 + $0x620] ss:$20 sps:$4 sm:$0xff]  }
 0x164   :  { %2760 = vmatprep.subr.bf16.mxu0 %v8378_v1  ;;  %v8459_v1 = vld [vmem:[#allocation7 + $0x64c] ss:$20 sps:$4 sm:$0xff]  }
 0x165   :  { %v8454_v2 = vld [vmem:[#allocation7 + $0xb40] ss:$20 sps:$4 sm:$0xff]  }
 0x166   :  { %2884 = vmatpush1.bf16.msra.mxu1 %v8379_v4  ;;  %v8462_v4 = vld [vmem:[#allocation7 + $0xb6c] ss:$20 sps:$4 sm:$0xff]  }
 0x167   :  { %2761 = vmatpush1.bf16.msra.mxu0 %v8376_v3  ;;  %2885 = vmatprep.subr.bf16.mxu1 %v8387_v6  ;;  %v8457_v3 = vld [vmem:[#allocation7 + $0x648] ss:$20 sps:$4 sm:$0xff]  }
 0x168   :  { %2762 = vmatprep.subr.bf16.mxu0 %v8384_v5  ;;  %v8465_v5 = vld [vmem:[#allocation7 + $0x674] ss:$20 sps:$4 sm:$0xff]  }
 0x169   :  { %v8460_v6 = vld [vmem:[#allocation7 + $0xb68] ss:$20 sps:$4 sm:$0xff]  }
 0x16a   :  { %2886 = vmatpush1.bf16.msra.mxu1 %v8385_v9  ;;  %v8468_v9 = vld [vmem:[#allocation7 + $0xb94] ss:$20 sps:$4 sm:$0xff]  }
 0x16b   :  { %2763 = vmatpush1.bf16.msra.mxu0 %v8382_v7  ;;  %2887 = vmatprep.subr.bf16.mxu1 %v8393_v12  ;;  %v8463_v7 = vld [vmem:[#allocation7 + $0x670] ss:$20 sps:$4 sm:$0xff]  }
 0x16c   :  { %2764 = vmatprep.subr.bf16.mxu0 %v8390_v10  ;;  %v8471_v10 = vld [vmem:[#allocation7 + $0x69c] ss:$20 sps:$4 sm:$0xff]  }
 0x16d   :  { %v8466_v12 = vld [vmem:[#allocation7 + $0xb90] ss:$20 sps:$4 sm:$0xff]  }
 0x16e   :  { %2888 = vmatpush1.bf16.msra.mxu1 %v8391_v14  ;;  %v172_v14 = vld [vmem:[#allocation2 + $0x40] sm:$0xff] }
 0x16f   :  { %2765 = vmatpush1.bf16.msra.mxu0 %v8388_v13  ;;  %2889 = vmatprep.subr.bf16.mxu1 %v8399_v16  ;;  %v8469_v13 = vld [vmem:[#allocation7 + $0x698] ss:$20 sps:$4 sm:$0xff]   ;;  %v8538_v16 = vld [vmem:[#allocation7 + $0x150] ss:$20 sps:$4 sm:$0xff]  }
 0x170   :  { %2766 = vmatprep.subr.bf16.mxu0 %v8396_v15  ;;  %v8474_v15 = vld [vmem:[#allocation7 + $0x6c4] ss:$20 sps:$4 sm:$0xff]  }
 0x172   :  { %2890 = vmatpush1.bf16.msra.mxu1 %v8397_v19  ;;  %v9828_v19 = vpack.c.bf16 %v172_v14, %v172_v14  ;;  %v8597_v14 = vld [vmem:[#allocation7 + $0x5b0] ss:$20 sps:$4 sm:$0xff]  }
 0x173   :  { %2767 = vmatpush1.bf16.msra.mxu0 %v8394_v18  ;;  %2891 = vmatprep.subr.bf16.mxu1 %v8405_v21  ;;  %v8472_v18 = vld [vmem:[#allocation7 + $0x6c0] ss:$20 sps:$4 sm:$0xff]   ;;  %v8539_v21 = vld [vmem:[#allocation7 + $0x10] ss:$20 sps:$4 sm:$0xff]  }
 0x174   :  { %2768 = vmatprep.subr.bf16.mxu0 %v8402_v20  ;;  %v8477_v20 = vld [vmem:[#allocation7 + $0x6ec] ss:$20 sps:$4 sm:$0xff]  }
 0x176   :  { %2892 = vmatpush1.bf16.msra.mxu1 %v8403_v23  ;;  %v8475_v23 = vld [vmem:[#allocation7 + $0x6e8] ss:$20 sps:$4 sm:$0xff]  }
 0x177   :  { %2769 = vmatpush1.bf16.msra.mxu0 %v8400_v22  ;;  %2902 = vmatprep.subr.bf16.mxu1 %v8411_v26  ;;  %v8543_v22 = vld [vmem:[#allocation7 + $0x178] ss:$20 sps:$4 sm:$0xff]  }
 0x178   :  { %2779 = vmatprep.subr.bf16.mxu0 %v8408_v25  ;;  %v8480_v25 = vld [vmem:[#allocation7 + $0x714] ss:$20 sps:$4 sm:$0xff]   ;;  %v8544_v26 = vld [vmem:[#allocation7 + $0x38] ss:$20 sps:$4 sm:$0xff]  }
 0x179   :  { %2894 = vmatmul.mubr.bf16.vlgmr.msra.gmra.mrb[4].mxu1 %v9803_v11 }
 0x17a   :  { %2771 = vmatmul.mubr.bf16.vlgmr.msra.gmra.mrb[0].mxu0 %v9819_v31  ;;  %2903 = vmatpush1.bf16.msra.mxu1 %v8409_v30  ;;  %v8549_v30 = vld [vmem:[#allocation7 + $0x60] ss:$20 sps:$4 sm:$0xff]  }
 0x17b   :  { %2780 = vmatpush1.bf16.msra.mxu0 %v8406_v29  ;;  %2904 = vmatprep.subr.bf16.mxu1 %v8417_v33  ;;  %v8483_v29 = vld [vmem:[#allocation7 + $0x73c] ss:$20 sps:$4 sm:$0xff]   ;;  %v8481_v33 = vld [vmem:[#allocation7 + $0x738] ss:$20 sps:$4 sm:$0xff]  }
 0x17c   :  { %2781 = vmatprep.subr.bf16.mxu0 %v8414_v32  ;;  %7378 = vmatprep.mubr.msk.bf16.mxu0 %vm2611_vm0, %v9821_v34  ;;  %v8553_v32 = vld [vmem:[#allocation7 + $0x1c8] ss:$20 sps:$4 sm:$0xff]  }
 0x17d   :  { %2934 = vmatprep.mubr.bf16.mxu1 %v9808_v36 }
 0x17e   :  { %2905 = vmatpush1.bf16.msra.mxu1 %v8415_v37  ;;  %v8554_v37 = vld [vmem:[#allocation7 + $0x88] ss:$20 sps:$4 sm:$0xff]  }
 0x17f   :  { %2782 = vmatpush1.bf16.msra.mxu0 %v8412_v35  ;;  %2906 = vmatprep.subr.bf16.mxu1 %v8423_v39  ;;  %v8486_v35 = vld [vmem:[#allocation7 + $0x764] ss:$20 sps:$4 sm:$0xff]   ;;  %v8484_v39 = vld [vmem:[#allocation7 + $0x760] ss:$20 sps:$4 sm:$0xff]  }
 0x180   :  { %2783 = vmatprep.subr.bf16.mxu0 %v8420_v38  ;;  %v8558_v38 = vld [vmem:[#allocation7 + $0x1f0] ss:$20 sps:$4 sm:$0xff]  }
 0x182   :  { %2907 = vmatpush1.bf16.msra.mxu1 %v8421_v41  ;;  %v8563_v41 = vld [vmem:[#allocation7 + $0x218] ss:$20 sps:$4 sm:$0xff]  }
 0x183   :  { %2784 = vmatpush1.bf16.msra.mxu0 %v8418_v40  ;;  %2908 = vmatprep.subr.bf16.mxu1 %v8429_v43  ;;  %v8489_v40 = vld [vmem:[#allocation7 + $0x78c] ss:$20 sps:$4 sm:$0xff]   ;;  %v8492_v43 = vld [vmem:[#allocation7 + $0x7b4] ss:$20 sps:$4 sm:$0xff]  }
 0x184   :  { %2785 = vmatprep.subr.bf16.mxu0 %v8426_v42  ;;  %v8487_v42 = vld [vmem:[#allocation7 + $0x788] ss:$20 sps:$4 sm:$0xff]  }
 0x186   :  { %2909 = vmatpush1.bf16.msra.mxu1 %v8427_v45  ;;  %v8568_v45 = vld [vmem:[#allocation7 + $0x240] ss:$20 sps:$4 sm:$0xff]  }
 0x187   :  { %2786 = vmatpush1.bf16.msra.mxu0 %v8424_v44  ;;  %2910 = vmatprep.subr.bf16.mxu1 %v8435_v47  ;;  %v8564_v44 = vld [vmem:[#allocation7 + $0xd8] ss:$20 sps:$4 sm:$0xff]   ;;  %v8495_v47 = vld [vmem:[#allocation7 + $0x7dc] ss:$20 sps:$4 sm:$0xff]  }
 0x188   :  { %2787 = vmatprep.subr.bf16.mxu0 %v8432_v46  ;;  %v8490_v46 = vld [vmem:[#allocation7 + $0x7b0] ss:$20 sps:$4 sm:$0xff]  }
 0x18a   :  { %2911 = vmatpush1.bf16.msra.mxu1 %v8433_v50  ;;  %v8573_v50 = vld [vmem:[#allocation7 + $0x268] ss:$20 sps:$4 sm:$0xff]  }
 0x18b   :  { %2788 = vmatpush1.bf16.msra.mxu0 %v8430_v49  ;;  %2912 = vmatprep.subr.bf16.mxu1 %v8441_v53  ;;  %v8569_v49 = vld [vmem:[#allocation7 + $0x100] ss:$20 sps:$4 sm:$0xff]   ;;  %v8498_v53 = vld [vmem:[#allocation7 + $0x804] ss:$20 sps:$4 sm:$0xff]  }
 0x18c   :  { %2789 = vmatprep.subr.bf16.mxu0 %v8438_v51  ;;  %v8493_v51 = vld [vmem:[#allocation7 + $0x7d8] ss:$20 sps:$4 sm:$0xff]  }
 0x18e   :  { %2913 = vmatpush1.bf16.msra.mxu1 %v8439_v55  ;;  %v8578_v55 = vld [vmem:[#allocation7 + $0x650] ss:$20 sps:$4 sm:$0xff]  }
 0x18f   :  { %2790 = vmatpush1.bf16.msra.mxu0 %v8436_v54  ;;  %2914 = vmatprep.subr.bf16.mxu1 %v8447_v57  ;;  %v8574_v54 = vld [vmem:[#allocation7 + $0x128] ss:$20 sps:$4 sm:$0xff]   ;;  %v8501_v57 = vld [vmem:[#allocation7 + $0x82c] ss:$20 sps:$4 sm:$0xff]  }
 0x190   :  { %2791 = vmatprep.subr.bf16.mxu0 %v8444_v56  ;;  %v8496_v56 = vld [vmem:[#allocation7 + $0x800] ss:$20 sps:$4 sm:$0xff]  }
 0x192   :  { %2915 = vmatpush1.bf16.msra.mxu1 %v8445_v59  ;;  %v8499_v59 = vld [vmem:[#allocation7 + $0x828] ss:$20 sps:$4 sm:$0xff]  }
 0x193   :  { %2792 = vmatpush1.bf16.msra.mxu0 %v8442_v58  ;;  %2916 = vmatprep.subr.bf16.mxu1 %v8453_v61  ;;  %v8579_v58 = vld [vmem:[#allocation7 + $0x510] ss:$20 sps:$4 sm:$0xff]   ;;  %v8504_v61 = vld [vmem:[#allocation7 + $0x854] ss:$20 sps:$4 sm:$0xff]  }
 0x194   :  { %2793 = vmatprep.subr.bf16.mxu0 %v8450_v60  ;;  %v8583_v60 = vld [vmem:[#allocation7 + $0x678] ss:$20 sps:$4 sm:$0xff]  }
 0x196   :  { %2917 = vmatpush1.bf16.msra.mxu1 %v8451_v63  ;;  %v8588_v63 = vld [vmem:[#allocation7 + $0x6a0] ss:$20 sps:$4 sm:$0xff]  }
 0x197   :  { %2794 = vmatpush1.bf16.msra.mxu0 %v8448_v62  ;;  %2918 = vmatprep.subr.bf16.mxu1 %v8459_v1  ;;  %v8584_v62 = vld [vmem:[#allocation7 + $0x538] ss:$20 sps:$4 sm:$0xff]   ;;  %v8507_v1 = vld [vmem:[#allocation7 + $0x87c] ss:$20 sps:$4 sm:$0xff]  }
 0x198   :  { %2795 = vmatprep.subr.bf16.mxu0 %v8456_v0  ;;  %v8502_v0 = vld [vmem:[#allocation7 + $0x850] ss:$20 sps:$4 sm:$0xff]  }
 0x19a   :  { %2919 = vmatpush1.bf16.msra.mxu1 %v8457_v3  ;;  %v8592_v3 = vld [vmem:[#allocation7 + $0x6c8] ss:$20 sps:$4 sm:$0xff]  }
 0x19b   :  { %2796 = vmatpush1.bf16.msra.mxu0 %v8454_v2  ;;  %2920 = vmatprep.subr.bf16.mxu1 %v8465_v5  ;;  %v8589_v2 = vld [vmem:[#allocation7 + $0x560] ss:$20 sps:$4 sm:$0xff]   ;;  %v8505_v5 = vld [vmem:[#allocation7 + $0x878] ss:$20 sps:$4 sm:$0xff]  }
 0x19c   :  { %2797 = vmatprep.subr.bf16.mxu0 %v8462_v4 }
 0x19e   :  { %2921 = vmatpush1.bf16.msra.mxu1 %v8463_v7  ;;  %v8510_v7 = vld [vmem:[#allocation7 + $0x8a4] ss:$20 sps:$4 sm:$0xff]  }
 0x19f   :  { %2798 = vmatpush1.bf16.msra.mxu0 %v8460_v6  ;;  %2922 = vmatprep.subr.bf16.mxu1 %v8471_v10 }
 0x1a0   :  { %2799 = vmatprep.subr.bf16.mxu0 %v8468_v9  ;;  %v8593_v9 = vld [vmem:[#allocation7 + $0x588] ss:$20 sps:$4 sm:$0xff]  }
 0x1a2   :  { %2923 = vmatpush1.bf16.msra.mxu1 %v8469_v13  ;;  %v8513_v13 = vld [vmem:[#allocation7 + $0x8cc] ss:$20 sps:$4 sm:$0xff]  }
 0x1a3   :  { %2800 = vmatpush1.bf16.msra.mxu0 %v8466_v12  ;;  %2924 = vmatprep.subr.bf16.mxu1 %v8474_v15  ;;  %v8508_v12 = vld [vmem:[#allocation7 + $0x8a0] ss:$20 sps:$4 sm:$0xff]   ;;  %v8600_v15 = vld [vmem:[#allocation7 + $0x718] ss:$20 sps:$4 sm:$0xff]  }
 0x1a4   :  { %7846 = vmatprep.subr.bf16.mxu0 %v8538_v16  ;;  %v8511_v16 = vld [vmem:[#allocation7 + $0x8c8] ss:$20 sps:$4 sm:$0xff]  }
 0x1a6   :  { %2812 = vmatmul.mubr.bf16.vlgmr.msra.gmra.mrb[0].mxu0 %v9828_v19  ;;  %2925 = vmatpush1.bf16.msra.mxu1 %v8472_v18  ;;  %v8516_v18 = vld [vmem:[#allocation7 + $0x8f4] ss:$20 sps:$4 sm:$0xff]  }
 0x1a7   :  { %7847 = vmatpush3.bf16.msra.mxu0 %v8539_v21  ;;  %2926 = vmatprep.subr.bf16.mxu1 %v8477_v20  ;;  %v8601_v20 = vld [vmem:[#allocation7 + $0x5d8] ss:$20 sps:$4 sm:$0xff]   ;;  %v8604_v21 = vld [vmem:[#allocation7 + $0x740] ss:$20 sps:$4 sm:$0xff]  }
 0x1a8   :  { %7848 = vmatprep.subr.bf16.mxu0 %v8543_v22  ;;  %3057 = vmatprep.mubr.bf16.mxu0 %v9795_v48  ;;  %v8559_v48 = vld [vmem:[#allocation7 + $0xb0] ss:$20 sps:$4 sm:$0xff]  }
 0x1a9   :  { %v8514_v22 = vld [vmem:[#allocation7 + $0x8f0] ss:$20 sps:$4 sm:$0xff]  }
 0x1aa   :  { %2927 = vmatpush1.bf16.msra.mxu1 %v8475_v23  ;;  %v8519_v23 = vld [vmem:[#allocation7 + $0x91c] ss:$20 sps:$4 sm:$0xff]  }
 0x1ab   :  { %7849 = vmatpush3.bf16.msra.mxu0 %v8544_v26  ;;  %2928 = vmatprep.subr.bf16.mxu1 %v8480_v25  ;;  %v8605_v25 = vld [vmem:[#allocation7 + $0x600] ss:$20 sps:$4 sm:$0xff]   ;;  %v8608_v26 = vld [vmem:[#allocation7 + $0x768] ss:$20 sps:$4 sm:$0xff]  }
 0x1ac   :  { %7850 = vmatprep.subr.bf16.mxu0 %v8548_v27  ;;  %v8517_v27 = vld [vmem:[#allocation7 + $0x918] ss:$20 sps:$4 sm:$0xff]  }
 0x1ae   :  { %2929 = vmatpush1.bf16.msra.mxu1 %v8478_v28  ;;  %v8522_v28 = vld [vmem:[#allocation7 + $0x944] ss:$20 sps:$4 sm:$0xff]  }
 0x1af   :  { %7851 = vmatpush3.bf16.msra.mxu0 %v8549_v30  ;;  %2930 = vmatprep.subr.bf16.mxu1 %v8483_v29  ;;  %v8609_v29 = vld [vmem:[#allocation7 + $0x628] ss:$20 sps:$4 sm:$0xff]   ;;  %v8520_v30 = vld [vmem:[#allocation7 + $0x940] ss:$20 sps:$4 sm:$0xff]  }
 0x1b0   :  { %7852 = vmatprep.subr.bf16.mxu0 %v8553_v32  ;;  %v8525_v32 = vld [vmem:[#allocation7 + $0x96c] ss:$20 sps:$4 sm:$0xff]  }
 0x1b2   :  { %2931 = vmatpush1.bf16.msra.mxu1 %v8481_v33  ;;  %v8612_v33 = vld [vmem:[#allocation7 + $0xa10] ss:$20 sps:$4 sm:$0xff]  }
 0x1b3   :  { %7853 = vmatpush3.bf16.msra.mxu0 %v8554_v37  ;;  %2932 = vmatprep.subr.bf16.mxu1 %v8486_v35  ;;  %v8523_v35 = vld [vmem:[#allocation7 + $0x968] ss:$20 sps:$4 sm:$0xff]   ;;  %v9596_v37 = vmov 0  }
 0x1b4   :  { %7854 = vmatprep.subr.bf16.mxu0 %v8558_v38  ;;  %v8528_v38 = vld [vmem:[#allocation7 + $0x994] ss:$20 sps:$4 sm:$0xff]  }
 0x1b6   :  { %2933 = vmatpush1.bf16.msra.mxu1 %v8484_v39  ;;  %v8615_v39 = vld [vmem:[#allocation7 + $0xa38] ss:$20 sps:$4 sm:$0xff]  }
 0x1b7   :  { %7855 = vmatpush3.bf16.msra.mxu0 %v8559_v48  ;;  %2943 = vmatprep.subr.bf16.mxu1 %v8489_v40  ;;  %v8526_v40 = vld [vmem:[#allocation7 + $0x990] ss:$20 sps:$4 sm:$0xff]  }
 0x1b8   :  { %7856 = vmatprep.subr.bf16.mxu0 %v8563_v41  ;;  %v8531_v48 = vld [vmem:[#allocation7 + $0x9bc] ss:$20 sps:$4 sm:$0xff]   ;;  %v8618_v41 = vld [vmem:[#allocation7 + $0xa60] ss:$20 sps:$4 sm:$0xff]  }
 0x1b9   :  { %2935 = vmatmul.mubr.bf16.vlgmr.msra.gmra.mrb[4].mxu1 %v9811_v17 }
 0x1ba   :  { %2944 = vmatpush1.bf16.msra.mxu1 %v8487_v42  ;;  %2975 = vmatprep.mubr.bf16.mxu1 %v9815_v24  ;;  %v8529_v42 = vld [vmem:[#allocation7 + $0x9b8] ss:$20 sps:$4 sm:$0xff]  }
 0x1bb   :  { %2945 = vmatprep.subr.bf16.mxu1 %v8492_v43  ;;  %7857 = vmatpush3.bf16.msra.mxu0 %v8564_v44  ;;  %v8534_v43 = vld [vmem:[#allocation7 + $0x9e4] ss:$20 sps:$4 sm:$0xff]   ;;  %v8532_v44 = vld [vmem:[#allocation7 + $0x9e0] ss:$20 sps:$4 sm:$0xff]  }
 0x1bc   :  { %7858 = vmatprep.subr.bf16.mxu0 %v8568_v45  ;;  %v8537_v45 = vld [vmem:[#allocation7 + $0xa0c] ss:$20 sps:$4 sm:$0xff]  }
 0x1be   :  { %2946 = vmatpush1.bf16.msra.mxu1 %v8490_v46  ;;  %v8624_v46 = vld [vmem:[#allocation7 + $0xab0] ss:$20 sps:$4 sm:$0xff]  }
 0x1bf   :  { %2947 = vmatprep.subr.bf16.mxu1 %v8495_v47  ;;  %7859 = vmatpush3.bf16.msra.mxu0 %v8569_v49  ;;  %v8535_v47 = vld [vmem:[#allocation7 + $0xa08] ss:$20 sps:$4 sm:$0xff]  }
 0x1c0   :  { %7860 = vmatprep.subr.bf16.mxu0 %v8573_v50  ;;  %v8542_v49 = vld [vmem:[#allocation7 + $0xa34] ss:$20 sps:$4 sm:$0xff]   ;;  %v8627_v50 = vld [vmem:[#allocation7 + $0xad8] ss:$20 sps:$4 sm:$0xff]  }
 0x1c2   :  { %2948 = vmatpush1.bf16.msra.mxu1 %v8493_v51  ;;  %v8540_v51 = vld [vmem:[#allocation7 + $0xa30] ss:$20 sps:$4 sm:$0xff]  }
 0x1c3   :  { %2949 = vmatprep.subr.bf16.mxu1 %v8498_v53  ;;  %7861 = vmatpush3.bf16.msra.mxu0 %v8574_v54  ;;  %v8547_v53 = vld [vmem:[#allocation7 + $0xa5c] ss:$20 sps:$4 sm:$0xff]   ;;  %v8630_v54 = vld [vmem:[#allocation7 + $0xb00] ss:$20 sps:$4 sm:$0xff]  }
 0x1c4   :  { %7890 = vmatprep.subr.bf16.mxu0 %v8578_v55  ;;  %v8545_v55 = vld [vmem:[#allocation7 + $0xa58] ss:$20 sps:$4 sm:$0xff]  }
 0x1c6   :  { %2950 = vmatpush1.bf16.msra.mxu1 %v8496_v56  ;;  %3058 = vmatmul.mubr.bf16.vlgmr.msra.gmra.mrb[4].mxu0 %v9801_v8  ;;  %v8552_v56 = vld [vmem:[#allocation7 + $0xa84] ss:$20 sps:$4 sm:$0xff]  }
 0x1c7   :  { %2951 = vmatprep.subr.bf16.mxu1 %v8501_v57  ;;  %7891 = vmatpush3.bf16.msra.mxu0 %v8579_v58  ;;  %v8633_v57 = vld [vmem:[#allocation7 + $0xb28] ss:$20 sps:$4 sm:$0xff]   ;;  %v8550_v58 = vld [vmem:[#allocation7 + $0xa80] ss:$20 sps:$4 sm:$0xff]  }
 0x1c8   :  { %7892 = vmatprep.subr.bf16.mxu0 %v8583_v60  ;;  %3137 = vmatprep.mubr.bf16.mxu0 %v9808_v36  ;;  %v8596_v36 = vld [vmem:[#allocation7 + $0x6f0] ss:$20 sps:$4 sm:$0xff]  }
 0x1c9   :  { %v8636_v60 = vld [vmem:[#allocation7 + $0xb50] ss:$20 sps:$4 sm:$0xff]  }
 0x1ca   :  { %2952 = vmatpush1.bf16.msra.mxu1 %v8499_v59  ;;  %v8557_v59 = vld [vmem:[#allocation7 + $0xaac] ss:$20 sps:$4 sm:$0xff]  }
 0x1cb   :  { %2953 = vmatprep.subr.bf16.mxu1 %v8504_v61  ;;  %7893 = vmatpush3.bf16.msra.mxu0 %v8584_v62  ;;  %v8562_v61 = vld [vmem:[#allocation7 + $0xad4] ss:$20 sps:$4 sm:$0xff]   ;;  %v8639_v62 = vld [vmem:[#allocation7 + $0xb78] ss:$20 sps:$4 sm:$0xff]  }
 0x1cc   :  { %v9836_v4 = vpop.f32.mrb[0].mxu1  ;;  %7894 = vmatprep.subr.bf16.mxu0 %v8588_v63  ;;  %v8560_v63 = vld [vmem:[#allocation7 + $0xad0] ss:$20 sps:$4 sm:$0xff]  }
 0x1cd   :  { %v9838_v6 = vpop.f32.mrb[1].mxu1 }
 0x1ce   :  { %v2653_v8 = vpop.f32.mrb[2].mxu1  ;;  %2954 = vmatpush1.bf16.msra.mxu1 %v8502_v0  ;;  %v8567_v0 = vld [vmem:[#allocation7 + $0xafc] ss:$20 sps:$4 sm:$0xff]  }
 0x1cf   :  { %v2654_v10 = vpop.f32.mrb[3].mxu1  ;;  %2955 = vmatprep.subr.bf16.mxu1 %v8507_v1  ;;  %7895 = vmatpush3.bf16.msra.mxu0 %v8589_v2  ;;  %v8642_v1 = vld [vmem:[#allocation7 + $0xba0] ss:$20 sps:$4 sm:$0xff]   ;;  %v8565_v2 = vld [vmem:[#allocation7 + $0xaf8] ss:$20 sps:$4 sm:$0xff]  }
 0x1d0   :  { %7896 = vmatprep.subr.bf16.mxu0 %v8592_v3  ;;  %v8572_v3 = vld [vmem:[#allocation7 + $0xb24] ss:$20 sps:$4 sm:$0xff]   ;;  %v8577_v8 = vld [vmem:[#allocation7 + $0xb4c] ss:$20 sps:$4 sm:$0xff]  }
 0x1d1   :  { %v8580_v10 = vld [vmem:[#allocation7 + $0xb70] ss:$20 sps:$4 sm:$0xff]  }
 0x1d2   :  { %2956 = vmatpush1.bf16.msra.mxu1 %v8505_v5  ;;  %v8570_v5 = vld [vmem:[#allocation7 + $0xb20] ss:$20 sps:$4 sm:$0xff]  }
 0x1d3   :  { %2957 = vmatprep.subr.bf16.mxu1 %v8510_v7  ;;  %7897 = vmatpush3.bf16.msra.mxu0 %v8593_v9  ;;  %v8575_v7 = vld [vmem:[#allocation7 + $0xb48] ss:$20 sps:$4 sm:$0xff]  }
 0x1d4   :  { %7898 = vmatprep.subr.bf16.mxu0 %v8596_v36  ;;  %v8582_v9 = vld [vmem:[#allocation7 + $0xb74] ss:$20 sps:$4 sm:$0xff]   ;;  %v8587_v36 = vld [vmem:[#allocation7 + $0xb9c] ss:$20 sps:$4 sm:$0xff]  }
 0x1d6   :  { %2958 = vmatpush1.bf16.msra.mxu1 %v8508_v12  ;;  %v8585_v12 = vld [vmem:[#allocation7 + $0xb98] ss:$20 sps:$4 sm:$0xff]  }
 0x1d7   :  { %2959 = vmatprep.subr.bf16.mxu1 %v8513_v13  ;;  %7899 = vmatpush3.bf16.msra.mxu0 %v8597_v14  ;;  %v8590_v13 = vld [vmem:[#allocation7 + $0x3d0] ss:$20 sps:$4 sm:$0xff]  }
 0x1d8   :  { %7900 = vmatprep.subr.bf16.mxu0 %v8600_v15  ;;  %v8591_v14 = vld [vmem:[#allocation7 + $0x290] ss:$20 sps:$4 sm:$0xff]   ;;  %v8594_v15 = vld [vmem:[#allocation7 + $0x3f8] ss:$20 sps:$4 sm:$0xff]  }
 0x1da   :  { %2960 = vmatpush1.bf16.msra.mxu1 %v8511_v16  ;;  %v8595_v16 = vld [vmem:[#allocation7 + $0x2b8] ss:$20 sps:$4 sm:$0xff]  }
 0x1db   :  { %2961 = vmatprep.subr.bf16.mxu1 %v8516_v18  ;;  %7901 = vmatpush3.bf16.msra.mxu0 %v8601_v20  ;;  %v8598_v18 = vld [vmem:[#allocation7 + $0x420] ss:$20 sps:$4 sm:$0xff]  }
 0x1dc   :  { %7902 = vmatprep.subr.bf16.mxu0 %v8604_v21  ;;  %v8599_v20 = vld [vmem:[#allocation7 + $0x2e0] ss:$20 sps:$4 sm:$0xff]   ;;  %v8602_v21 = vld [vmem:[#allocation7 + $0x448] ss:$20 sps:$4 sm:$0xff]  }
 0x1de   :  { %2962 = vmatpush1.bf16.msra.mxu1 %v8514_v22  ;;  %v8603_v22 = vld [vmem:[#allocation7 + $0x308] ss:$20 sps:$4 sm:$0xff]  }
 0x1df   :  { %2963 = vmatprep.subr.bf16.mxu1 %v8519_v23  ;;  %7903 = vmatpush3.bf16.msra.mxu0 %v8605_v25  ;;  %v8606_v23 = vld [vmem:[#allocation7 + $0x470] ss:$20 sps:$4 sm:$0xff]  }
 0x1e0   :  { %7904 = vmatprep.subr.bf16.mxu0 %v8608_v26  ;;  %v8607_v25 = vld [vmem:[#allocation7 + $0x330] ss:$20 sps:$4 sm:$0xff]   ;;  %v8610_v26 = vld [vmem:[#allocation7 + $0x498] ss:$20 sps:$4 sm:$0xff]  }
 0x1e2   :  { %2964 = vmatpush1.bf16.msra.mxu1 %v8517_v27  ;;  %v8611_v27 = vld [vmem:[#allocation7 + $0x358] ss:$20 sps:$4 sm:$0xff]  }
 0x1e3   :  { %2965 = vmatprep.subr.bf16.mxu1 %v8522_v28  ;;  %7905 = vmatpush3.bf16.msra.mxu0 %v8609_v29  ;;  %v8613_v28 = vld [vmem:[#allocation7 + $0x4c0] ss:$20 sps:$4 sm:$0xff]   ;;  %v8616_v29 = vld [vmem:[#allocation7 + $0x4e8] ss:$20 sps:$4 sm:$0xff]  }
 0x1e4   :  { %3185 = vmatprep.subr.bf16.mxu0 %v9596_v37 }
 0x1e6   :  { %2966 = vmatpush1.bf16.msra.mxu1 %v8520_v30  ;;  %3138 = vmatmul.mubr.bf16.vlgmr.msra.gmra.mrb[8].mxu0 %v9811_v17  ;;  %v8621_v17 = vld [vmem:[#allocation7 + $0xa88] ss:$20 sps:$4 sm:$0xff]   ;;  %v8619_v30 = vld [vmem:[#allocation7 + $0x8d0] ss:$20 sps:$4 sm:$0xff]  }
 0x1e7   :  { %2967 = vmatprep.subr.bf16.mxu1 %v8525_v32  ;;  %3186 = vmatpush1.bf16.msra.mxu0 %v8612_v33  ;;  %v8620_v32 = vld [vmem:[#allocation7 + $0x790] ss:$20 sps:$4 sm:$0xff]   ;;  %v8622_v33 = vld [vmem:[#allocation7 + $0x8f8] ss:$20 sps:$4 sm:$0xff]  }
 0x1e8   :  { %3187 = vmatprep.subr.bf16.mxu0 %v9596_v37  ;;  %7380 = vmatprep.mubr.msk.bf16.mxu0 %vm2611_vm0, %v9821_v34 }
 0x1ea   :  { %2968 = vmatpush1.bf16.msra.mxu1 %v8523_v35  ;;  %v8623_v35 = vld [vmem:[#allocation7 + $0x7b8] ss:$20 sps:$4 sm:$0xff]  }
 0x1eb   :  { %2969 = vmatprep.subr.bf16.mxu1 %v8528_v38  ;;  %3188 = vmatpush1.bf16.msra.mxu0 %v8615_v39  ;;  %v8625_v38 = vld [vmem:[#allocation7 + $0x920] ss:$20 sps:$4 sm:$0xff]  }
 0x1ec   :  { %3189 = vmatprep.subr.bf16.mxu0 %v9596_v37  ;;  %v8626_v39 = vld [vmem:[#allocation7 + $0x7e0] ss:$20 sps:$4 sm:$0xff]  }
 0x1ee   :  { %2970 = vmatpush1.bf16.msra.mxu1 %v8526_v40  ;;  %v8628_v40 = vld [vmem:[#allocation7 + $0x948] ss:$20 sps:$4 sm:$0xff]  }
 0x1ef   :  { %2971 = vmatprep.subr.bf16.mxu1 %v8531_v48  ;;  %3190 = vmatpush1.bf16.msra.mxu0 %v8618_v41  ;;  %v8629_v48 = vld [vmem:[#allocation7 + $0x808] ss:$20 sps:$4 sm:$0xff]   ;;  %v8631_v41 = vld [vmem:[#allocation7 + $0x970] ss:$20 sps:$4 sm:$0xff]  }
 0x1f0   :  { %3191 = vmatprep.subr.bf16.mxu0 %v9596_v37 }
 0x1f2   :  { %2972 = vmatpush1.bf16.msra.mxu1 %v8529_v42  ;;  %v8632_v42 = vld [vmem:[#allocation7 + $0x830] ss:$20 sps:$4 sm:$0xff]  }
 0x1f3   :  { %2973 = vmatprep.subr.bf16.mxu1 %v8534_v43  ;;  %3192 = vmatpush1.bf16.msra.mxu0 %v8621_v17  ;;  %v8634_v43 = vld [vmem:[#allocation7 + $0x998] ss:$20 sps:$4 sm:$0xff]  }
 0x1f4   :  { %3193 = vmatprep.subr.bf16.mxu0 %v9596_v37  ;;  %v8635_v17 = vld [vmem:[#allocation7 + $0x858] ss:$20 sps:$4 sm:$0xff]  }
 0x1f6   :  { %2974 = vmatpush1.bf16.msra.mxu1 %v8532_v44  ;;  %v8637_v44 = vld [vmem:[#allocation7 + $0x9c0] ss:$20 sps:$4 sm:$0xff]  }
 0x1f7   :  { %2984 = vmatprep.subr.bf16.mxu1 %v8537_v45  ;;  %3194 = vmatpush1.bf16.msra.mxu0 %v8624_v46  ;;  %v8640_v45 = vld [vmem:[#allocation7 + $0x9e8] ss:$20 sps:$4 sm:$0xff]  }
 0x1f8   :  { %3195 = vmatprep.subr.bf16.mxu0 %v9596_v37  ;;  %v8643_v46 = vld [vmem:[#allocation10 + $0x40] sm:$0xff]  }
 0x1f9   :  { %2976 = vmatmul.mubr.bf16.vlgmr.msra.gmra.mrb[4].mxu1 %v9819_v31 }
 0x1fa   :  { %2985 = vmatpush1.bf16.msra.mxu1 %v8535_v47  ;;  %7379 = vmatprep.mubr.msk.bf16.mxu1 %vm2611_vm0, %v9821_v34  ;;  %v8555_v34 = vld [vmem:[#allocation7 + $0xaa8] ss:$20 sps:$4 sm:$0xff]  }
 0x1fb   :  { %2986 = vmatprep.subr.bf16.mxu1 %v8542_v49  ;;  %3196 = vmatpush1.bf16.msra.mxu0 %v8627_v50  ;;  %v8644_v47 = vld [vmem:[#allocation10] sm:$0xff]   ;;  %v8645_v49 = vld [vmem:[#allocation10 + $0x48] sm:$0xff]  }
 0x1fc   :  { %3197 = vmatprep.subr.bf16.mxu0 %v9596_v37  ;;  %v8646_v50 = vld [vmem:[#allocation10 + $0x8] sm:$0xff]  }
 0x1fe   :  { %2987 = vmatpush1.bf16.msra.mxu1 %v8540_v51  ;;  %v8647_v51 = vld [vmem:[#allocation10 + $0x50] sm:$0xff]  }
 0x1ff   :  { %2988 = vmatprep.subr.bf16.mxu1 %v8547_v53  ;;  %3198 = vmatpush1.bf16.msra.mxu0 %v8630_v54  ;;  %v636_v53 = vlaneseq  ;;  %v8648_v54 = vld [vmem:[#allocation10 + $0x10] sm:$0xff]  }
 0x200   :  { %3199 = vmatprep.subr.bf16.mxu0 %v9596_v37 }
 0x202   :  { %2989 = vmatpush1.bf16.msra.mxu1 %v8545_v55  ;;  %v8649_v55 = vld [vmem:[#allocation10 + $0x58] sm:$0xff]  }
 0x203   :  { %2990 = vmatprep.subr.bf16.mxu1 %v8552_v56  ;;  %3200 = vmatpush1.bf16.msra.mxu0 %v8633_v57  ;;  %v9863_v56 = vshrl.u32 %v636_v53, 7  ;;  %v8650_v57 = vld [vmem:[#allocation10 + $0x18] sm:$0xff]  }
 0x204   :  { %3201 = vmatprep.subr.bf16.mxu0 %v9596_v37 }
 0x206   :  { %2991 = vmatpush1.bf16.msra.mxu1 %v8550_v58  ;;  %v9866_v58 = vsub.s32 0, %v9863_v56 }
 0x207   :  { %2992 = vmatprep.subr.bf16.mxu1 %v8557_v59  ;;  %3202 = vmatpush1.bf16.msra.mxu0 %v8636_v60  ;;  %v8651_v59 = vld [vmem:[#allocation10 + $0x60] sm:$0xff]   ;;  %v9868_v60 = vld [vmem:[#allocation8] sm:$0x1f] }
 0x208   :  { %3203 = vmatprep.subr.bf16.mxu0 %v9596_v37 }
 0x20a   :  { %2993 = vmatpush1.bf16.msra.mxu1 %v8555_v34  ;;  %v8652_v34 = vld [vmem:[#allocation10 + $0x20] sm:$0xff]  }
 0x20b   :  { %2994 = vmatprep.subr.bf16.mxu1 %v8562_v61  ;;  %3204 = vmatpush1.bf16.msra.mxu0 %v8639_v62  ;;  %v639_v61 = vrot.slane %v9868_v60, %v9866_v58  ;;  %v8653_v62 = vld [vmem:[#allocation10 + $0x68] sm:$0xff]  }
 0x20c   :  { %3205 = vmatprep.subr.bf16.mxu0 %v9596_v37 }
 0x20e   :  { %2995 = vmatpush1.bf16.msra.mxu1 %v8560_v63 }
 0x20f   :  { %2996 = vmatprep.subr.bf16.mxu1 %v8567_v0  ;;  %3206 = vmatpush1.bf16.msra.mxu0 %v8642_v1  ;;  %v8654_v0 = vld [vmem:[#allocation10 + $0x28] sm:$0xff]   ;;  %v2650_v1 = vadd.f32 %v9836_v4, %v639_v61  ;;  %v8659_v4 = vld [vmem:[#allocation10 + $0xc0] sm:$0xff]   ;;  %v9892_v61 = vsub.s32 3, %v9863_v56 }
 0x212   :  { %2997 = vmatpush1.bf16.msra.mxu1 %v8565_v2  ;;  %3218 = vmatmul.mubr.bf16.vlgmr.msra.gmra.mrb[12].mxu0 %v9828_v19  ;;  %v8655_v2 = vld [vmem:[#allocation10 + $0x70] sm:$0xff]  }
 0x213   :  { %2998 = vmatprep.subr.bf16.mxu1 %v8572_v3 }
 0x216   :  { %2999 = vmatpush1.bf16.msra.mxu1 %v8570_v5 }
 0x217   :  { %3000 = vmatprep.subr.bf16.mxu1 %v8577_v8 }
 0x21a   :  { %3001 = vmatpush1.bf16.msra.mxu1 %v8575_v7 }
 0x21b   :  { %3002 = vmatprep.subr.bf16.mxu1 %v8582_v9 }
 0x21e   :  { %3003 = vmatpush1.bf16.msra.mxu1 %v8580_v10 }
 0x21f   :  { %3004 = vmatprep.subr.bf16.mxu1 %v8587_v36  ;;  %v8656_v36 = vld [vmem:[#allocation10 + $0x30] sm:$0xff]  }
 0x222   :  { %3005 = vmatpush1.bf16.msra.mxu1 %v8585_v12 }
 0x223   :  { %7868 = vmatprep.subr.bf16.mxu1 %v8590_v13  ;;  %v8657_v13 = vld [vmem:[#allocation10 + $0x78] sm:$0xff]  }
 0x225   :  { %3017 = vmatmul.mubr.bf16.vlgmr.msra.gmra.mrb[4].mxu1 %v9828_v19  ;;  %v8614_v19 = vld [vmem:[#allocation7 + $0x380] ss:$20 sps:$4 sm:$0xff]  }
 0x226   :  { %7869 = vmatpush3.bf16.msra.mxu1 %v8591_v14  ;;  %3097 = vmatprep.mubr.bf16.mxu1 %v9797_v52  ;;  %v8617_v52 = vld [vmem:[#allocation7 + $0x3a8] ss:$20 sps:$4 sm:$0xff]  }
 0x227   :  { %7870 = vmatprep.subr.bf16.mxu1 %v8594_v15 }
 0x22a   :  { %7871 = vmatpush3.bf16.msra.mxu1 %v8595_v16  ;;  %v8658_v16 = vld [vmem:[#allocation10 + $0x38] sm:$0xff]  }
 0x22b   :  { %7872 = vmatprep.subr.bf16.mxu1 %v8598_v18 }
 0x22e   :  { %7873 = vmatpush3.bf16.msra.mxu1 %v8599_v20 }
 0x22f   :  { %7874 = vmatprep.subr.bf16.mxu1 %v8602_v21  ;;  %v8661_v21 = vld [vmem:[#allocation10 + $0xc8] sm:$0xff]  }
 0x232   :  { %7875 = vmatpush3.bf16.msra.mxu1 %v8603_v22  ;;  %v8662_v22 = vld [vmem:[#allocation10 + $0x88] sm:$0xff]  }
 0x233   :  { %7876 = vmatprep.subr.bf16.mxu1 %v8606_v23  ;;  %v8663_v23 = vld [vmem:[#allocation10 + $0xd0] sm:$0xff]  }
 0x236   :  { %7877 = vmatpush3.bf16.msra.mxu1 %v8607_v25  ;;  %v8664_v25 = vld [vmem:[#allocation10 + $0x90] sm:$0xff]  }
 0x237   :  { %7878 = vmatprep.subr.bf16.mxu1 %v8610_v26  ;;  %v8665_v26 = vld [vmem:[#allocation10 + $0xd8] sm:$0xff]  }
 0x23a   :  { %7879 = vmatpush3.bf16.msra.mxu1 %v8611_v27  ;;  %v8666_v27 = vld [vmem:[#allocation10 + $0x98] sm:$0xff]  }
 0x23b   :  { %7880 = vmatprep.subr.bf16.mxu1 %v8613_v28  ;;  %v8667_v28 = vld [vmem:[#allocation10 + $0xe0] sm:$0xff]  }
 0x23e   :  { %7881 = vmatpush3.bf16.msra.mxu1 %v8614_v19  ;;  %v8668_v19 = vld [vmem:[#allocation10 + $0xa0] sm:$0xff]  }
 0x23f   :  { %7882 = vmatprep.subr.bf16.mxu1 %v8616_v29  ;;  %v8669_v29 = vld [vmem:[#allocation10 + $0xe8] sm:$0xff]  }
 0x242   :  { %7883 = vmatpush3.bf16.msra.mxu1 %v8617_v52  ;;  %v8670_v52 = vld [vmem:[#allocation10 + $0xa8] sm:$0xff]  }
 0x243   :  { %7912 = vmatprep.subr.bf16.mxu1 %v8619_v30  ;;  %v8671_v30 = vld [vmem:[#allocation10 + $0xf0] sm:$0xff]  }
 0x245   :  { %3098 = vmatmul.mubr.bf16.vlgmr.msra.gmra.mrb[8].mxu1 %v9803_v11  ;;  %v8638_v11 = vld [vmem:[#allocation7 + $0x880] ss:$20 sps:$4 sm:$0xff]  }
 0x246   :  { %7913 = vmatpush3.bf16.msra.mxu1 %v8620_v32  ;;  %3177 = vmatprep.mubr.bf16.mxu1 %v9815_v24  ;;  %v8641_v24 = vld [vmem:[#allocation7 + $0x8a8] ss:$20 sps:$4 sm:$0xff]  }
 0x247   :  { %7914 = vmatprep.subr.bf16.mxu1 %v8622_v33 }
 0x24a   :  { %7915 = vmatpush3.bf16.msra.mxu1 %v8623_v35  ;;  %v8672_v35 = vld [vmem:[#allocation10 + $0xb0] sm:$0xff]  }
 0x24b   :  { %7916 = vmatprep.subr.bf16.mxu1 %v8625_v38 }
 0x24e   :  { %7917 = vmatpush3.bf16.msra.mxu1 %v8626_v39 }
 0x24f   :  { %7918 = vmatprep.subr.bf16.mxu1 %v8628_v40  ;;  %v8673_v40 = vld [vmem:[#allocation10 + $0xf8] sm:$0xff]  }
 0x252   :  { %7919 = vmatpush3.bf16.msra.mxu1 %v8629_v48 }
 0x253   :  { %7920 = vmatprep.subr.bf16.mxu1 %v8631_v41  ;;  %v8675_v41 = vld [vmem:[#allocation10 + $0x100] sm:$0xff]  }
 0x256   :  { %7921 = vmatpush3.bf16.msra.mxu1 %v8632_v42  ;;  %v9597_v42 = vmov 0.0  }
 0x257   :  { %7922 = vmatprep.subr.bf16.mxu1 %v8634_v43  ;;  %7988 = vmatprep.subr.bf16.mxu0 %v9597_v42  ;;  %v8674_v43 = vld [vmem:[#allocation10 + $0xb8] sm:$0xff]  }
 0x258   :  { %7989 = vmatpush3.bf16.msra.mxu0 %v8675_v41  ;;  %8000 = vmatprep.mubr.msk.bf16.mxu0 %vm9598_vm2, %v9597_v42 }
 0x259   :  { %7990 = vmatprep.subr.bf16.mxu0 %v9597_v42 }
 0x25a   :  { %7923 = vmatpush3.bf16.msra.mxu1 %v8635_v17  ;;  %v8676_v17 = vld [vmem:[#allocation10 + $0x108] sm:$0xff]  }
 0x25b   :  { %7924 = vmatprep.subr.bf16.mxu1 %v8637_v44  ;;  %v8677_v44 = vld [vmem:[#allocation10 + $0x110] sm:$0xff]  }
 0x25c   :  { %7991 = vmatpush3.bf16.msra.mxu0 %v8676_v17 }
 0x25d   :  { %7992 = vmatprep.subr.bf16.mxu0 %v9597_v42 }
 0x25e   :  { %7925 = vmatpush3.bf16.msra.mxu1 %v8638_v11  ;;  %v8678_v11 = vld [vmem:[#allocation10 + $0x118] sm:$0xff]  }
 0x25f   :  { %7926 = vmatprep.subr.bf16.mxu1 %v8640_v45 }
 0x260   :  { %7993 = vmatpush3.bf16.msra.mxu0 %v8677_v44 }
 0x261   :  { %7994 = vmatprep.subr.bf16.mxu0 %v9597_v42 }
 0x262   :  { %7927 = vmatpush3.bf16.msra.mxu1 %v8641_v24 }
 0x263   :  { %7934 = vmatprep.subr.bf16.mxu1 %v8643_v46 }
 0x264   :  { %7995 = vmatpush3.bf16.msra.mxu0 %v8678_v11 }
 0x265   :  { %3178 = vmatmul.mubr.bf16.vlgmr.msra.gmra.mrb[12].mxu1 %v9819_v31  ;;  %v9871_v31 = vsub.s32 1, %v9863_v56  ;;  %7996 = vmatprep.subr.bf16.mxu0 %v9597_v42 }
 0x266   :  { %7935 = vmatpush3.bf16.msra.mxu1 %v8644_v47 }
 0x267   :  { %7936 = vmatprep.subr.bf16.mxu1 %v8645_v49  ;;  %v643_v63 = vrot.slane %v9868_v60, %v9871_v31  ;;  %v8679_v49 = vld [vmem:[#allocation10 + $0x120] sm:$0xff]  }
 0x268   :  { %7997 = vmatpush3.bf16.msra.mxu0 %v8679_v49 }
 0x269   :  { %v2652_v3 = vadd.f32 %v9838_v6, %v643_v63  ;;  %v8660_v6 = vld [vmem:[#allocation10 + $0x80] sm:$0xff]   ;;  %7998 = vmatprep.subr.bf16.mxu0 %v9597_v42  ;;  %v651_v63 = vrot.slane %v9868_v60, %v9892_v61 }
 0x26a   :  { %7937 = vmatpush3.bf16.msra.mxu1 %v8646_v50 }
 0x26b   :  { %7938 = vmatprep.subr.bf16.mxu1 %v8647_v51  ;;  %v8680_v51 = vld [vmem:[#allocation10 + $0x128] ss:$0 sps:$4 sm:$0xff]  }
 0x26c   :  { %v3548_v53 = vsel %vm3546_vm1, %v8680_v51, 0 }
 0x26d   :  { %7999 = vmatpush3.bf16.msra.mxu0 %v3548_v53  ;;  %v3687_v53 = vld [vmem:[#allocation13 + $0x28] sm:$0x33] }
 0x26e   :  { %7939 = vmatpush3.bf16.msra.mxu1 %v8648_v54 }
 0x26f   :  { %7940 = vmatprep.subr.bf16.mxu1 %v8649_v55 }
 0x272   :  { %7941 = vmatpush3.bf16.msra.mxu1 %v8650_v57 }
 0x273   :  { %7942 = vmatprep.subr.bf16.mxu1 %v8651_v59 }
 0x276   :  { %7943 = vmatpush3.bf16.msra.mxu1 %v8652_v34  ;;  %v9889_v34 = vsub.s32 2, %v9863_v56 }
 0x277   :  { %7944 = vmatprep.subr.bf16.mxu1 %v8653_v62 }
 0x278   :  { %v647_v62 = vrot.slane %v9868_v60, %v9889_v34 }
 0x279   :  { %v2813_v5 = vpop.f32.mrb[0].mxu0 }
 0x27a   :  { %v8013_v8 = vadd.f32 %v2813_v5, %v2650_v1  ;;  %v2815_v7 = vpop.f32.mrb[1].mxu0  ;;  %7945 = vmatpush3.bf16.msra.mxu1 %v8654_v0 }
 0x27b   :  { %v8015_v9 = vadd.f32 %v2815_v7, %v2652_v3  ;;  %v2817_v10 = vpop.f32.mrb[2].mxu0  ;;  %7946 = vmatprep.subr.bf16.mxu1 %v8655_v2 }
 0x27c   :  { %v2818_v12 = vpop.f32.mrb[3].mxu0  ;;  %v3225_v18 = vmax.f32 %v8013_v8, 0.0 }
 0x27d   :  { %v3226_v14 = vmax.f32 %v8015_v9, 0.0  ;;  %v9900_v12 = vsub.s32 4, %v9863_v56 }
 0x27e   :  { %7947 = vmatpush3.bf16.msra.mxu1 %v8656_v36  ;;  %v3230_v20 = vpack.c.bf16 %v3225_v18, %v3225_v18 }
 0x27f   :  { %v3231_v15 = vpack.c.bf16 %v3226_v14, %v3226_v14  ;;  %7948 = vmatprep.subr.bf16.mxu1 %v8657_v13  ;;  %v655_v13 = vrot.slane %v9868_v60, %v9900_v12 }
 0x281   :  { %3582 = vmatprep.mubr.bf16.mxu1 %v3231_v15 }
 0x282   :  { %7949 = vmatpush3.bf16.msra.mxu1 %v8658_v16 }
 0x283   :  { %7956 = vmatprep.subr.bf16.mxu1 %v8659_v4 }
 0x285   :  { %3583 = vmatmul.mubr.bf16.vlgmr.msra.gmra.mrb[16].mxu1 %v3230_v20 }
 0x286   :  { %7957 = vmatpush3.bf16.msra.mxu1 %v8660_v6 }
 0x287   :  { %7958 = vmatprep.subr.bf16.mxu1 %v8661_v21 }
 0x28a   :  { %7959 = vmatpush3.bf16.msra.mxu1 %v8662_v22 }
 0x28b   :  { %7960 = vmatprep.subr.bf16.mxu1 %v8663_v23 }
 0x28e   :  { %7961 = vmatpush3.bf16.msra.mxu1 %v8664_v25 }
 0x28f   :  { %7962 = vmatprep.subr.bf16.mxu1 %v8665_v26 }
 0x292   :  { %7963 = vmatpush3.bf16.msra.mxu1 %v8666_v27 }
 0x293   :  { %7964 = vmatprep.subr.bf16.mxu1 %v8667_v28 }
 0x296   :  { %7965 = vmatpush3.bf16.msra.mxu1 %v8668_v19 }
 0x297   :  { %7966 = vmatprep.subr.bf16.mxu1 %v8669_v29 }
 0x299   :  { %v7862_v32 = vpop.f32.mrb[4].mxu0 }
 0x29a   :  { %v7863_v33 = vpop.f32.mrb[5].mxu0  ;;  %7967 = vmatpush3.bf16.msra.mxu1 %v8670_v52 }
 0x29b   :  { %v7864_v38 = vadd.f32 %v7863_v33, %v7862_v32  ;;  %v7865_v39 = vpop.f32.mrb[6].mxu0  ;;  %7968 = vmatprep.subr.bf16.mxu1 %v8671_v30 }
 0x29c   :  { %v7866_v48 = vpop.f32.mrb[7].mxu0  ;;  %v8683_v39 = vld [vmem:[#allocation13 + $0x4] ss:$20 sps:$4 sm:$0xff]  }
 0x29d   :  { %v3060_v16 = vadd.f32 %v7864_v38, %v655_v13  ;;  %v8681_v38 = vld [vmem:[#allocation13] ss:$20 sps:$4 sm:$0xff]  }
 0x29e   :  { %7969 = vmatpush3.bf16.msra.mxu1 %v8672_v35  ;;  %v8725_v13 = vld [vmem:[#allocation16 + $0x194] ss:$40 sps:$4 sm:$0xff]  }
 0x29f   :  { %7970 = vmatprep.subr.bf16.mxu1 %v8673_v40  ;;  %v7381_v40 = vld [vmem:[#allocation11] ss:$0 sm:$0xff] }
 0x2a2   :  { %7971 = vmatpush3.bf16.msra.mxu1 %v8674_v43 }
 0x2a3   :  { %3776 = vmatprep.subr.bf16.mxu1 %v8683_v39 }
 0x2b9   :  { %v7906_v45 = vpop.f32.mrb[8].mxu0 }
 0x2ba   :  { %v7907_v24 = vpop.f32.mrb[9].mxu0 }
 0x2bb   :  { %v7908_v46 = vadd.f32 %v7907_v24, %v7906_v45  ;;  %v7909_v47 = vpop.f32.mrb[10].mxu0 }
 0x2bc   :  { %v7910_v50 = vpop.f32.mrb[11].mxu0 }
 0x2e5   :  { %v3219_v54 = vpop.f32.mrb[12].mxu0 }
 0x2e6   :  { %v3221_v55 = vpop.f32.mrb[13].mxu0 }
 0x2e7   :  { %v3222_v57 = vpop.f32.mrb[14].mxu0  ;;  %v7427_v55 = vcombine.high %v3687_v53, %v3687_v53 }
 0x2e8   :  { %v3223_v59 = vpop.f32.mrb[15].mxu0  ;;  %v7426_v57 = vcombine.low %v3687_v53, %v3687_v53  ;;  %v8720_v53 = vld [vmem:[#allocation16 + $0x148] ss:$40 sps:$4 sm:$0xff]  }
 0x2ea   :  { %v3762_v59 = vsel %vm3760_vm5, %v7426_v57, 0  ;;  %v8734_v57 = vld [vmem:[#allocation16 + $0x1ec] ss:$40 sps:$4 sm:$0xff]  }
 0x2f8   :  { %v3018_v0 = vpop.f32.mrb[4].mxu1 }
 0x2f9   :  { %v8016_v1 = vadd.f32 %v3018_v0, %v647_v62  ;;  %v3020_v2 = vpop.f32.mrb[5].mxu1  ;;  %v8688_v62 = vld [vmem:[#allocation13 + $0xc] ss:$20 sps:$4 sm:$0xff]  }
 0x2fa   :  { %v8017_v3 = vadd.f32 %v3020_v2, %v651_v63  ;;  %v3022_v5 = vpop.f32.mrb[6].mxu1  ;;  %v8693_v0 = vld [vmem:[#allocation16] ss:$40 sps:$4 sm:$0xff]   ;;  %v8701_v2 = vld [vmem:[#allocation16 + $0x54] ss:$40 sps:$4 sm:$0xff]  }
 0x2fb   :  { %v3227_v8 = vmax.f32 %v8016_v1, 0.0  ;;  %v3023_v7 = vpop.f32.mrb[7].mxu1  ;;  %v8695_v1 = vld [vmem:[#allocation16 + $0x4] ss:$40 sps:$4 sm:$0xff]  }
 0x2fc   :  { %v3228_v9 = vmax.f32 %v8017_v3, 0.0  ;;  %6245 = vmatprep.subr.bf16.mxu0 %v8695_v1  ;;  %v8699_v3 = vld [vmem:[#allocation16 + $0x50] ss:$40 sps:$4 sm:$0xff]   ;;  %v8707_v5 = vld [vmem:[#allocation16 + $0xa4] ss:$40 sps:$4 sm:$0xff]  }
 0x2fd   :  { %v3232_v36 = vpack.c.bf16 %v3227_v8, %v3227_v8  ;;  %v8705_v8 = vld [vmem:[#allocation16 + $0xa0] ss:$40 sps:$4 sm:$0xff]   ;;  %v8713_v7 = vld [vmem:[#allocation16 + $0xf4] ss:$40 sps:$4 sm:$0xff]  }
 0x2fe   :  { %v3233_v10 = vpack.c.bf16 %v3228_v9, %v3228_v9  ;;  %v8711_v9 = vld [vmem:[#allocation16 + $0xf0] ss:$40 sps:$4 sm:$0xff]  }
 0x2ff   :  { %v8744_v1 = vld [vmem:[#allocation16 + $0x288] ss:$40 sps:$4 sm:$0xff]  }
 0x300   :  { %3622 = vmatprep.mubr.bf16.mxu1 %v3233_v10  ;;  %v8719_v10 = vld [vmem:[#allocation16 + $0x144] ss:$40 sps:$4 sm:$0xff]  }
 0x301   :  { %3623 = vmatmul.mubr.bf16.vlgmr.msra.gmra.mrb[20].mxu1 %v3232_v36  ;;  %v8717_v36 = vld [vmem:[#allocation16 + $0x140] ss:$40 sps:$4 sm:$0xff]  }
 0x302   :  { %3808 = vmatprep.mubr.bf16.mxu1 %v9596_v37  ;;  %3777 = vmatpush1.bf16.msra.mxu1 %v8681_v38  ;;  %v8686_v38 = vld [vmem:[#allocation13 + $0x8] ss:$20 sps:$4 sm:$0xff]  }
 0x303   :  { %7431 = vmatprep.subr.msk.bf16.mxu1 %vm3760_vm5, %v7427_v55  ;;  %v8726_v55 = vld [vmem:[#allocation16 + $0x198] ss:$40 sps:$4 sm:$0xff]  }
 0x306   :  { %3779 = vmatpush1.bf16.msra.mxu1 %v3762_v59  ;;  %v8732_v59 = vld [vmem:[#allocation16 + $0x1e8] ss:$40 sps:$4 sm:$0xff]  }
 0x307   :  { %3817 = vmatprep.subr.bf16.mxu1 %v8688_v62  ;;  %v8740_v62 = vld [vmem:[#allocation16 + $0x23c] ss:$40 sps:$4 sm:$0xff]  }
 0x318   :  { %v7884_v14 = vpop.f32.mrb[8].mxu1 }
 0x319   :  { %v7885_v15 = vpop.f32.mrb[9].mxu1 }
 0x31a   :  { %v7886_v18 = vadd.f32 %v7885_v15, %v7884_v14  ;;  %v7887_v4 = vpop.f32.mrb[10].mxu1  ;;  %v8723_v14 = vld [vmem:[#allocation16 + $0x190] ss:$40 sps:$4 sm:$0xff]   ;;  %v8731_v15 = vld [vmem:[#allocation16 + $0x1e4] ss:$40 sps:$4 sm:$0xff]  }
 0x31b   :  { %v7888_v6 = vpop.f32.mrb[11].mxu1  ;;  %v8735_v4 = vld [vmem:[#allocation16 + $0x230] ss:$40 sps:$4 sm:$0xff]  }
 0x31c   :  { %v3100_v20 = vadd.f32 %v7886_v18, %v3060_v16  ;;  %v8729_v16 = vld [vmem:[#allocation16 + $0x1e0] ss:$40 sps:$4 sm:$0xff]   ;;  %v8737_v18 = vld [vmem:[#allocation16 + $0x234] ss:$40 sps:$4 sm:$0xff]   ;;  %v8743_v6 = vld [vmem:[#allocation16 + $0x284] ss:$40 sps:$4 sm:$0xff]  }
 0x31e   :  { %v3140_v21 = vadd.f32 %v7908_v46, %v3100_v20  ;;  %v8741_v20 = vld [vmem:[#allocation16 + $0x280] ss:$40 sps:$4 sm:$0xff]  }
 0x338   :  { %v7928_v22 = vpop.f32.mrb[12].mxu1 }
 0x339   :  { %v7929_v23 = vpop.f32.mrb[13].mxu1 }
 0x33a   :  { %v7930_v25 = vadd.f32 %v7929_v23, %v7928_v22  ;;  %v7931_v26 = vpop.f32.mrb[14].mxu1  ;;  %v8747_v22 = vld [vmem:[#allocation16 + $0x2d0] ss:$40 sps:$4 sm:$0xff]   ;;  %v8755_v23 = vld [vmem:[#allocation16 + $0x324] ss:$40 sps:$4 sm:$0xff]  }
 0x33b   :  { %v7932_v27 = vpop.f32.mrb[15].mxu1  ;;  %v8761_v26 = vld [vmem:[#allocation16 + $0x374] ss:$40 sps:$4 sm:$0xff]  }
 0x33c   :  { %v3180_v28 = vadd.f32 %v7930_v25, %v3140_v21  ;;  %v8749_v21 = vld [vmem:[#allocation16 + $0x2d4] ss:$40 sps:$4 sm:$0xff]   ;;  %v8753_v25 = vld [vmem:[#allocation16 + $0x320] ss:$40 sps:$4 sm:$0xff]   ;;  %v8759_v27 = vld [vmem:[#allocation16 + $0x370] ss:$40 sps:$4 sm:$0xff]  }
 0x33e   :  { %v3220_v19 = vadd.f32 %v3219_v54, %v3180_v28  ;;  %v8767_v28 = vld [vmem:[#allocation16 + $0x3c4] ss:$40 sps:$4 sm:$0xff]  }
 0x340   :  { %v3229_v29 = vmax.f32 %v3220_v19, 0.0  ;;  %v8765_v19 = vld [vmem:[#allocation16 + $0x3c0] ss:$40 sps:$4 sm:$0xff]  }
 0x342   :  { %v3234_v52 = vpack.c.bf16 %v3229_v29, %v3229_v29  ;;  %v8773_v29 = vld [vmem:[#allocation16 + $0x414] ss:$40 sps:$4 sm:$0xff]  }
 0x344   :  { %8001 = vmatmul.mubr.msk.bf16.vlgmr.msra.gmra.mrb[16].mxu0 %vm3542_vm3, %v3234_v52  ;;  %v8771_v52 = vld [vmem:[#allocation16 + $0x410] ss:$40 sps:$4 sm:$0xff]  }
 0x345   :  { %6246 = vmatpush1.bf16.msra.mxu0 %v8693_v0  ;;  %v8746_v0 = vld [vmem:[#allocation16 + $0x28c] ss:$40 sps:$4 sm:$0xff]  }
 0x346   :  { %6247 = vmatprep.subr.bf16.mxu0 %v8701_v2  ;;  %v8752_v2 = vld [vmem:[#allocation16 + $0x2dc] ss:$40 sps:$4 sm:$0xff]  }
 0x349   :  { %6248 = vmatpush1.bf16.msra.mxu0 %v8699_v3  ;;  %v8750_v3 = vld [vmem:[#allocation16 + $0x2d8] ss:$40 sps:$4 sm:$0xff]  }
 0x34a   :  { %6249 = vmatprep.subr.bf16.mxu0 %v8707_v5  ;;  %v8758_v5 = vld [vmem:[#allocation16 + $0x32c] ss:$40 sps:$4 sm:$0xff]  }
 0x34d   :  { %6250 = vmatpush1.bf16.msra.mxu0 %v8705_v8  ;;  %v8756_v8 = vld [vmem:[#allocation16 + $0x328] ss:$40 sps:$4 sm:$0xff]  }
 0x34e   :  { %6251 = vmatprep.subr.bf16.mxu0 %v8713_v7  ;;  %v8764_v7 = vld [vmem:[#allocation16 + $0x37c] ss:$40 sps:$4 sm:$0xff]  }
 0x351   :  { %6252 = vmatpush1.bf16.msra.mxu0 %v8711_v9  ;;  %v8762_v9 = vld [vmem:[#allocation16 + $0x378] ss:$40 sps:$4 sm:$0xff]  }
 0x352   :  { %6253 = vmatprep.subr.bf16.mxu0 %v8719_v10  ;;  %v8770_v10 = vld [vmem:[#allocation16 + $0x3cc] ss:$40 sps:$4 sm:$0xff]  }
 0x355   :  { %6254 = vmatpush1.bf16.msra.mxu0 %v8717_v36  ;;  %v8768_v36 = vld [vmem:[#allocation16 + $0x3c8] ss:$40 sps:$4 sm:$0xff]  }
 0x356   :  { %6255 = vmatprep.subr.bf16.mxu0 %v8725_v13  ;;  %v8776_v13 = vld [vmem:[#allocation16 + $0x41c] ss:$40 sps:$4 sm:$0xff]  }
 0x358   :  { %v7950_v60 = vpop.f32.mrb[16].mxu1 }
 0x359   :  { %v7951_v30 = vpop.f32.mrb[17].mxu1  ;;  %6256 = vmatpush1.bf16.msra.mxu0 %v8723_v14  ;;  %v8774_v14 = vld [vmem:[#allocation16 + $0x418] ss:$40 sps:$4 sm:$0xff]  }
 0x35a   :  { %v7952_v32 = vadd.f32 %v7951_v30, %v7950_v60  ;;  %v7953_v33 = vpop.f32.mrb[18].mxu1  ;;  %6257 = vmatprep.subr.bf16.mxu0 %v8731_v15  ;;  %v3673_v60 = vld [vmem:[#allocation5] sm:$0xff] }
 0x35b   :  { %v7954_v35 = vpop.f32.mrb[19].mxu1  ;;  %v3688_v33 = vld [vmem:[#allocation13 + $0x30] sm:$0x33] }
 0x35c   :  { %v3585_v43 = vadd.f32 %v7952_v32, %v7381_v40  ;;  %v7429_v40 = vcombine.high %v3688_v33, %v3688_v33  ;;  %v8779_v15 = vld [vmem:[#allocation16 + $0x464] ss:$40 sps:$4 sm:$0xff]  }
 0x35d   :  { %6258 = vmatpush1.bf16.msra.mxu0 %v8729_v16  ;;  %v8782_v16 = vld [vmem:[#allocation16 + $0x46c] ss:$40 sps:$4 sm:$0xff]  }
 0x35e   :  { %6259 = vmatprep.subr.bf16.mxu0 %v8737_v18  ;;  %v8777_v18 = vld [vmem:[#allocation16 + $0x460] ss:$40 sps:$4 sm:$0xff]  }
 0x361   :  { %6260 = vmatpush1.bf16.msra.mxu0 %v8735_v4  ;;  %v8780_v4 = vld [vmem:[#allocation16 + $0x468] ss:$40 sps:$4 sm:$0xff]  }
 0x362   :  { %6261 = vmatprep.subr.bf16.mxu0 %v8743_v6  ;;  %v8785_v6 = vld [vmem:[#allocation16 + $0x4b4] ss:$40 sps:$4 sm:$0xff]  }
 0x365   :  { %6262 = vmatpush1.bf16.msra.mxu0 %v8741_v20  ;;  %v8788_v20 = vld [vmem:[#allocation16 + $0x4bc] ss:$40 sps:$4 sm:$0xff]  }
 0x366   :  { %6263 = vmatprep.subr.bf16.mxu0 %v8749_v21  ;;  %v8783_v21 = vld [vmem:[#allocation16 + $0x4b0] ss:$40 sps:$4 sm:$0xff]  }
 0x369   :  { %6264 = vmatpush1.bf16.msra.mxu0 %v8747_v22  ;;  %v8786_v22 = vld [vmem:[#allocation16 + $0x4b8] ss:$40 sps:$4 sm:$0xff]  }
 0x36a   :  { %6265 = vmatprep.subr.bf16.mxu0 %v8755_v23  ;;  %v8791_v23 = vld [vmem:[#allocation16 + $0x504] ss:$40 sps:$4 sm:$0xff]  }
 0x36d   :  { %6266 = vmatpush1.bf16.msra.mxu0 %v8753_v25  ;;  %v8794_v25 = vld [vmem:[#allocation16 + $0x50c] ss:$40 sps:$4 sm:$0xff]  }
 0x36e   :  { %6267 = vmatprep.subr.bf16.mxu0 %v8761_v26  ;;  %v9923_v26 = vld [vmem:[#allocation14] sm:$0x1f] }
 0x371   :  { %6268 = vmatpush1.bf16.msra.mxu0 %v8759_v27  ;;  %v3695_v27 = vrot.slane %v9923_v26, %v9866_v58 }
 0x372   :  { %6269 = vmatprep.subr.bf16.mxu0 %v8767_v28  ;;  %v3699_v28 = vrot.slane %v9923_v26, %v9871_v31 }
 0x375   :  { %6270 = vmatpush1.bf16.msra.mxu0 %v8765_v19 }
 0x376   :  { %6271 = vmatprep.subr.bf16.mxu0 %v8773_v29 }
 0x379   :  { %6272 = vmatpush1.bf16.msra.mxu0 %v8771_v52 }
 0x37a   :  { %6273 = vmatprep.subr.bf16.mxu0 %v8779_v15  ;;  %v8827_v15 = vld [vmem:[#allocation16 + $0x6e4] ss:$40 sps:$4 sm:$0xff]  }
 0x37d   :  { %6274 = vmatpush1.bf16.msra.mxu0 %v8777_v18  ;;  %v8825_v18 = vld [vmem:[#allocation16 + $0x6e0] ss:$40 sps:$4 sm:$0xff]  }
 0x37e   :  { %6275 = vmatprep.subr.bf16.mxu0 %v8785_v6  ;;  %v8833_v6 = vld [vmem:[#allocation16 + $0x734] ss:$40 sps:$4 sm:$0xff]  }
 0x381   :  { %6276 = vmatpush1.bf16.msra.mxu0 %v8783_v21  ;;  %v8831_v21 = vld [vmem:[#allocation16 + $0x730] ss:$40 sps:$4 sm:$0xff]  }
 0x382   :  { %6286 = vmatprep.subr.bf16.mxu0 %v8791_v23  ;;  %v8839_v23 = vld [vmem:[#allocation16 + $0x784] ss:$40 sps:$4 sm:$0xff]  }
 0x3d4   :  { %v7972_v48 = vpop.f32.mrb[20].mxu1 }
 0x3d5   :  { %v7973_v41 = vpop.f32.mrb[21].mxu1 }
 0x3d6   :  { %v7974_v17 = vadd.f32 %v7973_v41, %v7972_v48  ;;  %v7975_v44 = vpop.f32.mrb[22].mxu1  ;;  %v7428_v48 = vcombine.low %v3688_v33, %v3688_v33 }
 0x3d7   :  { %v7976_v11 = vpop.f32.mrb[23].mxu1 }
 0x3d8   :  { %v3625_v45 = vadd.f32 %v7974_v17, %v3585_v43  ;;  %v3768_v41 = vsel %vm3760_vm5, %v7428_v48, 0  ;;  %v8691_v43 = vld [vmem:[#allocation13 + $0x10] ss:$20 sps:$4 sm:$0xff]   ;;  %v8692_v17 = vld [vmem:[#allocation13 + $0x38] ss:$0 sps:$4 sm:$0x33]   ;;  %v3707_v48 = vrot.slane %v9923_v26, %v9892_v61 }
 0x3d9   :  { %v3774_v44 = vsel %vm3760_vm5, %v8692_v17, 0  ;;  %v8698_v11 = vld [vmem:[#allocation16 + $0xc] ss:$40 sps:$4 sm:$0xff]   ;;  %v8800_v17 = vld [vmem:[#allocation16 + $0x55c] ss:$40 sps:$4 sm:$0xff]  }
 0x417   :  { %v3664_v24 = vpop.f32.mrb[16].mxu0 }
 0x418   :  { %v9905_v46 = vadd.f32 %v3664_v24, %v3625_v45  ;;  %v8002_v47 = vpop.f32.mrb[17].mxu0  ;;  %v8696_v45 = vld [vmem:[#allocation16 + $0x8] ss:$40 sps:$4 sm:$0xff]   ;;  %v8704_v24 = vld [vmem:[#allocation16 + $0x5c] ss:$40 sps:$4 sm:$0xff]  }
 0x419   :  { %v3667_v49 = vpop.f32.mrb[18].mxu0  ;;  %v8710_v47 = vld [vmem:[#allocation16 + $0xac] ss:$40 sps:$4 sm:$0xff]  }
 0x41a   :  { %v3670_v50 = vmul.f32 0.5, %v9905_v46  ;;  %v8003_v51 = vpop.f32.mrb[19].mxu0  ;;  %6968 = vst.msk [vmem:[#allocation20] sm:$0xff] %vm6967_vm4, %v9905_v46  ;;  %v8708_v49 = vld [vmem:[#allocation16 + $0xa8] ss:$40 sps:$4 sm:$0xff]  }
 0x41b   :  { %v8714_v51 = vld [vmem:[#allocation16 + $0xf8] ss:$40 sps:$4 sm:$0xff]  }
 0x41c   :  { %v3671_v54 = vmul.f32 1.442695, %v3670_v50  ;;  %v8716_v50 = vld [vmem:[#allocation16 + $0xfc] ss:$40 sps:$4 sm:$0xff]  }
 0x41e   :  { %9258 = vpow2.f32 %v3671_v54  ;;  %v8728_v54 = vld [vmem:[#allocation16 + $0x19c] ss:$40 sps:$4 sm:$0xff]  }
 0x428   :  { %v9259_v63 = vpop.eup %9258 }
 0x429   :  { %3675 = vrot.lane.b32.xlu0 %v9259_v63, %s9599_s9  ;;  %v8738_v63 = vld [vmem:[#allocation16 + $0x238] ss:$40 sps:$4 sm:$0xff]  }
 0x49b   :  { %v3676_v30 = vpop.permute.xlu0 %3675 }
 0x49c   :  { %v3678_v32 = vmul.f32 %v3676_v30, %v3673_v60 }
 0x49e   :  { %v3679_v35 = vadd.f32 %v3678_v32, %v9905_v46  ;;  %v8702_v46 = vld [vmem:[#allocation16 + $0x58] ss:$40 sps:$4 sm:$0xff]  }
 0x4a0   :  { %v3680_v39 = vpack.c.bf16 %v3679_v35, %v3679_v35 }
 0x4a2   :  { %7432 = vmatmul.mubr.msk.bf16.vlgmr.msra.gmra.mrb[24].mxu1 %vm3756_vm6, %v3680_v39 }
 0x4a3   :  { %3818 = vmatpush1.bf16.msra.mxu1 %v8686_v38  ;;  %3849 = vmatprep.mubr.bf16.mxu1 %v9596_v37 }
 0x4a4   :  { %7433 = vmatprep.subr.msk.bf16.mxu1 %vm3760_vm5, %v7429_v40  ;;  %v8792_v40 = vld [vmem:[#allocation16 + $0x508] ss:$40 sps:$4 sm:$0xff]  }
 0x4a7   :  { %3820 = vmatpush1.bf16.msra.mxu1 %v3768_v41 }
 0x4a8   :  { %8004 = vmatprep.subr.bf16.mxu1 %v9597_v42 }
 0x4aa   :  { %7434 = vmatmul.mubr.msk.bf16.vlgmr.msra.gmra.mrb[28].mxu1 %vm3756_vm6, %v3680_v39 }
 0x4ab   :  { %8005 = vmatpush3.bf16.msra.mxu1 %v8691_v43  ;;  %8008 = vmatprep.mubr.msk.bf16.mxu1 %vm9598_vm2, %v9597_v42  ;;  %v8797_v43 = vld [vmem:[#allocation16 + $0x554] ss:$40 sps:$4 sm:$0xff]  }
 0x4ac   :  { %8006 = vmatprep.subr.bf16.mxu1 %v9597_v42  ;;  %v8722_v42 = vld [vmem:[#allocation16 + $0x14c] ss:$40 sps:$4 sm:$0xff]  }
 0x4af   :  { %8007 = vmatpush3.bf16.msra.mxu1 %v3774_v44 }
 0x4b0   :  { %6368 = vmatprep.subr.bf16.mxu1 %v8698_v11 }
 0x4b2   :  { %8009 = vmatmul.mubr.msk.bf16.vlgmr.msra.gmra.mrb[32].mxu1 %vm3756_vm6, %v3680_v39  ;;  %v8789_v39 = vld [vmem:[#allocation16 + $0x500] ss:$40 sps:$4 sm:$0xff]  }
 0x4b3   :  { %6369 = vmatpush1.bf16.msra.mxu1 %v8696_v45 }
 0x4b4   :  { %6370 = vmatprep.subr.bf16.mxu1 %v8704_v24 }
 0x4b7   :  { %6371 = vmatpush1.bf16.msra.mxu1 %v8702_v46  ;;  %v8795_v46 = vld [vmem:[#allocation16 + $0x550] ss:$40 sps:$4 sm:$0xff]  }
 0x4b8   :  { %6372 = vmatprep.subr.bf16.mxu1 %v8710_v47  ;;  %v8798_v47 = vld [vmem:[#allocation16 + $0x558] ss:$40 sps:$4 sm:$0xff]  }
 0x4bb   :  { %6373 = vmatpush1.bf16.msra.mxu1 %v8708_v49 }
 0x4bc   :  { %6374 = vmatprep.subr.bf16.mxu1 %v8716_v50  ;;  %v8803_v50 = vld [vmem:[#allocation16 + $0x5a4] ss:$40 sps:$4 sm:$0xff]  }
 0x4bf   :  { %6375 = vmatpush1.bf16.msra.mxu1 %v8714_v51  ;;  %v8806_v51 = vld [vmem:[#allocation16 + $0x5ac] ss:$40 sps:$4 sm:$0xff]  }
 0x4c0   :  { %6376 = vmatprep.subr.bf16.mxu1 %v8722_v42 }
 0x4c3   :  { %6377 = vmatpush1.bf16.msra.mxu1 %v8720_v53 }
 0x4c4   :  { %6378 = vmatprep.subr.bf16.mxu1 %v8728_v54  ;;  %v8801_v54 = vld [vmem:[#allocation16 + $0x5a0] ss:$40 sps:$4 sm:$0xff]  }
 0x4c7   :  { %6379 = vmatpush1.bf16.msra.mxu1 %v8726_v55  ;;  %v8804_v55 = vld [vmem:[#allocation16 + $0x5a8] ss:$40 sps:$4 sm:$0xff]  }
 0x4c8   :  { %6380 = vmatprep.subr.bf16.mxu1 %v8734_v57  ;;  %v8809_v57 = vld [vmem:[#allocation16 + $0x5f4] ss:$40 sps:$4 sm:$0xff]  }
 0x4cb   :  { %6381 = vmatpush1.bf16.msra.mxu1 %v8732_v59  ;;  %v8812_v59 = vld [vmem:[#allocation16 + $0x5fc] ss:$40 sps:$4 sm:$0xff]  }
 0x4cc   :  { %6382 = vmatprep.subr.bf16.mxu1 %v8740_v62 }
 0x4cf   :  { %6383 = vmatpush1.bf16.msra.mxu1 %v8738_v63 }
 0x4d0   :  { %6384 = vmatprep.subr.bf16.mxu1 %v8746_v0 }
 0x4d3   :  { %6385 = vmatpush1.bf16.msra.mxu1 %v8744_v1  ;;  %v8807_v1 = vld [vmem:[#allocation16 + $0x5f0] ss:$40 sps:$4 sm:$0xff]  }
 0x4d4   :  { %6386 = vmatprep.subr.bf16.mxu1 %v8752_v2  ;;  %v8810_v2 = vld [vmem:[#allocation16 + $0x5f8] ss:$40 sps:$4 sm:$0xff]  }
 0x4d7   :  { %6387 = vmatpush1.bf16.msra.mxu1 %v8750_v3 }
 0x4d8   :  { %6388 = vmatprep.subr.bf16.mxu1 %v8758_v5  ;;  %v8815_v5 = vld [vmem:[#allocation16 + $0x644] ss:$40 sps:$4 sm:$0xff]  }
 0x4db   :  { %6389 = vmatpush1.bf16.msra.mxu1 %v8756_v8  ;;  %v8818_v8 = vld [vmem:[#allocation16 + $0x64c] ss:$40 sps:$4 sm:$0xff]  }
 0x4dc   :  { %6390 = vmatprep.subr.bf16.mxu1 %v8764_v7  ;;  %v8813_v7 = vld [vmem:[#allocation16 + $0x640] ss:$40 sps:$4 sm:$0xff]  }
 0x4df   :  { %6391 = vmatpush1.bf16.msra.mxu1 %v8762_v9  ;;  %v8816_v9 = vld [vmem:[#allocation16 + $0x648] ss:$40 sps:$4 sm:$0xff]  }
 0x4e0   :  { %6392 = vmatprep.subr.bf16.mxu1 %v8770_v10  ;;  %v8821_v10 = vld [vmem:[#allocation16 + $0x694] ss:$40 sps:$4 sm:$0xff]  }
 0x4e3   :  { %6393 = vmatpush1.bf16.msra.mxu1 %v8768_v36  ;;  %v8824_v36 = vld [vmem:[#allocation16 + $0x69c] ss:$40 sps:$4 sm:$0xff]  }
 0x4e4   :  { %6394 = vmatprep.subr.bf16.mxu1 %v8776_v13  ;;  %v8819_v13 = vld [vmem:[#allocation16 + $0x690] ss:$40 sps:$4 sm:$0xff]  }
 0x4e7   :  { %6395 = vmatpush1.bf16.msra.mxu1 %v8774_v14  ;;  %v8822_v14 = vld [vmem:[#allocation16 + $0x698] ss:$40 sps:$4 sm:$0xff]  }
 0x4e8   :  { %6396 = vmatprep.subr.bf16.mxu1 %v8782_v16  ;;  %v8830_v16 = vld [vmem:[#allocation16 + $0x6ec] ss:$40 sps:$4 sm:$0xff]  }
 0x4eb   :  { %6397 = vmatpush1.bf16.msra.mxu1 %v8780_v4  ;;  %v8828_v4 = vld [vmem:[#allocation16 + $0x6e8] ss:$40 sps:$4 sm:$0xff]  }
 0x4ec   :  { %6398 = vmatprep.subr.bf16.mxu1 %v8788_v20  ;;  %v8836_v20 = vld [vmem:[#allocation16 + $0x73c] ss:$40 sps:$4 sm:$0xff]  }
 0x4ef   :  { %6399 = vmatpush1.bf16.msra.mxu1 %v8786_v22  ;;  %v8834_v22 = vld [vmem:[#allocation16 + $0x738] ss:$40 sps:$4 sm:$0xff]  }
 0x4f0   :  { %6409 = vmatprep.subr.bf16.mxu1 %v8794_v25  ;;  %v8842_v25 = vld [vmem:[#allocation16 + $0x78c] ss:$40 sps:$4 sm:$0xff]  }
 0x575   :  { %v3810_v19 = vpop.f32.mrb[24].mxu1 }
 0x576   :  { %v3811_v29 = vadd.f32 %v3810_v19, %v3695_v27  ;;  %v3812_v52 = vpop.f32.mrb[25].mxu1  ;;  %v8837_v27 = vld [vmem:[#allocation16 + $0x780] ss:$40 sps:$4 sm:$0xff]   ;;  %v8845_v19 = vld [vmem:[#allocation16 + $0x7d4] ss:$40 sps:$4 sm:$0xff]  }
 0x577   :  { %v3813_v60 = vadd.f32 %v3812_v52, %v3699_v28  ;;  %v3814_v30 = vpop.f32.mrb[26].mxu1  ;;  %v8840_v28 = vld [vmem:[#allocation16 + $0x788] ss:$40 sps:$4 sm:$0xff]  }
 0x578   :  { %v3898_v32 = vmax.f32 %v3811_v29, 0.0  ;;  %v3815_v33 = vpop.f32.mrb[27].mxu1  ;;  %v8848_v29 = vld [vmem:[#allocation16 + $0x7dc] ss:$40 sps:$4 sm:$0xff]   ;;  %v8843_v52 = vld [vmem:[#allocation16 + $0x7d0] ss:$40 sps:$4 sm:$0xff]  }
 0x579   :  { %v3899_v35 = vmax.f32 %v3813_v60, 0.0  ;;  %v8846_v60 = vld [vmem:[#allocation16 + $0x7d8] ss:$40 sps:$4 sm:$0xff]   ;;  %v8851_v30 = vld [vmem:[#allocation16 + $0x824] ss:$40 sps:$4 sm:$0xff]  }
 0x57a   :  { %v9933_v41 = vpack.c.bf16 %v3898_v32, %v3898_v32  ;;  %v8854_v32 = vld [vmem:[#allocation16 + $0x82c] ss:$40 sps:$4 sm:$0xff]   ;;  %v8849_v33 = vld [vmem:[#allocation16 + $0x820] ss:$40 sps:$4 sm:$0xff]  }
 0x57b   :  { %v9929_v38 = vpack.c.bf16 %v3899_v35, %v3899_v35  ;;  %v8852_v35 = vld [vmem:[#allocation16 + $0x828] ss:$40 sps:$4 sm:$0xff]  }
 0x57d   :  { %v9935_v44 = vpop.f32.mrb[28].mxu1  ;;  %6277 = vmatprep.mubr.bf16.mxu0 %v9929_v38  ;;  %6400 = vmatprep.mubr.bf16.mxu1 %v9929_v38 }
 0x57e   :  { %v3853_v11 = vpop.f32.mrb[29].mxu1  ;;  %6278 = vmatmul.mubr.bf16.vlgmr.msra.gmra.mrb[20].mxu0 %v9933_v41  ;;  %6401 = vmatmul.mubr.bf16.vlgmr.msra.gmra.mrb[36].mxu1 %v9933_v41 }
 0x57f   :  { %v3854_v45 = vadd.f32 %v3853_v11, %v3707_v48  ;;  %6287 = vmatpush1.bf16.msra.mxu0 %v8789_v39  ;;  %6410 = vmatpush1.bf16.msra.mxu1 %v8792_v40  ;;  %v3855_v24 = vpop.f32.mrb[30].mxu1  ;;  %v8857_v39 = vld [vmem:[#allocation16 + $0x874] ss:$40 sps:$4 sm:$0xff]   ;;  %v8855_v48 = vld [vmem:[#allocation16 + $0x870] ss:$40 sps:$4 sm:$0xff]  }
 0x580   :  { %v3856_v49 = vpop.f32.mrb[31].mxu1  ;;  %6288 = vmatprep.subr.bf16.mxu0 %v8797_v43  ;;  %6411 = vmatprep.subr.bf16.mxu1 %v8800_v17  ;;  %v8860_v40 = vld [vmem:[#allocation16 + $0x87c] ss:$40 sps:$4 sm:$0xff]   ;;  %v8858_v43 = vld [vmem:[#allocation16 + $0x878] ss:$40 sps:$4 sm:$0xff]  }
 0x581   :  { %v3901_v42 = vmax.f32 %v3854_v45, 0.0  ;;  %v8863_v17 = vld [vmem:[#allocation16 + $0x8c4] ss:$40 sps:$4 sm:$0xff]   ;;  %v8861_v45 = vld [vmem:[#allocation16 + $0x8c0] ss:$40 sps:$4 sm:$0xff]  }
 0x582   :  { %v8866_v11 = vld [vmem:[#allocation16 + $0x8cc] ss:$40 sps:$4 sm:$0xff]   ;;  %v8864_v24 = vld [vmem:[#allocation16 + $0x8c8] ss:$40 sps:$4 sm:$0xff]  }
 0x583   :  { %v9941_v53 = vpack.c.bf16 %v3901_v42, %v3901_v42  ;;  %6289 = vmatpush1.bf16.msra.mxu0 %v8795_v46  ;;  %6412 = vmatpush1.bf16.msra.mxu1 %v8798_v47  ;;  %v8869_v46 = vld [vmem:[#allocation16 + $0x914] ss:$40 sps:$4 sm:$0xff]   ;;  %v8867_v49 = vld [vmem:[#allocation16 + $0x910] ss:$40 sps:$4 sm:$0xff]   ;;  %v8875_v42 = vld [vmem:[#allocation16 + $0x964] ss:$40 sps:$4 sm:$0xff]  }
 0x584   :  { %6290 = vmatprep.subr.bf16.mxu0 %v8803_v50  ;;  %6413 = vmatprep.subr.bf16.mxu1 %v8806_v51  ;;  %v8872_v47 = vld [vmem:[#allocation16 + $0x91c] ss:$40 sps:$4 sm:$0xff]   ;;  %v8870_v50 = vld [vmem:[#allocation16 + $0x918] ss:$40 sps:$4 sm:$0xff]   ;;  %v3703_v51 = vrot.slane %v9923_v26, %v9889_v34 }
 0x585   :  { %v9943_v62 = vpop.f32.mrb[32].mxu1  ;;  %6318 = vmatprep.mubr.bf16.mxu0 %v9941_v53  ;;  %6441 = vmatprep.mubr.bf16.mxu1 %v9941_v53 }
 0x586   :  { %v8010_v63 = vpop.f32.mrb[33].mxu1 }
 0x587   :  { %6291 = vmatpush1.bf16.msra.mxu0 %v8801_v54  ;;  %6414 = vmatpush1.bf16.msra.mxu1 %v8804_v55  ;;  %v3895_v0 = vpop.f32.mrb[34].mxu1  ;;  %v8878_v54 = vld [vmem:[#allocation16 + $0x96c] ss:$40 sps:$4 sm:$0xff]   ;;  %v8873_v55 = vld [vmem:[#allocation16 + $0x960] ss:$40 sps:$4 sm:$0xff]  }
 0x588   :  { %v8011_v3 = vpop.f32.mrb[35].mxu1  ;;  %6292 = vmatprep.subr.bf16.mxu0 %v8809_v57  ;;  %6415 = vmatprep.subr.bf16.mxu1 %v8812_v59  ;;  %v8876_v57 = vld [vmem:[#allocation16 + $0x968] ss:$40 sps:$4 sm:$0xff]   ;;  %v3852_v59 = vadd.f32 %v9935_v44, %v3703_v51  ;;  %v8881_v63 = vld [vmem:[#allocation16 + $0x9b4] ss:$40 sps:$4 sm:$0xff]  }
 0x589   :  { %v8884_v0 = vld [vmem:[#allocation16 + $0x9bc] ss:$40 sps:$4 sm:$0xff]   ;;  %v8931_v51 = vld [vmem:[#allocation16 + $0xb0] ss:$40 sps:$4 sm:$0xff]  }
 0x58a   :  { %v3900_v3 = vmax.f32 %v3852_v59, 0.0  ;;  %v8893_v44 = vld [vmem:[#allocation16 + $0xa54] ss:$40 sps:$4 sm:$0xff]   ;;  %v8940_v59 = vld [vmem:[#allocation16 + $0x108] ss:$40 sps:$4 sm:$0xff]  }
 0x58b   :  { %6293 = vmatpush1.bf16.msra.mxu0 %v8807_v1  ;;  %6416 = vmatpush1.bf16.msra.mxu1 %v8810_v2  ;;  %v8879_v1 = vld [vmem:[#allocation16 + $0x9b0] ss:$40 sps:$4 sm:$0xff]  }
 0x58c   :  { %6294 = vmatprep.subr.bf16.mxu0 %v8815_v5  ;;  %6417 = vmatprep.subr.bf16.mxu1 %v8818_v8  ;;  %v8882_v2 = vld [vmem:[#allocation16 + $0x9b8] ss:$40 sps:$4 sm:$0xff]   ;;  %v8887_v5 = vld [vmem:[#allocation16 + $0xa04] ss:$40 sps:$4 sm:$0xff]  }
 0x58d   :  { %v8890_v8 = vld [vmem:[#allocation16 + $0xa0c] ss:$40 sps:$4 sm:$0xff]  }
 0x58f   :  { %6295 = vmatpush1.bf16.msra.mxu0 %v8813_v7  ;;  %6418 = vmatpush1.bf16.msra.mxu1 %v8816_v9  ;;  %v8885_v7 = vld [vmem:[#allocation16 + $0xa00] ss:$40 sps:$4 sm:$0xff]  }
 0x590   :  { %6296 = vmatprep.subr.bf16.mxu0 %v8821_v10  ;;  %6419 = vmatprep.subr.bf16.mxu1 %v8824_v36  ;;  %v8888_v9 = vld [vmem:[#allocation16 + $0xa08] ss:$40 sps:$4 sm:$0xff]   ;;  %v9950_v10 = vpack.c.bf16 %v3900_v3, %v3900_v3  ;;  %v8896_v36 = vld [vmem:[#allocation16 + $0xa5c] ss:$40 sps:$4 sm:$0xff]  }
 0x591   :  { %v8951_v3 = vld [vmem:[#allocation16 + $0x1a4] ss:$40 sps:$4 sm:$0xff]  }
 0x593   :  { %6297 = vmatpush1.bf16.msra.mxu0 %v8819_v13  ;;  %6420 = vmatpush1.bf16.msra.mxu1 %v8822_v14  ;;  %v8891_v13 = vld [vmem:[#allocation16 + $0xa50] ss:$40 sps:$4 sm:$0xff]  }
 0x594   :  { %6298 = vmatprep.subr.bf16.mxu0 %v8827_v15  ;;  %6421 = vmatprep.subr.bf16.mxu1 %v8830_v16  ;;  %v8894_v14 = vld [vmem:[#allocation16 + $0xa58] ss:$40 sps:$4 sm:$0xff]   ;;  %v8899_v15 = vld [vmem:[#allocation16 + $0xaa4] ss:$40 sps:$4 sm:$0xff]  }
 0x595   :  { %v8902_v16 = vld [vmem:[#allocation16 + $0xaac] ss:$40 sps:$4 sm:$0xff]  }
 0x597   :  { %6299 = vmatpush1.bf16.msra.mxu0 %v8825_v18  ;;  %6422 = vmatpush1.bf16.msra.mxu1 %v8828_v4  ;;  %v8897_v18 = vld [vmem:[#allocation16 + $0xaa0] ss:$40 sps:$4 sm:$0xff]  }
 0x598   :  { %6300 = vmatprep.subr.bf16.mxu0 %v8833_v6  ;;  %6423 = vmatprep.subr.bf16.mxu1 %v8836_v20  ;;  %v8900_v4 = vld [vmem:[#allocation16 + $0xaa8] ss:$40 sps:$4 sm:$0xff]   ;;  %v8905_v6 = vld [vmem:[#allocation16 + $0xaf4] ss:$40 sps:$4 sm:$0xff]  }
 0x599   :  { %v8908_v20 = vld [vmem:[#allocation16 + $0xafc] ss:$40 sps:$4 sm:$0xff]  }
 0x59b   :  { %6301 = vmatpush1.bf16.msra.mxu0 %v8831_v21  ;;  %6424 = vmatpush1.bf16.msra.mxu1 %v8834_v22  ;;  %v8903_v21 = vld [vmem:[#allocation16 + $0xaf0] ss:$40 sps:$4 sm:$0xff]  }
 0x59c   :  { %6302 = vmatprep.subr.bf16.mxu0 %v8839_v23  ;;  %6425 = vmatprep.subr.bf16.mxu1 %v8842_v25  ;;  %v8906_v22 = vld [vmem:[#allocation16 + $0xaf8] ss:$40 sps:$4 sm:$0xff]   ;;  %v3711_v23 = vrot.slane %v9923_v26, %v9900_v12  ;;  %v8911_v25 = vld [vmem:[#allocation16 + $0xb44] ss:$40 sps:$4 sm:$0xff]  }
 0x59f   :  { %6303 = vmatpush1.bf16.msra.mxu0 %v8837_v27  ;;  %6426 = vmatpush1.bf16.msra.mxu1 %v8840_v28  ;;  %v8914_v27 = vld [vmem:[#allocation16 + $0xb4c] ss:$40 sps:$4 sm:$0xff]  }
 0x5a0   :  { %6304 = vmatprep.subr.bf16.mxu0 %v8845_v19  ;;  %6427 = vmatprep.subr.bf16.mxu1 %v8848_v29  ;;  %v4278_v28 = vld [vmem:[#allocation16 + $0xb90] sm:$0xff]  ;;  %v4279_v19 = vld [vmem:[#allocation16 + $0xb98] sm:$0xff]  ;;  %v8909_v29 = vld [vmem:[#allocation16 + $0xb40] ss:$40 sps:$4 sm:$0xff]  }
 0x5a3   :  { %6305 = vmatpush1.bf16.msra.mxu0 %v8843_v52  ;;  %6428 = vmatpush1.bf16.msra.mxu1 %v8846_v60  ;;  %v8912_v52 = vld [vmem:[#allocation16 + $0xb48] ss:$40 sps:$4 sm:$0xff]   ;;  %v7807_v60 = vcombine.high %v4278_v28, %v4278_v28 }
 0x5a4   :  { %6306 = vmatprep.subr.bf16.mxu0 %v8851_v30  ;;  %6429 = vmatprep.subr.bf16.mxu1 %v8854_v32  ;;  %v7806_v30 = vcombine.low %v4278_v28, %v4278_v28  ;;  %v3893_v32 = vadd.f32 %v9943_v62, %v3711_v23  ;;  %v8919_v62 = vld [vmem:[#allocation16 + $0x10] ss:$40 sps:$4 sm:$0xff]   ;;  %v8978_v23 = vld [vmem:[#allocation16 + $0x2ec] ss:$40 sps:$4 sm:$0xff]  }
 0x5a5   :  { %v8981_v28 = vld [vmem:[#allocation16 + $0x334] ss:$40 sps:$4 sm:$0xff]  }
 0x5a6   :  { %v6216_v26 = vsel %vm3546_vm1, %v7806_v30, 0  ;;  %v8990_v30 = vld [vmem:[#allocation16 + $0x38c] ss:$40 sps:$4 sm:$0xff]  }
 0x5a7   :  { %6307 = vmatpush1.bf16.msra.mxu0 %v8849_v33  ;;  %6430 = vmatpush1.bf16.msra.mxu1 %v8852_v35  ;;  %v7809_v33 = vcombine.high %v4279_v19, %v4279_v19  ;;  %v7808_v35 = vcombine.low %v4279_v19, %v4279_v19  ;;  %v8984_v19 = vld [vmem:[#allocation16 + $0x33c] ss:$40 sps:$4 sm:$0xff]  }
 0x5a8   :  { %6308 = vmatprep.subr.bf16.mxu0 %v8857_v39  ;;  %6431 = vmatprep.subr.bf16.mxu1 %v8860_v40  ;;  %v3902_v39 = vmax.f32 %v3893_v32, 0.0  ;;  %v8985_v32 = vld [vmem:[#allocation16 + $0x380] ss:$40 sps:$4 sm:$0xff]  }
 0x5a9   :  { %v6222_v40 = vsel %vm3546_vm1, %v7808_v35, 0  ;;  %v8993_v35 = vld [vmem:[#allocation16 + $0x3d4] ss:$40 sps:$4 sm:$0xff]  }
 0x5ab   :  { %6309 = vmatpush1.bf16.msra.mxu0 %v8855_v48  ;;  %6432 = vmatpush1.bf16.msra.mxu1 %v8858_v43  ;;  %v8921_v48 = vld [vmem:[#allocation16 + $0x14] ss:$40 sps:$4 sm:$0xff]  }
 0x5ac   :  { %6310 = vmatprep.subr.bf16.mxu0 %v8863_v17  ;;  %6433 = vmatprep.subr.bf16.mxu1 %v8866_v11  ;;  %v8924_v43 = vld [vmem:[#allocation16 + $0x1c] ss:$40 sps:$4 sm:$0xff]   ;;  %v9963_v17 = vpack.c.bf16 %v3902_v39, %v3902_v39  ;;  %v8922_v11 = vld [vmem:[#allocation16 + $0x18] ss:$40 sps:$4 sm:$0xff]  }
 0x5ad   :  { %v8991_v39 = vld [vmem:[#allocation16 + $0x3d0] ss:$40 sps:$4 sm:$0xff]  }
 0x5af   :  { %6311 = vmatpush1.bf16.msra.mxu0 %v8861_v45  ;;  %6434 = vmatpush1.bf16.msra.mxu1 %v8864_v24  ;;  %v8927_v45 = vld [vmem:[#allocation16 + $0x64] ss:$40 sps:$4 sm:$0xff]  }
 0x5b0   :  { %6312 = vmatprep.subr.bf16.mxu0 %v8869_v46  ;;  %6435 = vmatprep.subr.bf16.mxu1 %v8872_v47  ;;  %v8930_v24 = vld [vmem:[#allocation16 + $0x6c] ss:$40 sps:$4 sm:$0xff]   ;;  %v8925_v46 = vld [vmem:[#allocation16 + $0x60] ss:$40 sps:$4 sm:$0xff]  }
 0x5b1   :  { %v8928_v47 = vld [vmem:[#allocation16 + $0x68] ss:$40 sps:$4 sm:$0xff]  }
 0x5b3   :  { %6313 = vmatpush1.bf16.msra.mxu0 %v8867_v49  ;;  %6436 = vmatpush1.bf16.msra.mxu1 %v8870_v50  ;;  %v8933_v49 = vld [vmem:[#allocation16 + $0xb4] ss:$40 sps:$4 sm:$0xff]  }
 0x5b4   :  { %6314 = vmatprep.subr.bf16.mxu0 %v8875_v42  ;;  %6437 = vmatprep.subr.bf16.mxu1 %v8878_v54  ;;  %v8936_v50 = vld [vmem:[#allocation16 + $0xbc] ss:$40 sps:$4 sm:$0xff]   ;;  %v8934_v42 = vld [vmem:[#allocation16 + $0xb8] ss:$40 sps:$4 sm:$0xff]  }
 0x5b5   :  { %v8939_v54 = vld [vmem:[#allocation16 + $0x104] ss:$40 sps:$4 sm:$0xff]  }
 0x5b7   :  { %6315 = vmatpush1.bf16.msra.mxu0 %v8873_v55  ;;  %6438 = vmatpush1.bf16.msra.mxu1 %v8876_v57  ;;  %v8942_v55 = vld [vmem:[#allocation16 + $0x10c] ss:$40 sps:$4 sm:$0xff]   ;;  %v8937_v57 = vld [vmem:[#allocation16 + $0x100] ss:$40 sps:$4 sm:$0xff]  }
 0x5b8   :  { %6316 = vmatprep.subr.bf16.mxu0 %v8881_v63  ;;  %6439 = vmatprep.subr.bf16.mxu1 %v8884_v0  ;;  %v8945_v63 = vld [vmem:[#allocation16 + $0x154] ss:$40 sps:$4 sm:$0xff]  }
 0x5b9   :  { %v8948_v0 = vld [vmem:[#allocation16 + $0x15c] ss:$40 sps:$4 sm:$0xff]  }
 0x5bb   :  { %6317 = vmatpush1.bf16.msra.mxu0 %v8879_v1  ;;  %6440 = vmatpush1.bf16.msra.mxu1 %v8882_v2  ;;  %v8943_v1 = vld [vmem:[#allocation16 + $0x150] ss:$40 sps:$4 sm:$0xff]  }
 0x5bc   :  { %6327 = vmatprep.subr.bf16.mxu0 %v8887_v5  ;;  %6450 = vmatprep.subr.bf16.mxu1 %v8890_v8  ;;  %v8946_v2 = vld [vmem:[#allocation16 + $0x158] ss:$40 sps:$4 sm:$0xff]   ;;  %v8954_v5 = vld [vmem:[#allocation16 + $0x1ac] ss:$40 sps:$4 sm:$0xff]  }
 0x5bd   :  { %v8949_v8 = vld [vmem:[#allocation16 + $0x1a0] ss:$40 sps:$4 sm:$0xff]  }
 0x5be   :  { %6319 = vmatmul.mubr.bf16.vlgmr.msra.gmra.mrb[20].mxu0 %v9950_v10  ;;  %6442 = vmatmul.mubr.bf16.vlgmr.msra.gmra.mrb[36].mxu1 %v9950_v10 }
 0x5bf   :  { %6328 = vmatpush1.bf16.msra.mxu0 %v8885_v7  ;;  %6451 = vmatpush1.bf16.msra.mxu1 %v8888_v9  ;;  %v8952_v7 = vld [vmem:[#allocation16 + $0x1a8] ss:$40 sps:$4 sm:$0xff]   ;;  %v8957_v9 = vld [vmem:[#allocation16 + $0x1f4] ss:$40 sps:$4 sm:$0xff]  }
 0x5c0   :  { %6329 = vmatprep.subr.bf16.mxu0 %v8893_v44  ;;  %6452 = vmatprep.subr.bf16.mxu1 %v8896_v36  ;;  %v8960_v44 = vld [vmem:[#allocation16 + $0x1fc] ss:$40 sps:$4 sm:$0xff]   ;;  %v8955_v36 = vld [vmem:[#allocation16 + $0x1f0] ss:$40 sps:$4 sm:$0xff]  }
 0x5c1   :  { %6359 = vmatprep.mubr.bf16.mxu0 %v9596_v37  ;;  %6482 = vmatprep.mubr.bf16.mxu1 %v9596_v37 }
 0x5c3   :  { %6330 = vmatpush1.bf16.msra.mxu0 %v8891_v13  ;;  %6453 = vmatpush1.bf16.msra.mxu1 %v8894_v14  ;;  %v8958_v13 = vld [vmem:[#allocation16 + $0x1f8] ss:$40 sps:$4 sm:$0xff]   ;;  %v8963_v14 = vld [vmem:[#allocation16 + $0x244] ss:$40 sps:$4 sm:$0xff]  }
 0x5c4   :  { %6331 = vmatprep.subr.bf16.mxu0 %v8899_v15  ;;  %6454 = vmatprep.subr.bf16.mxu1 %v8902_v16  ;;  %v8966_v15 = vld [vmem:[#allocation16 + $0x24c] ss:$40 sps:$4 sm:$0xff]   ;;  %v8961_v16 = vld [vmem:[#allocation16 + $0x240] ss:$40 sps:$4 sm:$0xff]  }
 0x5c7   :  { %6332 = vmatpush1.bf16.msra.mxu0 %v8897_v18  ;;  %6455 = vmatpush1.bf16.msra.mxu1 %v8900_v4  ;;  %v8964_v18 = vld [vmem:[#allocation16 + $0x248] ss:$40 sps:$4 sm:$0xff]   ;;  %v8969_v4 = vld [vmem:[#allocation16 + $0x294] ss:$40 sps:$4 sm:$0xff]  }
 0x5c8   :  { %6333 = vmatprep.subr.bf16.mxu0 %v8905_v6  ;;  %6456 = vmatprep.subr.bf16.mxu1 %v8908_v20  ;;  %v8972_v6 = vld [vmem:[#allocation16 + $0x29c] ss:$40 sps:$4 sm:$0xff]   ;;  %v8967_v20 = vld [vmem:[#allocation16 + $0x290] ss:$40 sps:$4 sm:$0xff]  }
 0x5cb   :  { %6334 = vmatpush1.bf16.msra.mxu0 %v8903_v21  ;;  %6457 = vmatpush1.bf16.msra.mxu1 %v8906_v22  ;;  %v8970_v21 = vld [vmem:[#allocation16 + $0x298] ss:$40 sps:$4 sm:$0xff]   ;;  %v8975_v22 = vld [vmem:[#allocation16 + $0x2e4] ss:$40 sps:$4 sm:$0xff]  }
 0x5cc   :  { %6335 = vmatprep.subr.bf16.mxu0 %v8911_v25  ;;  %6458 = vmatprep.subr.bf16.mxu1 %v8914_v27  ;;  %v8973_v25 = vld [vmem:[#allocation16 + $0x2e0] ss:$40 sps:$4 sm:$0xff]  }
 0x5cd   :  { %v8976_v27 = vld [vmem:[#allocation16 + $0x2e8] ss:$40 sps:$4 sm:$0xff]  }
 0x5cf   :  { %6336 = vmatpush1.bf16.msra.mxu0 %v8909_v29  ;;  %6459 = vmatpush1.bf16.msra.mxu1 %v8912_v52  ;;  %v8979_v29 = vld [vmem:[#allocation16 + $0x330] ss:$40 sps:$4 sm:$0xff]  }
 0x5d0   :  { %7816 = vmatprep.subr.msk.bf16.mxu0 %vm3546_vm1, %v7807_v60  ;;  %7818 = vmatprep.subr.msk.bf16.mxu1 %vm3546_vm1, %v7809_v33  ;;  %v8982_v52 = vld [vmem:[#allocation16 + $0x338] ss:$40 sps:$4 sm:$0xff]   ;;  %v8987_v60 = vld [vmem:[#allocation16 + $0x384] ss:$40 sps:$4 sm:$0xff]   ;;  %v8988_v33 = vld [vmem:[#allocation16 + $0x388] ss:$40 sps:$4 sm:$0xff]  }
 0x5d3   :  { %6338 = vmatpush1.bf16.msra.mxu0 %v6216_v26  ;;  %6461 = vmatpush1.bf16.msra.mxu1 %v6222_v40  ;;  %v8996_v26 = vld [vmem:[#allocation16 + $0x3dc] ss:$40 sps:$4 sm:$0xff]   ;;  %v8994_v40 = vld [vmem:[#allocation16 + $0x3d8] ss:$40 sps:$4 sm:$0xff]  }
 0x5d4   :  { %6491 = vmatprep.subr.bf16.mxu0 %v8921_v48  ;;  %6614 = vmatprep.subr.bf16.mxu1 %v8924_v43  ;;  %v8999_v48 = vld [vmem:[#allocation16 + $0x424] ss:$40 sps:$4 sm:$0xff]  }
 0x5d5   :  { %v9002_v43 = vld [vmem:[#allocation16 + $0x42c] ss:$40 sps:$4 sm:$0xff]  }
 0x5d6   :  { %7817 = vmatmul.mubr.msk.bf16.vlgmr.msra.gmra.mrb[20].mxu0 %vm3542_vm3, %v9963_v17  ;;  %7819 = vmatmul.mubr.msk.bf16.vlgmr.msra.gmra.mrb[36].mxu1 %vm3542_vm3, %v9963_v17 }
 0x5d7   :  { %6492 = vmatpush1.bf16.msra.mxu0 %v8919_v62  ;;  %6523 = vmatprep.mubr.bf16.mxu0 %v9929_v38  ;;  %v8997_v62 = vld [vmem:[#allocation16 + $0x420] ss:$40 sps:$4 sm:$0xff]  }
 0x5d8   :  { %6615 = vmatpush1.bf16.msra.mxu1 %v8922_v11  ;;  %6646 = vmatprep.mubr.bf16.mxu1 %v9929_v38  ;;  %v9000_v11 = vld [vmem:[#allocation16 + $0x428] ss:$40 sps:$4 sm:$0xff]  }
 0x5d9   :  { %6493 = vmatprep.subr.bf16.mxu0 %v8927_v45  ;;  %6616 = vmatprep.subr.bf16.mxu1 %v8930_v24  ;;  %v9005_v45 = vld [vmem:[#allocation16 + $0x474] ss:$40 sps:$4 sm:$0xff]  }
 0x5da   :  { %v9008_v24 = vld [vmem:[#allocation16 + $0x47c] ss:$40 sps:$4 sm:$0xff]  }
 0x5db   :  { %6494 = vmatpush1.bf16.msra.mxu0 %v8925_v46  ;;  %v9003_v46 = vld [vmem:[#allocation16 + $0x470] ss:$40 sps:$4 sm:$0xff]  }
 0x5dc   :  { %6617 = vmatpush1.bf16.msra.mxu1 %v8928_v47  ;;  %6495 = vmatprep.subr.bf16.mxu0 %v8933_v49  ;;  %v9006_v47 = vld [vmem:[#allocation16 + $0x478] ss:$40 sps:$4 sm:$0xff]   ;;  %v9011_v49 = vld [vmem:[#allocation16 + $0x4c4] ss:$40 sps:$4 sm:$0xff]  }
 0x5dd   :  { %6618 = vmatprep.subr.bf16.mxu1 %v8936_v50  ;;  %v9014_v50 = vld [vmem:[#allocation16 + $0x4cc] ss:$40 sps:$4 sm:$0xff]  }
 0x5df   :  { %6496 = vmatpush1.bf16.msra.mxu0 %v8931_v51  ;;  %v9009_v51 = vld [vmem:[#allocation16 + $0x4c0] ss:$40 sps:$4 sm:$0xff]  }
 0x5e0   :  { %6619 = vmatpush1.bf16.msra.mxu1 %v8934_v42  ;;  %6497 = vmatprep.subr.bf16.mxu0 %v8939_v54  ;;  %v9012_v42 = vld [vmem:[#allocation16 + $0x4c8] ss:$40 sps:$4 sm:$0xff]   ;;  %v9017_v54 = vld [vmem:[#allocation16 + $0x514] ss:$40 sps:$4 sm:$0xff]  }
 0x5e1   :  { %6620 = vmatprep.subr.bf16.mxu1 %v8942_v55  ;;  %v9020_v55 = vld [vmem:[#allocation16 + $0x51c] ss:$40 sps:$4 sm:$0xff]  }
 0x5e3   :  { %6498 = vmatpush1.bf16.msra.mxu0 %v8937_v57  ;;  %v9015_v57 = vld [vmem:[#allocation16 + $0x510] ss:$40 sps:$4 sm:$0xff]  }
 0x5e4   :  { %6621 = vmatpush1.bf16.msra.mxu1 %v8940_v59  ;;  %6499 = vmatprep.subr.bf16.mxu0 %v8945_v63  ;;  %v9018_v59 = vld [vmem:[#allocation16 + $0x518] ss:$40 sps:$4 sm:$0xff]   ;;  %v9023_v63 = vld [vmem:[#allocation16 + $0x564] ss:$40 sps:$4 sm:$0xff]  }
 0x5e5   :  { %6622 = vmatprep.subr.bf16.mxu1 %v8948_v0  ;;  %v9026_v0 = vld [vmem:[#allocation16 + $0x56c] ss:$40 sps:$4 sm:$0xff]  }
 0x5e7   :  { %6500 = vmatpush1.bf16.msra.mxu0 %v8943_v1  ;;  %v9021_v1 = vld [vmem:[#allocation16 + $0x560] ss:$40 sps:$4 sm:$0xff]  }
 0x5e8   :  { %6623 = vmatpush1.bf16.msra.mxu1 %v8946_v2  ;;  %6501 = vmatprep.subr.bf16.mxu0 %v8951_v3  ;;  %v9024_v2 = vld [vmem:[#allocation16 + $0x568] ss:$40 sps:$4 sm:$0xff]   ;;  %v9029_v3 = vld [vmem:[#allocation16 + $0x5b4] ss:$40 sps:$4 sm:$0xff]  }
 0x5e9   :  { %6624 = vmatprep.subr.bf16.mxu1 %v8954_v5  ;;  %v9032_v5 = vld [vmem:[#allocation16 + $0x5bc] ss:$40 sps:$4 sm:$0xff]  }
 0x5eb   :  { %6502 = vmatpush1.bf16.msra.mxu0 %v8949_v8  ;;  %v9027_v8 = vld [vmem:[#allocation16 + $0x5b0] ss:$40 sps:$4 sm:$0xff]  }
 0x5ec   :  { %6625 = vmatpush1.bf16.msra.mxu1 %v8952_v7  ;;  %6503 = vmatprep.subr.bf16.mxu0 %v8957_v9  ;;  %v9030_v7 = vld [vmem:[#allocation16 + $0x5b8] ss:$40 sps:$4 sm:$0xff]   ;;  %v9035_v9 = vld [vmem:[#allocation16 + $0x604] ss:$40 sps:$4 sm:$0xff]  }
 0x5ed   :  { %6626 = vmatprep.subr.bf16.mxu1 %v8960_v44  ;;  %v9038_v44 = vld [vmem:[#allocation16 + $0x60c] ss:$40 sps:$4 sm:$0xff]  }
 0x5ef   :  { %6504 = vmatpush1.bf16.msra.mxu0 %v8955_v36  ;;  %v9033_v36 = vld [vmem:[#allocation16 + $0x600] ss:$40 sps:$4 sm:$0xff]  }
 0x5f0   :  { %6627 = vmatpush1.bf16.msra.mxu1 %v8958_v13  ;;  %6505 = vmatprep.subr.bf16.mxu0 %v8963_v14  ;;  %v9036_v13 = vld [vmem:[#allocation16 + $0x608] ss:$40 sps:$4 sm:$0xff]   ;;  %v9041_v14 = vld [vmem:[#allocation16 + $0x654] ss:$40 sps:$4 sm:$0xff]  }
 0x5f1   :  { %6628 = vmatprep.subr.bf16.mxu1 %v8966_v15  ;;  %v9044_v15 = vld [vmem:[#allocation16 + $0x65c] ss:$40 sps:$4 sm:$0xff]  }
 0x5f3   :  { %6506 = vmatpush1.bf16.msra.mxu0 %v8961_v16  ;;  %v9039_v16 = vld [vmem:[#allocation16 + $0x650] ss:$40 sps:$4 sm:$0xff]  }
 0x5f4   :  { %6629 = vmatpush1.bf16.msra.mxu1 %v8964_v18  ;;  %6507 = vmatprep.subr.bf16.mxu0 %v8969_v4  ;;  %v9042_v18 = vld [vmem:[#allocation16 + $0x658] ss:$40 sps:$4 sm:$0xff]   ;;  %v9047_v4 = vld [vmem:[#allocation16 + $0x6a4] ss:$40 sps:$4 sm:$0xff]  }
 0x5f5   :  { %6630 = vmatprep.subr.bf16.mxu1 %v8972_v6  ;;  %v9050_v6 = vld [vmem:[#allocation16 + $0x6ac] ss:$40 sps:$4 sm:$0xff]  }
 0x5f7   :  { %6508 = vmatpush1.bf16.msra.mxu0 %v8967_v20  ;;  %v9045_v20 = vld [vmem:[#allocation16 + $0x6a0] ss:$40 sps:$4 sm:$0xff]  }
 0x5f8   :  { %6631 = vmatpush1.bf16.msra.mxu1 %v8970_v21  ;;  %6509 = vmatprep.subr.bf16.mxu0 %v8975_v22  ;;  %v9048_v21 = vld [vmem:[#allocation16 + $0x6a8] ss:$40 sps:$4 sm:$0xff]   ;;  %v9053_v22 = vld [vmem:[#allocation16 + $0x6f4] ss:$40 sps:$4 sm:$0xff]  }
 0x5f9   :  { %6632 = vmatprep.subr.bf16.mxu1 %v8978_v23  ;;  %v9056_v23 = vld [vmem:[#allocation16 + $0x6fc] ss:$40 sps:$4 sm:$0xff]  }
 0x5fb   :  { %6510 = vmatpush1.bf16.msra.mxu0 %v8973_v25  ;;  %v9051_v25 = vld [vmem:[#allocation16 + $0x6f0] ss:$40 sps:$4 sm:$0xff]  }
 0x5fc   :  { %6633 = vmatpush1.bf16.msra.mxu1 %v8976_v27  ;;  %6511 = vmatprep.subr.bf16.mxu0 %v8981_v28  ;;  %v9054_v27 = vld [vmem:[#allocation16 + $0x6f8] ss:$40 sps:$4 sm:$0xff]   ;;  %v9059_v28 = vld [vmem:[#allocation16 + $0x744] ss:$40 sps:$4 sm:$0xff]  }
 0x5fd   :  { %6634 = vmatprep.subr.bf16.mxu1 %v8984_v19  ;;  %v9062_v19 = vld [vmem:[#allocation16 + $0x74c] ss:$40 sps:$4 sm:$0xff]  }
 0x5ff   :  { %6512 = vmatpush1.bf16.msra.mxu0 %v8979_v29  ;;  %v9057_v29 = vld [vmem:[#allocation16 + $0x740] ss:$40 sps:$4 sm:$0xff]  }
 0x600   :  { %6635 = vmatpush1.bf16.msra.mxu1 %v8982_v52  ;;  %6513 = vmatprep.subr.bf16.mxu0 %v8987_v60  ;;  %v9060_v52 = vld [vmem:[#allocation16 + $0x748] ss:$40 sps:$4 sm:$0xff]   ;;  %v9065_v60 = vld [vmem:[#allocation16 + $0x794] ss:$40 sps:$4 sm:$0xff]  }
 0x601   :  { %6636 = vmatprep.subr.bf16.mxu1 %v8990_v30  ;;  %v9068_v30 = vld [vmem:[#allocation16 + $0x79c] ss:$40 sps:$4 sm:$0xff]  }
 0x603   :  { %6514 = vmatpush1.bf16.msra.mxu0 %v8985_v32  ;;  %v9063_v32 = vld [vmem:[#allocation16 + $0x790] ss:$40 sps:$4 sm:$0xff]  }
 0x604   :  { %6637 = vmatpush1.bf16.msra.mxu1 %v8988_v33  ;;  %6515 = vmatprep.subr.bf16.mxu0 %v8993_v35  ;;  %v9066_v33 = vld [vmem:[#allocation16 + $0x798] ss:$40 sps:$4 sm:$0xff]   ;;  %v9071_v35 = vld [vmem:[#allocation16 + $0x7e4] ss:$40 sps:$4 sm:$0xff]  }
 0x605   :  { %6638 = vmatprep.subr.bf16.mxu1 %v8996_v26  ;;  %v9074_v26 = vld [vmem:[#allocation16 + $0x7ec] ss:$40 sps:$4 sm:$0xff]  }
 0x607   :  { %6516 = vmatpush1.bf16.msra.mxu0 %v8991_v39  ;;  %v9069_v39 = vld [vmem:[#allocation16 + $0x7e0] ss:$40 sps:$4 sm:$0xff]  }
 0x608   :  { %6639 = vmatpush1.bf16.msra.mxu1 %v8994_v40  ;;  %6517 = vmatprep.subr.bf16.mxu0 %v8999_v48  ;;  %v9072_v40 = vld [vmem:[#allocation16 + $0x7e8] ss:$40 sps:$4 sm:$0xff]   ;;  %v9077_v48 = vld [vmem:[#allocation16 + $0x834] ss:$40 sps:$4 sm:$0xff]  }
 0x609   :  { %6640 = vmatprep.subr.bf16.mxu1 %v9002_v43  ;;  %v9080_v43 = vld [vmem:[#allocation16 + $0x83c] ss:$40 sps:$4 sm:$0xff]  }
 0x60b   :  { %6518 = vmatpush1.bf16.msra.mxu0 %v8997_v62  ;;  %v9075_v62 = vld [vmem:[#allocation16 + $0x830] ss:$40 sps:$4 sm:$0xff]  }
 0x60c   :  { %6641 = vmatpush1.bf16.msra.mxu1 %v9000_v11  ;;  %6519 = vmatprep.subr.bf16.mxu0 %v9005_v45  ;;  %v9078_v11 = vld [vmem:[#allocation16 + $0x838] ss:$40 sps:$4 sm:$0xff]   ;;  %v9083_v45 = vld [vmem:[#allocation16 + $0x884] ss:$40 sps:$4 sm:$0xff]  }
 0x60d   :  { %6642 = vmatprep.subr.bf16.mxu1 %v9008_v24  ;;  %v9086_v24 = vld [vmem:[#allocation16 + $0x88c] ss:$40 sps:$4 sm:$0xff]  }
 0x60f   :  { %6520 = vmatpush1.bf16.msra.mxu0 %v9003_v46  ;;  %v9081_v46 = vld [vmem:[#allocation16 + $0x880] ss:$40 sps:$4 sm:$0xff]  }
 0x610   :  { %6643 = vmatpush1.bf16.msra.mxu1 %v9006_v47  ;;  %6521 = vmatprep.subr.bf16.mxu0 %v9011_v49  ;;  %v9084_v47 = vld [vmem:[#allocation16 + $0x888] ss:$40 sps:$4 sm:$0xff]   ;;  %v9089_v49 = vld [vmem:[#allocation16 + $0x8d4] ss:$40 sps:$4 sm:$0xff]  }
 0x611   :  { %6644 = vmatprep.subr.bf16.mxu1 %v9014_v50  ;;  %v9092_v50 = vld [vmem:[#allocation16 + $0x8dc] ss:$40 sps:$4 sm:$0xff]  }
 0x613   :  { %6522 = vmatpush1.bf16.msra.mxu0 %v9009_v51  ;;  %v9087_v51 = vld [vmem:[#allocation16 + $0x8d0] ss:$40 sps:$4 sm:$0xff]  }
 0x614   :  { %6645 = vmatpush1.bf16.msra.mxu1 %v9012_v42  ;;  %6532 = vmatprep.subr.bf16.mxu0 %v9017_v54  ;;  %v9090_v42 = vld [vmem:[#allocation16 + $0x8d8] ss:$40 sps:$4 sm:$0xff]   ;;  %v9095_v54 = vld [vmem:[#allocation16 + $0x924] ss:$40 sps:$4 sm:$0xff]  }
 0x615   :  { %6655 = vmatprep.subr.bf16.mxu1 %v9020_v55  ;;  %v9098_v55 = vld [vmem:[#allocation16 + $0x92c] ss:$40 sps:$4 sm:$0xff]  }
 0x616   :  { %6524 = vmatmul.mubr.bf16.vlgmr.msra.gmra.mrb[24].mxu0 %v9933_v41 }
 0x617   :  { %6647 = vmatmul.mubr.bf16.vlgmr.msra.gmra.mrb[40].mxu1 %v9933_v41  ;;  %6533 = vmatpush1.bf16.msra.mxu0 %v9015_v57  ;;  %v9093_v57 = vld [vmem:[#allocation16 + $0x920] ss:$40 sps:$4 sm:$0xff]  }
 0x618   :  { %6564 = vmatprep.mubr.bf16.mxu0 %v9941_v53  ;;  %6656 = vmatpush1.bf16.msra.mxu1 %v9018_v59  ;;  %v9096_v59 = vld [vmem:[#allocation16 + $0x928] ss:$40 sps:$4 sm:$0xff]  }
 0x619   :  { %6687 = vmatprep.mubr.bf16.mxu1 %v9941_v53  ;;  %6534 = vmatprep.subr.bf16.mxu0 %v9023_v63  ;;  %v9101_v63 = vld [vmem:[#allocation16 + $0x974] ss:$40 sps:$4 sm:$0xff]  }
 0x61a   :  { %6657 = vmatprep.subr.bf16.mxu1 %v9026_v0  ;;  %v9104_v0 = vld [vmem:[#allocation16 + $0x97c] ss:$40 sps:$4 sm:$0xff]  }
 0x61b   :  { %6535 = vmatpush1.bf16.msra.mxu0 %v9021_v1  ;;  %v9099_v1 = vld [vmem:[#allocation16 + $0x970] ss:$40 sps:$4 sm:$0xff]  }
 0x61c   :  { %6658 = vmatpush1.bf16.msra.mxu1 %v9024_v2  ;;  %6536 = vmatprep.subr.bf16.mxu0 %v9029_v3  ;;  %v9102_v2 = vld [vmem:[#allocation16 + $0x978] ss:$40 sps:$4 sm:$0xff]   ;;  %v9107_v3 = vld [vmem:[#allocation16 + $0x9c4] ss:$40 sps:$4 sm:$0xff]  }
 0x61d   :  { %6659 = vmatprep.subr.bf16.mxu1 %v9032_v5  ;;  %v9110_v5 = vld [vmem:[#allocation16 + $0x9cc] ss:$40 sps:$4 sm:$0xff]  }
 0x61f   :  { %6537 = vmatpush1.bf16.msra.mxu0 %v9027_v8  ;;  %v9105_v8 = vld [vmem:[#allocation16 + $0x9c0] ss:$40 sps:$4 sm:$0xff]  }
 0x620   :  { %6660 = vmatpush1.bf16.msra.mxu1 %v9030_v7  ;;  %6538 = vmatprep.subr.bf16.mxu0 %v9035_v9  ;;  %v9108_v7 = vld [vmem:[#allocation16 + $0x9c8] ss:$40 sps:$4 sm:$0xff]   ;;  %v9113_v9 = vld [vmem:[#allocation16 + $0xa14] ss:$40 sps:$4 sm:$0xff]  }
 0x621   :  { %6661 = vmatprep.subr.bf16.mxu1 %v9038_v44  ;;  %v9116_v44 = vld [vmem:[#allocation16 + $0xa1c] ss:$40 sps:$4 sm:$0xff]  }
 0x623   :  { %6539 = vmatpush1.bf16.msra.mxu0 %v9033_v36  ;;  %v9111_v36 = vld [vmem:[#allocation16 + $0xa10] ss:$40 sps:$4 sm:$0xff]  }
 0x624   :  { %6662 = vmatpush1.bf16.msra.mxu1 %v9036_v13  ;;  %6540 = vmatprep.subr.bf16.mxu0 %v9041_v14  ;;  %v9114_v13 = vld [vmem:[#allocation16 + $0xa18] ss:$40 sps:$4 sm:$0xff]   ;;  %v9119_v14 = vld [vmem:[#allocation16 + $0xa64] ss:$40 sps:$4 sm:$0xff]  }
 0x625   :  { %6663 = vmatprep.subr.bf16.mxu1 %v9044_v15  ;;  %v9122_v15 = vld [vmem:[#allocation16 + $0xa6c] ss:$40 sps:$4 sm:$0xff]  }
 0x627   :  { %6541 = vmatpush1.bf16.msra.mxu0 %v9039_v16  ;;  %v9117_v16 = vld [vmem:[#allocation16 + $0xa60] ss:$40 sps:$4 sm:$0xff]  }
 0x628   :  { %6664 = vmatpush1.bf16.msra.mxu1 %v9042_v18  ;;  %6542 = vmatprep.subr.bf16.mxu0 %v9047_v4  ;;  %v9120_v18 = vld [vmem:[#allocation16 + $0xa68] ss:$40 sps:$4 sm:$0xff]   ;;  %v9125_v4 = vld [vmem:[#allocation16 + $0xab4] ss:$40 sps:$4 sm:$0xff]  }
 0x629   :  { %6665 = vmatprep.subr.bf16.mxu1 %v9050_v6  ;;  %v9128_v6 = vld [vmem:[#allocation16 + $0xabc] ss:$40 sps:$4 sm:$0xff]  }
 0x62b   :  { %6543 = vmatpush1.bf16.msra.mxu0 %v9045_v20  ;;  %v9123_v20 = vld [vmem:[#allocation16 + $0xab0] ss:$40 sps:$4 sm:$0xff]  }
 0x62c   :  { %6666 = vmatpush1.bf16.msra.mxu1 %v9048_v21  ;;  %6544 = vmatprep.subr.bf16.mxu0 %v9053_v22  ;;  %v9126_v21 = vld [vmem:[#allocation16 + $0xab8] ss:$40 sps:$4 sm:$0xff]   ;;  %v9131_v22 = vld [vmem:[#allocation16 + $0xb04] ss:$40 sps:$4 sm:$0xff]  }
 0x62d   :  { %6667 = vmatprep.subr.bf16.mxu1 %v9056_v23  ;;  %v9134_v23 = vld [vmem:[#allocation16 + $0xb0c] ss:$40 sps:$4 sm:$0xff]  }
 0x62f   :  { %6545 = vmatpush1.bf16.msra.mxu0 %v9051_v25  ;;  %v9129_v25 = vld [vmem:[#allocation16 + $0xb00] ss:$40 sps:$4 sm:$0xff]  }
 0x630   :  { %6668 = vmatpush1.bf16.msra.mxu1 %v9054_v27  ;;  %6546 = vmatprep.subr.bf16.mxu0 %v9059_v28  ;;  %v9132_v27 = vld [vmem:[#allocation16 + $0xb08] ss:$40 sps:$4 sm:$0xff]   ;;  %v9137_v28 = vld [vmem:[#allocation16 + $0xb54] ss:$40 sps:$4 sm:$0xff]  }
 0x631   :  { %6669 = vmatprep.subr.bf16.mxu1 %v9062_v19  ;;  %v9140_v19 = vld [vmem:[#allocation16 + $0xb5c] ss:$40 sps:$4 sm:$0xff]  }
 0x633   :  { %6547 = vmatpush1.bf16.msra.mxu0 %v9057_v29  ;;  %v4280_v29 = vld [vmem:[#allocation16 + $0xba0] sm:$0xff] }
 0x634   :  { %6670 = vmatpush1.bf16.msra.mxu1 %v9060_v52  ;;  %6548 = vmatprep.subr.bf16.mxu0 %v9065_v60  ;;  %v4281_v52 = vld [vmem:[#allocation16 + $0xba8] sm:$0xff]  ;;  %v9135_v60 = vld [vmem:[#allocation16 + $0xb50] ss:$40 sps:$4 sm:$0xff]  }
 0x635   :  { %6671 = vmatprep.subr.bf16.mxu1 %v9068_v30  ;;  %v9138_v30 = vld [vmem:[#allocation16 + $0xb58] ss:$40 sps:$4 sm:$0xff]  }
 0x637   :  { %6549 = vmatpush1.bf16.msra.mxu0 %v9063_v32  ;;  %v7811_v32 = vcombine.high %v4280_v29, %v4280_v29 }
 0x638   :  { %6672 = vmatpush1.bf16.msra.mxu1 %v9066_v33  ;;  %6550 = vmatprep.subr.bf16.mxu0 %v9071_v35  ;;  %v7810_v33 = vcombine.low %v4280_v29, %v4280_v29  ;;  %v7813_v35 = vcombine.high %v4281_v52, %v4281_v52 }
 0x639   :  { %6673 = vmatprep.subr.bf16.mxu1 %v9074_v26  ;;  %v7812_v26 = vcombine.low %v4281_v52, %v4281_v52 }
 0x63b   :  { %6551 = vmatpush1.bf16.msra.mxu0 %v9069_v39  ;;  %v6228_v39 = vsel %vm3546_vm1, %v7810_v33, 0  ;;  %v9198_v33 = vld [vmem:[#allocation16 + $0x574] ss:$40 sps:$4 sm:$0xff]  }
 0x63c   :  { %6674 = vmatpush1.bf16.msra.mxu1 %v9072_v40  ;;  %6552 = vmatprep.subr.bf16.mxu0 %v9077_v48  ;;  %v9147_v40 = vld [vmem:[#allocation16 + $0x24] ss:$40 sps:$4 sm:$0xff]   ;;  %v6234_v48 = vsel %vm3546_vm1, %v7812_v26, 0 }
 0x63d   :  { %6675 = vmatprep.subr.bf16.mxu1 %v9080_v43  ;;  %v9145_v43 = vld [vmem:[#allocation16 + $0x20] ss:$40 sps:$4 sm:$0xff]  }
 0x63f   :  { %6553 = vmatpush1.bf16.msra.mxu0 %v9075_v62  ;;  %v9150_v62 = vld [vmem:[#allocation16 + $0x74] ss:$40 sps:$4 sm:$0xff]  }
 0x640   :  { %6676 = vmatpush1.bf16.msra.mxu1 %v9078_v11  ;;  %6554 = vmatprep.subr.bf16.mxu0 %v9083_v45  ;;  %v9148_v11 = vld [vmem:[#allocation16 + $0x70] ss:$40 sps:$4 sm:$0xff]   ;;  %v9153_v45 = vld [vmem:[#allocation16 + $0xc4] ss:$40 sps:$4 sm:$0xff]  }
 0x641   :  { %6677 = vmatprep.subr.bf16.mxu1 %v9086_v24  ;;  %v9151_v24 = vld [vmem:[#allocation16 + $0xc0] ss:$40 sps:$4 sm:$0xff]  }
 0x643   :  { %6555 = vmatpush1.bf16.msra.mxu0 %v9081_v46  ;;  %v9156_v46 = vld [vmem:[#allocation16 + $0x114] ss:$40 sps:$4 sm:$0xff]  }
 0x644   :  { %6678 = vmatpush1.bf16.msra.mxu1 %v9084_v47  ;;  %6556 = vmatprep.subr.bf16.mxu0 %v9089_v49  ;;  %v9154_v47 = vld [vmem:[#allocation16 + $0x110] ss:$40 sps:$4 sm:$0xff]   ;;  %v9159_v49 = vld [vmem:[#allocation16 + $0x164] ss:$40 sps:$4 sm:$0xff]  }
 0x645   :  { %6679 = vmatprep.subr.bf16.mxu1 %v9092_v50  ;;  %v9157_v50 = vld [vmem:[#allocation16 + $0x160] ss:$40 sps:$4 sm:$0xff]  }
 0x647   :  { %6557 = vmatpush1.bf16.msra.mxu0 %v9087_v51  ;;  %v9162_v51 = vld [vmem:[#allocation16 + $0x1b4] ss:$40 sps:$4 sm:$0xff]  }
 0x648   :  { %6680 = vmatpush1.bf16.msra.mxu1 %v9090_v42  ;;  %6558 = vmatprep.subr.bf16.mxu0 %v9095_v54  ;;  %v9160_v42 = vld [vmem:[#allocation16 + $0x1b0] ss:$40 sps:$4 sm:$0xff]   ;;  %v9165_v54 = vld [vmem:[#allocation16 + $0x204] ss:$40 sps:$4 sm:$0xff]  }
 0x649   :  { %6681 = vmatprep.subr.bf16.mxu1 %v9098_v55  ;;  %v9168_v55 = vld [vmem:[#allocation16 + $0x254] ss:$40 sps:$4 sm:$0xff]  }
 0x64b   :  { %6559 = vmatpush1.bf16.msra.mxu0 %v9093_v57  ;;  %v9166_v57 = vld [vmem:[#allocation16 + $0x250] ss:$40 sps:$4 sm:$0xff]  }
 0x64c   :  { %6682 = vmatpush1.bf16.msra.mxu1 %v9096_v59  ;;  %6560 = vmatprep.subr.bf16.mxu0 %v9101_v63  ;;  %v9171_v59 = vld [vmem:[#allocation16 + $0x2a4] ss:$40 sps:$4 sm:$0xff]   ;;  %v9169_v63 = vld [vmem:[#allocation16 + $0x2a0] ss:$40 sps:$4 sm:$0xff]  }
 0x64d   :  { %6683 = vmatprep.subr.bf16.mxu1 %v9104_v0  ;;  %v9174_v0 = vld [vmem:[#allocation16 + $0x2f4] ss:$40 sps:$4 sm:$0xff]  }
 0x64f   :  { %6561 = vmatpush1.bf16.msra.mxu0 %v9099_v1  ;;  %v9172_v1 = vld [vmem:[#allocation16 + $0x2f0] ss:$40 sps:$4 sm:$0xff]  }
 0x650   :  { %6684 = vmatpush1.bf16.msra.mxu1 %v9102_v2  ;;  %6562 = vmatprep.subr.bf16.mxu0 %v9107_v3  ;;  %v9177_v2 = vld [vmem:[#allocation16 + $0x344] ss:$40 sps:$4 sm:$0xff]   ;;  %v9175_v3 = vld [vmem:[#allocation16 + $0x340] ss:$40 sps:$4 sm:$0xff]  }
 0x651   :  { %6685 = vmatprep.subr.bf16.mxu1 %v9110_v5  ;;  %v9180_v5 = vld [vmem:[#allocation16 + $0x394] ss:$40 sps:$4 sm:$0xff]  }
 0x653   :  { %6563 = vmatpush1.bf16.msra.mxu0 %v9105_v8  ;;  %v9178_v8 = vld [vmem:[#allocation16 + $0x390] ss:$40 sps:$4 sm:$0xff]  }
 0x654   :  { %6686 = vmatpush1.bf16.msra.mxu1 %v9108_v7  ;;  %6573 = vmatprep.subr.bf16.mxu0 %v9113_v9  ;;  %v9183_v7 = vld [vmem:[#allocation16 + $0x3e4] ss:$40 sps:$4 sm:$0xff]   ;;  %v9181_v9 = vld [vmem:[#allocation16 + $0x3e0] ss:$40 sps:$4 sm:$0xff]  }
 0x655   :  { %6696 = vmatprep.subr.bf16.mxu1 %v9116_v44  ;;  %v9186_v44 = vld [vmem:[#allocation16 + $0x434] ss:$40 sps:$4 sm:$0xff]  }
 0x656   :  { %6565 = vmatmul.mubr.bf16.vlgmr.msra.gmra.mrb[24].mxu0 %v9950_v10 }
 0x657   :  { %6688 = vmatmul.mubr.bf16.vlgmr.msra.gmra.mrb[40].mxu1 %v9950_v10  ;;  %6574 = vmatpush1.bf16.msra.mxu0 %v9111_v36  ;;  %v9184_v36 = vld [vmem:[#allocation16 + $0x430] ss:$40 sps:$4 sm:$0xff]  }
 0x658   :  { %6697 = vmatpush1.bf16.msra.mxu1 %v9114_v13  ;;  %6575 = vmatprep.subr.bf16.mxu0 %v9119_v14  ;;  %v9189_v13 = vld [vmem:[#allocation16 + $0x484] ss:$40 sps:$4 sm:$0xff]   ;;  %v9187_v14 = vld [vmem:[#allocation16 + $0x480] ss:$40 sps:$4 sm:$0xff]  }
 0x659   :  { %6698 = vmatprep.subr.bf16.mxu1 %v9122_v15  ;;  %6605 = vmatprep.mubr.bf16.mxu0 %v9596_v37  ;;  %v9988_v15 = vld [vmem:[#allocation17] sm:$0xff] }
 0x65a   :  { %6728 = vmatprep.mubr.bf16.mxu1 %v9596_v37 }
 0x65b   :  { %6576 = vmatpush1.bf16.msra.mxu0 %v9117_v16  ;;  %v9192_v16 = vld [vmem:[#allocation16 + $0x4d4] ss:$40 sps:$4 sm:$0xff]  }
 0x65c   :  { %6699 = vmatpush1.bf16.msra.mxu1 %v9120_v18  ;;  %6577 = vmatprep.subr.bf16.mxu0 %v9125_v4  ;;  %v4290_v18 = vrot.slane %v9988_v15, %v9866_v58  ;;  %v4298_v4 = vrot.slane %v9988_v15, %v9889_v34 }
 0x65d   :  { %6700 = vmatprep.subr.bf16.mxu1 %v9128_v6  ;;  %v4294_v6 = vrot.slane %v9988_v15, %v9871_v31 }
 0x65f   :  { %6578 = vmatpush1.bf16.msra.mxu0 %v9123_v20  ;;  %v4302_v20 = vrot.slane %v9988_v15, %v9892_v61 }
 0x660   :  { %6701 = vmatpush1.bf16.msra.mxu1 %v9126_v21  ;;  %6579 = vmatprep.subr.bf16.mxu0 %v9131_v22  ;;  %v9190_v21 = vld [vmem:[#allocation16 + $0x4d0] ss:$40 sps:$4 sm:$0xff]   ;;  %v9195_v22 = vld [vmem:[#allocation16 + $0x524] ss:$40 sps:$4 sm:$0xff]  }
 0x661   :  { %6702 = vmatprep.subr.bf16.mxu1 %v9134_v23 }
 0x663   :  { %6580 = vmatpush1.bf16.msra.mxu0 %v9129_v25 }
 0x664   :  { %6703 = vmatpush1.bf16.msra.mxu1 %v9132_v27  ;;  %6581 = vmatprep.subr.bf16.mxu0 %v9137_v28 }
 0x665   :  { %6704 = vmatprep.subr.bf16.mxu1 %v9140_v19 }
 0x667   :  { %6582 = vmatpush1.bf16.msra.mxu0 %v9135_v60 }
 0x668   :  { %6705 = vmatpush1.bf16.msra.mxu1 %v9138_v30  ;;  %7820 = vmatprep.subr.msk.bf16.mxu0 %vm3546_vm1, %v7811_v32  ;;  %v9193_v32 = vld [vmem:[#allocation16 + $0x520] ss:$40 sps:$4 sm:$0xff]  }
 0x669   :  { %7822 = vmatprep.subr.msk.bf16.mxu1 %vm3546_vm1, %v7813_v35 }
 0x66b   :  { %6584 = vmatpush1.bf16.msra.mxu0 %v6228_v39 }
 0x66c   :  { %6707 = vmatpush1.bf16.msra.mxu1 %v6234_v48  ;;  %6737 = vmatprep.subr.bf16.mxu0 %v9147_v40 }
 0x66e   :  { %7821 = vmatmul.mubr.msk.bf16.vlgmr.msra.gmra.mrb[24].mxu0 %vm3542_vm3, %v9963_v17 }
 0x66f   :  { %7823 = vmatmul.mubr.msk.bf16.vlgmr.msra.gmra.mrb[40].mxu1 %vm3542_vm3, %v9963_v17  ;;  %6738 = vmatpush1.bf16.msra.mxu0 %v9145_v43  ;;  %v9196_v43 = vld [vmem:[#allocation16 + $0x570] ss:$40 sps:$4 sm:$0xff]  }
 0x670   :  { %6769 = vmatprep.mubr.bf16.mxu0 %v9929_v38  ;;  %6739 = vmatprep.subr.bf16.mxu0 %v9150_v62  ;;  %v9163_v38 = vld [vmem:[#allocation16 + $0x200] ss:$40 sps:$4 sm:$0xff]   ;;  %v9201_v62 = vld [vmem:[#allocation16 + $0x5c4] ss:$40 sps:$4 sm:$0xff]  }
 0x673   :  { %6740 = vmatpush1.bf16.msra.mxu0 %v9148_v11  ;;  %v9199_v11 = vld [vmem:[#allocation16 + $0x5c0] ss:$40 sps:$4 sm:$0xff]  }
 0x674   :  { %6741 = vmatprep.subr.bf16.mxu0 %v9153_v45  ;;  %v9204_v45 = vld [vmem:[#allocation16 + $0x614] ss:$40 sps:$4 sm:$0xff]  }
 0x677   :  { %6742 = vmatpush1.bf16.msra.mxu0 %v9151_v24  ;;  %v9202_v24 = vld [vmem:[#allocation16 + $0x610] ss:$40 sps:$4 sm:$0xff]  }
 0x678   :  { %6743 = vmatprep.subr.bf16.mxu0 %v9156_v46 }
 0x67b   :  { %6744 = vmatpush1.bf16.msra.mxu0 %v9154_v47  ;;  %v9207_v47 = vld [vmem:[#allocation16 + $0x664] ss:$40 sps:$4 sm:$0xff]  }
 0x67c   :  { %6745 = vmatprep.subr.bf16.mxu0 %v9159_v49 }
 0x67f   :  { %6746 = vmatpush1.bf16.msra.mxu0 %v9157_v50 }
 0x680   :  { %6747 = vmatprep.subr.bf16.mxu0 %v9162_v51 }
 0x683   :  { %6748 = vmatpush1.bf16.msra.mxu0 %v9160_v42 }
 0x684   :  { %6749 = vmatprep.subr.bf16.mxu0 %v9165_v54  ;;  %v9205_v54 = vld [vmem:[#allocation16 + $0x660] ss:$40 sps:$4 sm:$0xff]  }
 0x687   :  { %6750 = vmatpush1.bf16.msra.mxu0 %v9163_v38 }
 0x688   :  { %6751 = vmatprep.subr.bf16.mxu0 %v9168_v55  ;;  %v9210_v55 = vld [vmem:[#allocation16 + $0x6b4] ss:$40 sps:$4 sm:$0xff]  }
 0x68b   :  { %6752 = vmatpush1.bf16.msra.mxu0 %v9166_v57  ;;  %v9208_v57 = vld [vmem:[#allocation16 + $0x6b0] ss:$40 sps:$4 sm:$0xff]  }
 0x68c   :  { %6753 = vmatprep.subr.bf16.mxu0 %v9171_v59  ;;  %v9213_v59 = vld [vmem:[#allocation16 + $0x704] ss:$40 sps:$4 sm:$0xff]  }
 0x68f   :  { %6754 = vmatpush1.bf16.msra.mxu0 %v9169_v63  ;;  %v9211_v63 = vld [vmem:[#allocation16 + $0x700] ss:$40 sps:$4 sm:$0xff]  }
 0x690   :  { %6755 = vmatprep.subr.bf16.mxu0 %v9174_v0  ;;  %v9216_v0 = vld [vmem:[#allocation16 + $0x754] ss:$40 sps:$4 sm:$0xff]  }
 0x693   :  { %6756 = vmatpush1.bf16.msra.mxu0 %v9172_v1 }
 0x694   :  { %6757 = vmatprep.subr.bf16.mxu0 %v9177_v2 }
 0x697   :  { %6758 = vmatpush1.bf16.msra.mxu0 %v9175_v3 }
 0x698   :  { %6759 = vmatprep.subr.bf16.mxu0 %v9180_v5  ;;  %v9214_v5 = vld [vmem:[#allocation16 + $0x750] ss:$40 sps:$4 sm:$0xff]  }
 0x69b   :  { %6760 = vmatpush1.bf16.msra.mxu0 %v9178_v8 }
 0x69c   :  { %6761 = vmatprep.subr.bf16.mxu0 %v9183_v7  ;;  %v9219_v7 = vld [vmem:[#allocation16 + $0x7a4] ss:$40 sps:$4 sm:$0xff]  }
 0x69f   :  { %6762 = vmatpush1.bf16.msra.mxu0 %v9181_v9 }
 0x6a0   :  { %6763 = vmatprep.subr.bf16.mxu0 %v9186_v44 }
 0x6a3   :  { %6764 = vmatpush1.bf16.msra.mxu0 %v9184_v36  ;;  %v9217_v36 = vld [vmem:[#allocation16 + $0x7a0] ss:$40 sps:$4 sm:$0xff]  }
 0x6a4   :  { %6765 = vmatprep.subr.bf16.mxu0 %v9189_v13  ;;  %v9222_v13 = vld [vmem:[#allocation16 + $0x7f4] ss:$40 sps:$4 sm:$0xff]  }
 0x6a7   :  { %6766 = vmatpush1.bf16.msra.mxu0 %v9187_v14  ;;  %v9220_v14 = vld [vmem:[#allocation16 + $0x7f0] ss:$40 sps:$4 sm:$0xff]  }
 0x6a8   :  { %6767 = vmatprep.subr.bf16.mxu0 %v9192_v16  ;;  %v9225_v16 = vld [vmem:[#allocation16 + $0x844] ss:$40 sps:$4 sm:$0xff]  }
 0x6a9   :  { %v6361_v23 = vpop.f32.mrb[20].mxu0  ;;  %v6484_v25 = vpop.f32.mrb[36].mxu1 }
 0x6aa   :  { %v8018_v27 = vadd.f32 %v6361_v23, %v4290_v18  ;;  %v8020_v28 = vadd.f32 %v6484_v25, %v4298_v4  ;;  %v6363_v19 = vpop.f32.mrb[21].mxu0  ;;  %v6486_v29 = vpop.f32.mrb[37].mxu1  ;;  %v9223_v18 = vld [vmem:[#allocation16 + $0x840] ss:$40 sps:$4 sm:$0xff]   ;;  %v9228_v4 = vld [vmem:[#allocation16 + $0x894] ss:$40 sps:$4 sm:$0xff]  }
 0x6ab   :  { %v8019_v52 = vadd.f32 %v6363_v19, %v4294_v6  ;;  %v8021_v60 = vadd.f32 %v6486_v29, %v4302_v20  ;;  %v6365_v30 = vpop.f32.mrb[22].mxu0  ;;  %v6488_v34 = vpop.f32.mrb[38].mxu1  ;;  %6768 = vmatpush1.bf16.msra.mxu0 %v9190_v21  ;;  %v9226_v6 = vld [vmem:[#allocation16 + $0x890] ss:$40 sps:$4 sm:$0xff]   ;;  %v9231_v20 = vld [vmem:[#allocation16 + $0x8e4] ss:$40 sps:$4 sm:$0xff]  }
 0x6ac   :  { %v7826_v35 = vmul.f32 -1.442695, %v8018_v27  ;;  %v7828_v26 = vmul.f32 -1.442695, %v8020_v28  ;;  %v6366_v39 = vpop.f32.mrb[23].mxu0  ;;  %v6489_v61 = vpop.f32.mrb[39].mxu1  ;;  %6778 = vmatprep.subr.bf16.mxu0 %v9195_v22 }
 0x6ad   :  { %v7827_v40 = vmul.f32 -1.442695, %v8019_v52  ;;  %v7829_v48 = vmul.f32 -1.442695, %v8021_v60  ;;  %v9229_v21 = vld [vmem:[#allocation16 + $0x8e0] ss:$40 sps:$4 sm:$0xff]  }
 0x6ae   :  { %9260 = vpow2.f32 %v7826_v35  ;;  %6770 = vmatmul.mubr.bf16.vlgmr.msra.gmra.mrb[28].mxu0 %v9933_v41  ;;  %v9234_v22 = vld [vmem:[#allocation16 + $0x934] ss:$40 sps:$4 sm:$0xff]   ;;  %v9232_v23 = vld [vmem:[#allocation16 + $0x930] ss:$40 sps:$4 sm:$0xff]   ;;  %v9237_v25 = vld [vmem:[#allocation16 + $0x984] ss:$40 sps:$4 sm:$0xff]  }
 0x6af   :  { %9262 = vpow2.f32 %v7828_v26  ;;  %6779 = vmatpush1.bf16.msra.mxu0 %v9193_v32  ;;  %6810 = vmatprep.mubr.bf16.mxu0 %v9941_v53  ;;  %v9235_v27 = vld [vmem:[#allocation16 + $0x980] ss:$40 sps:$4 sm:$0xff]   ;;  %v9240_v28 = vld [vmem:[#allocation16 + $0x9d4] ss:$40 sps:$4 sm:$0xff]   ;;  %v9238_v19 = vld [vmem:[#allocation16 + $0x9d0] ss:$40 sps:$4 sm:$0xff]  }
 0x6b0   :  { %9264 = vpow2.f32 %v7827_v40  ;;  %6780 = vmatprep.subr.bf16.mxu0 %v9198_v33  ;;  %v9243_v29 = vld [vmem:[#allocation16 + $0xa24] ss:$40 sps:$4 sm:$0xff]   ;;  %v9241_v52 = vld [vmem:[#allocation16 + $0xa20] ss:$40 sps:$4 sm:$0xff]   ;;  %v9246_v60 = vld [vmem:[#allocation16 + $0xa74] ss:$40 sps:$4 sm:$0xff]  }
 0x6b1   :  { %9266 = vpow2.f32 %v7829_v48  ;;  %v9244_v30 = vld [vmem:[#allocation16 + $0xa70] ss:$40 sps:$4 sm:$0xff]   ;;  %v9249_v34 = vld [vmem:[#allocation16 + $0xac4] ss:$40 sps:$4 sm:$0xff]   ;;  %v9247_v32 = vld [vmem:[#allocation16 + $0xac0] ss:$40 sps:$4 sm:$0xff]  }
 0x6b2   :  { %v9252_v33 = vld [vmem:[#allocation16 + $0xb14] ss:$40 sps:$4 sm:$0xff]   ;;  %v9250_v35 = vld [vmem:[#allocation16 + $0xb10] ss:$40 sps:$4 sm:$0xff]   ;;  %v9255_v26 = vld [vmem:[#allocation16 + $0xb64] ss:$40 sps:$4 sm:$0xff]  }
 0x6b3   :  { %6781 = vmatpush1.bf16.msra.mxu0 %v9196_v43  ;;  %v4282_v39 = vld [vmem:[#allocation16 + $0xbb0] sm:$0xff]  ;;  %v9253_v61 = vld [vmem:[#allocation16 + $0xb60] ss:$40 sps:$4 sm:$0xff]   ;;  %v4313_v48 = vsub.s32 6, %v9863_v56  ;;  %v4309_v43 = vsub.s32 5, %v9863_v56 }
 0x6b4   :  { %6782 = vmatprep.subr.bf16.mxu0 %v9201_v62  ;;  %v7815_v40 = vcombine.high %v4282_v39, %v4282_v39  ;;  %v4317_v62 = vsub.s32 7, %v9863_v56 }
 0x6b7   :  { %6783 = vmatpush1.bf16.msra.mxu0 %v9199_v11  ;;  %v4306_v11 = vrot.slane %v9988_v15, %v9900_v12 }
 0x6b8   :  { %v9261_v46 = vpop.eup %9260  ;;  %6784 = vmatprep.subr.bf16.mxu0 %v9204_v45  ;;  %v4314_v45 = vrot.slane %v9988_v15, %v4313_v48 }
 0x6b9   :  { %v9263_v49 = vpop.eup %9262  ;;  %v6890_v41 = vadd.f32 1.0, %v9261_v46  ;;  %v4318_v46 = vrot.slane %v9988_v15, %v4317_v62 }
 0x6ba   :  { %v9265_v50 = vpop.eup %9264  ;;  %v6892_v51 = vadd.f32 1.0, %v9263_v49 }
 0x6bb   :  { %v9267_v42 = vpop.eup %9266  ;;  %9268 = vrcp.f32 %v6890_v41  ;;  %v6891_v53 = vadd.f32 1.0, %v9265_v50  ;;  %6785 = vmatpush1.bf16.msra.mxu0 %v9202_v24  ;;  %v4310_v24 = vrot.slane %v9988_v15, %v4309_v43 }
 0x6bc   :  { %9270 = vrcp.f32 %v6892_v51  ;;  %v6893_v38 = vadd.f32 1.0, %v9267_v42  ;;  %6786 = vmatprep.subr.bf16.mxu0 %v9207_v47 }
 0x6bd   :  { %9272 = vrcp.f32 %v6891_v53 }
 0x6be   :  { %9274 = vrcp.f32 %v6893_v38 }
 0x6bf   :  { %6787 = vmatpush1.bf16.msra.mxu0 %v9205_v54 }
 0x6c0   :  { %6788 = vmatprep.subr.bf16.mxu0 %v9210_v55 }
 0x6c3   :  { %6789 = vmatpush1.bf16.msra.mxu0 %v9208_v57 }
 0x6c4   :  { %6790 = vmatprep.subr.bf16.mxu0 %v9213_v59 }
 0x6c5   :  { %v9269_v1 = vpop.eup %9268 }
 0x6c6   :  { %v9271_v2 = vpop.eup %9270 }
 0x6c7   :  { %v9273_v3 = vpop.eup %9272  ;;  %6791 = vmatpush1.bf16.msra.mxu0 %v9211_v63 }
 0x6c8   :  { %v9275_v8 = vpop.eup %9274  ;;  %6792 = vmatprep.subr.bf16.mxu0 %v9216_v0  ;;  %v7841_v9 = vpack.c.bf16 %v9273_v3, %v9269_v1 }
 0x6c9   :  { %v7842_v44 = vpack.c.bf16 %v9275_v8, %v9271_v2 }
 0x6ca   :  { %6960 = vst [vmem:[#allocation19] sm:$0xff] %v7841_v9 }
 0x6cb   :  { %6793 = vmatpush1.bf16.msra.mxu0 %v9214_v5  ;;  %6961 = vst [vmem:[#allocation19 + $0x8] sm:$0xff] %v7842_v44 }
 0x6cc   :  { %6794 = vmatprep.subr.bf16.mxu0 %v9219_v7 }
 0x6cf   :  { %6795 = vmatpush1.bf16.msra.mxu0 %v9217_v36 }
 0x6d0   :  { %6796 = vmatprep.subr.bf16.mxu0 %v9222_v13 }
 0x6d3   :  { %6797 = vmatpush1.bf16.msra.mxu0 %v9220_v14 }
 0x6d4   :  { %6798 = vmatprep.subr.bf16.mxu0 %v9225_v16 }
 0x6d7   :  { %6799 = vmatpush1.bf16.msra.mxu0 %v9223_v18 }
 0x6d8   :  { %6800 = vmatprep.subr.bf16.mxu0 %v9228_v4 }
 0x6db   :  { %6801 = vmatpush1.bf16.msra.mxu0 %v9226_v6 }
 0x6dc   :  { %6802 = vmatprep.subr.bf16.mxu0 %v9231_v20 }
 0x6df   :  { %6803 = vmatpush1.bf16.msra.mxu0 %v9229_v21 }
 0x6e0   :  { %6804 = vmatprep.subr.bf16.mxu0 %v9234_v22 }
 0x6e3   :  { %6805 = vmatpush1.bf16.msra.mxu0 %v9232_v23 }
 0x6e4   :  { %6806 = vmatprep.subr.bf16.mxu0 %v9237_v25 }
 0x6e7   :  { %6807 = vmatpush1.bf16.msra.mxu0 %v9235_v27 }
 0x6e8   :  { %6808 = vmatprep.subr.bf16.mxu0 %v9240_v28 }
 0x6eb   :  { %6809 = vmatpush1.bf16.msra.mxu0 %v9238_v19 }
 0x6ec   :  { %6819 = vmatprep.subr.bf16.mxu0 %v9243_v29 }
 0x6ee   :  { %6811 = vmatmul.mubr.bf16.vlgmr.msra.gmra.mrb[28].mxu0 %v9950_v10  ;;  %v7814_v10 = vcombine.low %v4282_v39, %v4282_v39 }
 0x6ef   :  { %6820 = vmatpush1.bf16.msra.mxu0 %v9241_v52  ;;  %6851 = vmatprep.mubr.bf16.mxu0 %v9596_v37 }
 0x6f0   :  { %6821 = vmatprep.subr.bf16.mxu0 %v9246_v60  ;;  %v6240_v37 = vsel %vm3546_vm1, %v7814_v10, 0 }
 0x6f3   :  { %6822 = vmatpush1.bf16.msra.mxu0 %v9244_v30 }
 0x6f4   :  { %6823 = vmatprep.subr.bf16.mxu0 %v9249_v34 }
 0x6f7   :  { %6824 = vmatpush1.bf16.msra.mxu0 %v9247_v32 }
 0x6f8   :  { %6825 = vmatprep.subr.bf16.mxu0 %v9252_v33 }
 0x6fb   :  { %6826 = vmatpush1.bf16.msra.mxu0 %v9250_v35 }
 0x6fc   :  { %6827 = vmatprep.subr.bf16.mxu0 %v9255_v26 }
 0x6ff   :  { %6828 = vmatpush1.bf16.msra.mxu0 %v9253_v61 }
 0x700   :  { %7824 = vmatprep.subr.msk.bf16.mxu0 %vm3546_vm1, %v7815_v40 }
 0x703   :  { %6830 = vmatpush1.bf16.msra.mxu0 %v6240_v37 }
 0x706   :  { %7825 = vmatmul.mubr.msk.bf16.vlgmr.msra.gmra.mrb[28].mxu0 %vm3542_vm3, %v9963_v17 }
 0x741   :  { %v6607_v47 = vpop.f32.mrb[24].mxu0 }
 0x742   :  { %v8022_v49 = vadd.f32 %v6607_v47, %v4306_v11  ;;  %v6730_v41 = vpop.f32.mrb[40].mxu1  ;;  %v6609_v50 = vpop.f32.mrb[25].mxu0 }
 0x743   :  { %v8024_v17 = vadd.f32 %v6730_v41, %v4314_v45  ;;  %v8023_v51 = vadd.f32 %v6609_v50, %v4310_v24  ;;  %v6732_v42 = vpop.f32.mrb[41].mxu1  ;;  %v6611_v53 = vpop.f32.mrb[26].mxu0 }
 0x744   :  { %v7830_v54 = vmul.f32 -1.442695, %v8022_v49  ;;  %v8025_v38 = vadd.f32 %v6732_v42, %v4318_v46  ;;  %v6734_v56 = vpop.f32.mrb[42].mxu1  ;;  %v6612_v55 = vpop.f32.mrb[27].mxu0 }
 0x745   :  { %v7832_v57 = vmul.f32 -1.442695, %v8024_v17  ;;  %v7831_v12 = vmul.f32 -1.442695, %v8023_v51  ;;  %v6735_v59 = vpop.f32.mrb[43].mxu1 }
 0x746   :  { %9276 = vpow2.f32 %v7830_v54  ;;  %v7833_v63 = vmul.f32 -1.442695, %v8025_v38 }
 0x747   :  { %9278 = vpow2.f32 %v7832_v57 }
 0x748   :  { %9280 = vpow2.f32 %v7831_v12 }
 0x749   :  { %9282 = vpow2.f32 %v7833_v63 }
 0x750   :  { %v9277_v15 = vpop.eup %9276 }
 0x751   :  { %v9279_v0 = vpop.eup %9278  ;;  %v6894_v1 = vadd.f32 1.0, %v9277_v15 }
 0x752   :  { %v9281_v2 = vpop.eup %9280  ;;  %v6896_v3 = vadd.f32 1.0, %v9279_v0 }
 0x753   :  { %v9283_v5 = vpop.eup %9282  ;;  %9284 = vrcp.f32 %v6894_v1  ;;  %v6895_v8 = vadd.f32 1.0, %v9281_v2 }
 0x754   :  { %9286 = vrcp.f32 %v6896_v3  ;;  %v6897_v7 = vadd.f32 1.0, %v9283_v5 }
 0x755   :  { %9288 = vrcp.f32 %v6895_v8 }
 0x756   :  { %9290 = vrcp.f32 %v6897_v7 }
 0x75d   :  { %v9285_v9 = vpop.eup %9284 }
 0x75e   :  { %v9287_v44 = vpop.eup %9286 }
 0x75f   :  { %v9289_v36 = vpop.eup %9288 }
 0x760   :  { %v9291_v13 = vpop.eup %9290  ;;  %v7843_v14 = vpack.c.bf16 %v9289_v36, %v9285_v9 }
 0x761   :  { %v7844_v16 = vpack.c.bf16 %v9291_v13, %v9287_v44 }
 0x762   :  { %6962 = vst [vmem:[#allocation19 + $0x10] sm:$0xff] %v7843_v14 }
 0x763   :  { %6963 = vst [vmem:[#allocation19 + $0x18] sm:$0xff] %v7844_v16 }
 0x764   :  { %9531 = shalt.err (!%p9528_p0)
}
 0x765   :  { %s9532_s15 = scalar_lea.hbm %s10052_s11, 128 }
 0x766   :  { %p9533_p1 = scmp.ne.s32.totalorder %s10052_s11, %s9532_s15  ;;  %p9536_p2 = scmp.lt.u32.totalorder %s9532_s15, %s10052_s11 }
 0x768   :  { %p9538_p3 = pnand %p9536_p2, %p9533_p1 }
 0x76a   :  { %9541 = shalt.err (!%p9538_p3)
}
 0x76b   :  { %6988 = dma.vmem_to_hbm [thread:$0]  %s6986_s4, 128, %s10052_s11, [#allocation21]   ;;  %v4284_v18 = vld [vmem:[#allocation17 + $0x8] sm:$0x3]  ;;  %vm6964_vm7 = vcmask 392196  }
 0x76c   :  { %v4322_v4 = vrot.slane %v4284_v18, %v9866_v58  ;;  %v4326_v6 = vrot.slane %v4284_v18, %v9871_v31  ;;  %s9601_s11 = smov [#allocation19]   ;;  %vm6965_vm8 = vmor %vm6964_vm7, %vm3546_vm1 }
 0x76d   :  { %s6975_s6 = sshll.u32 %s9601_s11, 4  ;;  %s6976_s6 = int_to_ptr.vmem [resolvable:$true] %s6975_s6 }
 0x76e   :  { %s9542_s0 = scalar_lea.vmem %s6976_s6, 640  ;;  %p9547_p5 = scmp.lt.s32.totalorder %s6976_s6, %s6976_s6 }
 0x76f   :  { %p9543_p4 = scmp.ne.s32.totalorder %s6976_s6, %s9542_s0  ;;  %p9548_p6 = scmp.lt.s32.totalorder %s9542_s0, %s9542_s0 }
 0x771   :  { %p9549_p7 = por %p9548_p6, %p9547_p5 }
 0x773   :  { %p9550_p8 = pnand %p9549_p7, %p9543_p4 }
 0x7d9   :  { %v6853_v20 = vpop.f32.mrb[28].mxu0 }
 0x7da   :  { %v8026_v21 = vadd.f32 %v6853_v20, %v4322_v4  ;;  %v6855_v22 = vpop.f32.mrb[29].mxu0 }
 0x7db   :  { %v8027_v23 = vadd.f32 %v6855_v22, %v4326_v6  ;;  %v6857_v25 = vpop.f32.mrb[30].mxu0 }
 0x7dc   :  { %v7834_v27 = vmul.f32 -1.442695, %v8026_v21  ;;  %v6858_v28 = vpop.f32.mrb[31].mxu0 }
 0x7dd   :  { %v7835_v19 = vmul.f32 -1.442695, %v8027_v23 }
 0x7de   :  { %9292 = vpow2.f32 %v7834_v27 }
 0x7df   :  { %9294 = vpow2.f32 %v7835_v19 }
 0x7e8   :  { %v9293_v29 = vpop.eup %9292 }
 0x7e9   :  { %v9295_v52 = vpop.eup %9294  ;;  %v6898_v60 = vadd.f32 1.0, %v9293_v29 }
 0x7ea   :  { %v6899_v30 = vadd.f32 1.0, %v9295_v52 }
 0x7eb   :  { %9296 = vrcp.f32 %v6898_v60 }
 0x7ec   :  { %9298 = vrcp.f32 %v6899_v30 }
 0x7f5   :  { %v9297_v58 = vpop.eup %9296 }
 0x7f6   :  { %v9299_v31 = vpop.eup %9298 }
 0x7f7   :  { %v7845_v34 = vpack.c.bf16 %v9299_v31, %v9297_v58 }
 0x7f9   :  { %6966 = vst.msk [vmem:[#allocation19 + $0x20] sm:$0xff] %vm6965_vm8, %v7845_v34 }
 0x7fa   :  { %9553 = shalt.err (!%p9550_p8)
}
 0x7fb   :  { %s9554_s21 = scalar_lea.hbm %s10051_s10, 640 }
 0x7fc   :  { %p9555_p9 = scmp.ne.s32.totalorder %s10051_s10, %s9554_s21  ;;  %p9558_p10 = scmp.lt.u32.totalorder %s9554_s21, %s10051_s10 }
 0x7fe   :  { %p9560_p11 = pnand %p9558_p10, %p9555_p9 }
 0x800   :  { %9563 = shalt.err (!%p9560_p11)
}
 0x801   :  { %6978 = dma.vmem_to_hbm [thread:$0]  %s6976_s6, 640, %s10051_s10, [#allocation4]  }
 0x802   :  { %9576 = dma.done.wait [#allocation4], 640  }
 0x803   :  { %9577 = vsyncadd [#allocation4], 4294966656 }
 0x804   :  { %9578 = dma.done.wait [#allocation21], 128  }
 0x805   :  { %9579 = vsyncadd [#allocation21], 4294967168 }
 0x806   :  { %6995 = vsyncpa [#allocation3], 1 }
 0x807   :  { %6996 = vsyncpa [#allocation6], 1 }
 0x808   :  { %6997 = vsyncpa [#allocation9], 1 }
 0x809   :  { %6998 = vsyncpa [#allocation12], 1 }
 0x80a   :  { %6999 = vsyncpa [#allocation15], 1 }
 0x80b   :  { %7000 = vsyncpa [#allocation18], 1 }
 0x80c   :  { %7001 = vsyncpa [#allocation4], 1 }
 0x80d   :  { %7002 = vsyncpa [#allocation21], 1 }

</bundles_post_ra>
